<compile_context>
chip_gen: v6e
topology: v6e:2x2x1
jax: 0.10.0
libtpu: 0.0.40
codegen_flags: <defaults>
</compile_context>

<pallas_src>
import functools

import jax
import jax.numpy as jnp
from jax.experimental import pallas as pl
from jax.experimental.pallas import tpu as pltpu


# ----------------------------- Pallas kernel ------------------------------- #

def _basic_block_kernel(xp_ref, xr_ref, w1_ref, w2_ref, b1_ref, b2_ref,
                        o_ref, mid_ref, acc_ref, *, H, W, d):
    """Fused BasicBlock for one image.

    xp_ref : (H+2d, W+2d, Cp)  bf16  input padded spatially by d (conv1 pad)
    xr_ref : (H*W, Cp)         f32   residual (original input, flattened)
    w1/w2  : (9, Cp, Cp)       bf16  BN-scale-folded conv weights (tap-major)
    b1/b2  : (1, Cp)           f32   BN biases
    o_ref  : (H*W, Cp)         f32   output
    mid_ref: (H+2d, W+2d, Cp)  bf16  VMEM scratch: conv1 output + zero halo ring
    acc_ref: (H*W, Cp)         f32   VMEM scratch: shared accumulator
    """
    Cp = o_ref.shape[-1]
    M = H * W

    # ---- conv1 (+ folded BN1) + ReLU : im2col fused as 9 shifted MXU dots ----
    acc_ref[...] = jnp.zeros_like(acc_ref)
    for kh in range(3):
        for kw in range(3):
            xs = xp_ref[kh * d:kh * d + H, kw * d:kw * d + W, :].reshape(M, Cp)
            acc_ref[...] += jnp.dot(xs, w1_ref[kh * 3 + kw],
                                    preferred_element_type=jnp.float32)
    mid = jnp.maximum(acc_ref[...] + b1_ref[...], 0.0)          # f32 epilogue

    # conv1 output stays resident in VMEM; the zero ring of width d is exactly
    # conv2's zero padding (it must be zero, not a computed conv1 value).
    mid_ref[...] = jnp.zeros_like(mid_ref)
    mid_ref[d:d + H, d:d + W, :] = mid.reshape(H, W, Cp).astype(mid_ref.dtype)

    # ---- conv2 (+ folded BN2) + residual add --------------------------------
    acc_ref[...] = jnp.zeros_like(acc_ref)
    for kh in range(3):
        for kw in range(3):
            ms = mid_ref[kh * d:kh * d + H, kw * d:kw * d + W, :].reshape(M, Cp)
            acc_ref[...] += jnp.dot(ms, w2_ref[kh * 3 + kw],
                                    preferred_element_type=jnp.float32)
    o_ref[...] = (acc_ref[...] + b2_ref[...] + xr_ref[...]).astype(o_ref.dtype)


# ------------------------------ glue (JAX) --------------------------------- #

def _round_up(x, m):
    return (x + m - 1) // m * m


def _fold_bn(gamma, beta, running_mean, running_var, eps=1e-5):
    scale = gamma / jnp.sqrt(running_var + eps)
    bias = beta - running_mean * scale
    return scale, bias


def _prep_weight(w_oihw, scale, cp):
    """(Cout, Cin, 3, 3) torch-layout weight -> (9, Cp, Cp) bf16 with BN scale folded in."""
    cout, cin = w_oihw.shape[0], w_oihw.shape[1]
    wf = w_oihw * scale.reshape(cout, 1, 1, 1)               # fold BN scale (per out chan)
    w = jnp.transpose(wf, (2, 3, 1, 0)).reshape(9, cin, cout)  # (kh*3+kw, Cin, Cout)
    w = jnp.pad(w, ((0, 0), (0, cp - cin), (0, cp - cout)))
    return w.astype(jnp.bfloat16)


class BasicBlockPallas:
    """JAX/Pallas port of the PyTorch BasicBlock (downsample=None, stride=1)."""

    def __init__(self, inplanes, planes, stride=1, pad=1, dilation=1, key=None):
        assert stride == 1 and inplanes == planes, \
            "residual add requires downsample=None with matching shapes"
        eff_pad = dilation if dilation > 1 else pad
        assert eff_pad == dilation, "spatial size must be preserved for the residual add"
        self.d = dilation
        self.planes = planes
        self.Cp = _round_up(planes, 128)   # lane-dense channel dim

        k = jax.random.split(key, 6)
        self.w1 = 0.1 * jax.random.normal(k[0], (planes, inplanes, 3, 3), jnp.float32)
        self.w2 = 0.1 * jax.random.normal(k[1], (planes, planes, 3, 3), jnp.float32)
        g1 = 1.0 + 0.1 * jax.random.normal(k[2], (planes,), jnp.float32)
        b1 = 0.1 * jax.random.normal(k[3], (planes,), jnp.float32)
        g2 = 1.0 + 0.1 * jax.random.normal(k[4], (planes,), jnp.float32)
        b2 = 0.1 * jax.random.normal(k[5], (planes,), jnp.float32)
        zeros = jnp.zeros((planes,), jnp.float32)
        ones = jnp.ones((planes,), jnp.float32)
        # TODO(synk): training-mode BatchNorm (batch statistics) is not modeled;
        # eval-mode folded affine (running_mean=0, running_var=1) is used.
        s1, bb1 = _fold_bn(g1, b1, zeros, ones)
        s2, bb2 = _fold_bn(g2, b2, zeros, ones)
        self.w1m9 = _prep_weight(self.w1, s1, self.Cp)
        self.w2m9 = _prep_weight(self.w2, s2, self.Cp)
        self.b1p = jnp.pad(bb1, (0, self.Cp - planes)).reshape(1, self.Cp).astype(jnp.float32)
        self.b2p = jnp.pad(bb2, (0, self.Cp - planes)).reshape(1, self.Cp).astype(jnp.float32)

    def _run(self, xp, xr, H, W):
        N = xp.shape[0]
        Cp, d = self.Cp, self.d
        Hp, Wp = H + 2 * d, W + 2 * d
        M = H * W

        # VMEM budget: double-buffered per-image blocks + resident weights + scratch.
        per_step = (2 * (Hp * Wp * Cp * 2 + M * Cp * 4 + M * Cp * 4)
                    + 2 * 9 * Cp * Cp * 2 + 2 * Cp * 4
                    + Hp * Wp * Cp * 2 + M * Cp * 4)
        if per_step > 40 << 20:
            # TODO(synk): very large spatial sizes need row-band tiling with halo DMA.
            raise NotImplementedError("image too large for whole-image VMEM residency")
        vmem_bytes = min(48 << 20, max(4 * per_step, 16 << 20))

        kernel = functools.partial(_basic_block_kernel, H=H, W=W, d=d)
        grid_spec = pltpu.PrefetchScalarGridSpec(
            num_scalar_prefetch=0,
            grid=(N,),
            in_specs=[
                pl.BlockSpec((None, Hp, Wp, Cp), lambda n: (n, 0, 0, 0)),  # padded input (bf16)
                pl.BlockSpec((None, M, Cp), lambda n: (n, 0, 0)),          # residual (f32)
                pl.BlockSpec((9, Cp, Cp), lambda n: (0, 0, 0)),            # folded W1 (bf16)
                pl.BlockSpec((9, Cp, Cp), lambda n: (0, 0, 0)),            # folded W2 (bf16)
                pl.BlockSpec((1, Cp), lambda n: (0, 0)),                   # bias1 (f32)
                pl.BlockSpec((1, Cp), lambda n: (0, 0)),                   # bias2 (f32)
            ],
            out_specs=pl.BlockSpec((None, M, Cp), lambda n: (n, 0, 0)),
            scratch_shapes=[
                pltpu.VMEM((Hp, Wp, Cp), jnp.bfloat16),   # conv1 output + zero halo ring
                pltpu.VMEM((M, Cp), jnp.float32),         # shared f32 accumulator
            ],
        )
        return pl.pallas_call(
            kernel,
            out_shape=jax.ShapeDtypeStruct((N, M, Cp), jnp.float32),
            grid_spec=grid_spec,
            compiler_params=pltpu.CompilerParams(
                dimension_semantics=("parallel",),   # batch shards across TCs (v7x)
                vmem_limit_bytes=vmem_bytes,
            ),
        )(xp, xr, self.w1m9, self.w2m9, self.b1p, self.b2p)

    def __call__(self, x_nchw):
        # NCHW <-> NHWC conversion only at the block boundary.
        x = jnp.transpose(x_nchw, (0, 2, 3, 1)).astype(jnp.float32)
        N, H, W, C = x.shape
        Cp, d = self.Cp, self.d
        xc = jnp.pad(x, ((0, 0), (0, 0), (0, 0), (0, Cp - C)))              # channel pad (f32)
        xp = jnp.pad(xc, ((0, 0), (d, d), (d, d), (0, 0))).astype(jnp.bfloat16)  # conv1 pad
        xr = xc.reshape(N, H * W, Cp)                                       # f32 residual
        out = self._run(xp, xr, H, W)
        out = out.reshape(N, H, W, Cp)[..., :C]
        return jnp.transpose(out, (0, 3, 1, 2))


# ------------------------------ reference ---------------------------------- #

def _reference(block, x_nchw):
    """Pure-JAX reference mirroring the kernel's math (bf16 MXU operands, f32 accum)."""
    x = jnp.transpose(x_nchw, (0, 2, 3, 1)).astype(jnp.float32)
    N, H, W, C = x.shape
    Cp, d = block.Cp, block.d
    xc = jnp.pad(x, ((0, 0), (0, 0), (0, 0), (0, Cp - C)))
    xp = jnp.pad(xc, ((0, 0), (d, d), (d, d), (0, 0))).astype(jnp.bfloat16).astype(jnp.float32)
    w1 = block.w1m9.astype(jnp.float32)
    w2 = block.w2m9.astype(jnp.float32)

    def conv9(xpad, w9):
        acc = jnp.zeros((N, H, W, Cp), jnp.float32)
        for kh in range(3):
            for kw in range(3):
                acc += jnp.einsum('nhwc,cf->nhwf',
                                  xpad[:, kh * d:kh * d + H, kw * d:kw * d + W, :],
                                  w9[kh * 3 + kw])
        return acc

    mid = jnp.maximum(conv9(xp, w1) + block.b1p.reshape(1, 1, 1, Cp), 0.0)
    midp = jnp.pad(mid.astype(jnp.bfloat16).astype(jnp.float32),
                   ((0, 0), (d, d), (d, d), (0, 0)))
    out = conv9(midp, w2) + block.b2p.reshape(1, 1, 1, Cp) + xc
    return jnp.transpose(out[..., :C], (0, 3, 1, 2))


if __name__ == "__main__":
    key = jax.random.PRNGKey(0)
    kx, kp = jax.random.split(key)

    # small shapes: batch=2, inplanes=planes=8, spatial=16x16
    x = jax.random.normal(kx, (2, 8, 16, 16), jnp.float32)
    block = BasicBlockPallas(inplanes=8, planes=8, stride=1, pad=1, dilation=1, key=kp)

    out = jax.block_until_ready(block(x))
    ref = _reference(block, x)

    assert out.shape == (2, 8, 16, 16), out.shape
    err = float(jnp.max(jnp.abs(out - ref)))
    assert jnp.allclose(out, ref, atol=2e-3, rtol=2e-3), err
    print("KERNEL_OK")
</pallas_src>

<mosaic_0001>
module attributes {stable_mosaic.version = 11 : i64} {
  func.func @_basic_block_kernel(%arg0: i32, %arg1: memref<1x18x18x128xbf16, #tpu.memory_space<vmem>>, %arg2: memref<1x256x128xf32, #tpu.memory_space<vmem>>, %arg3: memref<9x128x128xbf16, #tpu.memory_space<vmem>>, %arg4: memref<9x128x128xbf16, #tpu.memory_space<vmem>>, %arg5: memref<1x128xf32, #tpu.memory_space<vmem>>, %arg6: memref<1x128xf32, #tpu.memory_space<vmem>>, %arg7: memref<1x256x128xf32, #tpu.memory_space<vmem>>, %arg8: memref<18x18x128xbf16, #tpu.memory_space<vmem>>, %arg9: memref<256x128xf32, #tpu.memory_space<vmem>>) attributes {dimension_semantics = [#tpu.dimension_semantics<parallel>], iteration_bounds = array<i64: 2>, scalar_prefetch = 0 : i64, scratch_operands = 2 : i64, tpu.core_type = #tpu.core_type<tc>, window_params = [{transform_indices = @transform_0, window_bounds = array<i64: 1, 18, 18, 128>}, {transform_indices = @transform_1, window_bounds = array<i64: 1, 256, 128>}, {pipeline_mode = #tpu.pipeline_mode<synchronous>, transform_indices = @transform_2, window_bounds = array<i64: 9, 128, 128>}, {pipeline_mode = #tpu.pipeline_mode<synchronous>, transform_indices = @transform_3, window_bounds = array<i64: 9, 128, 128>}, {pipeline_mode = #tpu.pipeline_mode<synchronous>, transform_indices = @transform_4, window_bounds = array<i64: 1, 128>}, {pipeline_mode = #tpu.pipeline_mode<synchronous>, transform_indices = @transform_5, window_bounds = array<i64: 1, 128>}, {transform_indices = @transform_6, window_bounds = array<i64: 1, 256, 128>}]} {
    %cst = arith.constant 0.000000e+00 : f32
    %0 = vector.broadcast %cst : f32 to vector<256x128xf32>
    %c0 = arith.constant 0 : index
    %c0_0 = arith.constant 0 : index
    %1 = vector.load %arg9[%c0, %c0_0] : memref<256x128xf32, #tpu.memory_space<vmem>>, vector<256x128xf32>
    tpu.vector_store %arg9[%c0, %c0_0], %0 {strides = array<i32>} : memref<256x128xf32, #tpu.memory_space<vmem>>, vector<256x128xf32>,
    %c0_1 = arith.constant 0 : index
    %c0_2 = arith.constant 0 : index
    %c0_3 = arith.constant 0 : index
    %c0_4 = arith.constant 0 : index
    %2 = vector.load %arg1[%c0_1, %c0_2, %c0_3, %c0_4] : memref<1x18x18x128xbf16, #tpu.memory_space<vmem>>, vector<1x16x16x128xbf16>
    %3 = vector.shape_cast %2 : vector<1x16x16x128xbf16> to vector<16x16x128xbf16>
    %4 = vector.shape_cast %3 : vector<16x16x128xbf16> to vector<256x128xbf16>
    %c0_5 = arith.constant 0 : index
    %c0_6 = arith.constant 0 : index
    %5 = vector.load %arg9[%c0_5, %c0_6] : memref<256x128xf32, #tpu.memory_space<vmem>>, vector<256x128xf32>
    %c0_7 = arith.constant 0 : index
    %c0_8 = arith.constant 0 : index
    %c0_9 = arith.constant 0 : index
    %6 = vector.load %arg3[%c0_7, %c0_8, %c0_9] : memref<9x128x128xbf16, #tpu.memory_space<vmem>>, vector<1x128x128xbf16>
    %7 = vector.shape_cast %6 : vector<1x128x128xbf16> to vector<128x128xbf16>
    %cst_10 = arith.constant dense<0.000000e+00> : vector<256x128xf32>
    %8 = tpu.matmul %4, %7, %cst_10 {dimension_numbers = #tpu.dot_dimension_numbers<[1], [0], [0], [1], [0, 0, 1, 1], [], []>} : vector<256x128xbf16>, vector<128x128xbf16>, vector<256x128xf32> -> vector<256x128xf32>
    %9 = arith.addf %5, %8 : vector<256x128xf32>
    %c0_11 = arith.constant 0 : index
    %c0_12 = arith.constant 0 : index
    %10 = vector.load %arg9[%c0_11, %c0_12] : memref<256x128xf32, #tpu.memory_space<vmem>>, vector<256x128xf32>
    tpu.vector_store %arg9[%c0_11, %c0_12], %9 {strides = array<i32>} : memref<256x128xf32, #tpu.memory_space<vmem>>, vector<256x128xf32>,
    %c0_13 = arith.constant 0 : index
    %c0_14 = arith.constant 0 : index
    %c1 = arith.constant 1 : index
    %c0_15 = arith.constant 0 : index
    %11 = vector.load %arg1[%c0_13, %c0_14, %c1, %c0_15] : memref<1x18x18x128xbf16, #tpu.memory_space<vmem>>, vector<1x16x16x128xbf16>
    %12 = vector.shape_cast %11 : vector<1x16x16x128xbf16> to vector<16x16x128xbf16>
    %13 = vector.shape_cast %12 : vector<16x16x128xbf16> to vector<256x128xbf16>
    %c0_16 = arith.constant 0 : index
    %c0_17 = arith.constant 0 : index
    %14 = vector.load %arg9[%c0_16, %c0_17] : memref<256x128xf32, #tpu.memory_space<vmem>>, vector<256x128xf32>
    %c1_18 = arith.constant 1 : index
    %c0_19 = arith.constant 0 : index
    %c0_20 = arith.constant 0 : index
    %15 = vector.load %arg3[%c1_18, %c0_19, %c0_20] : memref<9x128x128xbf16, #tpu.memory_space<vmem>>, vector<1x128x128xbf16>
    %16 = vector.shape_cast %15 : vector<1x128x128xbf16> to vector<128x128xbf16>
    %cst_21 = arith.constant dense<0.000000e+00> : vector<256x128xf32>
    %17 = tpu.matmul %13, %16, %cst_21 {dimension_numbers = #tpu.dot_dimension_numbers<[1], [0], [0], [1], [0, 0, 1, 1], [], []>} : vector<256x128xbf16>, vector<128x128xbf16>, vector<256x128xf32> -> vector<256x128xf32>
    %18 = arith.addf %14, %17 : vector<256x128xf32>
    %c0_22 = arith.constant 0 : index
    %c0_23 = arith.constant 0 : index
    %19 = vector.load %arg9[%c0_22, %c0_23] : memref<256x128xf32, #tpu.memory_space<vmem>>, vector<256x128xf32>
    tpu.vector_store %arg9[%c0_22, %c0_23], %18 {strides = array<i32>} : memref<256x128xf32, #tpu.memory_space<vmem>>, vector<256x128xf32>,
    %c0_24 = arith.constant 0 : index
    %c0_25 = arith.constant 0 : index
    %c2 = arith.constant 2 : index
    %c0_26 = arith.constant 0 : index
    %20 = vector.load %arg1[%c0_24, %c0_25, %c2, %c0_26] : memref<1x18x18x128xbf16, #tpu.memory_space<vmem>>, vector<1x16x16x128xbf16>
    %21 = vector.shape_cast %20 : vector<1x16x16x128xbf16> to vector<16x16x128xbf16>
    %22 = vector.shape_cast %21 : vector<16x16x128xbf16> to vector<256x128xbf16>
    %c0_27 = arith.constant 0 : index
    %c0_28 = arith.constant 0 : index
    %23 = vector.load %arg9[%c0_27, %c0_28] : memref<256x128xf32, #tpu.memory_space<vmem>>, vector<256x128xf32>
    %c2_29 = arith.constant 2 : index
    %c0_30 = arith.constant 0 : index
    %c0_31 = arith.constant 0 : index
    %24 = vector.load %arg3[%c2_29, %c0_30, %c0_31] : memref<9x128x128xbf16, #tpu.memory_space<vmem>>, vector<1x128x128xbf16>
    %25 = vector.shape_cast %24 : vector<1x128x128xbf16> to vector<128x128xbf16>
    %cst_32 = arith.constant dense<0.000000e+00> : vector<256x128xf32>
    %26 = tpu.matmul %22, %25, %cst_32 {dimension_numbers = #tpu.dot_dimension_numbers<[1], [0], [0], [1], [0, 0, 1, 1], [], []>} : vector<256x128xbf16>, vector<128x128xbf16>, vector<256x128xf32> -> vector<256x128xf32>
    %27 = arith.addf %23, %26 : vector<256x128xf32>
    %c0_33 = arith.constant 0 : index
    %c0_34 = arith.constant 0 : index
    %28 = vector.load %arg9[%c0_33, %c0_34] : memref<256x128xf32, #tpu.memory_space<vmem>>, vector<256x128xf32>
    tpu.vector_store %arg9[%c0_33, %c0_34], %27 {strides = array<i32>} : memref<256x128xf32, #tpu.memory_space<vmem>>, vector<256x128xf32>,
    %c0_35 = arith.constant 0 : index
    %c1_36 = arith.constant 1 : index
    %c0_37 = arith.constant 0 : index
    %c0_38 = arith.constant 0 : index
    %29 = vector.load %arg1[%c0_35, %c1_36, %c0_37, %c0_38] : memref<1x18x18x128xbf16, #tpu.memory_space<vmem>>, vector<1x16x16x128xbf16>
    %30 = vector.shape_cast %29 : vector<1x16x16x128xbf16> to vector<16x16x128xbf16>
    %31 = vector.shape_cast %30 : vector<16x16x128xbf16> to vector<256x128xbf16>
    %c0_39 = arith.constant 0 : index
    %c0_40 = arith.constant 0 : index
    %32 = vector.load %arg9[%c0_39, %c0_40] : memref<256x128xf32, #tpu.memory_space<vmem>>, vector<256x128xf32>
    %c3 = arith.constant 3 : index
    %c0_41 = arith.constant 0 : index
    %c0_42 = arith.constant 0 : index
    %33 = vector.load %arg3[%c3, %c0_41, %c0_42] : memref<9x128x128xbf16, #tpu.memory_space<vmem>>, vector<1x128x128xbf16>
    %34 = vector.shape_cast %33 : vector<1x128x128xbf16> to vector<128x128xbf16>
    %cst_43 = arith.constant dense<0.000000e+00> : vector<256x128xf32>
    %35 = tpu.matmul %31, %34, %cst_43 {dimension_numbers = #tpu.dot_dimension_numbers<[1], [0], [0], [1], [0, 0, 1, 1], [], []>} : vector<256x128xbf16>, vector<128x128xbf16>, vector<256x128xf32> -> vector<256x128xf32>
    %36 = arith.addf %32, %35 : vector<256x128xf32>
    %c0_44 = arith.constant 0 : index
    %c0_45 = arith.constant 0 : index
    %37 = vector.load %arg9[%c0_44, %c0_45] : memref<256x128xf32, #tpu.memory_space<vmem>>, vector<256x128xf32>
    tpu.vector_store %arg9[%c0_44, %c0_45], %36 {strides = array<i32>} : memref<256x128xf32, #tpu.memory_space<vmem>>, vector<256x128xf32>,
    %c0_46 = arith.constant 0 : index
    %c1_47 = arith.constant 1 : index
    %c1_48 = arith.constant 1 : index
    %c0_49 = arith.constant 0 : index
    %38 = vector.load %arg1[%c0_46, %c1_47, %c1_48, %c0_49] : memref<1x18x18x128xbf16, #tpu.memory_space<vmem>>, vector<1x16x16x128xbf16>
    %39 = vector.shape_cast %38 : vector<1x16x16x128xbf16> to vector<16x16x128xbf16>
    %40 = vector.shape_cast %39 : vector<16x16x128xbf16> to vector<256x128xbf16>
    %c0_50 = arith.constant 0 : index
    %c0_51 = arith.constant 0 : index
    %41 = vector.load %arg9[%c0_50, %c0_51] : memref<256x128xf32, #tpu.memory_space<vmem>>, vector<256x128xf32>
    %c4 = arith.constant 4 : index
    %c0_52 = arith.constant 0 : index
    %c0_53 = arith.constant 0 : index
    %42 = vector.load %arg3[%c4, %c0_52, %c0_53] : memref<9x128x128xbf16, #tpu.memory_space<vmem>>, vector<1x128x128xbf16>
    %43 = vector.shape_cast %42 : vector<1x128x128xbf16> to vector<128x128xbf16>
    %cst_54 = arith.constant dense<0.000000e+00> : vector<256x128xf32>
    %44 = tpu.matmul %40, %43, %cst_54 {dimension_numbers = #tpu.dot_dimension_numbers<[1], [0], [0], [1], [0, 0, 1, 1], [], []>} : vector<256x128xbf16>, vector<128x128xbf16>, vector<256x128xf32> -> vector<256x128xf32>
    %45 = arith.addf %41, %44 : vector<256x128xf32>
    %c0_55 = arith.constant 0 : index
    %c0_56 = arith.constant 0 : index
    %46 = vector.load %arg9[%c0_55, %c0_56] : memref<256x128xf32, #tpu.memory_space<vmem>>, vector<256x128xf32>
    tpu.vector_store %arg9[%c0_55, %c0_56], %45 {strides = array<i32>} : memref<256x128xf32, #tpu.memory_space<vmem>>, vector<256x128xf32>,
    %c0_57 = arith.constant 0 : index
    %c1_58 = arith.constant 1 : index
    %c2_59 = arith.constant 2 : index
    %c0_60 = arith.constant 0 : index
    %47 = vector.load %arg1[%c0_57, %c1_58, %c2_59, %c0_60] : memref<1x18x18x128xbf16, #tpu.memory_space<vmem>>, vector<1x16x16x128xbf16>
    %48 = vector.shape_cast %47 : vector<1x16x16x128xbf16> to vector<16x16x128xbf16>
    %49 = vector.shape_cast %48 : vector<16x16x128xbf16> to vector<256x128xbf16>
    %c0_61 = arith.constant 0 : index
    %c0_62 = arith.constant 0 : index
    %50 = vector.load %arg9[%c0_61, %c0_62] : memref<256x128xf32, #tpu.memory_space<vmem>>, vector<256x128xf32>
    %c5 = arith.constant 5 : index
    %c0_63 = arith.constant 0 : index
    %c0_64 = arith.constant 0 : index
    %51 = vector.load %arg3[%c5, %c0_63, %c0_64] : memref<9x128x128xbf16, #tpu.memory_space<vmem>>, vector<1x128x128xbf16>
    %52 = vector.shape_cast %51 : vector<1x128x128xbf16> to vector<128x128xbf16>
    %cst_65 = arith.constant dense<0.000000e+00> : vector<256x128xf32>
    %53 = tpu.matmul %49, %52, %cst_65 {dimension_numbers = #tpu.dot_dimension_numbers<[1], [0], [0], [1], [0, 0, 1, 1], [], []>} : vector<256x128xbf16>, vector<128x128xbf16>, vector<256x128xf32> -> vector<256x128xf32>
    %54 = arith.addf %50, %53 : vector<256x128xf32>
    %c0_66 = arith.constant 0 : index
    %c0_67 = arith.constant 0 : index
    %55 = vector.load %arg9[%c0_66, %c0_67] : memref<256x128xf32, #tpu.memory_space<vmem>>, vector<256x128xf32>
    tpu.vector_store %arg9[%c0_66, %c0_67], %54 {strides = array<i32>} : memref<256x128xf32, #tpu.memory_space<vmem>>, vector<256x128xf32>,
    %c0_68 = arith.constant 0 : index
    %c2_69 = arith.constant 2 : index
    %c0_70 = arith.constant 0 : index
    %c0_71 = arith.constant 0 : index
    %56 = vector.load %arg1[%c0_68, %c2_69, %c0_70, %c0_71] : memref<1x18x18x128xbf16, #tpu.memory_space<vmem>>, vector<1x16x16x128xbf16>
    %57 = vector.shape_cast %56 : vector<1x16x16x128xbf16> to vector<16x16x128xbf16>
    %58 = vector.shape_cast %57 : vector<16x16x128xbf16> to vector<256x128xbf16>
    %c0_72 = arith.constant 0 : index
    %c0_73 = arith.constant 0 : index
    %59 = vector.load %arg9[%c0_72, %c0_73] : memref<256x128xf32, #tpu.memory_space<vmem>>, vector<256x128xf32>
    %c6 = arith.constant 6 : index
    %c0_74 = arith.constant 0 : index
    %c0_75 = arith.constant 0 : index
    %60 = vector.load %arg3[%c6, %c0_74, %c0_75] : memref<9x128x128xbf16, #tpu.memory_space<vmem>>, vector<1x128x128xbf16>
    %61 = vector.shape_cast %60 : vector<1x128x128xbf16> to vector<128x128xbf16>
    %cst_76 = arith.constant dense<0.000000e+00> : vector<256x128xf32>
    %62 = tpu.matmul %58, %61, %cst_76 {dimension_numbers = #tpu.dot_dimension_numbers<[1], [0], [0], [1], [0, 0, 1, 1], [], []>} : vector<256x128xbf16>, vector<128x128xbf16>, vector<256x128xf32> -> vector<256x128xf32>
    %63 = arith.addf %59, %62 : vector<256x128xf32>
    %c0_77 = arith.constant 0 : index
    %c0_78 = arith.constant 0 : index
    %64 = vector.load %arg9[%c0_77, %c0_78] : memref<256x128xf32, #tpu.memory_space<vmem>>, vector<256x128xf32>
    tpu.vector_store %arg9[%c0_77, %c0_78], %63 {strides = array<i32>} : memref<256x128xf32, #tpu.memory_space<vmem>>, vector<256x128xf32>,
    %c0_79 = arith.constant 0 : index
    %c2_80 = arith.constant 2 : index
    %c1_81 = arith.constant 1 : index
    %c0_82 = arith.constant 0 : index
    %65 = vector.load %arg1[%c0_79, %c2_80, %c1_81, %c0_82] : memref<1x18x18x128xbf16, #tpu.memory_space<vmem>>, vector<1x16x16x128xbf16>
    %66 = vector.shape_cast %65 : vector<1x16x16x128xbf16> to vector<16x16x128xbf16>
    %67 = vector.shape_cast %66 : vector<16x16x128xbf16> to vector<256x128xbf16>
    %c0_83 = arith.constant 0 : index
    %c0_84 = arith.constant 0 : index
    %68 = vector.load %arg9[%c0_83, %c0_84] : memref<256x128xf32, #tpu.memory_space<vmem>>, vector<256x128xf32>
    %c7 = arith.constant 7 : index
    %c0_85 = arith.constant 0 : index
    %c0_86 = arith.constant 0 : index
    %69 = vector.load %arg3[%c7, %c0_85, %c0_86] : memref<9x128x128xbf16, #tpu.memory_space<vmem>>, vector<1x128x128xbf16>
    %70 = vector.shape_cast %69 : vector<1x128x128xbf16> to vector<128x128xbf16>
    %cst_87 = arith.constant dense<0.000000e+00> : vector<256x128xf32>
    %71 = tpu.matmul %67, %70, %cst_87 {dimension_numbers = #tpu.dot_dimension_numbers<[1], [0], [0], [1], [0, 0, 1, 1], [], []>} : vector<256x128xbf16>, vector<128x128xbf16>, vector<256x128xf32> -> vector<256x128xf32>
    %72 = arith.addf %68, %71 : vector<256x128xf32>
    %c0_88 = arith.constant 0 : index
    %c0_89 = arith.constant 0 : index
    %73 = vector.load %arg9[%c0_88, %c0_89] : memref<256x128xf32, #tpu.memory_space<vmem>>, vector<256x128xf32>
    tpu.vector_store %arg9[%c0_88, %c0_89], %72 {strides = array<i32>} : memref<256x128xf32, #tpu.memory_space<vmem>>, vector<256x128xf32>,
    %c0_90 = arith.constant 0 : index
    %c2_91 = arith.constant 2 : index
    %c2_92 = arith.constant 2 : index
    %c0_93 = arith.constant 0 : index
    %74 = vector.load %arg1[%c0_90, %c2_91, %c2_92, %c0_93] : memref<1x18x18x128xbf16, #tpu.memory_space<vmem>>, vector<1x16x16x128xbf16>
    %75 = vector.shape_cast %74 : vector<1x16x16x128xbf16> to vector<16x16x128xbf16>
    %76 = vector.shape_cast %75 : vector<16x16x128xbf16> to vector<256x128xbf16>
    %c0_94 = arith.constant 0 : index
    %c0_95 = arith.constant 0 : index
    %77 = vector.load %arg9[%c0_94, %c0_95] : memref<256x128xf32, #tpu.memory_space<vmem>>, vector<256x128xf32>
    %c8 = arith.constant 8 : index
    %c0_96 = arith.constant 0 : index
    %c0_97 = arith.constant 0 : index
    %78 = vector.load %arg3[%c8, %c0_96, %c0_97] : memref<9x128x128xbf16, #tpu.memory_space<vmem>>, vector<1x128x128xbf16>
    %79 = vector.shape_cast %78 : vector<1x128x128xbf16> to vector<128x128xbf16>
    %cst_98 = arith.constant dense<0.000000e+00> : vector<256x128xf32>
    %80 = tpu.matmul %76, %79, %cst_98 {dimension_numbers = #tpu.dot_dimension_numbers<[1], [0], [0], [1], [0, 0, 1, 1], [], []>} : vector<256x128xbf16>, vector<128x128xbf16>, vector<256x128xf32> -> vector<256x128xf32>
    %81 = arith.addf %77, %80 : vector<256x128xf32>
    %c0_99 = arith.constant 0 : index
    %c0_100 = arith.constant 0 : index
    %82 = vector.load %arg9[%c0_99, %c0_100] : memref<256x128xf32, #tpu.memory_space<vmem>>, vector<256x128xf32>
    tpu.vector_store %arg9[%c0_99, %c0_100], %81 {strides = array<i32>} : memref<256x128xf32, #tpu.memory_space<vmem>>, vector<256x128xf32>,
    %c0_101 = arith.constant 0 : index
    %c0_102 = arith.constant 0 : index
    %83 = vector.load %arg9[%c0_101, %c0_102] : memref<256x128xf32, #tpu.memory_space<vmem>>, vector<256x128xf32>
    %c0_103 = arith.constant 0 : index
    %c0_104 = arith.constant 0 : index
    %84 = vector.load %arg5[%c0_103, %c0_104] : memref<1x128xf32, #tpu.memory_space<vmem>>, vector<1x128xf32>
    %85 = vector.broadcast %84 : vector<1x128xf32> to vector<256x128xf32>
    %86 = arith.addf %83, %85 : vector<256x128xf32>
    %cst_105 = arith.constant 0.000000e+00 : f32
    %87 = vector.broadcast %cst_105 : f32 to vector<256x128xf32>
    %88 = arith.maximumf %86, %87 : vector<256x128xf32>
    %cst_106 = arith.constant 0.000000e+00 : bf16
    %89 = vector.broadcast %cst_106 : bf16 to vector<18x18x128xbf16>
    %c0_107 = arith.constant 0 : index
    %c0_108 = arith.constant 0 : index
    %c0_109 = arith.constant 0 : index
    %90 = vector.load %arg8[%c0_107, %c0_108, %c0_109] : memref<18x18x128xbf16, #tpu.memory_space<vmem>>, vector<18x18x128xbf16>
    tpu.vector_store %arg8[%c0_107, %c0_108, %c0_109], %89 {strides = array<i32>} : memref<18x18x128xbf16, #tpu.memory_space<vmem>>, vector<18x18x128xbf16>,
    %91 = vector.shape_cast %88 : vector<256x128xf32> to vector<16x16x128xf32>
    %92 = arith.truncf %91 : vector<16x16x128xf32> to vector<16x16x128xbf16>
    %c1_110 = arith.constant 1 : index
    %c1_111 = arith.constant 1 : index
    %c0_112 = arith.constant 0 : index
    %93 = vector.load %arg8[%c1_110, %c1_111, %c0_112] : memref<18x18x128xbf16, #tpu.memory_space<vmem>>, vector<16x16x128xbf16>
    tpu.vector_store %arg8[%c1_110, %c1_111, %c0_112], %92 {strides = array<i32>} : memref<18x18x128xbf16, #tpu.memory_space<vmem>>, vector<16x16x128xbf16>,
    %cst_113 = arith.constant 0.000000e+00 : f32
    %94 = vector.broadcast %cst_113 : f32 to vector<256x128xf32>
    %c0_114 = arith.constant 0 : index
    %c0_115 = arith.constant 0 : index
    %95 = vector.load %arg9[%c0_114, %c0_115] : memref<256x128xf32, #tpu.memory_space<vmem>>, vector<256x128xf32>
    tpu.vector_store %arg9[%c0_114, %c0_115], %94 {strides = array<i32>} : memref<256x128xf32, #tpu.memory_space<vmem>>, vector<256x128xf32>,
    %c0_116 = arith.constant 0 : index
    %c0_117 = arith.constant 0 : index
    %c0_118 = arith.constant 0 : index
    %96 = vector.load %arg8[%c0_116, %c0_117, %c0_118] : memref<18x18x128xbf16, #tpu.memory_space<vmem>>, vector<16x16x128xbf16>
    %97 = vector.shape_cast %96 : vector<16x16x128xbf16> to vector<256x128xbf16>
    %c0_119 = arith.constant 0 : index
    %c0_120 = arith.constant 0 : index
    %98 = vector.load %arg9[%c0_119, %c0_120] : memref<256x128xf32, #tpu.memory_space<vmem>>, vector<256x128xf32>
    %c0_121 = arith.constant 0 : index
    %c0_122 = arith.constant 0 : index
    %c0_123 = arith.constant 0 : index
    %99 = vector.load %arg4[%c0_121, %c0_122, %c0_123] : memref<9x128x128xbf16, #tpu.memory_space<vmem>>, vector<1x128x128xbf16>
    %100 = vector.shape_cast %99 : vector<1x128x128xbf16> to vector<128x128xbf16>
    %cst_124 = arith.constant dense<0.000000e+00> : vector<256x128xf32>
    %101 = tpu.matmul %97, %100, %cst_124 {dimension_numbers = #tpu.dot_dimension_numbers<[1], [0], [0], [1], [0, 0, 1, 1], [], []>} : vector<256x128xbf16>, vector<128x128xbf16>, vector<256x128xf32> -> vector<256x128xf32>
    %102 = arith.addf %98, %101 : vector<256x128xf32>
    %c0_125 = arith.constant 0 : index
    %c0_126 = arith.constant 0 : index
    %103 = vector.load %arg9[%c0_125, %c0_126] : memref<256x128xf32, #tpu.memory_space<vmem>>, vector<256x128xf32>
    tpu.vector_store %arg9[%c0_125, %c0_126], %102 {strides = array<i32>} : memref<256x128xf32, #tpu.memory_space<vmem>>, vector<256x128xf32>,
    %c0_127 = arith.constant 0 : index
    %c1_128 = arith.constant 1 : index
    %c0_129 = arith.constant 0 : index
    %104 = vector.load %arg8[%c0_127, %c1_128, %c0_129] : memref<18x18x128xbf16, #tpu.memory_space<vmem>>, vector<16x16x128xbf16>
    %105 = vector.shape_cast %104 : vector<16x16x128xbf16> to vector<256x128xbf16>
    %c0_130 = arith.constant 0 : index
    %c0_131 = arith.constant 0 : index
    %106 = vector.load %arg9[%c0_130, %c0_131] : memref<256x128xf32, #tpu.memory_space<vmem>>, vector<256x128xf32>
    %c1_132 = arith.constant 1 : index
    %c0_133 = arith.constant 0 : index
    %c0_134 = arith.constant 0 : index
    %107 = vector.load %arg4[%c1_132, %c0_133, %c0_134] : memref<9x128x128xbf16, #tpu.memory_space<vmem>>, vector<1x128x128xbf16>
    %108 = vector.shape_cast %107 : vector<1x128x128xbf16> to vector<128x128xbf16>
    %cst_135 = arith.constant dense<0.000000e+00> : vector<256x128xf32>
    %109 = tpu.matmul %105, %108, %cst_135 {dimension_numbers = #tpu.dot_dimension_numbers<[1], [0], [0], [1], [0, 0, 1, 1], [], []>} : vector<256x128xbf16>, vector<128x128xbf16>, vector<256x128xf32> -> vector<256x128xf32>
    %110 = arith.addf %106, %109 : vector<256x128xf32>
    %c0_136 = arith.constant 0 : index
    %c0_137 = arith.constant 0 : index
    %111 = vector.load %arg9[%c0_136, %c0_137] : memref<256x128xf32, #tpu.memory_space<vmem>>, vector<256x128xf32>
    tpu.vector_store %arg9[%c0_136, %c0_137], %110 {strides = array<i32>} : memref<256x128xf32, #tpu.memory_space<vmem>>, vector<256x128xf32>,
    %c0_138 = arith.constant 0 : index
    %c2_139 = arith.constant 2 : index
    %c0_140 = arith.constant 0 : index
    %112 = vector.load %arg8[%c0_138, %c2_139, %c0_140] : memref<18x18x128xbf16, #tpu.memory_space<vmem>>, vector<16x16x128xbf16>
    %113 = vector.shape_cast %112 : vector<16x16x128xbf16> to vector<256x128xbf16>
    %c0_141 = arith.constant 0 : index
    %c0_142 = arith.constant 0 : index
    %114 = vector.load %arg9[%c0_141, %c0_142] : memref<256x128xf32, #tpu.memory_space<vmem>>, vector<256x128xf32>
    %c2_143 = arith.constant 2 : index
    %c0_144 = arith.constant 0 : index
    %c0_145 = arith.constant 0 : index
    %115 = vector.load %arg4[%c2_143, %c0_144, %c0_145] : memref<9x128x128xbf16, #tpu.memory_space<vmem>>, vector<1x128x128xbf16>
    %116 = vector.shape_cast %115 : vector<1x128x128xbf16> to vector<128x128xbf16>
    %cst_146 = arith.constant dense<0.000000e+00> : vector<256x128xf32>
    %117 = tpu.matmul %113, %116, %cst_146 {dimension_numbers = #tpu.dot_dimension_numbers<[1], [0], [0], [1], [0, 0, 1, 1], [], []>} : vector<256x128xbf16>, vector<128x128xbf16>, vector<256x128xf32> -> vector<256x128xf32>
    %118 = arith.addf %114, %117 : vector<256x128xf32>
    %c0_147 = arith.constant 0 : index
    %c0_148 = arith.constant 0 : index
    %119 = vector.load %arg9[%c0_147, %c0_148] : memref<256x128xf32, #tpu.memory_space<vmem>>, vector<256x128xf32>
    tpu.vector_store %arg9[%c0_147, %c0_148], %118 {strides = array<i32>} : memref<256x128xf32, #tpu.memory_space<vmem>>, vector<256x128xf32>,
    %c1_149 = arith.constant 1 : index
    %c0_150 = arith.constant 0 : index
    %c0_151 = arith.constant 0 : index
    %120 = vector.load %arg8[%c1_149, %c0_150, %c0_151] : memref<18x18x128xbf16, #tpu.memory_space<vmem>>, vector<16x16x128xbf16>
    %121 = vector.shape_cast %120 : vector<16x16x128xbf16> to vector<256x128xbf16>
    %c0_152 = arith.constant 0 : index
    %c0_153 = arith.constant 0 : index
    %122 = vector.load %arg9[%c0_152, %c0_153] : memref<256x128xf32, #tpu.memory_space<vmem>>, vector<256x128xf32>
    %c3_154 = arith.constant 3 : index
    %c0_155 = arith.constant 0 : index
    %c0_156 = arith.constant 0 : index
    %123 = vector.load %arg4[%c3_154, %c0_155, %c0_156] : memref<9x128x128xbf16, #tpu.memory_space<vmem>>, vector<1x128x128xbf16>
    %124 = vector.shape_cast %123 : vector<1x128x128xbf16> to vector<128x128xbf16>
    %cst_157 = arith.constant dense<0.000000e+00> : vector<256x128xf32>
    %125 = tpu.matmul %121, %124, %cst_157 {dimension_numbers = #tpu.dot_dimension_numbers<[1], [0], [0], [1], [0, 0, 1, 1], [], []>} : vector<256x128xbf16>, vector<128x128xbf16>, vector<256x128xf32> -> vector<256x128xf32>
    %126 = arith.addf %122, %125 : vector<256x128xf32>
    %c0_158 = arith.constant 0 : index
    %c0_159 = arith.constant 0 : index
    %127 = vector.load %arg9[%c0_158, %c0_159] : memref<256x128xf32, #tpu.memory_space<vmem>>, vector<256x128xf32>
    tpu.vector_store %arg9[%c0_158, %c0_159], %126 {strides = array<i32>} : memref<256x128xf32, #tpu.memory_space<vmem>>, vector<256x128xf32>,
    %c1_160 = arith.constant 1 : index
    %c1_161 = arith.constant 1 : index
    %c0_162 = arith.constant 0 : index
    %128 = vector.load %arg8[%c1_160, %c1_161, %c0_162] : memref<18x18x128xbf16, #tpu.memory_space<vmem>>, vector<16x16x128xbf16>
    %129 = vector.shape_cast %128 : vector<16x16x128xbf16> to vector<256x128xbf16>
    %c0_163 = arith.constant 0 : index
    %c0_164 = arith.constant 0 : index
    %130 = vector.load %arg9[%c0_163, %c0_164] : memref<256x128xf32, #tpu.memory_space<vmem>>, vector<256x128xf32>
    %c4_165 = arith.constant 4 : index
    %c0_166 = arith.constant 0 : index
    %c0_167 = arith.constant 0 : index
    %131 = vector.load %arg4[%c4_165, %c0_166, %c0_167] : memref<9x128x128xbf16, #tpu.memory_space<vmem>>, vector<1x128x128xbf16>
    %132 = vector.shape_cast %131 : vector<1x128x128xbf16> to vector<128x128xbf16>
    %cst_168 = arith.constant dense<0.000000e+00> : vector<256x128xf32>
    %133 = tpu.matmul %129, %132, %cst_168 {dimension_numbers = #tpu.dot_dimension_numbers<[1], [0], [0], [1], [0, 0, 1, 1], [], []>} : vector<256x128xbf16>, vector<128x128xbf16>, vector<256x128xf32> -> vector<256x128xf32>
    %134 = arith.addf %130, %133 : vector<256x128xf32>
    %c0_169 = arith.constant 0 : index
    %c0_170 = arith.constant 0 : index
    %135 = vector.load %arg9[%c0_169, %c0_170] : memref<256x128xf32, #tpu.memory_space<vmem>>, vector<256x128xf32>
    tpu.vector_store %arg9[%c0_169, %c0_170], %134 {strides = array<i32>} : memref<256x128xf32, #tpu.memory_space<vmem>>, vector<256x128xf32>,
    %c1_171 = arith.constant 1 : index
    %c2_172 = arith.constant 2 : index
    %c0_173 = arith.constant 0 : index
    %136 = vector.load %arg8[%c1_171, %c2_172, %c0_173] : memref<18x18x128xbf16, #tpu.memory_space<vmem>>, vector<16x16x128xbf16>
    %137 = vector.shape_cast %136 : vector<16x16x128xbf16> to vector<256x128xbf16>
    %c0_174 = arith.constant 0 : index
    %c0_175 = arith.constant 0 : index
    %138 = vector.load %arg9[%c0_174, %c0_175] : memref<256x128xf32, #tpu.memory_space<vmem>>, vector<256x128xf32>
    %c5_176 = arith.constant 5 : index
    %c0_177 = arith.constant 0 : index
    %c0_178 = arith.constant 0 : index
    %139 = vector.load %arg4[%c5_176, %c0_177, %c0_178] : memref<9x128x128xbf16, #tpu.memory_space<vmem>>, vector<1x128x128xbf16>
    %140 = vector.shape_cast %139 : vector<1x128x128xbf16> to vector<128x128xbf16>
    %cst_179 = arith.constant dense<0.000000e+00> : vector<256x128xf32>
    %141 = tpu.matmul %137, %140, %cst_179 {dimension_numbers = #tpu.dot_dimension_numbers<[1], [0], [0], [1], [0, 0, 1, 1], [], []>} : vector<256x128xbf16>, vector<128x128xbf16>, vector<256x128xf32> -> vector<256x128xf32>
    %142 = arith.addf %138, %141 : vector<256x128xf32>
    %c0_180 = arith.constant 0 : index
    %c0_181 = arith.constant 0 : index
    %143 = vector.load %arg9[%c0_180, %c0_181] : memref<256x128xf32, #tpu.memory_space<vmem>>, vector<256x128xf32>
    tpu.vector_store %arg9[%c0_180, %c0_181], %142 {strides = array<i32>} : memref<256x128xf32, #tpu.memory_space<vmem>>, vector<256x128xf32>,
    %c2_182 = arith.constant 2 : index
    %c0_183 = arith.constant 0 : index
    %c0_184 = arith.constant 0 : index
    %144 = vector.load %arg8[%c2_182, %c0_183, %c0_184] : memref<18x18x128xbf16, #tpu.memory_space<vmem>>, vector<16x16x128xbf16>
    %145 = vector.shape_cast %144 : vector<16x16x128xbf16> to vector<256x128xbf16>
    %c0_185 = arith.constant 0 : index
    %c0_186 = arith.constant 0 : index
    %146 = vector.load %arg9[%c0_185, %c0_186] : memref<256x128xf32, #tpu.memory_space<vmem>>, vector<256x128xf32>
    %c6_187 = arith.constant 6 : index
    %c0_188 = arith.constant 0 : index
    %c0_189 = arith.constant 0 : index
    %147 = vector.load %arg4[%c6_187, %c0_188, %c0_189] : memref<9x128x128xbf16, #tpu.memory_space<vmem>>, vector<1x128x128xbf16>
    %148 = vector.shape_cast %147 : vector<1x128x128xbf16> to vector<128x128xbf16>
    %cst_190 = arith.constant dense<0.000000e+00> : vector<256x128xf32>
    %149 = tpu.matmul %145, %148, %cst_190 {dimension_numbers = #tpu.dot_dimension_numbers<[1], [0], [0], [1], [0, 0, 1, 1], [], []>} : vector<256x128xbf16>, vector<128x128xbf16>, vector<256x128xf32> -> vector<256x128xf32>
    %150 = arith.addf %146, %149 : vector<256x128xf32>
    %c0_191 = arith.constant 0 : index
    %c0_192 = arith.constant 0 : index
    %151 = vector.load %arg9[%c0_191, %c0_192] : memref<256x128xf32, #tpu.memory_space<vmem>>, vector<256x128xf32>
    tpu.vector_store %arg9[%c0_191, %c0_192], %150 {strides = array<i32>} : memref<256x128xf32, #tpu.memory_space<vmem>>, vector<256x128xf32>,
    %c2_193 = arith.constant 2 : index
    %c1_194 = arith.constant 1 : index
    %c0_195 = arith.constant 0 : index
    %152 = vector.load %arg8[%c2_193, %c1_194, %c0_195] : memref<18x18x128xbf16, #tpu.memory_space<vmem>>, vector<16x16x128xbf16>
    %153 = vector.shape_cast %152 : vector<16x16x128xbf16> to vector<256x128xbf16>
    %c0_196 = arith.constant 0 : index
    %c0_197 = arith.constant 0 : index
    %154 = vector.load %arg9[%c0_196, %c0_197] : memref<256x128xf32, #tpu.memory_space<vmem>>, vector<256x128xf32>
    %c7_198 = arith.constant 7 : index
    %c0_199 = arith.constant 0 : index
    %c0_200 = arith.constant 0 : index
    %155 = vector.load %arg4[%c7_198, %c0_199, %c0_200] : memref<9x128x128xbf16, #tpu.memory_space<vmem>>, vector<1x128x128xbf16>
    %156 = vector.shape_cast %155 : vector<1x128x128xbf16> to vector<128x128xbf16>
    %cst_201 = arith.constant dense<0.000000e+00> : vector<256x128xf32>
    %157 = tpu.matmul %153, %156, %cst_201 {dimension_numbers = #tpu.dot_dimension_numbers<[1], [0], [0], [1], [0, 0, 1, 1], [], []>} : vector<256x128xbf16>, vector<128x128xbf16>, vector<256x128xf32> -> vector<256x128xf32>
    %158 = arith.addf %154, %157 : vector<256x128xf32>
    %c0_202 = arith.constant 0 : index
    %c0_203 = arith.constant 0 : index
    %159 = vector.load %arg9[%c0_202, %c0_203] : memref<256x128xf32, #tpu.memory_space<vmem>>, vector<256x128xf32>
    tpu.vector_store %arg9[%c0_202, %c0_203], %158 {strides = array<i32>} : memref<256x128xf32, #tpu.memory_space<vmem>>, vector<256x128xf32>,
    %c2_204 = arith.constant 2 : index
    %c2_205 = arith.constant 2 : index
    %c0_206 = arith.constant 0 : index
    %160 = vector.load %arg8[%c2_204, %c2_205, %c0_206] : memref<18x18x128xbf16, #tpu.memory_space<vmem>>, vector<16x16x128xbf16>
    %161 = vector.shape_cast %160 : vector<16x16x128xbf16> to vector<256x128xbf16>
    %c0_207 = arith.constant 0 : index
    %c0_208 = arith.constant 0 : index
    %162 = vector.load %arg9[%c0_207, %c0_208] : memref<256x128xf32, #tpu.memory_space<vmem>>, vector<256x128xf32>
    %c8_209 = arith.constant 8 : index
    %c0_210 = arith.constant 0 : index
    %c0_211 = arith.constant 0 : index
    %163 = vector.load %arg4[%c8_209, %c0_210, %c0_211] : memref<9x128x128xbf16, #tpu.memory_space<vmem>>, vector<1x128x128xbf16>
    %164 = vector.shape_cast %163 : vector<1x128x128xbf16> to vector<128x128xbf16>
    %cst_212 = arith.constant dense<0.000000e+00> : vector<256x128xf32>
    %165 = tpu.matmul %161, %164, %cst_212 {dimension_numbers = #tpu.dot_dimension_numbers<[1], [0], [0], [1], [0, 0, 1, 1], [], []>} : vector<256x128xbf16>, vector<128x128xbf16>, vector<256x128xf32> -> vector<256x128xf32>
    %166 = arith.addf %162, %165 : vector<256x128xf32>
    %c0_213 = arith.constant 0 : index
    %c0_214 = arith.constant 0 : index
    %167 = vector.load %arg9[%c0_213, %c0_214] : memref<256x128xf32, #tpu.memory_space<vmem>>, vector<256x128xf32>
    tpu.vector_store %arg9[%c0_213, %c0_214], %166 {strides = array<i32>} : memref<256x128xf32, #tpu.memory_space<vmem>>, vector<256x128xf32>,
    %c0_215 = arith.constant 0 : index
    %c0_216 = arith.constant 0 : index
    %168 = vector.load %arg9[%c0_215, %c0_216] : memref<256x128xf32, #tpu.memory_space<vmem>>, vector<256x128xf32>
    %c0_217 = arith.constant 0 : index
    %c0_218 = arith.constant 0 : index
    %169 = vector.load %arg6[%c0_217, %c0_218] : memref<1x128xf32, #tpu.memory_space<vmem>>, vector<1x128xf32>
    %170 = vector.broadcast %169 : vector<1x128xf32> to vector<256x128xf32>
    %171 = arith.addf %168, %170 : vector<256x128xf32>
    %c0_219 = arith.constant 0 : index
    %c0_220 = arith.constant 0 : index
    %c0_221 = arith.constant 0 : index
    %172 = vector.load %arg2[%c0_219, %c0_220, %c0_221] : memref<1x256x128xf32, #tpu.memory_space<vmem>>, vector<1x256x128xf32>
    %173 = vector.shape_cast %172 : vector<1x256x128xf32> to vector<256x128xf32>
    %174 = arith.addf %171, %173 : vector<256x128xf32>
    %c0_222 = arith.constant 0 : index
    %c0_223 = arith.constant 0 : index
    %c0_224 = arith.constant 0 : index
    %175 = vector.load %arg7[%c0_222, %c0_223, %c0_224] : memref<1x256x128xf32, #tpu.memory_space<vmem>>, vector<1x256x128xf32>
    %176 = vector.shape_cast %175 : vector<1x256x128xf32> to vector<256x128xf32>
    %177 = vector.shape_cast %174 : vector<256x128xf32> to vector<1x256x128xf32>
    tpu.vector_store %arg7[%c0_222, %c0_223, %c0_224], %177 {strides = array<i32>} : memref<1x256x128xf32, #tpu.memory_space<vmem>>, vector<1x256x128xf32>,
    return
  }
  func.func @transform_0(%arg0: i32) -> (i32, i32, i32, i32) {
    %c0_i32 = arith.constant 0 : i32
    %c0_i32_0 = arith.constant 0 : i32
    %c0_i32_1 = arith.constant 0 : i32
    %c0_i32_2 = arith.constant 0 : i32
    return %arg0, %c0_i32, %c0_i32_0, %c0_i32_1 : i32, i32, i32, i32
  }
  func.func @transform_1(%arg0: i32) -> (i32, i32, i32) {
    %c0_i32 = arith.constant 0 : i32
    %c0_i32_0 = arith.constant 0 : i32
    %c0_i32_1 = arith.constant 0 : i32
    return %arg0, %c0_i32, %c0_i32_0 : i32, i32, i32
  }
  func.func @transform_2(%arg0: i32) -> (i32, i32, i32) {
    %c0_i32 = arith.constant 0 : i32
    %c0_i32_0 = arith.constant 0 : i32
    %c0_i32_1 = arith.constant 0 : i32
    %c0_i32_2 = arith.constant 0 : i32
    return %c0_i32, %c0_i32_0, %c0_i32_1 : i32, i32, i32
  }
  func.func @transform_3(%arg0: i32) -> (i32, i32, i32) {
    %c0_i32 = arith.constant 0 : i32
    %c0_i32_0 = arith.constant 0 : i32
    %c0_i32_1 = arith.constant 0 : i32
    %c0_i32_2 = arith.constant 0 : i32
    return %c0_i32, %c0_i32_0, %c0_i32_1 : i32, i32, i32
  }
  func.func @transform_4(%arg0: i32) -> (i32, i32) {
    %c0_i32 = arith.constant 0 : i32
    %c0_i32_0 = arith.constant 0 : i32
    %c0_i32_1 = arith.constant 0 : i32
    return %c0_i32, %c0_i32_0 : i32, i32
  }
  func.func @transform_5(%arg0: i32) -> (i32, i32) {
    %c0_i32 = arith.constant 0 : i32
    %c0_i32_0 = arith.constant 0 : i32
    %c0_i32_1 = arith.constant 0 : i32
    return %c0_i32, %c0_i32_0 : i32, i32
  }
  func.func @transform_6(%arg0: i32) -> (i32, i32, i32) {
    %c0_i32 = arith.constant 0 : i32
    %c0_i32_0 = arith.constant 0 : i32
    %c0_i32_1 = arith.constant 0 : i32
    return %arg0, %c0_i32, %c0_i32_0 : i32, i32, i32
  }
}

</mosaic_0001>

<bundles_post_ra>
// kernel: tpu_custom_call.1
= control target key start
LH: loop header
LB: loop body
LE: loop exit
PB: predicated region body
PF: predicated region fallthrough
CT: control target
= control target key end

     0   :  { %11 = vsyncpa [#allocation5], 0  ;;  %s19082_s0 = inlined_call_operand.vmem [shape: bf16[2,18,18,128], index: 0, kind: input, shape index: {}]   ;;  %s19083_s1 = inlined_call_operand.hbm [shape: f32[2,256,128], index: 1, kind: input, shape index: {}]   ;;  %s19084_s2 = inlined_call_operand.vmem [shape: bf16[9,128,128], index: 2, kind: input, shape index: {}]   ;;  %s19085_s3 = inlined_call_operand.hbm [shape: bf16[9,128,128], index: 3, kind: input, shape index: {}]   ;;  %s19086_s4 = inlined_call_operand.vmem [shape: f32[1,128], index: 4, kind: input, shape index: {}]   ;;  %s19087_s5 = inlined_call_operand.vmem [shape: f32[1,128], index: 5, kind: input, shape index: {}]   ;;  %s19088_s6 = inlined_call_operand.hbm [shape: f32[2,256,128], index: 6, kind: output, shape index: {}]  }
   0x1   :  { %13 = vsyncpa [#allocation5 + $0x1], 0 }
   0x2   :  { %14 = vsyncpa [#allocation8], 0 }
   0x3   :  { %15 = vsyncpa [#allocation6], 0 }
   0x4   :  { %17 = vsyncpa [#allocation6 + $0x1], 0  ;;  %s15288_s21 = smov 0   ;;  %s15290_s22 = smov 0  }
   0x5   :  { %s15292_s23 = smov 0   ;;  %s15294_s24 = smov 0  }
   0x6 LB: > { %s15309_s25 = sadd.s32 4294967295, %s15241_s24   ;;  %s12519_s26 = sadd.s32 4294967294, %s15241_s24   ;;  %s15241_s24 = sphi %s15294_s24, %s19403_s24   ;;  %s15237_s23 = sphi %s15292_s23, %s19402_s23   ;;  %s15233_s22 = sphi %s15290_s22, %s19401_s22   ;;  %s15229_s21 = sphi %s15288_s21, %s19400_s21  }
   0x7   : > { %p69_p0 = scmp.ne.s32.totalorder %s15233_s22, %s15229_s21  ;;  %p19089_p1 = scmp.eq.s32.totalorder %s15309_s25, 0 }
   0x8   : > { %p183_p3 = scmp.eq.s32.totalorder %s12519_s26, 1  ;;  %p12520_p5 = scmp.ge.s32.totalorder %s15241_s24, 1 }
   0x9   : > { %p15318_p4 = por %p19089_p1, %p69_p0  ;;  %p190_p7 = scmp.lt.s32.totalorder %s15241_s24, 3 }
   0xa   : > { %p15323_p6 = por %p183_p3, %p69_p0  ;;  %s15243_s30 = smov [#allocation7]  }
   0xb   : > { %s19098_s27 = scalar_select %p15318_p4, 1, 0 }
   0xc   : > { %s19099_s28 = scalar_select %p15323_p6, 1, 0 }
   0xd   : > { %p15328_p8 = pnand %p12520_p5, %p190_p7  ;;  %s205_s7 = sshll.u32 %s15243_s30, 4  ;;  %s206_s7 = int_to_ptr.vmem [resolvable:$true] %s205_s7 }
   0xe   : > { %s15342_s9 = sadd.s32 1, %s15241_s24   ;;  %s56_s10 = sadd.s32 1, %s15237_s23 }
   0xf   : > { %s19100_s29 = scalar_select %p15328_p8, 1, 0 }
  0x10   : > { %p14821_p9 = pneg %p15328_p8  ;;  %s53_s11 = ssub.s32 %s15241_s24, %s15342_s9 }
  0x11   : > { %s15130_s12 = scalar_lea.vmem %s206_s7, 9216  ;;  %p15138_p5 = scmp.lt.s32.totalorder %s206_s7, %s206_s7 }
  0x12   : > { %p15337_p11 = pnand %p14821_p9, %p19089_p1  ;;  %p15131_p13 = scmp.ne.s32.totalorder %s206_s7, %s15130_s12 }
  0x13   : > { %p15139_p7 = scmp.lt.s32.totalorder %s15130_s12, %s15130_s12 }
  0x14   : > { %p15121_p12 = pneg %p15337_p11 }
  0x15   : > { %p15140_p10 = por %p15139_p7, %p15138_p5 }
  0x16   : > { %p15133_p0 = pnand %p15131_p13, %p15121_p12 }
  0x18   : > { %p15134_p3 = pneg %p15133_p0 }
  0x1a   : > { %p15141_p2 = pnand %p15140_p10, %p15134_p3 }
  0x1c   : > { %15144 = shalt.err (!%p15141_p2)
}
  0x1d   : > { %s15244_s13 = smov 64   ;;  %s15245_s14 = smov 4  }
  0x1e   : > { %14824 = dma.hbm_to_vmem [thread:$0]  (!%p15337_p11), %s19085_s3, 9216, %s206_s7, [#allocation8], %s15244_s13, %s15244_s13, %s15245_s14  }
  0x1f   : > { %p54_p9 = scmp.eq.s32.totalorder %s53_s11, 0  ;;  %p63_p12 = scmp.ne.s32.totalorder %s15237_s23, %s15233_s22 }
  0x20   : > { %p64_p10 = scmp.eq.s32.totalorder %s15241_s24, 0  ;;  %p14834_p2 = scmp.lt.s32.totalorder %s15241_s24, 2 }
  0x21   : > { %s15359_s17 = scalar_select %p54_p9, %s15237_s23, %s56_s10  }
  0x22   : > { %p65_p13 = por %p64_p10, %p63_p12  ;;  %p19102_p0 = scmp.eq.s32.totalorder %s15309_s25, 1 }
  0x23   : > { %s233_s19 = sand.u32 1, %s15237_s23   ;;  %s13482_s20 = sshll.u32 %s15241_s24, 12 }
  0x24   : > { %p15363_p3 = por %p19102_p0, %p63_p12  ;;  %s12523_s26 = sshll.u32 %s233_s19, 8 }
  0x25   : > { %s15372_s12 = scalar_lea.hbm %s19083_s1, %s13482_s20  ;;  %s237_s7 = scalar_lea.vmem [#allocation4], %s12523_s26 }
  0x26   : > { %s19103_s18 = scalar_select %p15363_p3, 1, 0 }
  0x27   : > { %s244_s10 = sshll.u32 %s237_s7, 4  ;;  %p15374_p11 = pnand %p14834_p2, %p65_p13  ;;  %s15378_s10 = int_to_ptr.vmem [resolvable:$true] %s244_s10 }
  0x28   : > { %s15380_s13 = scalar_lea.sflag [#allocation5], %s233_s19  ;;  %s15145_s14 = scalar_lea.hbm %s15372_s12, 4096 }
  0x29   : > { %p15146_p5 = scmp.ne.s32.totalorder %s15372_s12, %s15145_s14  ;;  %p15147_p7 = pneg %p15374_p11 }
  0x2a   : > { %s15150_s20 = scalar_lea.hbm %s19083_s1, 8192  ;;  %p15151_p10 = scmp.lt.s32.totalorder %s15372_s12, %s19083_s1 }
  0x2b   : > { %p15148_p9 = pnand %p15147_p7, %p15146_p5  ;;  %p15152_p2 = scmp.lt.s32.totalorder %s15150_s20, %s15145_s14 }
  0x2d   : > { %p15149_p12 = pneg %p15148_p9  ;;  %p15153_p13 = por %p15152_p2, %p15151_p10 }
  0x2f   : > { %p15154_p0 = pnand %p15153_p13, %p15149_p12 }
  0x31   : > { %15157 = shalt.err (!%p15154_p0)
}
  0x32   : > { %s15158_s19 = scalar_lea.vmem %s15378_s10, 4096  ;;  %s15246_s8 = smov [#allocation4]  }
  0x33   : > { %p15159_p1 = scmp.ne.s32.totalorder %s15378_s10, %s15158_s19  ;;  %s15163_s7 = sshll.u32 %s15246_s8, 4  ;;  %s15164_s7 = int_to_ptr.vmem [resolvable:$false] %s15163_s7 }
  0x34   : > { %s15165_s15 = scalar_lea.vmem %s15164_s7, 8192  ;;  %p15166_p9 = scmp.lt.s32.totalorder %s15378_s10, %s15164_s7 }
  0x35   : > { %p15161_p6 = pnand %p15159_p1, %p15147_p7  ;;  %p15167_p3 = scmp.lt.s32.totalorder %s15165_s15, %s15158_s19 }
  0x37   : > { %p15162_p5 = pneg %p15161_p6  ;;  %p15168_p4 = por %p15167_p3, %p15166_p9 }
  0x39   : > { %p15169_p8 = pnand %p15168_p4, %p15162_p5 }
  0x3b   : > { %15172 = shalt.err (!%p15169_p8)
}
  0x3c   : > { %s15247_s14 = smov 128   ;;  %s15248_s16 = smov 8  }
  0x3d   : > { %14828 = dma.hbm_to_vmem [thread:$0]  (!%p15374_p11), %s15372_s12, 4096, %s15378_s10, %s15380_s13, %s15247_s14, %s15247_s14, %s15248_s16  }
  0x3e   : > { %p19105_p1 = scmp.ne.s32.totalorder %s19100_s29, 0 }
  0x40   : > { %256 = sbr.rel (%p19105_p1) target bundleno = 1218 (0x4c2), region = 44 }
  0x45   : > { %s15404_s20 = sand.u32 1, %s15233_s22   ;;  %p19106_p4 = scmp.ne.s32.totalorder %s19098_s27, 0 }
  0x46   : > { %s12527_s26 = sshll.u32 %s15404_s20, 8  ;;  %s259_s30 = scalar_lea.sflag [#allocation5], %s15404_s20 }
  0x47   : > { %s15410_s19 = scalar_lea.vmem [#allocation4], %s12527_s26 }
  0x48   : > { %15216 = dma.done.wait (%p19106_p4), %s259_s30, 4096  }
  0x49   : > { %15218 = vsyncadd (%p19106_p4), %s259_s30, 4294963200  ;;  %p19107_p6 = scmp.eq.s32.totalorder %s15309_s25, 0 }
  0x4b   : > { %15220 = dma.done.wait (%p19107_p6), [#allocation8], 9216   ;;  %p19108_p8 = pmov %p19107_p6 }
  0x4c   : > { %v14877_v0 = vld [vmem:[%s19084_s2 + $0x38] sm:$0xff]   ;;  %v14879_v2 = vld [vmem:[%s19084_s2 + $0x30] sm:$0xff]   ;;  %p300_p3 = scmp.lt.s32.totalorder %s15309_s25, 1  ;;  %v14881_v4 = vld [vmem:[%s19084_s2 + $0x28] sm:$0xff]   ;;  %vm835_vm0 = vsmask.f32 3328 }
  0x4d   : > { %15222 = vsyncadd (%p19108_p8), [#allocation8], 4294958080  ;;  %v14878_v1 = vld [vmem:[%s19084_s2 + $0x78] sm:$0xff]   ;;  %13948 = vmatprep.subr.bf16.mxu0 %v14877_v0  ;;  %v14880_v3 = vld [vmem:[%s19084_s2 + $0x70] sm:$0xff]   ;;  %vm836_vm1 = vsmask.f32 7440 }
  0x4e   : > { %13996 = vmatprep.subr.bf16.mxu1 %v14878_v1  ;;  %13949 = vmatpush3.bf16.msra.mxu0 %v14877_v0  ;;  %v14882_v5 = vld [vmem:[%s19084_s2 + $0x68] sm:$0xff]   ;;  %s301_s29 = scalar_select %p300_p3, %s15309_s25, 1  ;;  %v14883_v6 = vld [vmem:[%s19084_s2 + $0x20] sm:$0xff]   ;;  %v14885_v8 = vld [vmem:[%s19084_s2 + $0x18] sm:$0xff]   ;;  %v19109_v38 = vmov 0  ;;  %vm1704_vm3 = vcmask 1042432  }
  0x4f   : > { %13997 = vmatpush3.bf16.msra.mxu1 %v14878_v1  ;;  %13950 = vmatprep.subr.bf16.mxu0 %v14879_v2  ;;  %v14884_v7 = vld [vmem:[%s19084_s2 + $0x60] sm:$0xff]   ;;  %v14886_v9 = vld [vmem:[%s19084_s2 + $0x58] sm:$0xff]   ;;  %v14887_v10 = vld [vmem:[%s19084_s2 + $0x10] sm:$0xff]   ;;  %vm1705_vm4 = vcmask 1046532   ;;  %vm6508_vm6 = vcmask 1043456   ;;  %vm6515_vm10 = vcmask 1040384  }
  0x50   : > { %13998 = vmatprep.subr.bf16.mxu1 %v14880_v3  ;;  %s14812_s27 = smul.u32 216, %s301_s29  ;;  %v14888_v11 = vld [vmem:[%s19084_s2 + $0x50] sm:$0xff]   ;;  %v14889_v16 = vld [vmem:[%s19084_s2 + $0x8] sm:$0xff]   ;;  %vm15478_vm2 = vmor %vm835_vm0, %vm836_vm1  ;;  %vm6509_vm7 = vsmask.f32 7938  ;;  %s18822_s14 = scalar_lea.vmem [#allocation9], %s12527_s26 }
  0x51   : > { %v14890_v21 = vld [vmem:[%s19084_s2 + $0x48] sm:$0xff]   ;;  %v19110_v38 = vsel %vm15478_vm2, 4294967295, %v19109_v38  ;;  %v14891_v42 = vld [vmem:[%s19084_s2] sm:$0xff]   ;;  %v14895_v58 = vld [vmem:[%s19084_s2 + $0xb8] sm:$0xff]   ;;  %vm6184_vm8 = vsmask.f32 256 }
  0x52   : > { %13951 = vmatpush3.bf16.msra.mxu0 %v14879_v2  ;;  %s15458_s10 = scalar_lea.vmem %s19082_s0, %s14812_s27  ;;  %19111 = vst [vmem:[#allocation13_spill] sm:$0xff] %v19110_v38  ;;  %v14892_v46 = vld [vmem:[%s19084_s2 + $0x40] sm:$0xff]   ;;  %vm15658_vm5 = vmor %vm1704_vm3, %vm1705_vm4  ;;  %vm6185_vm9 = vsmask.f32 4368  ;;  %s13515_s26 = sshll.u32 %s15309_s25, 12 }
  0x53   : > { %13999 = vmatpush3.bf16.msra.mxu1 %v14880_v3  ;;  %13952 = vmatprep.subr.bf16.mxu0 %v14881_v4  ;;  %v14893_v12 = vld [vmem:[%s15458_s10] sm:$0xff]   ;;  %v789_v15 = vld [vmem:[%s15458_s10 + $0x8] sm:$0x1]  ;;  %v790_v23 = vld [vmem:[%s15458_s10 + $0xc] sm:$0xf]  ;;  %s12424_s16 = sshll.u32 %s18822_s14, 4  ;;  %s19035_s29 = scalar_lea.hbm %s19088_s6, %s13515_s26  ;;  %s19037_s16 = int_to_ptr.vmem [resolvable:$true] %s12424_s16 }
  0x54   : > { %14000 = vmatprep.subr.bf16.mxu1 %v14882_v5  ;;  %v787_v13 = vld [vmem:[%s15458_s10] sm:$0xf]  ;;  %v788_v14 = vld [vmem:[%s15458_s10 + $0x4] sm:$0xf]  ;;  %13964 = vmatprep.mubr.bf16.mxu0 %v14893_v12  ;;  %v858_v22 = vshll.u32 %v789_v15, 16  ;;  %v863_v31 = vshrl.u32 %v790_v23, 16  ;;  %vm17322_vm11 = vmand %vm6508_vm6, %vm6509_vm7 }
  0x55   : > { %v839_v17 = vshrl.u32 %v787_v13, 16  ;;  %v842_v18 = vshll.u32 %v787_v13, 16  ;;  %v848_v19 = vshll.u32 %v788_v14, 16  ;;  %v852_v20 = vshrl.u32 %v788_v14, 16  ;;  %v791_v28 = vld [vmem:[%s15458_s10 + $0x10] sm:$0xf]  ;;  %vm17333_vm12 = vmor %vm6184_vm8, %vm6185_vm9 }
  0x56   : > { %13953 = vmatpush3.bf16.msra.mxu0 %v14881_v4  ;;  %v860_v29 = vrot.slane %v858_v22, 5  ;;  %v792_v30 = vld [vmem:[%s15458_s10 + $0x14] sm:$0x1]  ;;  %v866_v32 = vshll.u32 %v790_v23, 16  ;;  %v872_v33 = vshll.u32 %v791_v28, 16  ;;  %v876_v36 = vshrl.u32 %v791_v28, 16  ;;  %vm17339_vm13 = vmand %vm6515_vm10, %vm6184_vm8 }
  0x57   : > { %14001 = vmatpush3.bf16.msra.mxu1 %v14882_v5  ;;  %13954 = vmatprep.subr.bf16.mxu0 %v14883_v6  ;;  %v841_v24 = vrot.slane %v839_v17, 4  ;;  %v844_v25 = vrot.slane %v842_v18, 5  ;;  %v850_v26 = vrot.slane %v848_v19, 5  ;;  %v854_v27 = vrot.slane %v852_v20, 4  ;;  %v793_v49 = vld [vmem:[%s15458_s10 + $0x18] sm:$0xf] }
  0x58   : > { %14002 = vmatprep.subr.bf16.mxu1 %v14884_v7  ;;  %v882_v37 = vshll.u32 %v792_v30, 16  ;;  %v865_v39 = vrot.slane %v863_v31, 4  ;;  %v868_v40 = vrot.slane %v866_v32, 5  ;;  %v874_v41 = vrot.slane %v872_v33, 5  ;;  %v794_v50 = vld [vmem:[%s15458_s10 + $0x1c] sm:$0xf] }
  0x59   : > { %v845_v34 = vor.u32 %v844_v25, %v841_v24  ;;  %v855_v35 = vor.u32 %v854_v27, %v850_v26  ;;  %v878_v45 = vrot.slane %v876_v36, 4  ;;  %v795_v54 = vld [vmem:[%s15458_s10 + $0x20] sm:$0x1]  ;;  %v887_v55 = vshrl.u32 %v793_v49, 16  ;;  %v14894_v61 = vld [vmem:[%s15458_s10 + $0xc] sm:$0xff]   ;;  %s12411_s25 = scalar_lea.sflag [#allocation6], %s15404_s20 }
  0x5a   : > { %13955 = vmatpush3.bf16.msra.mxu0 %v14883_v6  ;;  %v869_v47 = vor.u32 %v868_v40, %v865_v39  ;;  %v884_v48 = vrot.slane %v882_v37, 5  ;;  %v890_v59 = vshll.u32 %v793_v49, 16  ;;  %v896_v60 = vshll.u32 %v794_v50, 16  ;;  %v796_v2 = vld [vmem:[%s15458_s10 + $0x24] sm:$0xf]  ;;  %v14901_v31 = vld [vmem:[%s19084_s2 + $0xa8] sm:$0xff]  }
  0x5b   : > { %14003 = vmatpush3.bf16.msra.mxu1 %v14884_v7  ;;  %13956 = vmatprep.subr.bf16.mxu0 %v14885_v8  ;;  %v846_v43 = vrot.slane %v845_v34, 4  ;;  %v856_v44 = vrot.slane %v855_v35, 4  ;;  %v879_v53 = vor.u32 %v878_v45, %v874_v41  ;;  %v889_v63 = vrot.slane %v887_v55, 4  ;;  %v797_v6 = vld [vmem:[%s15458_s10 + $0x28] sm:$0xf]  ;;  %s15173_s11 = scalar_lea.vmem %s19037_s16, 4096 }
  0x5c   : > { %14004 = vmatprep.subr.bf16.mxu1 %v14886_v9  ;;  %v870_v57 = vrot.slane %v869_v47, 4  ;;  %v900_v0 = vshrl.u32 %v794_v50, 16  ;;  %v906_v1 = vshll.u32 %v795_v54, 16  ;;  %v892_v4 = vrot.slane %v890_v59, 5  ;;  %v798_v7 = vld [vmem:[%s15458_s10 + $0x2c] sm:$0x1]  ;;  %p15174_p11 = scmp.ne.s32.totalorder %s19037_s16, %s15173_s11 }
  0x5d   : > { %v851_v51 = vsel %vm15478_vm2, %v846_v43, %v850_v26  ;;  %v861_v52 = vsel %vm15478_vm2, %v856_v44, %v860_v29  ;;  %v880_v62 = vrot.slane %v879_v53, 4  ;;  %v898_v5 = vrot.slane %v896_v60, 5  ;;  %v799_v25 = vld [vmem:[%s15458_s10 + $0x30] sm:$0xf]  ;;  %v800_v29 = vld [vmem:[%s15458_s10 + $0x34] sm:$0xf] }
  0x5e   : > { %13957 = vmatpush3.bf16.msra.mxu0 %v14885_v8  ;;  %v12571_v56 = vcombine.low %v851_v51, %v861_v52  ;;  %v875_v3 = vsel %vm15478_vm2, %v870_v57, %v874_v41  ;;  %v911_v12 = vshrl.u32 %v796_v2, 16  ;;  %v893_v14 = vor.u32 %v892_v4, %v889_v63  ;;  %v801_v34 = vld [vmem:[%s15458_s10 + $0x38] sm:$0x1]  ;;  %v14897_v39 = vld [vmem:[%s15458_s10 + $0x24] sm:$0xff]   ;;  %v802_v43 = vld [vmem:[%s15458_s10 + $0x3c] sm:$0xf] }
  0x5f   : > { %14005 = vmatpush3.bf16.msra.mxu1 %v14886_v9  ;;  %13958 = vmatprep.subr.bf16.mxu0 %v14887_v10  ;;  %v885_v8 = vsel %vm15478_vm2, %v880_v62, %v884_v48  ;;  %v14896_v9 = vld [vmem:[%s15458_s10 + $0x18] sm:$0xff]   ;;  %v914_v15 = vshll.u32 %v796_v2, 16  ;;  %v924_v19 = vshrl.u32 %v797_v6, 16  ;;  %v930_v20 = vshll.u32 %v798_v7, 16  ;;  %v803_v49 = vld [vmem:[%s15458_s10 + $0x40] sm:$0xf] }
  0x60   : > { %14006 = vmatprep.subr.bf16.mxu1 %v14888_v11  ;;  %14012 = vmatprep.mubr.bf16.mxu1 %v12571_v56  ;;  %v12572_v13 = vcombine.low %v875_v3, %v885_v8  ;;  %v913_v18 = vrot.slane %v911_v12, 4  ;;  %v894_v22 = vrot.slane %v893_v14, 4  ;;  %v935_v30 = vshrl.u32 %v799_v25, 16  ;;  %v804_v53 = vld [vmem:[%s15458_s10 + $0x44] sm:$0x1]  ;;  %p19397_p7 = scmp.ne.s32.totalorder %s19103_s18, 0 }
  0x61   : > { %v916_v23 = vrot.slane %v914_v15, 5  ;;  %v926_v27 = vrot.slane %v924_v19, 4  ;;  %v932_v28 = vrot.slane %v930_v20, 5  ;;  %v938_v35 = vshll.u32 %v799_v25, 16  ;;  %v805_v3 = vld [vmem:[%s15458_s10 + $0x48] sm:$0xf] }
  0x62   : > { %13959 = vmatpush3.bf16.msra.mxu0 %v14887_v10  ;;  %v902_v10 = vrot.slane %v900_v0, 4  ;;  %v899_v32 = vsel %vm15478_vm2, %v894_v22, %v898_v5  ;;  %v944_v36 = vshll.u32 %v800_v29, 16  ;;  %v937_v41 = vrot.slane %v935_v30, 4  ;;  %v806_v7 = vld [vmem:[%s15458_s10 + $0x4c] sm:$0xf]  ;;  %v14900_v15 = vld [vmem:[%s15458_s10 + $0x3c] sm:$0xff]   ;;  %p15175_p12 = pnand %p15174_p11, %p19397_p7 }
  0x63   : > { %14007 = vmatpush3.bf16.msra.mxu1 %v14888_v11  ;;  %13960 = vmatprep.subr.bf16.mxu0 %v14889_v16  ;;  %v908_v11 = vrot.slane %v906_v1, 5  ;;  %v917_v33 = vor.u32 %v916_v23, %v913_v18  ;;  %v940_v47 = vrot.slane %v938_v35, 5  ;;  %v954_v52 = vshll.u32 %v801_v34, 16  ;;  %v14904_v19 = vld [vmem:[%s19084_s2 + $0xa0] sm:$0xff]   ;;  %v14902_v22 = vld [vmem:[%s15458_s10 + $0x48] sm:$0xff]  }
  0x64   : > { %14008 = vmatprep.subr.bf16.mxu1 %v14890_v21  ;;  %v903_v17 = vor.u32 %v902_v10, %v898_v5  ;;  %v946_v48 = vrot.slane %v944_v36, 5  ;;  %v959_v54 = vshrl.u32 %v802_v43, 16  ;;  %v962_v57 = vshll.u32 %v802_v43, 16  ;;  %v808_v25 = vld [vmem:[%s15458_s10 + $0x54] sm:$0xf]  ;;  %p15176_p10 = pneg %p15175_p12 }
  0x65   : > { %v918_v45 = vrot.slane %v917_v33, 4  ;;  %v941_v56 = vor.u32 %v940_v47, %v937_v41  ;;  %v972_v5 = vshrl.u32 %v803_v49, 16  ;;  %v983_v8 = vshrl.u32 %v805_v3, 16  ;;  %v810_v30 = vld [vmem:[%s15458_s10 + $0x5c] sm:$0x1] }
  0x66   : > { %13961 = vmatpush3.bf16.msra.mxu0 %v14889_v16  ;;  %v920_v16 = vshll.u32 %v797_v6, 16  ;;  %v904_v26 = vrot.slane %v903_v17, 4  ;;  %v961_v62 = vrot.slane %v959_v54, 4  ;;  %v964_v1 = vrot.slane %v962_v57, 5  ;;  %v813_v54 = vld [vmem:[%s15458_s10 + $0x68] sm:$0x1] }
  0x67   : > { %14009 = vmatpush3.bf16.msra.mxu1 %v14890_v21  ;;  %13962 = vmatprep.subr.bf16.mxu0 %v14891_v42  ;;  %v14898_v21 = vld [vmem:[%s19084_s2 + $0xb0] sm:$0xff]   ;;  %v942_v0 = vrot.slane %v941_v56, 4  ;;  %v978_v6 = vshll.u32 %v804_v53, 16  ;;  %v986_v12 = vshll.u32 %v805_v3, 16  ;;  %v985_v18 = vrot.slane %v983_v8, 4  ;;  %v14908_v8 = vld [vmem:[%s19084_s2 + $0xf8] sm:$0xff]  }
  0x68   : > { %14010 = vmatprep.subr.bf16.mxu1 %v14892_v46  ;;  %v922_v24 = vrot.slane %v920_v16, 5  ;;  %v909_v37 = vsel %vm15478_vm2, %v904_v26, %v908_v11  ;;  %v965_v10 = vor.u32 %v964_v1, %v961_v62  ;;  %v807_v11 = vld [vmem:[%s15458_s10 + $0x50] sm:$0x1]  ;;  %v974_v16 = vrot.slane %v972_v5, 4  ;;  %v14903_v56 = vld [vmem:[%s15458_s10 + $0x54] sm:$0xff]   ;;  %v14905_v62 = vld [vmem:[%s15458_s10 + $0x60] sm:$0xff]  }
  0x69   : > { %v12573_v44 = vcombine.low %v899_v32, %v909_v37  ;;  %v980_v17 = vrot.slane %v978_v6, 5  ;;  %v988_v23 = vrot.slane %v986_v12, 5  ;;  %v1007_v33 = vshrl.u32 %v808_v25, 16  ;;  %v814_v1 = vld [vmem:[%s15458_s10 + $0x6c] sm:$0xf] }
  0x6a   : > { %13963 = vmatpush3.bf16.msra.mxu0 %v14891_v42  ;;  %v927_v40 = vor.u32 %v926_v27, %v922_v24  ;;  %v948_v42 = vshrl.u32 %v800_v29, 16  ;;  %v923_v55 = vsel %vm15478_vm2, %v918_v45, %v922_v24  ;;  %v996_v27 = vshrl.u32 %v806_v7, 16  ;;  %v809_v29 = vld [vmem:[%s15458_s10 + $0x58] sm:$0xf] }
  0x6b   : > { %14011 = vmatpush3.bf16.msra.mxu1 %v14892_v46  ;;  %14044 = vmatprep.subr.bf16.mxu0 %v14895_v58  ;;  %v14899_v46 = vld [vmem:[%s15458_s10 + $0x30] sm:$0xff]   ;;  %v989_v32 = vor.u32 %v988_v23, %v985_v18  ;;  %v1010_v34 = vshll.u32 %v808_v25, 16  ;;  %v1009_v41 = vrot.slane %v1007_v33, 4  ;;  %v1020_v43 = vshrl.u32 %v809_v29, 16 }
  0x6c   : > { %v928_v50 = vrot.slane %v927_v40, 4  ;;  %v950_v51 = vrot.slane %v948_v42, 4  ;;  %v998_v36 = vrot.slane %v996_v27, 4  ;;  %v1026_v47 = vshll.u32 %v810_v30, 16  ;;  %14092 = vmatprep.subr.bf16.mxu1 %v14908_v8  ;;  %v14909_v18 = vld [vmem:[%s19084_s2 + $0xf0] sm:$0xff]  }
  0x6d   : > { %13965 = vmatmul.mubr.bf16.vlgmr.msra.gmra.mxu0 %v14894_v61  ;;  %v956_v61 = vrot.slane %v954_v52, 5  ;;  %v990_v40 = vrot.slane %v989_v32, 4  ;;  %v1012_v42 = vrot.slane %v1010_v34, 5  ;;  %v1022_v53 = vrot.slane %v1020_v43, 4  ;;  %v14906_v33 = vld [vmem:[%s15458_s10 + $0x6c] sm:$0xff]  }
  0x6e   : > { %14013 = vmatmul.mubr.bf16.vlgmr.msra.gmra.mxu1 %v12572_v13  ;;  %14045 = vmatpush3.bf16.msra.mxu0 %v14895_v58  ;;  %v968_v58 = vshll.u32 %v803_v49, 16  ;;  %v933_v59 = vsel %vm15478_vm2, %v928_v50, %v932_v28  ;;  %v951_v60 = vor.u32 %v950_v51, %v946_v48  ;;  %v992_v13 = vshll.u32 %v806_v7, 16  ;;  %v812_v49 = vld [vmem:[%s15458_s10 + $0x64] sm:$0xf]  ;;  %v815_v7 = vld [vmem:[%s15458_s10 + $0x70] sm:$0xf] }
  0x6f   : > { %13968 = vmatprep.mubr.bf16.mxu0 %v14896_v9  ;;  %14046 = vmatprep.subr.bf16.mxu0 %v14898_v21  ;;  %v12574_v63 = vcombine.low %v923_v55, %v933_v59  ;;  %v947_v9 = vsel %vm15478_vm2, %v942_v0, %v946_v48  ;;  %v1002_v28 = vshll.u32 %v807_v11, 16  ;;  %v811_v48 = vld [vmem:[%s15458_s10 + $0x60] sm:$0xf]  ;;  %v1013_v52 = vor.u32 %v1012_v42, %v1009_v41  ;;  %v14912_v41 = vld [vmem:[%s19084_s2 + $0x90] sm:$0xff]  }
  0x70   : > { %14016 = vmatprep.mubr.bf16.mxu1 %v12573_v44  ;;  %v970_v2 = vrot.slane %v968_v58, 5  ;;  %v952_v4 = vrot.slane %v951_v60, 4  ;;  %v994_v24 = vrot.slane %v992_v13, 5  ;;  %v1028_v57 = vrot.slane %v1026_v47, 5  ;;  %v816_v13 = vld [vmem:[%s15458_s10 + $0x74] sm:$0x1]  ;;  %14093 = vmatpush3.bf16.msra.mxu1 %v14908_v8 }
  0x71   : > { %v1004_v37 = vrot.slane %v1002_v28, 5  ;;  %v1031_v58 = vshrl.u32 %v811_v48, 16  ;;  %v1034_v59 = vshll.u32 %v811_v48, 16  ;;  %v1014_v60 = vrot.slane %v1013_v52, 4  ;;  %14094 = vmatprep.subr.bf16.mxu1 %v14909_v18  ;;  %v819_v43 = vld [vmem:[%s15458_s10 + $0x80] sm:$0x1] }
  0x72   : > { %14047 = vmatpush3.bf16.msra.mxu0 %v14898_v21  ;;  %v957_v14 = vsel %vm15478_vm2, %v952_v4, %v956_v61  ;;  %v966_v21 = vrot.slane %v965_v10, 4  ;;  %v975_v26 = vor.u32 %v974_v16, %v970_v2  ;;  %v999_v45 = vor.u32 %v998_v36, %v994_v24  ;;  %v14913_v47 = vld [vmem:[%s19084_s2 + $0xe8] sm:$0xff]   ;;  %v14914_v52 = vld [vmem:[%s19084_s2 + $0xe0] sm:$0xff]  }
  0x73   : > { %14048 = vmatprep.subr.bf16.mxu0 %v14901_v31  ;;  %v12575_v20 = vcombine.low %v947_v9, %v957_v14  ;;  %v995_v51 = vsel %vm15478_vm2, %v990_v40, %v994_v24  ;;  %v1044_v0 = vshrl.u32 %v812_v49, 16  ;;  %v1033_v4 = vrot.slane %v1031_v58, 4  ;;  %v818_v40 = vld [vmem:[%s15458_s10 + $0x7c] sm:$0xf]  ;;  %v14911_v8 = vld [vmem:[%s15458_s10 + $0x84] sm:$0xff]  }
  0x74   : > { %v976_v35 = vrot.slane %v975_v26, 4  ;;  %v1000_v55 = vrot.slane %v999_v45, 4  ;;  %v1036_v5 = vrot.slane %v1034_v59, 5  ;;  %v1050_v6 = vshll.u32 %v813_v54, 16  ;;  %14095 = vmatpush3.bf16.msra.mxu1 %v14909_v18 }
  0x75   : > { %13969 = vmatmul.mubr.bf16.gmra.mxu0 %v14897_v39  ;;  %v1016_v39 = vshll.u32 %v809_v29, 16  ;;  %v1074_v30 = vshll.u32 %v816_v13, 16  ;;  %14096 = vmatprep.subr.bf16.mxu1 %v14913_v47 }
  0x76   : > { %14017 = vmatmul.mubr.bf16.gmra.mxu1 %v12574_v63  ;;  %13972 = vmatprep.mubr.bf16.mxu0 %v14899_v46  ;;  %v981_v44 = vsel %vm15478_vm2, %v976_v35, %v980_v17  ;;  %v1040_v63 = vshll.u32 %v812_v49, 16  ;;  %v1005_v3 = vsel %vm15478_vm2, %v1000_v55, %v1004_v37  ;;  %v1037_v14 = vor.u32 %v1036_v5, %v1033_v4  ;;  %v14910_v37 = vld [vmem:[%s15458_s10 + $0x78] sm:$0xff]  }
  0x77   : > { %14049 = vmatpush3.bf16.msra.mxu0 %v14901_v31  ;;  %14020 = vmatprep.mubr.bf16.mxu1 %v12575_v20  ;;  %v971_v31 = vsel %vm15478_vm2, %v966_v21, %v970_v2  ;;  %v1018_v46 = vrot.slane %v1016_v39, 5  ;;  %v14907_v2 = vld [vmem:[%s19084_s2 + $0x98] sm:$0xff]   ;;  %v12577_v9 = vcombine.low %v995_v51, %v1005_v3  ;;  %v1052_v16 = vrot.slane %v1050_v6, 5 }
  0x78   : > { %14050 = vmatprep.subr.bf16.mxu0 %v14904_v19  ;;  %v12576_v50 = vcombine.low %v971_v31, %v981_v44  ;;  %v1042_v12 = vrot.slane %v1040_v63, 5  ;;  %v1055_v17 = vshrl.u32 %v814_v1, 16  ;;  %v1058_v20 = vshll.u32 %v814_v1, 16  ;;  %v817_v39 = vld [vmem:[%s15458_s10 + $0x78] sm:$0xf]  ;;  %14097 = vmatpush3.bf16.msra.mxu1 %v14913_v47 }
  0x79   : > { %v1023_v61 = vor.u32 %v1022_v53, %v1018_v46  ;;  %v1019_v10 = vsel %vm15478_vm2, %v1014_v60, %v1018_v46  ;;  %v1064_v21 = vshll.u32 %v815_v7, 16  ;;  %v1038_v24 = vrot.slane %v1037_v14, 4  ;;  %v820_v60 = vld [vmem:[%s15458_s10 + $0x84] sm:$0xf]  ;;  %v822_v1 = vld [vmem:[%s15458_s10 + $0x8c] sm:$0x1]  ;;  %14098 = vmatprep.subr.bf16.mxu1 %v14914_v52 }
  0x7a   : > { %v1057_v26 = vrot.slane %v1055_v17, 4  ;;  %v1060_v27 = vrot.slane %v1058_v20, 5  ;;  %v1076_v36 = vrot.slane %v1074_v30, 5  ;;  %v1079_v44 = vshrl.u32 %v817_v39, 16  ;;  %v828_v47 = vld [vmem:[%s15458_s10 + $0xa4] sm:$0x1] }
  0x7b   : > { %14051 = vmatpush3.bf16.msra.mxu0 %v14904_v19  ;;  %v1024_v11 = vrot.slane %v1023_v61, 4  ;;  %v1066_v28 = vrot.slane %v1064_v21, 5  ;;  %v1043_v31 = vsel %vm15478_vm2, %v1038_v24, %v1042_v12  ;;  %v1082_v45 = vshll.u32 %v817_v39, 16  ;;  %v821_v61 = vld [vmem:[%s15458_s10 + $0x88] sm:$0xf] }
  0x7c   : > { %14052 = vmatprep.subr.bf16.mxu0 %v14907_v2  ;;  %v1061_v34 = vor.u32 %v1060_v27, %v1057_v26  ;;  %v1088_v46 = vshll.u32 %v818_v40, 16  ;;  %v1092_v51 = vshrl.u32 %v818_v40, 16  ;;  %v1081_v53 = vrot.slane %v1079_v44, 4  ;;  %14099 = vmatpush3.bf16.msra.mxu1 %v14914_v52  ;;  %v825_v26 = vld [vmem:[%s15458_s10 + $0x98] sm:$0x1] }
  0x7d   : > { %13973 = vmatmul.mubr.bf16.gmra.mxu0 %v14900_v15  ;;  %v1046_v15 = vrot.slane %v1044_v0, 4  ;;  %v1029_v19 = vsel %vm15478_vm2, %v1024_v11, %v1028_v57  ;;  %v1084_v54 = vrot.slane %v1082_v45, 5  ;;  %v1106_v4 = vshll.u32 %v820_v60, 16  ;;  %v14917_v11 = vld [vmem:[%s19084_s2 + $0x88] sm:$0xff]  }
  0x7e   : > { %13976 = vmatprep.mubr.bf16.mxu0 %v14902_v22  ;;  %14021 = vmatmul.mubr.bf16.gmra.mxu1 %v12576_v50  ;;  %v1068_v22 = vshrl.u32 %v815_v7, 16  ;;  %v12578_v23 = vcombine.low %v1019_v10, %v1029_v19  ;;  %v1062_v49 = vrot.slane %v1061_v34, 4  ;;  %v1090_v55 = vrot.slane %v1088_v46, 5  ;;  %v14918_v19 = vld [vmem:[%s19084_s2 + $0xd8] sm:$0xff]  }
  0x7f   : > { %14053 = vmatpush3.bf16.msra.mxu0 %v14907_v2  ;;  %14024 = vmatprep.mubr.bf16.mxu1 %v12577_v9  ;;  %v1047_v25 = vor.u32 %v1046_v15, %v1042_v12  ;;  %v1094_v59 = vrot.slane %v1092_v51, 4  ;;  %v1085_v63 = vor.u32 %v1084_v54, %v1081_v53  ;;  %v1103_v2 = vshrl.u32 %v820_v60, 16 }
  0x80   : > { %v1070_v29 = vrot.slane %v1068_v22, 4  ;;  %14054 = vmatprep.subr.bf16.mxu0 %v14912_v41  ;;  %v1067_v57 = vsel %vm15478_vm2, %v1062_v49, %v1066_v28  ;;  %v1112_v5 = vshll.u32 %v821_v61, 16  ;;  %v1116_v6 = vshrl.u32 %v821_v61, 16  ;;  %14100 = vmatprep.subr.bf16.mxu1 %v14918_v19 }
  0x81   : > { %v1048_v32 = vrot.slane %v1047_v25, 4  ;;  %v1095_v3 = vor.u32 %v1094_v59, %v1090_v55  ;;  %v1086_v7 = vrot.slane %v1085_v63, 4  ;;  %v1105_v9 = vrot.slane %v1103_v2, 4  ;;  %v824_v25 = vld [vmem:[%s15458_s10 + $0x94] sm:$0xf]  ;;  %14101 = vmatpush3.bf16.msra.mxu1 %v14918_v19 }
  0x82   : > { %v1071_v35 = vor.u32 %v1070_v29, %v1066_v28  ;;  %v1122_v10 = vshll.u32 %v822_v1, 16  ;;  %v1108_v13 = vrot.slane %v1106_v4, 5  ;;  %v1114_v14 = vrot.slane %v1112_v5, 5  ;;  %v829_v4 = vld [vmem:[%s15458_s10 + $0xa8] sm:$0xf] }
  0x83   : > { %v1053_v42 = vsel %vm15478_vm2, %v1048_v32, %v1052_v16  ;;  %14055 = vmatpush3.bf16.msra.mxu0 %v14912_v41  ;;  %v1096_v12 = vrot.slane %v1095_v3, 4  ;;  %v1118_v15 = vrot.slane %v1116_v6, 4  ;;  %v14915_v16 = vld [vmem:[%s15458_s10 + $0x90] sm:$0xff]   ;;  %v1091_v17 = vsel %vm15478_vm2, %v1086_v7, %v1090_v55  ;;  %v830_v6 = vld [vmem:[%s15458_s10 + $0xac] sm:$0xf] }
  0x84   : > { %v12579_v48 = vcombine.low %v1043_v31, %v1053_v42  ;;  %v1072_v50 = vrot.slane %v1071_v35, 4  ;;  %v1124_v18 = vrot.slane %v1122_v10, 5  ;;  %14056 = vmatprep.subr.bf16.mxu0 %v14917_v11  ;;  %v1109_v21 = vor.u32 %v1108_v13, %v1105_v9  ;;  %v826_v42 = vld [vmem:[%s15458_s10 + $0x9c] sm:$0xf]  ;;  %v831_v7 = vld [vmem:[%s15458_s10 + $0xb0] sm:$0x1] }
  0x85   : > { %13977 = vmatmul.mubr.bf16.gmra.mxu0 %v14903_v56  ;;  %v1098_v56 = vshll.u32 %v819_v43, 16  ;;  %v1119_v22 = vor.u32 %v1118_v15, %v1114_v14  ;;  %v1136_v31 = vshll.u32 %v824_v25, 16  ;;  %v1140_v32 = vshrl.u32 %v824_v25, 16  ;;  %v827_v43 = vld [vmem:[%s15458_s10 + $0xa0] sm:$0xf] }
  0x86   : > { %13980 = vmatprep.mubr.bf16.mxu0 %v14905_v62  ;;  %14025 = vmatmul.mubr.bf16.gmra.mxu1 %v12578_v23  ;;  %v1077_v58 = vsel %vm15478_vm2, %v1072_v50, %v1076_v36  ;;  %v823_v23 = vld [vmem:[%s15458_s10 + $0x90] sm:$0xf]  ;;  %v1110_v29 = vrot.slane %v1109_v21, 4  ;;  %v1146_v35 = vshll.u32 %v825_v26, 16  ;;  %v14916_v50 = vld [vmem:[%s15458_s10 + $0x9c] sm:$0xff]   ;;  %v1154_v51 = vshll.u32 %v826_v42, 16 }
  0x87   : > { %14028 = vmatprep.mubr.bf16.mxu1 %v12579_v48  ;;  %v12580_v62 = vcombine.low %v1067_v57, %v1077_v58  ;;  %v1100_v0 = vrot.slane %v1098_v56, 5  ;;  %14057 = vmatpush3.bf16.msra.mxu0 %v14917_v11  ;;  %v1127_v27 = vshrl.u32 %v823_v23, 16  ;;  %v1130_v28 = vshll.u32 %v823_v23, 16  ;;  %v14919_v36 = vld [vmem:[%s19084_s2 + $0xd0] sm:$0xff]   ;;  %v14920_v57 = vld [vmem:[%s15458_s10 + $0xa8] sm:$0xff]  }
  0x88   : > { %v1120_v30 = vrot.slane %v1119_v22, 4  ;;  %v1138_v40 = vrot.slane %v1136_v31, 5  ;;  %v1142_v41 = vrot.slane %v1140_v32, 4  ;;  %v1148_v46 = vrot.slane %v1146_v35, 5  ;;  %14102 = vmatprep.subr.bf16.mxu1 %v14919_v36  ;;  %v832_v23 = vld [vmem:[%s15458_s10 + $0xb4] sm:$0xf] }
  0x89   : > { %v1101_v20 = vsel %vm15478_vm2, %v1096_v12, %v1100_v0  ;;  %v1132_v34 = vrot.slane %v1130_v28, 5  ;;  %v1151_v48 = vshrl.u32 %v826_v42, 16  ;;  %v1160_v52 = vshll.u32 %v827_v43, 16  ;;  %14103 = vmatpush3.bf16.msra.mxu1 %v14919_v36  ;;  %v14922_v0 = vld [vmem:[%s19084_s2 + $0x80] sm:$0xff]   ;;  %v834_v28 = vld [vmem:[%s15458_s10 + $0xbc] sm:$0x1] }
  0x8a   : > { %v12581_v24 = vcombine.low %v1091_v17, %v1101_v20  ;;  %v1125_v39 = vsel %vm15478_vm2, %v1120_v30, %v1124_v18  ;;  %v1143_v49 = vor.u32 %v1142_v41, %v1138_v40  ;;  %v1164_v53 = vshrl.u32 %v827_v43, 16  ;;  %14058 = vmatprep.subr.bf16.mxu0 %v14922_v0  ;;  %v14921_v17 = vld [vmem:[%s15458_s10 + $0xb4] sm:$0xff]   ;;  %v14923_v18 = vld [vmem:[%s19084_s2 + $0xc8] sm:$0xff]  }
  0x8b   : > { %v1153_v55 = vrot.slane %v1151_v48, 4  ;;  %v1170_v56 = vshll.u32 %v828_v47, 16  ;;  %v1156_v59 = vrot.slane %v1154_v51, 5  ;;  %v1162_v60 = vrot.slane %v1160_v52, 5  ;;  %14059 = vmatpush3.bf16.msra.mxu0 %v14922_v0  ;;  %14104 = vmatprep.subr.bf16.mxu1 %v14923_v18  ;;  %v1609_v51 = vld [vmem:[%s15458_s10 + $0x4] sm:$0xf] }
  0x8c   : > { %v1144_v58 = vrot.slane %v1143_v49, 4  ;;  %v1166_v61 = vrot.slane %v1164_v53, 4  ;;  %v1178_v9 = vshll.u32 %v829_v4, 16  ;;  %v1184_v12 = vshll.u32 %v830_v6, 16  ;;  %v1610_v52 = vld [vmem:[%s15458_s10 + $0x8] sm:$0x1] }
  0x8d   : > { %13981 = vmatmul.mubr.bf16.gmra.mxu0 %v14906_v33  ;;  %v1129_v33 = vrot.slane %v1127_v27, 4  ;;  %v1172_v63 = vrot.slane %v1170_v56, 5  ;;  %v1157_v2 = vor.u32 %v1156_v59, %v1153_v55  ;;  %v1188_v13 = vshrl.u32 %v830_v6, 16  ;;  %14105 = vmatpush3.bf16.msra.mxu1 %v14923_v18  ;;  %v1617_v18 = vld [vmem:[%s15458_s10 + $0x24] sm:$0xe] }
  0x8e   : > { %13984 = vmatprep.mubr.bf16.mxu0 %v14910_v37  ;;  %14029 = vmatmul.mubr.bf16.gmra.mxu1 %v12580_v62  ;;  %v1115_v37 = vsel %vm15478_vm2, %v1110_v29, %v1114_v14  ;;  %v1149_v1 = vsel %vm15478_vm2, %v1144_v58, %v1148_v46  ;;  %v1167_v3 = vor.u32 %v1166_v61, %v1162_v60  ;;  %v1180_v15 = vrot.slane %v1178_v9, 5  ;;  %v1613_v61 = vld [vmem:[%s15458_s10 + $0x14] sm:$0x1] }
  0x8f   : > { %14032 = vmatprep.mubr.bf16.mxu1 %v12581_v24  ;;  %v12582_v44 = vcombine.low %v1115_v37, %v1125_v39  ;;  %v1133_v45 = vor.u32 %v1132_v34, %v1129_v33  ;;  %v1158_v10 = vrot.slane %v1157_v2, 4  ;;  %v1186_v21 = vrot.slane %v1184_v12, 5  ;;  %v833_v24 = vld [vmem:[%s15458_s10 + $0xb8] sm:$0xf]  ;;  %v14924_v34 = vld [vmem:[%s19084_s2 + $0xc0] sm:$0xff]  }
  0x90   : > { %v1168_v11 = vrot.slane %v1167_v3, 4  ;;  %v1190_v22 = vrot.slane %v1188_v13, 4  ;;  %v1199_v29 = vshrl.u32 %v832_v23, 16  ;;  %v1202_v31 = vshll.u32 %v832_v23, 16  ;;  %v15652_v39 = vld [vmem:[%s19084_s2 + $0x138] sm:$0xff]   ;;  %14106 = vmatprep.subr.bf16.mxu1 %v14924_v34  ;;  %v14928_v13 = vld [vmem:[%s19084_s2 + $0x130] sm:$0xff]  }
  0x91   : > { %v1134_v54 = vrot.slane %v1133_v45, 4  ;;  %v1163_v19 = vsel %vm15478_vm2, %v1158_v10, %v1162_v60  ;;  %v1208_v32 = vshll.u32 %v833_v24, 16  ;;  %v1212_v33 = vshrl.u32 %v833_v24, 16  ;;  %14140 = vmatprep.subr.bf16.mxu0 %v15652_v39  ;;  %14107 = vmatpush3.bf16.msra.mxu1 %v14924_v34  ;;  %v1612_v60 = vld [vmem:[%s15458_s10 + $0x10] sm:$0xf]  ;;  %v14927_v24 = vld [vmem:[%s15458_s10 + $0x18] sm:$0xff]  }
  0x92   : > { %v1173_v20 = vsel %vm15478_vm2, %v1168_v11, %v1172_v63  ;;  %v1191_v30 = vor.u32 %v1190_v22, %v1186_v21  ;;  %v1201_v36 = vrot.slane %v1199_v29, 4  ;;  %v1218_v37 = vshll.u32 %v834_v28, 16  ;;  %v1614_v11 = vld [vmem:[%s15458_s10 + $0x18] sm:$0xe]  ;;  %v1615_v12 = vld [vmem:[%s15458_s10 + $0x1c] sm:$0xf] }
  0x93   : > { %v1139_v62 = vsel %vm15478_vm2, %v1134_v54, %v1138_v40  ;;  %v12584_v25 = vcombine.low %v1163_v19, %v1173_v20  ;;  %v1204_v41 = vrot.slane %v1202_v31, 5  ;;  %v1210_v42 = vrot.slane %v1208_v32, 5  ;;  %v1619_v22 = vld [vmem:[%s15458_s10 + $0x2c] sm:$0x1]  ;;  %v14929_v29 = vld [vmem:[%s15458_s10 + $0x24] sm:$0xff]  }
  0x94   : > { %v12583_v5 = vcombine.low %v1139_v62, %v1149_v1  ;;  %v1192_v40 = vrot.slane %v1191_v30, 4  ;;  %v1214_v43 = vrot.slane %v1212_v33, 4  ;;  %v1220_v45 = vrot.slane %v1218_v37, 5  ;;  %v14931_v33 = vld [vmem:[%s19084_s2 + $0x128] sm:$0xff]   ;;  %v1622_v37 = vld [vmem:[%s15458_s10 + $0x38] sm:$0x1] }
  0x95   : > { %13985 = vmatmul.mubr.bf16.gmra.mxu0 %v14911_v8  ;;  %v1175_v8 = vshrl.u32 %v829_v4, 16  ;;  %v19112_v46 = vmov 0  ;;  %v1205_v48 = vor.u32 %v1204_v41, %v1201_v36  ;;  %v1709_v55 = vrot.slane %v1609_v51, 5  ;;  %v1621_v36 = vld [vmem:[%s15458_s10 + $0x34] sm:$0xf] }
  0x96   : > { %13988 = vmatprep.mubr.bf16.mxu0 %v14915_v16  ;;  %14033 = vmatmul.mubr.bf16.gmra.mxu1 %v12582_v44  ;;  %v1194_v16 = vshll.u32 %v831_v7, 16  ;;  %v19113_v46 = vsel %vm15658_vm5, 4294967295, %v19112_v46  ;;  %v1215_v49 = vor.u32 %v1214_v43, %v1210_v42  ;;  %v1712_v56 = vrot.slane %v1610_v52, 5  ;;  %v1623_v43 = vld [vmem:[%s15458_s10 + $0x3c] sm:$0xe] }
  0x97   : > { %14036 = vmatprep.mubr.bf16.mxu1 %v12583_v5  ;;  %v1177_v14 = vrot.slane %v1175_v8, 4  ;;  %19114 = vst [vmem:[#allocation14_spill] sm:$0xff] %v19113_v46  ;;  %v1206_v58 = vrot.slane %v1205_v48, 4  ;;  %v1711_v63 = vrot.slane %v1709_v55, 4  ;;  %v1716_v1 = vrot.slane %v1612_v60, 5  ;;  %v14926_v5 = vld [vmem:[%s15458_s10 + $0xc] sm:$0xff]  }
  0x98   : > { %v1196_v27 = vrot.slane %v1194_v16, 5  ;;  %v1216_v59 = vrot.slane %v1215_v49, 4  ;;  %v1719_v4 = vrot.slane %v1613_v61, 5  ;;  %v12597_v16 = vrot.slane %v1614_v11, 9  ;;  %v1627_v60 = vld [vmem:[%s15458_s10 + $0x4c] sm:$0xf] }
  0x99   : > { %v1181_v26 = vor.u32 %v1180_v15, %v1177_v14  ;;  %v1211_v2 = vsel %vm15478_vm2, %v1206_v58, %v1210_v42  ;;  %v1713_v7 = vsel %vm15658_vm5, %v1711_v63, %v1712_v56  ;;  %v1718_v9 = vrot.slane %v1716_v1, 4  ;;  %v1616_v15 = vld [vmem:[%s15458_s10 + $0x20] sm:$0x1]  ;;  %v1628_v61 = vld [vmem:[%s15458_s10 + $0x50] sm:$0x1] }
  0x9a   : > { %v1197_v47 = vsel %vm15478_vm2, %v1192_v40, %v1196_v27  ;;  %v1221_v3 = vsel %vm15478_vm2, %v1216_v59, %v1220_v45  ;;  %v1726_v20 = vrot.slane %v1616_v15, 5  ;;  %v12598_v23 = vrot.slane %v1617_v18, 9  ;;  %v1624_v45 = vld [vmem:[%s15458_s10 + $0x40] sm:$0xf]  ;;  %v1626_v59 = vld [vmem:[%s15458_s10 + $0x48] sm:$0xe] }
  0x9b   : > { %v1182_v35 = vrot.slane %v1181_v26, 4  ;;  %v12586_v6 = vcombine.low %v1211_v2, %v1221_v3  ;;  %v1720_v14 = vsel %vm15658_vm5, %v1718_v9, %v1719_v4  ;;  %v1733_v28 = vrot.slane %v1619_v22, 5  ;;  %v14932_v63 = vld [vmem:[%s15458_s10 + $0x3c] sm:$0xff]   ;;  %v1629_v3 = vld [vmem:[%s15458_s10 + $0x54] sm:$0xe] }
  0x9c   : > { %v1737_v41 = vrot.slane %v1621_v36, 5  ;;  %v1740_v42 = vrot.slane %v1622_v37, 5  ;;  %v12600_v48 = vrot.slane %v1623_v43, 9  ;;  %v1744_v51 = vrot.slane %v1624_v45, 5  ;;  %v1630_v4 = vld [vmem:[%s15458_s10 + $0x58] sm:$0xf] }
  0x9d   : > { %13989 = vmatmul.mubr.bf16.gmra.mxu0 %v14916_v50  ;;  %v1187_v44 = vsel %vm15478_vm2, %v1182_v35, %v1186_v21  ;;  %v1608_v50 = vld [vmem:[%s15458_s10] sm:$0xe]  ;;  %v1618_v21 = vld [vmem:[%s15458_s10 + $0x28] sm:$0xf]  ;;  %v1620_v35 = vld [vmem:[%s15458_s10 + $0x30] sm:$0xe] }
  0x9e   : > { %13992 = vmatprep.mubr.bf16.mxu0 %v14920_v57  ;;  %14037 = vmatmul.mubr.bf16.gmra.mxu1 %v12584_v25  ;;  %v12585_v53 = vcombine.low %v1187_v44, %v1197_v47  ;;  %v12595_v54 = vrot.slane %v1608_v50, 9  ;;  %v1611_v57 = vld [vmem:[%s15458_s10 + $0xc] sm:$0xe]  ;;  %v1730_v27 = vrot.slane %v1618_v21, 5  ;;  %v12599_v40 = vrot.slane %v1620_v35, 9  ;;  %v14940_v15 = vld [vmem:[%s19084_s2 + $0x178] sm:$0xff]  }
  0x9f   : > { %v12596_v0 = vrot.slane %v1611_v57, 9  ;;  %v1625_v47 = vld [vmem:[%s15458_s10 + $0x44] sm:$0x1]  ;;  %v1739_v50 = vrot.slane %v1737_v41, 4  ;;  %v1746_v56 = vrot.slane %v1744_v51, 4  ;;  %v1745_v58 = vsel %vm15658_vm5, %v12600_v48, %v1744_v51  ;;  %14188 = vmatprep.subr.bf16.mxu1 %v14940_v15 }
  0xa0   : > { %14040 = vmatprep.mubr.bf16.mxu1 %v12585_v53  ;;  %v1710_v62 = vsel %vm15658_vm5, %v12595_v54, %v1709_v55  ;;  %v1731_v31 = vsel %vm15658_vm5, %v12598_v23, %v1730_v27  ;;  %v1732_v32 = vrot.slane %v1730_v27, 4  ;;  %v1738_v49 = vsel %vm15658_vm5, %v12599_v40, %v1737_v41  ;;  %v14934_v53 = vld [vmem:[%s19084_s2 + $0x120] sm:$0xff]   ;;  %v14930_v54 = vld [vmem:[%s15458_s10 + $0x30] sm:$0xff]   ;;  %v1639_v43 = vld [vmem:[%s15458_s10 + $0x7c] sm:$0xf] }
  0xa1   : > { %v1717_v8 = vsel %vm15658_vm5, %v12596_v0, %v1716_v1  ;;  %v12627_v10 = vcombine.low %v1710_v62, %v1713_v7  ;;  %v1747_v52 = vrot.slane %v1625_v47, 5  ;;  %v1741_v55 = vsel %vm15658_vm5, %v1739_v50, %v1740_v42  ;;  %v14937_v7 = vld [vmem:[%s19084_s2 + $0x118] sm:$0xff]   ;;  %v1633_v18 = vld [vmem:[%s15458_s10 + $0x64] sm:$0xf]  ;;  %v1636_v27 = vld [vmem:[%s15458_s10 + $0x70] sm:$0xf] }
  0xa2   : > { %v12628_v19 = vcombine.low %v1717_v8, %v1720_v14  ;;  %v12631_v57 = vcombine.low %v1738_v49, %v1741_v55  ;;  %v12601_v0 = vrot.slane %v1626_v59, 9  ;;  %v1751_v1 = vrot.slane %v1627_v60, 5  ;;  %v1638_v42 = vld [vmem:[%s15458_s10 + $0x78] sm:$0xe]  ;;  %v1641_v48 = vld [vmem:[%s15458_s10 + $0x84] sm:$0xe] }
  0xa3   : > { %v1748_v62 = vsel %vm15658_vm5, %v1746_v56, %v1747_v52  ;;  %v1754_v2 = vrot.slane %v1628_v61, 5  ;;  %v1765_v22 = vrot.slane %v1633_v18, 5  ;;  %v12605_v45 = vrot.slane %v1638_v42, 9  ;;  %v14936_v49 = vld [vmem:[%s15458_s10 + $0x60] sm:$0xff]   ;;  %v1642_v51 = vld [vmem:[%s15458_s10 + $0x88] sm:$0xf] }
  0xa4   : > { %v1752_v8 = vsel %vm15658_vm5, %v12601_v0, %v1751_v1  ;;  %v1753_v9 = vrot.slane %v1751_v1, 4  ;;  %v1779_v47 = vrot.slane %v1639_v43, 5  ;;  %v1643_v52 = vld [vmem:[%s15458_s10 + $0x8c] sm:$0x1]  ;;  %v12606_v55 = vrot.slane %v1641_v48, 9  ;;  %v14943_v18 = vld [vmem:[%s15458_s10 + $0x84] sm:$0xff]  }
  0xa5   : > { %13993 = vmatmul.mubr.bf16.gmra.mxu0 %v14921_v17  ;;  %v1723_v17 = vrot.slane %v1615_v12, 5  ;;  %v12632_v12 = vcombine.low %v1745_v58, %v1748_v62  ;;  %v1786_v56 = vrot.slane %v1642_v51, 5  ;;  %v1789_v62 = vrot.slane %v1643_v52, 5  ;;  %v1644_v1 = vld [vmem:[%s15458_s10 + $0x90] sm:$0xe]  ;;  %v14955_v51 = vld [vmem:[%s19084_s2 + $0x148] sm:$0xff]  }
  0xa6   : > { %14041 = vmatmul.mubr.bf16.gmra.mxu1 %v12586_v6  ;;  %14060 = vmatprep.mubr.bf16.mxu0 %v12627_v10  ;;  %v12602_v6 = vrot.slane %v1629_v3, 9  ;;  %v1758_v10 = vrot.slane %v1630_v4, 5  ;;  %v1780_v60 = vsel %vm15658_vm5, %v12605_v45, %v1779_v47 }
  0xa7   : > { %14108 = vmatprep.mubr.bf16.mxu1 %v14926_v5  ;;  %v1724_v25 = vsel %vm15658_vm5, %v12597_v16, %v1723_v17  ;;  %v1725_v26 = vrot.slane %v1723_v17, 4  ;;  %v1631_v5 = vld [vmem:[%s15458_s10 + $0x5c] sm:$0x1]  ;;  %v1632_v17 = vld [vmem:[%s15458_s10 + $0x60] sm:$0xe]  ;;  %v1788_v4 = vrot.slane %v1786_v56, 4 }
  0xa8   : > { %v1761_v11 = vrot.slane %v1631_v5, 5  ;;  %v1760_v14 = vrot.slane %v1758_v10, 4  ;;  %v12603_v21 = vrot.slane %v1632_v17, 9  ;;  %v1646_v5 = vld [vmem:[%s15458_s10 + $0x98] sm:$0x1] }
  0xa9   : > { %v1727_v30 = vsel %vm15658_vm5, %v1725_v26, %v1726_v20  ;;  %v14933_v20 = vld [vmem:[%s15458_s10 + $0x48] sm:$0xff]   ;;  %v1759_v26 = vsel %vm15658_vm5, %v12602_v6, %v1758_v10  ;;  %v1648_v10 = vld [vmem:[%s15458_s10 + $0xa0] sm:$0xf]  ;;  %v1790_v17 = vsel %vm15658_vm5, %v1788_v4, %v1789_v62 }
  0xaa   : > { %v12629_v34 = vcombine.low %v1724_v25, %v1727_v30  ;;  %v14941_v25 = vld [vmem:[%s19084_s2 + $0x170] sm:$0xff]   ;;  %v1762_v30 = vsel %vm15658_vm5, %v1760_v14, %v1761_v11  ;;  %v1766_v35 = vsel %vm15658_vm5, %v12603_v21, %v1765_v22  ;;  %v1649_v11 = vld [vmem:[%s15458_s10 + $0xa4] sm:$0x1]  ;;  %v14947_v14 = vld [vmem:[%s19084_s2 + $0x108] sm:$0xff]  }
  0xab   : > { %v12634_v40 = vcombine.low %v1759_v26, %v1762_v30  ;;  %v14951_v26 = vld [vmem:[%s19084_s2 + $0x150] sm:$0xff]   ;;  %v14949_v4 = vld [vmem:[%s15458_s10 + $0xa8] sm:$0xff]  }
  0xac   : > { %v1652_v30 = vld [vmem:[%s15458_s10 + $0xb0] sm:$0x1] }
  0xad   : > { %14061 = vmatmul.mubr.bf16.vlgmr.msra.gmra.mxu0 %v12628_v19  ;;  %v1634_v19 = vld [vmem:[%s15458_s10 + $0x68] sm:$0x1] }
  0xae   : > { %14141 = vmatpush3.bf16.msra.mxu0 %v15652_v39  ;;  %v1734_v39 = vsel %vm15658_vm5, %v1732_v32, %v1733_v28  ;;  %14064 = vmatprep.mubr.bf16.mxu0 %v12629_v34  ;;  %v1768_v23 = vrot.slane %v1634_v19, 5  ;;  %v1637_v28 = vld [vmem:[%s15458_s10 + $0x74] sm:$0x1]  ;;  %v1767_v32 = vrot.slane %v1765_v22, 4  ;;  %v1772_v34 = vrot.slane %v1636_v27, 5 }
  0xaf   : > { %14142 = vmatprep.subr.bf16.mxu0 %v14928_v13  ;;  %v12630_v44 = vcombine.low %v1731_v31, %v1734_v39  ;;  %14109 = vmatmul.mubr.bf16.vlgmr.msra.gmra.mxu1 %v14927_v24  ;;  %v1635_v24 = vld [vmem:[%s15458_s10 + $0x6c] sm:$0xe]  ;;  %v14935_v31 = vld [vmem:[%s15458_s10 + $0x54] sm:$0xff]   ;;  %v1775_v39 = vrot.slane %v1637_v28, 5  ;;  %v1803_v22 = vrot.slane %v1649_v11, 5 }
  0xb0   : > { %14112 = vmatprep.mubr.bf16.mxu1 %v14929_v29  ;;  %14189 = vmatpush3.bf16.msra.mxu1 %v14940_v15  ;;  %v14942_v29 = vld [vmem:[%s19084_s2 + $0x110] sm:$0xff]   ;;  %v1769_v36 = vsel %vm15658_vm5, %v1767_v32, %v1768_v23  ;;  %v1774_v37 = vrot.slane %v1772_v34, 4  ;;  %v14939_v15 = vld [vmem:[%s15458_s10 + $0x78] sm:$0xff]   ;;  %v1650_v27 = vld [vmem:[%s15458_s10 + $0xa8] sm:$0xe] }
  0xb1   : > { %14190 = vmatprep.subr.bf16.mxu1 %v14941_v25  ;;  %v12635_v41 = vcombine.low %v1766_v35, %v1769_v36  ;;  %v14950_v23 = vld [vmem:[%s19084_s2 + $0x158] sm:$0xff]   ;;  %v1651_v28 = vld [vmem:[%s15458_s10 + $0xac] sm:$0xf] }
  0xb2   : > { %14143 = vmatpush3.bf16.msra.mxu0 %v14928_v13  ;;  %v1755_v13 = vsel %vm15658_vm5, %v1753_v9, %v1754_v2  ;;  %v1776_v59 = vsel %vm15658_vm5, %v1774_v37, %v1775_v39  ;;  %v1645_v2 = vld [vmem:[%s15458_s10 + $0x94] sm:$0xf]  ;;  %v1796_v9 = vrot.slane %v1646_v5, 5  ;;  %v1807_v32 = vrot.slane %v1651_v28, 5  ;;  %v1654_v35 = vld [vmem:[%s15458_s10 + $0xb8] sm:$0xf] }
  0xb3   : > { %14144 = vmatprep.subr.bf16.mxu0 %v14931_v33  ;;  %v12633_v16 = vcombine.low %v1752_v8, %v1755_v13  ;;  %v1793_v6 = vrot.slane %v1645_v2, 5  ;;  %v12607_v8 = vrot.slane %v1644_v1, 9  ;;  %v1800_v13 = vrot.slane %v1648_v10, 5  ;;  %v1655_v36 = vld [vmem:[%s15458_s10 + $0xbc] sm:$0x1]  ;;  %v14944_v37 = vld [vmem:[%s15458_s10 + $0x90] sm:$0xff]  }
  0xb4   : > { %14191 = vmatpush3.bf16.msra.mxu1 %v14941_v25  ;;  %v1809_v39 = vrot.slane %v1807_v32, 4  ;;  %v12726_v1 = vld [vmem:[%s15458_s10 + $0x18] sm:$0xf]  ;;  %v12727_v2 = vld [vmem:[%s15458_s10 + $0x1c] sm:$0xf] }
  0xb5   : > { %14065 = vmatmul.mubr.bf16.gmra.mxu0 %v12630_v44  ;;  %v1640_v44 = vld [vmem:[%s15458_s10 + $0x80] sm:$0x1]  ;;  %v1794_v19 = vsel %vm15658_vm5, %v12607_v8, %v1793_v6  ;;  %v1802_v25 = vrot.slane %v1800_v13, 4  ;;  %v14953_v10 = vld [vmem:[%s15458_s10 + $0xb4] sm:$0xff]  }
  0xb6   : > { %14145 = vmatpush3.bf16.msra.mxu0 %v14931_v33  ;;  %14068 = vmatprep.mubr.bf16.mxu0 %v12631_v57  ;;  %v12604_v33 = vrot.slane %v1635_v24, 9  ;;  %v1782_v50 = vrot.slane %v1640_v44, 5  ;;  %v14945_v57 = vld [vmem:[%s19084_s2 + $0x168] sm:$0xff]   ;;  %v14948_v44 = vld [vmem:[%s15458_s10 + $0x9c] sm:$0xff]  }
  0xb7   : > { %14146 = vmatprep.subr.bf16.mxu0 %v14934_v53  ;;  %14113 = vmatmul.mubr.bf16.gmra.mxu1 %v14930_v54  ;;  %v1781_v54 = vrot.slane %v1779_v47, 4  ;;  %v1804_v43 = vsel %vm15658_vm5, %v1802_v25, %v1803_v22 }
  0xb8   : > { %14116 = vmatprep.mubr.bf16.mxu1 %v14932_v63  ;;  %v1773_v58 = vsel %vm15658_vm5, %v12604_v33, %v1772_v34  ;;  %14192 = vmatprep.subr.bf16.mxu1 %v14945_v57  ;;  %v14946_v63 = vld [vmem:[%s19084_s2 + $0x160] sm:$0xff]   ;;  %v1653_v33 = vld [vmem:[%s15458_s10 + $0xb4] sm:$0xe]  ;;  %v1810_v34 = vrot.slane %v1652_v30, 5 }
  0xb9   : > { %v1783_v61 = vsel %vm15658_vm5, %v1781_v54, %v1782_v50  ;;  %14193 = vmatpush3.bf16.msra.mxu1 %v14945_v57  ;;  %v12636_v0 = vcombine.low %v1773_v58, %v1776_v59  ;;  %v12610_v48 = vrot.slane %v1653_v33, 9  ;;  %v1817_v50 = vrot.slane %v1655_v36, 5  ;;  %v14956_v54 = vld [vmem:[%s19084_s2 + $0x140] sm:$0xff]   ;;  %v12725_v57 = vld [vmem:[%s15458_s10 + $0x14] sm:$0x1] }
  0xba   : > { %14147 = vmatpush3.bf16.msra.mxu0 %v14934_v53  ;;  %v14938_v53 = vld [vmem:[%s15458_s10 + $0x6c] sm:$0xff]   ;;  %14194 = vmatprep.subr.bf16.mxu1 %v14946_v63  ;;  %v12637_v3 = vcombine.low %v1780_v60, %v1783_v61  ;;  %v1811_v47 = vsel %vm15658_vm5, %v1809_v39, %v1810_v34  ;;  %v12814_v34 = vld [vmem:[%s15458_s10 + $0x18] sm:$0xe] }
  0xbb   : > { %14148 = vmatprep.subr.bf16.mxu0 %v14937_v7 }
  0xbd   : > { %14069 = vmatmul.mubr.bf16.gmra.mxu0 %v12632_v12  ;;  %v1795_v12 = vrot.slane %v1793_v6, 4  ;;  %14195 = vmatpush3.bf16.msra.mxu1 %v14946_v63 }
  0xbe   : > { %14072 = vmatprep.mubr.bf16.mxu0 %v12633_v16  ;;  %14149 = vmatpush3.bf16.msra.mxu0 %v14937_v7  ;;  %v1647_v7 = vld [vmem:[%s15458_s10 + $0x9c] sm:$0xe]  ;;  %v1787_v16 = vsel %vm15658_vm5, %v12606_v55, %v1786_v56  ;;  %v12723_v55 = vld [vmem:[%s15458_s10 + $0xc] sm:$0xf]  ;;  %v12724_v56 = vld [vmem:[%s15458_s10 + $0x10] sm:$0xf] }
  0xbf   : > { %14150 = vmatprep.subr.bf16.mxu0 %v14942_v29  ;;  %14117 = vmatmul.mubr.bf16.gmra.mxu1 %v14933_v20  ;;  %v1797_v20 = vsel %vm15658_vm5, %v1795_v12, %v1796_v9  ;;  %v12608_v21 = vrot.slane %v1647_v7, 9  ;;  %v12638_v24 = vcombine.low %v1787_v16, %v1790_v17  ;;  %v2705_v58 = vshrl.u32 %v12723_v55, 16  ;;  %v12728_v9 = vld [vmem:[%s15458_s10 + $0x20] sm:$0x1] }
  0xc0   : > { %14120 = vmatprep.mubr.bf16.mxu1 %v14935_v31  ;;  %14196 = vmatprep.subr.bf16.mxu1 %v14950_v23  ;;  %v12609_v31 = vrot.slane %v1650_v27, 9  ;;  %v2708_v59 = vshll.u32 %v12723_v55, 16  ;;  %v2714_v60 = vshll.u32 %v12724_v56, 16  ;;  %v2718_v61 = vshrl.u32 %v12724_v56, 16 }
  0xc1   : > { %14197 = vmatpush3.bf16.msra.mxu1 %v14950_v23  ;;  %v1801_v42 = vsel %vm15658_vm5, %v12608_v21, %v1800_v13  ;;  %v2707_v5 = vrot.slane %v2705_v58, 4  ;;  %v2729_v12 = vshrl.u32 %v12726_v1, 16  ;;  %v2732_v13 = vshll.u32 %v12726_v1, 16  ;;  %v12812_v23 = vld [vmem:[%s15458_s10 + $0x10] sm:$0xf] }
  0xc2   : > { %14151 = vmatpush3.bf16.msra.mxu0 %v14942_v29  ;;  %v12639_v29 = vcombine.low %v1794_v19, %v1797_v20  ;;  %14198 = vmatprep.subr.bf16.mxu1 %v14951_v26  ;;  %v1808_v45 = vsel %vm15658_vm5, %v12609_v31, %v1807_v32  ;;  %v12640_v52 = vcombine.low %v1801_v42, %v1804_v43  ;;  %v2710_v6 = vrot.slane %v2708_v59, 5  ;;  %v12811_v19 = vld [vmem:[%s15458_s10 + $0xc] sm:$0xe]  ;;  %v12729_v42 = vld [vmem:[%s15458_s10 + $0x24] sm:$0xf] }
  0xc3   : > { %14152 = vmatprep.subr.bf16.mxu0 %v14947_v14  ;;  %v2716_v7 = vrot.slane %v2714_v60, 5  ;;  %v2720_v8 = vrot.slane %v2718_v61, 4  ;;  %v2742_v17 = vshrl.u32 %v12727_v2, 16  ;;  %v2731_v20 = vrot.slane %v2729_v12, 4  ;;  %v12732_v58 = vld [vmem:[%s15458_s10 + $0x30] sm:$0xf] }
  0xc4   : > { %v2734_v21 = vrot.slane %v2732_v13, 5  ;;  %v3572_v32 = vrot.slane %v12812_v23, 5  ;;  %v2756_v56 = vshll.u32 %v12729_v42, 16  ;;  %v12733_v59 = vld [vmem:[%s15458_s10 + $0x34] sm:$0xf]  ;;  %v14954_v60 = vld [vmem:[%s15458_s10 + $0xc0] sm:$0xff]  }
  0xc5   : > { %14073 = vmatmul.mubr.bf16.gmra.mxu0 %v12634_v40  ;;  %v1814_v40 = vrot.slane %v1654_v35, 5  ;;  %14199 = vmatpush3.bf16.msra.mxu1 %v14951_v26  ;;  %v2721_v16 = vor.u32 %v2720_v8, %v2716_v7  ;;  %v2744_v27 = vrot.slane %v2742_v17, 4  ;;  %v12815_v35 = vld [vmem:[%s15458_s10 + $0x1c] sm:$0xf]  ;;  %v12818_v17 = vld [vmem:[%s15458_s10 + $0x28] sm:$0xf] }
  0xc6   : > { %14076 = vmatprep.mubr.bf16.mxu0 %v12635_v41  ;;  %14153 = vmatpush3.bf16.msra.mxu0 %v14947_v14  ;;  %v14952_v41 = vld [vmem:[%s19084_s2 + $0x100] sm:$0xff]   ;;  %v2738_v14 = vshll.u32 %v12727_v2, 16  ;;  %v2735_v31 = vor.u32 %v2734_v21, %v2731_v20  ;;  %v12820_v23 = vld [vmem:[%s15458_s10 + $0x30] sm:$0xe] }
  0xc7   : > { %14121 = vmatmul.mubr.bf16.gmra.mxu1 %v14936_v49  ;;  %14154 = vmatprep.subr.bf16.mxu0 %v14952_v41  ;;  %v1816_v49 = vrot.slane %v1814_v40, 4  ;;  %v1815_v62 = vsel %vm15658_vm5, %v12610_v48, %v1814_v40  ;;  %v2722_v26 = vrot.slane %v2721_v16, 4  ;;  %v12816_v40 = vld [vmem:[%s15458_s10 + $0x20] sm:$0x1]  ;;  %v12730_v48 = vld [vmem:[%s15458_s10 + $0x28] sm:$0xf] }
  0xc8   : > { %14124 = vmatprep.mubr.bf16.mxu1 %v14938_v53  ;;  %v12641_v53 = vcombine.low %v1808_v45, %v1811_v47  ;;  %14200 = vmatprep.subr.bf16.mxu1 %v14955_v51  ;;  %v2740_v22 = vrot.slane %v2738_v14, 5  ;;  %v3574_v47 = vrot.slane %v3572_v32, 4  ;;  %v2766_v8 = vshrl.u32 %v12730_v48, 16  ;;  %v14958_v16 = vld [vmem:[%s19084_s2 + $0x1b0] sm:$0xff]  }
  0xc9   : > { %v1818_v63 = vsel %vm15658_vm5, %v1816_v49, %v1817_v50  ;;  %14201 = vmatpush3.bf16.msra.mxu1 %v14955_v51  ;;  %v3579_v50 = vrot.slane %v12815_v35, 5  ;;  %v3582_v51 = vrot.slane %v12816_v40, 5  ;;  %v2780_v14 = vshll.u32 %v12732_v58, 16  ;;  %v12735_v40 = vld [vmem:[%s15458_s10 + $0x3c] sm:$0xf] }
  0xca   : > { %14155 = vmatpush3.bf16.msra.mxu0 %v14952_v41  ;;  %14202 = vmatprep.subr.bf16.mxu1 %v14956_v54  ;;  %v12642_v30 = vcombine.low %v1815_v62, %v1818_v63  ;;  %v2745_v39 = vor.u32 %v2744_v27, %v2740_v22  ;;  %v12860_v41 = vrot.slane %v12814_v34, 9  ;;  %v14962_v34 = vld [vmem:[%s19084_s2 + $0x1f8] sm:$0xff]  }
  0xcc   : > { %v2746_v49 = vrot.slane %v2745_v39, 4  ;;  %v15880_v63 = vsel %vm15658_vm5, %v12860_v41, %v3579_v50 }
  0xcd   : > { %14077 = vmatmul.mubr.bf16.gmra.mxu0 %v12636_v0  ;;  %v2724_v0 = vshll.u32 %v12725_v57, 16  ;;  %14203 = vmatpush3.bf16.msra.mxu1 %v14956_v54  ;;  %v2762_v57 = vshll.u32 %v12730_v48, 16 }
  0xce   : > { %14080 = vmatprep.mubr.bf16.mxu0 %v12637_v3  ;;  %v15848_v3 = vld [vmem:[%s19084_s2 + $0x1b8] sm:$0xff]   ;;  %14284 = vmatprep.subr.bf16.mxu1 %v14962_v34 }
  0xcf   : > { %14125 = vmatmul.mubr.bf16.gmra.mxu1 %v14939_v15  ;;  %v2726_v11 = vrot.slane %v2724_v0, 5  ;;  %14236 = vmatprep.subr.bf16.mxu0 %v15848_v3  ;;  %v2711_v15 = vor.u32 %v2710_v6, %v2707_v5  ;;  %v3581_v0 = vrot.slane %v3579_v50, 4  ;;  %v2764_v5 = vrot.slane %v2762_v57, 5  ;;  %v12734_v6 = vld [vmem:[%s15458_s10 + $0x38] sm:$0x1] }
  0xd0   : > { %14128 = vmatprep.mubr.bf16.mxu1 %v14943_v18  ;;  %v2748_v18 = vshll.u32 %v12728_v9, 16  ;;  %v2796_v27 = vshll.u32 %v12734_v6, 16 }
  0xd1   : > { %v2712_v25 = vrot.slane %v2711_v15, 4  ;;  %v2786_v15 = vshll.u32 %v12733_v59, 16 }
  0xd2   : > { %v2750_v28 = vrot.slane %v2748_v18, 5  ;;  %v12819_v18 = vld [vmem:[%s15458_s10 + $0x2c] sm:$0x1] }
  0xd3   : > { %v2717_v36 = vsel %vm15478_vm2, %v2712_v25, %v2716_v7  ;;  %v3583_v7 = vsel %vm15658_vm5, %v3581_v0, %v3582_v51  ;;  %v2782_v25 = vrot.slane %v2780_v14, 5  ;;  %v3589_v39 = vrot.slane %v12819_v18, 5 }
  0xd4   : > { %v2751_v61 = vsel %vm15478_vm2, %v2746_v49, %v2750_v28  ;;  %v12892_v12 = vcombine.low %v15880_v63, %v3583_v7  ;;  %v12821_v28 = vld [vmem:[%s15458_s10 + $0x34] sm:$0xf]  ;;  %v12862_v49 = vrot.slane %v12820_v23, 9 }
  0xd5   : > { %14081 = vmatmul.mubr.bf16.gmra.mxu0 %v12638_v24  ;;  %v12859_v24 = vrot.slane %v12811_v19, 9  ;;  %v2768_v19 = vrot.slane %v2766_v8, 4  ;;  %v3593_v50 = vrot.slane %v12821_v28, 5 }
  0xd6   : > { %14084 = vmatprep.mubr.bf16.mxu0 %v12639_v29  ;;  %v12813_v29 = vld [vmem:[%s15458_s10 + $0x14] sm:$0x1] }
  0xd7   : > { %14129 = vmatmul.mubr.bf16.gmra.mxu1 %v14944_v37  ;;  %v3575_v33 = vrot.slane %v12813_v29, 5  ;;  %v2727_v37 = vsel %vm15478_vm2, %v2722_v26, %v2726_v11  ;;  %v3573_v45 = vsel %vm15658_vm5, %v12859_v24, %v3572_v32  ;;  %v12817_v11 = vld [vmem:[%s15458_s10 + $0x24] sm:$0xe]  ;;  %v2788_v26 = vrot.slane %v2786_v15, 5  ;;  %v12824_v15 = vld [vmem:[%s15458_s10 + $0x40] sm:$0xf] }
  0xd8   : > { %14132 = vmatprep.mubr.bf16.mxu1 %v14948_v44  ;;  %v12787_v43 = vcombine.low %v2717_v36, %v2727_v37  ;;  %v2736_v44 = vrot.slane %v2735_v31, 4  ;;  %v2769_v29 = vor.u32 %v2768_v19, %v2764_v5  ;;  %v12861_v31 = vrot.slane %v12817_v11, 9 }
  0xd9   : > { %v3576_v55 = vsel %vm15658_vm5, %v3574_v47, %v3575_v33  ;;  %v3586_v32 = vrot.slane %v12818_v17, 5  ;;  %v12822_v33 = vld [vmem:[%s15458_s10 + $0x38] sm:$0x1]  ;;  %v2798_v37 = vrot.slane %v2796_v27, 5  ;;  %v14959_v47 = vld [vmem:[%s19084_s2 + $0x1a8] sm:$0xff]   ;;  %v3595_v63 = vrot.slane %v3593_v50, 4 }
  0xda   : > { %v2741_v54 = vsel %vm15478_vm2, %v2736_v44, %v2740_v22  ;;  %v12891_v62 = vcombine.low %v3573_v45, %v3576_v55  ;;  %v2790_v22 = vshrl.u32 %v12733_v59, 16  ;;  %v2770_v41 = vrot.slane %v2769_v29, 4  ;;  %v12736_v45 = vld [vmem:[%s15458_s10 + $0x40] sm:$0xf] }
  0xdb   : > { %v12788_v1 = vcombine.low %v2741_v54, %v2751_v61  ;;  %v3588_v44 = vrot.slane %v3586_v32, 4  ;;  %v3596_v51 = vrot.slane %v12822_v33, 5  ;;  %v2801_v55 = vshrl.u32 %v12735_v40, 16  ;;  %v12739_v61 = vld [vmem:[%s15458_s10 + $0x4c] sm:$0xf] }
  0xdc   : > { %v3594_v59 = vsel %vm15658_vm5, %v12862_v49, %v3593_v50  ;;  %v2810_v6 = vshll.u32 %v12736_v45, 16  ;;  %v2814_v7 = vshrl.u32 %v12736_v45, 16  ;;  %v2838_v28 = vshrl.u32 %v12739_v61, 16  ;;  %v12741_v50 = vld [vmem:[%s15458_s10 + $0x54] sm:$0xf] }
  0xdd   : > { %14085 = vmatmul.mubr.bf16.gmra.mxu0 %v12640_v52  ;;  %v12731_v52 = vld [vmem:[%s15458_s10 + $0x2c] sm:$0x1]  ;;  %v3590_v54 = vsel %vm15658_vm5, %v3588_v44, %v3589_v39  ;;  %v2803_v0 = vrot.slane %v2801_v55, 4  ;;  %v3597_v11 = vsel %vm15658_vm5, %v3595_v63, %v3596_v51  ;;  %v14966_v44 = vld [vmem:[%s19084_s2 + $0x1e0] sm:$0xff]  }
  0xde   : > { %14088 = vmatprep.mubr.bf16.mxu0 %v12641_v53  ;;  %v2753_v53 = vshrl.u32 %v12729_v42, 16  ;;  %v2772_v9 = vshll.u32 %v12731_v52, 16  ;;  %v2812_v17 = vrot.slane %v2810_v6, 5  ;;  %v2816_v18 = vrot.slane %v2814_v7, 4  ;;  %v14967_v7 = vld [vmem:[%s19084_s2 + $0x188] sm:$0xff]  }
  0xdf   : > { %14133 = vmatmul.mubr.bf16.gmra.mxu1 %v14949_v4  ;;  %v2758_v4 = vrot.slane %v2756_v56, 5 }
  0xe0   : > { %14136 = vmatprep.mubr.bf16.mxu1 %v14953_v10  ;;  %v2755_v2 = vrot.slane %v2753_v53, 4  ;;  %v2777_v10 = vshrl.u32 %v12732_v58, 16  ;;  %v2774_v20 = vrot.slane %v2772_v9, 5  ;;  %v12823_v9 = vld [vmem:[%s15458_s10 + $0x3c] sm:$0xe]  ;;  %v2817_v27 = vor.u32 %v2816_v18, %v2812_v17 }
  0xe2   : > { %v2759_v13 = vor.u32 %v2758_v4, %v2755_v2  ;;  %v2779_v21 = vrot.slane %v2777_v10, 4  ;;  %v2775_v52 = vsel %vm15478_vm2, %v2770_v41, %v2774_v20  ;;  %v12740_v2 = vld [vmem:[%s15458_s10 + $0x50] sm:$0x1]  ;;  %v14960_v10 = vld [vmem:[%s19084_s2 + $0x1a0] sm:$0xff]   ;;  %v2818_v39 = vrot.slane %v2817_v27, 4 }
  0xe3   : > { %v14963_v4 = vld [vmem:[%s19084_s2 + $0x1f0] sm:$0xff]   ;;  %v12825_v20 = vld [vmem:[%s15458_s10 + $0x44] sm:$0x1]  ;;  %v2844_v29 = vshll.u32 %v12740_v2, 16  ;;  %v2849_v2 = vshrl.u32 %v12741_v50, 16 }
  0xe4   : > { %v2760_v24 = vrot.slane %v2759_v13, 4  ;;  %v2783_v36 = vor.u32 %v2782_v25, %v2779_v21  ;;  %v14965_v21 = vld [vmem:[%s19084_s2 + $0x1e8] sm:$0xff]   ;;  %v2834_v25 = vshll.u32 %v12739_v61, 16 }
  0xe5   : > { %14089 = vmatmul.mubr.bf16.gmra.mxu0 %v12642_v30  ;;  %v2792_v30 = vrot.slane %v2790_v22, 4  ;;  %v2846_v41 = vrot.slane %v2844_v29, 5 }
  0xe6   : > { %14156 = vmatprep.mubr.bf16.mxu0 %v12787_v43  ;;  %v2765_v35 = vsel %vm15478_vm2, %v2760_v24, %v2764_v5  ;;  %v3587_v43 = vsel %vm15658_vm5, %v12861_v31, %v3586_v32  ;;  %v2784_v48 = vrot.slane %v2783_v36, 4  ;;  %v12827_v31 = vld [vmem:[%s15458_s10 + $0x4c] sm:$0xf]  ;;  %v14961_v32 = vld [vmem:[%s19084_s2 + $0x198] sm:$0xff]   ;;  %v3600_v36 = vrot.slane %v12824_v15, 5 }
  0xe7   : > { %14137 = vmatmul.mubr.bf16.gmra.mxu1 %v14954_v60  ;;  %v2793_v42 = vor.u32 %v2792_v30, %v2788_v26  ;;  %v12789_v56 = vcombine.low %v2765_v35, %v2775_v52  ;;  %v12893_v58 = vcombine.low %v3587_v43, %v3590_v54  ;;  %v12738_v60 = vld [vmem:[%s15458_s10 + $0x48] sm:$0xf]  ;;  %v12863_v30 = vrot.slane %v12823_v9, 9  ;;  %v15945_v43 = vld [vmem:[%s19084_s2 + $0x190] sm:$0xff]   ;;  %v12742_v54 = vld [vmem:[%s15458_s10 + $0x58] sm:$0xf] }
  0xe8   : > { %14204 = vmatprep.mubr.bf16.mxu1 %v12891_v62  ;;  %v2789_v57 = vsel %vm15478_vm2, %v2784_v48, %v2788_v26  ;;  %v2825_v13 = vshrl.u32 %v12738_v60, 16  ;;  %v2828_v14 = vshll.u32 %v12738_v60, 16  ;;  %v12826_v26 = vld [vmem:[%s15458_s10 + $0x48] sm:$0xe]  ;;  %v2836_v35 = vrot.slane %v2834_v25, 5 }
  0xe9   : > { %v2794_v53 = vrot.slane %v2793_v42, 4  ;;  %v3603_v42 = vrot.slane %v12825_v20, 5  ;;  %v3601_v48 = vsel %vm15658_vm5, %v12863_v30, %v3600_v36  ;;  %v3602_v49 = vrot.slane %v3600_v36, 4  ;;  %v12744_v60 = vld [vmem:[%s15458_s10 + $0x60] sm:$0xf] }
  0xea   : > { %v2827_v23 = vrot.slane %v2825_v13, 4  ;;  %v2830_v24 = vrot.slane %v2828_v14, 5  ;;  %v12864_v52 = vrot.slane %v12826_v26, 9  ;;  %v2862_v6 = vshrl.u32 %v12742_v54, 16  ;;  %v14969_v14 = vld [vmem:[%s19084_s2 + $0x1d0] sm:$0xff]  }
  0xeb   : > { %v2799_v62 = vsel %vm15478_vm2, %v2794_v53, %v2798_v37  ;;  %v12828_v37 = vld [vmem:[%s15458_s10 + $0x50] sm:$0x1]  ;;  %v3607_v53 = vrot.slane %v12827_v31, 5  ;;  %v2873_v13 = vshrl.u32 %v12744_v60, 16  ;;  %v12830_v20 = vld [vmem:[%s15458_s10 + $0x58] sm:$0xf] }
  0xec   : > { %v12790_v5 = vcombine.low %v2789_v57, %v2799_v62  ;;  %v3604_v57 = vsel %vm15658_vm5, %v3602_v49, %v3603_v42  ;;  %v12831_v25 = vld [vmem:[%s15458_s10 + $0x5c] sm:$0x1]  ;;  %v2876_v27 = vshll.u32 %v12744_v60, 16  ;;  %v12832_v30 = vld [vmem:[%s15458_s10 + $0x60] sm:$0xe]  ;;  %v3614_v36 = vrot.slane %v12830_v20, 5 }
  0xed   : > { %14157 = vmatmul.mubr.bf16.vlgmr.msra.gmra.mxu0 %v12788_v1  ;;  %v2804_v1 = vshll.u32 %v12735_v40, 16  ;;  %v2840_v40 = vrot.slane %v2838_v28, 4  ;;  %v12895_v62 = vcombine.low %v3601_v48, %v3604_v57  ;;  %v3608_v63 = vsel %vm15658_vm5, %v12864_v52, %v3607_v53  ;;  %v12833_v31 = vld [vmem:[%s15458_s10 + $0x64] sm:$0xf]  ;;  %v12747_v52 = vld [vmem:[%s15458_s10 + $0x6c] sm:$0xf] }
  0xee   : > { %14237 = vmatpush3.bf16.msra.mxu0 %v15848_v3  ;;  %v12737_v3 = vld [vmem:[%s15458_s10 + $0x44] sm:$0x1]  ;;  %14160 = vmatprep.mubr.bf16.mxu0 %v12789_v56  ;;  %v3616_v48 = vrot.slane %v3614_v36, 4 }
  0xef   : > { %14238 = vmatprep.subr.bf16.mxu0 %v14958_v16  ;;  %14205 = vmatmul.mubr.bf16.vlgmr.msra.gmra.mxu1 %v12892_v12  ;;  %v2820_v8 = vshll.u32 %v12737_v3, 16  ;;  %v2806_v12 = vrot.slane %v2804_v1, 5  ;;  %v2841_v3 = vor.u32 %v2840_v40, %v2836_v35  ;;  %v14968_v1 = vld [vmem:[%s19084_s2 + $0x1d8] sm:$0xff]   ;;  %v2878_v40 = vrot.slane %v2876_v27, 5  ;;  %v12837_v27 = vld [vmem:[%s15458_s10 + $0x74] sm:$0x1] }
  0xf0   : > { %14208 = vmatprep.mubr.bf16.mxu1 %v12893_v58  ;;  %14285 = vmatpush3.bf16.msra.mxu1 %v14962_v34  ;;  %v2831_v34 = vor.u32 %v2830_v24, %v2827_v23  ;;  %v3610_v58 = vrot.slane %v12828_v37, 5  ;;  %v2875_v24 = vrot.slane %v2873_v13, 4  ;;  %v14970_v37 = vld [vmem:[%s19084_s2 + $0x180] sm:$0xff]  }
  0xf1   : > { %v2822_v19 = vrot.slane %v2820_v8, 5  ;;  %14286 = vmatprep.subr.bf16.mxu1 %v14963_v4  ;;  %v2807_v22 = vor.u32 %v2806_v12, %v2803_v0  ;;  %v2842_v61 = vrot.slane %v2841_v3, 4  ;;  %v3609_v0 = vrot.slane %v3607_v53, 4  ;;  %v12746_v12 = vld [vmem:[%s15458_s10 + $0x68] sm:$0x1] }
  0xf2   : > { %14239 = vmatpush3.bf16.msra.mxu0 %v14958_v16  ;;  %v12894_v16 = vcombine.low %v3594_v59, %v3597_v11  ;;  %v12743_v59 = vld [vmem:[%s15458_s10 + $0x5c] sm:$0x1]  ;;  %v12745_v11 = vld [vmem:[%s15458_s10 + $0x64] sm:$0xf]  ;;  %v3617_v3 = vrot.slane %v12831_v25, 5 }
  0xf3   : > { %14240 = vmatprep.subr.bf16.mxu0 %v14959_v47  ;;  %v2808_v33 = vrot.slane %v2807_v22, 4  ;;  %v2823_v51 = vsel %vm15478_vm2, %v2818_v39, %v2822_v19  ;;  %v2847_v8 = vsel %vm15478_vm2, %v2842_v61, %v2846_v41  ;;  %v3611_v9 = vsel %vm15658_vm5, %v3609_v0, %v3610_v58  ;;  %v12829_v19 = vld [vmem:[%s15458_s10 + $0x54] sm:$0xe]  ;;  %v12748_v53 = vld [vmem:[%s15458_s10 + $0x70] sm:$0xf] }
  0xf4   : > { %14287 = vmatpush3.bf16.msra.mxu1 %v14963_v4  ;;  %v2852_v4 = vshll.u32 %v12741_v50, 16  ;;  %v2864_v22 = vrot.slane %v2862_v6, 4  ;;  %v2882_v28 = vshll.u32 %v12745_v11, 16  ;;  %v2886_v29 = vshrl.u32 %v12745_v11, 16  ;;  %v12749_v58 = vld [vmem:[%s15458_s10 + $0x74] sm:$0x1] }
  0xf5   : > { %14161 = vmatmul.mubr.bf16.gmra.mxu0 %v12790_v5  ;;  %14288 = vmatprep.subr.bf16.mxu1 %v14965_v21  ;;  %v2813_v45 = vsel %vm15478_vm2, %v2808_v33, %v2812_v17  ;;  %v2858_v5 = vshll.u32 %v12742_v54, 16  ;;  %v2851_v17 = vrot.slane %v2849_v2, 4  ;;  %v2879_v50 = vor.u32 %v2878_v40, %v2875_v24  ;;  %v12751_v0 = vld [vmem:[%s15458_s10 + $0x7c] sm:$0xf] }
  0xf6   : > { %14241 = vmatpush3.bf16.msra.mxu0 %v14959_v47  ;;  %v2832_v47 = vrot.slane %v2831_v34, 4  ;;  %v12791_v55 = vcombine.low %v2813_v45, %v2823_v51  ;;  %v2854_v18 = vrot.slane %v2852_v4, 5  ;;  %v2892_v34 = vshll.u32 %v12746_v12, 16  ;;  %v16014_v2 = vld [vmem:[%s19084_s2 + $0x238] sm:$0xff]  }
  0xf7   : > { %14242 = vmatprep.subr.bf16.mxu0 %v14960_v10  ;;  %14209 = vmatmul.mubr.bf16.gmra.mxu1 %v12894_v16  ;;  %v12896_v16 = vcombine.low %v3608_v63, %v3611_v9  ;;  %v2884_v41 = vrot.slane %v2882_v28, 5  ;;  %v2888_v42 = vrot.slane %v2886_v29, 4  ;;  %v2880_v60 = vrot.slane %v2879_v50, 4  ;;  %v12750_v63 = vld [vmem:[%s15458_s10 + $0x78] sm:$0xf] }
  0xf8   : > { %v2837_v56 = vsel %vm15478_vm2, %v2832_v47, %v2836_v35  ;;  %14289 = vmatpush3.bf16.msra.mxu1 %v14965_v21  ;;  %14164 = vmatprep.mubr.bf16.mxu0 %v12791_v55  ;;  %v2860_v21 = vrot.slane %v2858_v5, 5  ;;  %v2855_v26 = vor.u32 %v2854_v18, %v2851_v17  ;;  %v12865_v35 = vrot.slane %v12829_v19, 9  ;;  %v12835_v17 = vld [vmem:[%s15458_s10 + $0x6c] sm:$0xe]  ;;  %v12840_v50 = vld [vmem:[%s15458_s10 + $0x80] sm:$0x1] }
  0xf9   : > { %14290 = vmatprep.subr.bf16.mxu1 %v14966_v44  ;;  %14212 = vmatprep.mubr.bf16.mxu1 %v12895_v62  ;;  %v12792_v15 = vcombine.low %v2837_v56, %v2847_v8  ;;  %v2894_v45 = vrot.slane %v2892_v34, 5  ;;  %v2889_v51 = vor.u32 %v2888_v42, %v2884_v41  ;;  %v12866_v55 = vrot.slane %v12832_v30, 9 }
  0xfa   : > { %14243 = vmatpush3.bf16.msra.mxu0 %v14960_v10  ;;  %v2868_v10 = vshll.u32 %v12743_v59, 16  ;;  %v2865_v33 = vor.u32 %v2864_v22, %v2860_v21  ;;  %v2856_v39 = vrot.slane %v2855_v26, 4  ;;  %v3615_v47 = vsel %vm15658_vm5, %v12865_v35, %v3614_v36  ;;  %v12836_v22 = vld [vmem:[%s15458_s10 + $0x70] sm:$0xf] }
  0xfb   : > { %14244 = vmatprep.subr.bf16.mxu0 %v14961_v32  ;;  %v3621_v56 = vrot.slane %v12833_v31, 5  ;;  %v2890_v61 = vrot.slane %v2889_v51, 4  ;;  %v3618_v62 = vsel %vm15658_vm5, %v3616_v48, %v3617_v3  ;;  %v2885_v8 = vsel %vm15478_vm2, %v2880_v60, %v2884_v41 }
  0xfc   : > { %14291 = vmatpush3.bf16.msra.mxu1 %v14966_v44  ;;  %v2870_v23 = vrot.slane %v2868_v10, 5  ;;  %v2866_v44 = vrot.slane %v2865_v33, 4  ;;  %v2861_v49 = vsel %vm15478_vm2, %v2856_v39, %v2860_v21  ;;  %v12897_v4 = vcombine.low %v3615_v47, %v3618_v62 }
  0xfd   : > { %14292 = vmatprep.subr.bf16.mxu1 %v14968_v1  ;;  %14165 = vmatmul.mubr.bf16.gmra.mxu0 %v12792_v15  ;;  %v3622_v5 = vsel %vm15658_vm5, %v12866_v55, %v3621_v56  ;;  %v3623_v6 = vrot.slane %v3621_v56, 4  ;;  %v2895_v9 = vsel %vm15478_vm2, %v2890_v61, %v2894_v45  ;;  %v2900_v10 = vshll.u32 %v12747_v52, 16 }
  0xfe   : > { %14245 = vmatpush3.bf16.msra.mxu0 %v14961_v32  ;;  %v12834_v32 = vld [vmem:[%s15458_s10 + $0x68] sm:$0x1]  ;;  %v2871_v54 = vsel %vm15478_vm2, %v2866_v44, %v2870_v23  ;;  %v2906_v11 = vshll.u32 %v12748_v53, 16  ;;  %v12794_v12 = vcombine.low %v2885_v8, %v2895_v9  ;;  %v2910_v15 = vshrl.u32 %v12748_v53, 16 }
  0xff   : > { %14246 = vmatprep.subr.bf16.mxu0 %v15945_v43  ;;  %14213 = vmatmul.mubr.bf16.gmra.mxu1 %v12896_v16  ;;  %v3624_v57 = vrot.slane %v12834_v32, 5  ;;  %v12793_v59 = vcombine.low %v2861_v49, %v2871_v54  ;;  %v12752_v16 = vld [vmem:[%s15458_s10 + $0x80] sm:$0x1]  ;;  %v2902_v19 = vrot.slane %v2900_v10, 5  ;;  %v2916_v21 = vshll.u32 %v12749_v58, 16 }
 0x100   : > { %14293 = vmatpush3.bf16.msra.mxu1 %v14968_v1  ;;  %v14972_v1 = vld [vmem:[%s19084_s2 + $0x1c0] sm:$0xff]   ;;  %14216 = vmatprep.mubr.bf16.mxu1 %v12897_v4  ;;  %v2908_v20 = vrot.slane %v2906_v11, 5  ;;  %v2912_v23 = vrot.slane %v2910_v15, 4  ;;  %v2921_v24 = vshrl.u32 %v12750_v63, 16  ;;  %v2924_v25 = vshll.u32 %v12750_v63, 16 }
 0x101   : > { %14294 = vmatprep.subr.bf16.mxu1 %v14969_v14  ;;  %14168 = vmatprep.mubr.bf16.mxu0 %v12793_v59  ;;  %v3625_v13 = vsel %vm15658_vm5, %v3623_v6, %v3624_v57  ;;  %v2930_v26 = vshll.u32 %v12751_v0, 16  ;;  %v2918_v29 = vrot.slane %v2916_v21, 5  ;;  %v2934_v30 = vshrl.u32 %v12751_v0, 16  ;;  %v12838_v32 = vld [vmem:[%s15458_s10 + $0x78] sm:$0xe] }
 0x102   : > { %14247 = vmatpush3.bf16.msra.mxu0 %v15945_v43  ;;  %v14971_v43 = vld [vmem:[%s19084_s2 + $0x1c8] sm:$0xff]   ;;  %v12898_v18 = vcombine.low %v3622_v5, %v3625_v13  ;;  %v2940_v31 = vshll.u32 %v12752_v16, 16  ;;  %v2913_v33 = vor.u32 %v2912_v23, %v2908_v20  ;;  %v2923_v34 = vrot.slane %v2921_v24, 4  ;;  %v12756_v63 = vld [vmem:[%s15458_s10 + $0x90] sm:$0xf] }
 0x103   : > { %14248 = vmatprep.subr.bf16.mxu0 %v14967_v7  ;;  %v2926_v35 = vrot.slane %v2924_v25, 5  ;;  %v2932_v36 = vrot.slane %v2930_v26, 5  ;;  %v2936_v40 = vrot.slane %v2934_v30, 4  ;;  %v12867_v42 = vrot.slane %v12835_v17, 9  ;;  %v12754_v57 = vld [vmem:[%s15458_s10 + $0x88] sm:$0xf] }
 0x104   : > { %14295 = vmatpush3.bf16.msra.mxu1 %v14969_v14  ;;  %v2942_v41 = vrot.slane %v2940_v31, 5  ;;  %v2914_v44 = vrot.slane %v2913_v33, 4  ;;  %v3628_v47 = vrot.slane %v12836_v22, 5  ;;  %v3631_v48 = vrot.slane %v12837_v27, 5  ;;  %v12755_v58 = vld [vmem:[%s15458_s10 + $0x8c] sm:$0x1] }
 0x105   : > { %14296 = vmatprep.subr.bf16.mxu1 %v14971_v43  ;;  %14169 = vmatmul.mubr.bf16.gmra.mxu0 %v12794_v12  ;;  %v2927_v45 = vor.u32 %v2926_v35, %v2923_v34  ;;  %v2937_v49 = vor.u32 %v2936_v40, %v2932_v36  ;;  %v12868_v51 = vrot.slane %v12838_v32, 9  ;;  %v12757_v0 = vld [vmem:[%s15458_s10 + $0x94] sm:$0xf]  ;;  %v3638_v5 = vrot.slane %v12840_v50, 5  ;;  %v12758_v15 = vld [vmem:[%s15458_s10 + $0x98] sm:$0x1] }
 0x106   : > { %14249 = vmatpush3.bf16.msra.mxu0 %v14967_v7  ;;  %v2897_v7 = vshrl.u32 %v12747_v52, 16  ;;  %v12753_v52 = vld [vmem:[%s15458_s10 + $0x84] sm:$0xf]  ;;  %v2919_v53 = vsel %vm15478_vm2, %v2914_v44, %v2918_v29  ;;  %v3629_v55 = vsel %vm15658_vm5, %v12867_v42, %v3628_v47  ;;  %v3630_v56 = vrot.slane %v3628_v47, 4  ;;  %v12842_v21 = vld [vmem:[%s15458_s10 + $0x88] sm:$0xf] }
 0x107   : > { %14250 = vmatprep.subr.bf16.mxu0 %v14970_v37  ;;  %14217 = vmatmul.mubr.bf16.gmra.mxu1 %v12898_v18  ;;  %v2928_v54 = vrot.slane %v2927_v45, 4  ;;  %v2938_v60 = vrot.slane %v2937_v49, 4  ;;  %v2945_v6 = vshrl.u32 %v12753_v52, 16  ;;  %v2948_v9 = vshll.u32 %v12753_v52, 16  ;;  %v12841_v16 = vld [vmem:[%s15458_s10 + $0x84] sm:$0xe] }
 0x108   : > { %v2899_v14 = vrot.slane %v2897_v7, 4  ;;  %14297 = vmatpush3.bf16.msra.mxu1 %v14971_v43  ;;  %v3632_v4 = vsel %vm15658_vm5, %v3630_v56, %v3631_v48  ;;  %v2954_v10 = vshll.u32 %v12754_v57, 16  ;;  %v2969_v23 = vshrl.u32 %v12756_v63, 16  ;;  %v12843_v26 = vld [vmem:[%s15458_s10 + $0x8c] sm:$0x1] }
 0x109   : > { %14298 = vmatprep.subr.bf16.mxu1 %v14972_v1  ;;  %v2943_v7 = vsel %vm15478_vm2, %v2938_v60, %v2942_v41  ;;  %v12899_v8 = vcombine.low %v3629_v55, %v3632_v4  ;;  %v2947_v13 = vrot.slane %v2945_v6, 4  ;;  %v2950_v18 = vrot.slane %v2948_v9, 5  ;;  %v12844_v31 = vld [vmem:[%s15458_s10 + $0x90] sm:$0xe]  ;;  %v12846_v49 = vld [vmem:[%s15458_s10 + $0x98] sm:$0x1] }
 0x10a   : > { %14251 = vmatpush3.bf16.msra.mxu0 %v14970_v37  ;;  %v2903_v28 = vor.u32 %v2902_v19, %v2899_v14  ;;  %v12839_v37 = vld [vmem:[%s15458_s10 + $0x7c] sm:$0xf]  ;;  %v2958_v14 = vshrl.u32 %v12754_v57, 16  ;;  %v2956_v19 = vrot.slane %v2954_v10, 5  ;;  %v2972_v24 = vshll.u32 %v12756_v63, 16 }
 0x10b   : > { %14332 = vmatprep.subr.bf16.mxu0 %v16014_v2  ;;  %v3635_v3 = vrot.slane %v12839_v37, 5  ;;  %14220 = vmatprep.mubr.bf16.mxu1 %v12899_v8  ;;  %v2978_v25 = vshll.u32 %v12757_v0, 16  ;;  %v2951_v27 = vor.u32 %v2950_v18, %v2947_v13  ;;  %v2982_v29 = vshrl.u32 %v12757_v0, 16  ;;  %v12760_v56 = vld [vmem:[%s15458_s10 + $0xa0] sm:$0xf] }
 0x10c   : > { %v2904_v39 = vrot.slane %v2903_v28, 4  ;;  %14299 = vmatpush3.bf16.msra.mxu1 %v14972_v1  ;;  %v2933_v1 = vsel %vm15478_vm2, %v2928_v54, %v2932_v36  ;;  %v2960_v22 = vrot.slane %v2958_v14, 4  ;;  %v2988_v30 = vshll.u32 %v12758_v15, 16  ;;  %v12845_v36 = vld [vmem:[%s15458_s10 + $0x94] sm:$0xf] }
 0x10d   : > { %v3636_v61 = vsel %vm15658_vm5, %v12868_v51, %v3635_v3  ;;  %v3637_v62 = vrot.slane %v3635_v3, 4  ;;  %v12796_v11 = vcombine.low %v2933_v1, %v2943_v7  ;;  %v2971_v33 = vrot.slane %v2969_v23, 4  ;;  %v12759_v3 = vld [vmem:[%s15458_s10 + $0x9c] sm:$0xf]  ;;  %v12761_v57 = vld [vmem:[%s15458_s10 + $0xa4] sm:$0x1] }
 0x10e   : > { %v2909_v43 = vsel %vm15478_vm2, %v2904_v39, %v2908_v20  ;;  %v2964_v20 = vshll.u32 %v12755_v58, 16  ;;  %v2961_v32 = vor.u32 %v2960_v22, %v2956_v19  ;;  %v2974_v34 = vrot.slane %v2972_v24, 5  ;;  %v12763_v63 = vld [vmem:[%s15458_s10 + $0xac] sm:$0xf]  ;;  %v12764_v14 = vld [vmem:[%s15458_s10 + $0xb0] sm:$0x1] }
 0x10f   : > { %v12795_v59 = vcombine.low %v2909_v43, %v2919_v53  ;;  %v3639_v12 = vsel %vm15658_vm5, %v3637_v62, %v3638_v5  ;;  %v2980_v35 = vrot.slane %v2978_v25, 5  ;;  %v2952_v37 = vrot.slane %v2951_v27, 4  ;;  %v12762_v62 = vld [vmem:[%s15458_s10 + $0xa8] sm:$0xf]  ;;  %v12847_v15 = vld [vmem:[%s15458_s10 + $0x9c] sm:$0xe] }
 0x110   : > { %v12900_v17 = vcombine.low %v3636_v61, %v3639_v12  ;;  %v2966_v28 = vrot.slane %v2964_v20, 5  ;;  %v2984_v39 = vrot.slane %v2982_v29, 4  ;;  %v2990_v40 = vrot.slane %v2988_v30, 5  ;;  %v12848_v20 = vld [vmem:[%s15458_s10 + $0xa0] sm:$0xf] }
 0x111   : > { %14172 = vmatprep.mubr.bf16.mxu0 %v12795_v59  ;;  %v12869_v41 = vrot.slane %v12841_v16, 9  ;;  %v2962_v42 = vrot.slane %v2961_v32, 4  ;;  %v2975_v44 = vor.u32 %v2974_v34, %v2971_v33  ;;  %v3642_v45 = vrot.slane %v12842_v21, 5  ;;  %v12849_v25 = vld [vmem:[%s15458_s10 + $0xa4] sm:$0x1] }
 0x112   : > { %14173 = vmatmul.mubr.bf16.gmra.mxu0 %v12796_v11  ;;  %14221 = vmatmul.mubr.bf16.gmra.mxu1 %v12900_v17  ;;  %v3645_v47 = vrot.slane %v12843_v26, 5  ;;  %v2957_v48 = vsel %vm15478_vm2, %v2952_v37, %v2956_v19  ;;  %v2985_v43 = vor.u32 %v2984_v39, %v2980_v35  ;;  %v12870_v50 = vrot.slane %v12844_v31, 9  ;;  %v12850_v30 = vld [vmem:[%s15458_s10 + $0xa8] sm:$0xe] }
 0x113   : > { %v3649_v51 = vrot.slane %v12845_v36, 5  ;;  %v2967_v52 = vsel %vm15478_vm2, %v2962_v42, %v2966_v28  ;;  %v2976_v53 = vrot.slane %v2975_v44, 4  ;;  %v3643_v54 = vsel %vm15658_vm5, %v12869_v41, %v3642_v45 }
 0x114   : > { %v3644_v55 = vrot.slane %v3642_v45, 4  ;;  %v12797_v58 = vcombine.low %v2957_v48, %v2967_v52  ;;  %v2986_v59 = vrot.slane %v2985_v43, 4  ;;  %v3652_v4 = vrot.slane %v12846_v49, 5  ;;  %v12852_v43 = vld [vmem:[%s15458_s10 + $0xb0] sm:$0x1] }
 0x115   : > { %v3650_v60 = vsel %vm15658_vm5, %v12870_v50, %v3649_v51  ;;  %v3651_v61 = vrot.slane %v3649_v51, 4  ;;  %v2981_v0 = vsel %vm15478_vm2, %v2976_v53, %v2980_v35  ;;  %v2993_v5 = vshrl.u32 %v12759_v3, 16  ;;  %v12851_v35 = vld [vmem:[%s15458_s10 + $0xac] sm:$0xf]  ;;  %v12765_v51 = vld [vmem:[%s15458_s10 + $0xb4] sm:$0xf] }
 0x116   : > { %v3646_v1 = vsel %vm15658_vm5, %v3644_v55, %v3645_v47  ;;  %14176 = vmatprep.mubr.bf16.mxu0 %v12797_v58  ;;  %v2991_v6 = vsel %vm15478_vm2, %v2986_v59, %v2990_v40  ;;  %v2996_v8 = vshll.u32 %v12759_v3, 16  ;;  %v3002_v9 = vshll.u32 %v12760_v56, 16 }
 0x117   : > { %v12901_v7 = vcombine.low %v3643_v54, %v3646_v1  ;;  %v12798_v10 = vcombine.low %v2981_v0, %v2991_v6  ;;  %v3653_v11 = vsel %vm15658_vm5, %v3651_v61, %v3652_v4  ;;  %v2995_v12 = vrot.slane %v2993_v5, 4  ;;  %v12769_v0 = vld [vmem:[%s15458_s10 + $0xc4] sm:$0xf] }
 0x118   : > { %v3006_v13 = vshrl.u32 %v12760_v56, 16  ;;  %v12902_v16 = vcombine.low %v3650_v60, %v3653_v11  ;;  %v2998_v17 = vrot.slane %v2996_v8, 5  ;;  %v3004_v18 = vrot.slane %v3002_v9, 5  ;;  %v12766_v56 = vld [vmem:[%s15458_s10 + $0xb8] sm:$0xf] }
 0x119   : > { %14224 = vmatprep.mubr.bf16.mxu1 %v12901_v7  ;;  %v3012_v19 = vshll.u32 %v12761_v57, 16  ;;  %v3017_v22 = vshrl.u32 %v12762_v62, 16  ;;  %v3020_v23 = vshll.u32 %v12762_v62, 16  ;;  %v3026_v24 = vshll.u32 %v12763_v63, 16  ;;  %v12767_v57 = vld [vmem:[%s15458_s10 + $0xbc] sm:$0x1] }
 0x11a   : > { %14177 = vmatmul.mubr.bf16.gmra.mxu0 %v12798_v10  ;;  %v3008_v21 = vrot.slane %v3006_v13, 4  ;;  %14225 = vmatmul.mubr.bf16.gmra.mxu1 %v12902_v16  ;;  %v2999_v26 = vor.u32 %v2998_v17, %v2995_v12  ;;  %v3030_v28 = vshrl.u32 %v12763_v63, 16  ;;  %v3036_v29 = vshll.u32 %v12764_v14, 16  ;;  %v12768_v63 = vld [vmem:[%s15458_s10 + $0xc0] sm:$0xf] }
 0x11b   : > { %v3014_v27 = vrot.slane %v3012_v19, 5  ;;  %v3019_v32 = vrot.slane %v3017_v22, 4  ;;  %v3022_v33 = vrot.slane %v3020_v23, 5  ;;  %v3028_v34 = vrot.slane %v3026_v24, 5  ;;  %v12770_v8 = vld [vmem:[%s15458_s10 + $0xc8] sm:$0x1] }
 0x11c   : > { %v3009_v31 = vor.u32 %v3008_v21, %v3004_v18  ;;  %v3000_v36 = vrot.slane %v2999_v26, 4  ;;  %v3032_v37 = vrot.slane %v3030_v28, 4  ;;  %v3038_v39 = vrot.slane %v3036_v29, 5  ;;  %v12853_v19 = vld [vmem:[%s15458_s10 + $0xb4] sm:$0xe] }
 0x11d   : > { %v12871_v40 = vrot.slane %v12847_v15, 9  ;;  %v3023_v42 = vor.u32 %v3022_v33, %v3019_v32  ;;  %v3656_v44 = vrot.slane %v12848_v20, 5  ;;  %v3659_v45 = vrot.slane %v12849_v25, 5  ;;  %v12854_v25 = vld [vmem:[%s15458_s10 + $0xb8] sm:$0xf] }
 0x11e   : > { %v3010_v41 = vrot.slane %v3009_v31, 4  ;;  %v3005_v47 = vsel %vm15478_vm2, %v3000_v36, %v3004_v18  ;;  %v3033_v48 = vor.u32 %v3032_v37, %v3028_v34  ;;  %v12872_v49 = vrot.slane %v12850_v30, 9  ;;  %v12855_v26 = vld [vmem:[%s15458_s10 + $0xbc] sm:$0x1]  ;;  %v12856_v32 = vld [vmem:[%s15458_s10 + $0xc0] sm:$0xe] }
 0x11f   : > { %v3663_v50 = vrot.slane %v12851_v35, 5  ;;  %v3024_v53 = vrot.slane %v3023_v42, 4  ;;  %v3657_v54 = vsel %vm15658_vm5, %v12871_v40, %v3656_v44  ;;  %v3658_v55 = vrot.slane %v3656_v44, 4  ;;  %v12857_v33 = vld [vmem:[%s15458_s10 + $0xc4] sm:$0xf] }
 0x120   : > { %v3015_v52 = vsel %vm15478_vm2, %v3010_v41, %v3014_v27  ;;  %v3034_v60 = vrot.slane %v3033_v48, 4  ;;  %v3666_v6 = vrot.slane %v12852_v43, 5  ;;  %v3041_v7 = vshrl.u32 %v12765_v51, 16 }
 0x121   : > { %v12799_v59 = vcombine.low %v3005_v47, %v3015_v52  ;;  %v3664_v61 = vsel %vm15658_vm5, %v12872_v49, %v3663_v50  ;;  %v3665_v62 = vrot.slane %v3663_v50, 4  ;;  %v3029_v4 = vsel %vm15478_vm2, %v3024_v53, %v3028_v34 }
 0x122   : > { %v3660_v5 = vsel %vm15658_vm5, %v3658_v55, %v3659_v45  ;;  %v3039_v10 = vsel %vm15478_vm2, %v3034_v60, %v3038_v39  ;;  %v3044_v12 = vshll.u32 %v12765_v51, 16  ;;  %v3050_v13 = vshll.u32 %v12766_v56, 16  ;;  %v12858_v60 = vld [vmem:[%s15458_s10 + $0xc8] sm:$0x1] }
 0x123   : > { %14180 = vmatprep.mubr.bf16.mxu0 %v12799_v59  ;;  %v12903_v11 = vcombine.low %v3657_v54, %v3660_v5  ;;  %v12800_v15 = vcombine.low %v3029_v4, %v3039_v10  ;;  %v3667_v16 = vsel %vm15658_vm5, %v3665_v62, %v3666_v6  ;;  %v3043_v17 = vrot.slane %v3041_v7, 4  ;;  %v12989_v10 = vld [vmem:[%s15458_s10 + $0x20] sm:$0x1] }
 0x124   : > { %v3054_v18 = vshrl.u32 %v12766_v56, 16  ;;  %v12904_v21 = vcombine.low %v3664_v61, %v3667_v16  ;;  %v3046_v22 = vrot.slane %v3044_v12, 5  ;;  %v3052_v23 = vrot.slane %v3050_v13, 5 }
 0x125   : > { %14228 = vmatprep.mubr.bf16.mxu1 %v12903_v11  ;;  %v3060_v24 = vshll.u32 %v12767_v57, 16  ;;  %14181 = vmatmul.mubr.bf16.gmra.mxu0 %v12800_v15  ;;  %v3065_v29 = vshrl.u32 %v12768_v63, 16  ;;  %v3068_v30 = vshll.u32 %v12768_v63, 16  ;;  %v3074_v31 = vshll.u32 %v12769_v0, 16  ;;  %v12987_v63 = vld [vmem:[%s15458_s10 + $0x18] sm:$0xf] }
 0x126   : > { %v3056_v28 = vrot.slane %v3054_v18, 4  ;;  %14229 = vmatmul.mubr.bf16.gmra.mxu1 %v12904_v21  ;;  %v3047_v35 = vor.u32 %v3046_v22, %v3043_v17  ;;  %v3078_v37 = vshrl.u32 %v12769_v0, 16  ;;  %v3084_v39 = vshll.u32 %v12770_v8, 16  ;;  %v12988_v8 = vld [vmem:[%s15458_s10 + $0x1c] sm:$0xf] }
 0x127   : > { %v3062_v36 = vrot.slane %v3060_v24, 5  ;;  %v3067_v42 = vrot.slane %v3065_v29, 4  ;;  %v3070_v44 = vrot.slane %v3068_v30, 5  ;;  %v3076_v45 = vrot.slane %v3074_v31, 5  ;;  %v12990_v17 = vld [vmem:[%s15458_s10 + $0x24] sm:$0xf] }
 0x128   : > { %v3057_v41 = vor.u32 %v3056_v28, %v3052_v23  ;;  %v3048_v48 = vrot.slane %v3047_v35, 4  ;;  %v3080_v43 = vrot.slane %v3078_v37, 4  ;;  %v3086_v49 = vrot.slane %v3084_v39, 5 }
 0x129   : > { %v12873_v50 = vrot.slane %v12853_v19, 9  ;;  %v3071_v53 = vor.u32 %v3070_v44, %v3067_v42  ;;  %v3670_v54 = vrot.slane %v12854_v25, 5  ;;  %v3673_v55 = vrot.slane %v12855_v26, 5  ;;  %v12992_v42 = vld [vmem:[%s15458_s10 + $0x2c] sm:$0x1] }
 0x12a   : > { %v3058_v52 = vrot.slane %v3057_v41, 4  ;;  %v3053_v57 = vsel %vm15478_vm2, %v3048_v48, %v3052_v23  ;;  %v3081_v59 = vor.u32 %v3080_v43, %v3076_v45  ;;  %v12874_v61 = vrot.slane %v12856_v32, 9  ;;  %v14973_v23 = vld [vmem:[%s15458_s10 + $0x18] sm:$0xff]  }
 0x12b   : > { %v3677_v62 = vrot.slane %v12857_v33, 5  ;;  %v3072_v5 = vrot.slane %v3071_v53, 4  ;;  %v3671_v6 = vsel %vm15658_vm5, %v12873_v50, %v3670_v54  ;;  %v3672_v7 = vrot.slane %v3670_v54, 4 }
 0x12c   : > { %v3063_v4 = vsel %vm15478_vm2, %v3058_v52, %v3062_v36  ;;  %v3082_v13 = vrot.slane %v3081_v59, 4  ;;  %v3680_v22 = vrot.slane %v12858_v60, 5  ;;  %v4568_v29 = vshrl.u32 %v12987_v63, 16 }
 0x12d   : > { %v16091_v3 = vpop.f32.mrf.mxu0  ;;  %v12801_v12 = vcombine.low %v3053_v57, %v3063_v4  ;;  %v3678_v15 = vsel %vm15658_vm5, %v12874_v61, %v3677_v62  ;;  %v3679_v16 = vrot.slane %v3677_v62, 4  ;;  %v3077_v19 = vsel %vm15478_vm2, %v3072_v5, %v3076_v45  ;;  %v12993_v57 = vld [vmem:[%s15458_s10 + $0x30] sm:$0xf]  ;;  %v14974_v4 = vld [vmem:[%s15458_s10 + $0x24] sm:$0xff]  }
 0x12e   : > { %v16099_v58 = vpop.f32.mrf.mxu1  ;;  %v3674_v21 = vsel %vm15658_vm5, %v3672_v7, %v3673_v55  ;;  %v3087_v26 = vsel %vm15478_vm2, %v3082_v13, %v3086_v49  ;;  %v4571_v30 = vshll.u32 %v12987_v63, 16  ;;  %v4577_v35 = vshll.u32 %v12988_v8, 16 }
 0x12f   : > { %v16105_v1 = vpop.f32.mrf.mxu0  ;;  %v16165_v24 = vadd.f32 %v16099_v58, %v16091_v3  ;;  %14184 = vmatprep.mubr.bf16.mxu0 %v12801_v12  ;;  %v12905_v28 = vcombine.low %v3671_v6, %v3674_v21  ;;  %v12802_v32 = vcombine.low %v3077_v19, %v3087_v26  ;;  %v3681_v33 = vsel %vm15658_vm5, %v3679_v16, %v3680_v22  ;;  %v12991_v3 = vld [vmem:[%s15458_s10 + $0x28] sm:$0xf]  ;;  %v14976_v19 = vld [vmem:[%s15458_s10 + $0x30] sm:$0xff]   ;;  %v12996_v21 = vld [vmem:[%s15458_s10 + $0x3c] sm:$0xf] }
 0x130   : > { %v16112_v9 = vpop.f32.mrf.mxu1  ;;  %v4581_v36 = vshrl.u32 %v12988_v8, 16  ;;  %v12906_v58 = vcombine.low %v3678_v15, %v3681_v33  ;;  %v4570_v37 = vrot.slane %v4568_v29, 4  ;;  %v4573_v39 = vrot.slane %v4571_v30, 5 }
 0x131   : > { %v16116_v14 = vpop.f32.mrf.mxu0  ;;  %14232 = vmatprep.mubr.bf16.mxu1 %v12905_v28  ;;  %v4587_v41 = vshll.u32 %v12989_v10, 16  ;;  %14185 = vmatmul.mubr.bf16.gmra.mxu0 %v12802_v32  ;;  %v4579_v45 = vrot.slane %v4577_v35, 5  ;;  %v16181_v43 = vadd.f32 %v16112_v9, %v16105_v1  ;;  %v4592_v49 = vshrl.u32 %v12990_v17, 16  ;;  %v12994_v9 = vld [vmem:[%s15458_s10 + $0x34] sm:$0xf] }
 0x132   : > { %v16121_v20 = vpop.f32.mrf.mxu1  ;;  %v4583_v48 = vrot.slane %v4581_v36, 4  ;;  %14233 = vmatmul.mubr.bf16.gmra.mxu1 %v12906_v58  ;;  %14252 = vmatprep.mubr.bf16.mxu0 %v14973_v23  ;;  %v4574_v52 = vor.u32 %v4573_v39, %v4570_v37  ;;  %v4595_v54 = vshll.u32 %v12990_v17, 16  ;;  %v4601_v55 = vshll.u32 %v12991_v3, 16  ;;  %v12995_v10 = vld [vmem:[%s15458_s10 + $0x38] sm:$0x1] }
 0x133   : > { %v16125_v27 = vpop.f32.mrf.mxu0  ;;  %v4589_v53 = vrot.slane %v4587_v41, 5  ;;  %v4594_v61 = vrot.slane %v4592_v49, 4  ;;  %v4605_v62 = vshrl.u32 %v12991_v3, 16  ;;  %v4611_v1 = vshll.u32 %v12992_v42, 16  ;;  %v12997_v42 = vld [vmem:[%s15458_s10 + $0x40] sm:$0xf] }
 0x134   : > { %v16129_v34 = vpop.f32.mrf.mxu1  ;;  %v4584_v60 = vor.u32 %v4583_v48, %v4579_v45  ;;  %v4575_v5 = vrot.slane %v4574_v52, 4  ;;  %v4597_v6 = vrot.slane %v4595_v54, 5  ;;  %v4603_v7 = vrot.slane %v4601_v55, 5 }
 0x135   : > { %v16131_v40 = vpop.f32.mrf.mxu0  ;;  %v16194_v8 = vadd.f32 %v16121_v20, %v16116_v14  ;;  %v4607_v15 = vrot.slane %v4605_v62, 4  ;;  %v4613_v16 = vrot.slane %v4611_v1, 5  ;;  %v16201_v17 = vadd.f32 %v16129_v34, %v16125_v27  ;;  %v14978_v20 = vld [vmem:[%s19084_s2 + $0x230] sm:$0xff]  }
 0x136   : > { %v16133_v47 = vpop.f32.mrf.mxu1  ;;  %v4585_v13 = vrot.slane %v4584_v60, 4  ;;  %v4580_v23 = vsel %vm15478_vm2, %v4575_v5, %v4579_v45  ;;  %v4598_v26 = vor.u32 %v4597_v6, %v4594_v61  ;;  %v4616_v28 = vshrl.u32 %v12993_v57, 16  ;;  %v14977_v60 = vld [vmem:[%s15458_s10 + $0x3c] sm:$0xff]  }
 0x137   : > { %v16135_v51 = vpop.f32.mrf.mxu0  ;;  %v16211_v14 = vadd.f32 %v16133_v47, %v16131_v40  ;;  %v4608_v34 = vor.u32 %v4607_v15, %v4603_v7  ;;  %v4619_v30 = vshll.u32 %v12993_v57, 16  ;;  %v4625_v32 = vshll.u32 %v12994_v9, 16 }
 0x138   : > { %v16137_v56 = vpop.f32.mrf.mxu1  ;;  %v4590_v27 = vsel %vm15478_vm2, %v4585_v13, %v4589_v53  ;;  %v4599_v36 = vrot.slane %v4598_v26, 4  ;;  %v4618_v40 = vrot.slane %v4616_v28, 4  ;;  %v4629_v47 = vshrl.u32 %v12994_v9, 16  ;;  %v12998_v53 = vld [vmem:[%s15458_s10 + $0x44] sm:$0x1] }
 0x139   : > { %v16143_v0 = vpop.f32.mrf.mxu0  ;;  %v13051_v35 = vcombine.low %v4580_v23, %v4590_v27  ;;  %14253 = vmatmul.mubr.bf16.vlgmr.msra.gmra.mxu0 %v14974_v4  ;;  %v4609_v58 = vrot.slane %v4608_v34, 4  ;;  %v4621_v37 = vrot.slane %v4619_v30, 5  ;;  %v4627_v39 = vrot.slane %v4625_v32, 5  ;;  %v14984_v23 = vld [vmem:[%s19084_s2 + $0x220] sm:$0xff]  }
 0x13a   : > { %v16151_v11 = vpop.f32.mrf.mxu1  ;;  %v4635_v41 = vshll.u32 %v12995_v10, 16  ;;  %14333 = vmatpush3.bf16.msra.mxu0 %v16014_v2  ;;  %v4604_v48 = vsel %vm15478_vm2, %v4599_v36, %v4603_v7  ;;  %v4631_v49 = vrot.slane %v4629_v47, 4  ;;  %v16232_v52 = vadd.f32 %v16137_v56, %v16135_v51  ;;  %14256 = vmatprep.mubr.bf16.mxu0 %v14976_v19  ;;  %v14981_v51 = vld [vmem:[%s19084_s2 + $0x228] sm:$0xff]  }
 0x13b   : > { %v16156_v18 = vpop.f32.mrf.mxu0  ;;  %14300 = vmatprep.mubr.bf16.mxu1 %v13051_v35  ;;  %v4640_v54 = vshrl.u32 %v12996_v21, 16  ;;  %v4614_v57 = vsel %vm15478_vm2, %v4609_v58, %v4613_v16  ;;  %14334 = vmatprep.subr.bf16.mxu0 %v14978_v20  ;;  %v4622_v2 = vor.u32 %v4621_v37, %v4618_v40  ;;  %v4643_v62 = vshll.u32 %v12996_v21, 16  ;;  %v12999_v56 = vld [vmem:[%s15458_s10 + $0x48] sm:$0xf]  ;;  %v13000_v10 = vld [vmem:[%s15458_s10 + $0x4c] sm:$0xf] }
 0x13c   : > { %v16167_v25 = vpop.f32.mrf.mxu1  ;;  %v4637_v61 = vrot.slane %v4635_v41, 5  ;;  %v13052_v9 = vcombine.low %v4604_v48, %v4614_v57  ;;  %v4632_v4 = vor.u32 %v4631_v49, %v4627_v39  ;;  %v4649_v6 = vshll.u32 %v12997_v42, 16  ;;  %v14979_v7 = vld [vmem:[%s15458_s10 + $0x48] sm:$0xff]   ;;  %v13002_v49 = vld [vmem:[%s15458_s10 + $0x54] sm:$0xf] }
 0x13d   : > { %v16171_v31 = vpop.f32.mrf.mxu0  ;;  %v4642_v5 = vrot.slane %v4640_v54, 4  ;;  %v4623_v15 = vrot.slane %v4622_v2, 4  ;;  %v4645_v16 = vrot.slane %v4643_v62, 5  ;;  %v4653_v19 = vshrl.u32 %v12997_v42, 16 }
 0x13e   : > { %v16183_v50 = vpop.f32.mrf.mxu1  ;;  %v4659_v21 = vshll.u32 %v12998_v53, 16  ;;  %14301 = vmatmul.mubr.bf16.vlgmr.msra.gmra.mxu1 %v13052_v9  ;;  %v4633_v28 = vrot.slane %v4632_v4, 4  ;;  %14335 = vmatpush3.bf16.msra.mxu0 %v14978_v20  ;;  %v4651_v27 = vrot.slane %v4649_v6, 5  ;;  %v16257_v34 = vadd.f32 %v16151_v11, %v16143_v0  ;;  %v13001_v20 = vld [vmem:[%s15458_s10 + $0x50] sm:$0x1]  ;;  %v14980_v4 = vld [vmem:[%s15458_s10 + $0x54] sm:$0xff]  }
 0x13f   : > { %v16177_v44 = vpop.f32.mrf.mxu0  ;;  %v16261_v30 = vadd.f32 %v16167_v25, %v16156_v18  ;;  %v4628_v35 = vsel %vm15478_vm2, %v4623_v15, %v4627_v39  ;;  %v4646_v36 = vor.u32 %v4645_v16, %v4642_v5  ;;  %v4655_v40 = vrot.slane %v4653_v19, 4  ;;  %14336 = vmatprep.subr.bf16.mxu0 %v14981_v51  ;;  %v13003_v53 = vld [vmem:[%s15458_s10 + $0x58] sm:$0xf]  ;;  %v14982_v19 = vld [vmem:[%s15458_s10 + $0x60] sm:$0xff]  }
 0x140   : > { %v16189_v63 = vpop.f32.mrf.mxu1  ;;  %v4661_v47 = vrot.slane %v4659_v21, 5  ;;  %v4638_v0 = vsel %vm15478_vm2, %v4633_v28, %v4637_v61  ;;  %v16274_v11 = vadd.f32 %v16183_v50, %v16171_v31  ;;  %v4664_v18 = vshrl.u32 %v12999_v56, 16  ;;  %v14987_v31 = vld [vmem:[%s19084_s2 + $0x218] sm:$0xff]  }
 0x141   : > { %v16186_v59 = vpop.f32.mrf.mxu0  ;;  %v4667_v25 = vshll.u32 %v12999_v56, 16  ;;  %14257 = vmatmul.mubr.bf16.gmra.mxu0 %v14977_v60  ;;  %v13053_v39 = vcombine.low %v4628_v35, %v4638_v0  ;;  %v4647_v41 = vrot.slane %v4646_v36, 4  ;;  %v4656_v42 = vor.u32 %v4655_v40, %v4651_v27  ;;  %v13004_v60 = vld [vmem:[%s15458_s10 + $0x5c] sm:$0x1]  ;;  %v13005_v40 = vld [vmem:[%s15458_s10 + $0x60] sm:$0xf] }
 0x142   : > { %v16205_v22 = vpop.f32.mrf.mxu1  ;;  %v4673_v48 = vshll.u32 %v13000_v10, 16  ;;  %14260 = vmatprep.mubr.bf16.mxu0 %v14979_v7  ;;  %v4666_v50 = vrot.slane %v4664_v18, 4  ;;  %v4677_v2 = vshrl.u32 %v13000_v10, 16  ;;  %v4683_v61 = vshll.u32 %v13001_v20, 16  ;;  %14337 = vmatpush3.bf16.msra.mxu0 %v14981_v51 }
 0x143   : > { %v16197_v12 = vpop.f32.mrf.mxu0  ;;  %v4669_v57 = vrot.slane %v4667_v25, 5  ;;  %14304 = vmatprep.mubr.bf16.mxu1 %v13053_v39  ;;  %v4652_v56 = vsel %vm15478_vm2, %v4647_v41, %v4651_v27  ;;  %v4657_v9 = vrot.slane %v4656_v42, 4  ;;  %v16293_v6 = vadd.f32 %v16189_v63, %v16177_v44  ;;  %14338 = vmatprep.subr.bf16.mxu0 %v14984_v23  ;;  %v14990_v63 = vld [vmem:[%s19084_s2 + $0x210] sm:$0xff]  }
 0x144   : > { %v16220_v33 = vpop.f32.mrf.mxu1  ;;  %v4675_v5 = vrot.slane %v4673_v48, 5  ;;  %v4679_v51 = vrot.slane %v4677_v2, 4  ;;  %v4685_v15 = vrot.slane %v4683_v61, 5  ;;  %v4688_v16 = vshrl.u32 %v13002_v49, 16 }
 0x145   : > { %v16216_v29 = vpop.f32.mrf.mxu0  ;;  %v4670_v10 = vor.u32 %v4669_v57, %v4666_v50  ;;  %v4662_v28 = vsel %vm15478_vm2, %v4657_v9, %v4661_v47  ;;  %v4691_v27 = vshll.u32 %v13002_v49, 16  ;;  %v4697_v35 = vshll.u32 %v13003_v53, 16  ;;  %v13006_v49 = vld [vmem:[%s15458_s10 + $0x64] sm:$0xf] }
 0x146   : > { %v16225_v45 = vpop.f32.mrf.mxu1  ;;  %v4701_v36 = vshrl.u32 %v13003_v53, 16  ;;  %v13054_v20 = vcombine.low %v4652_v56, %v4662_v28  ;;  %v4680_v18 = vor.u32 %v4679_v51, %v4675_v5  ;;  %v4690_v25 = vrot.slane %v4688_v16, 4  ;;  %14339 = vmatpush3.bf16.msra.mxu0 %v14984_v23  ;;  %v13008_v51 = vld [vmem:[%s15458_s10 + $0x6c] sm:$0xf]  ;;  %v13009_v16 = vld [vmem:[%s15458_s10 + $0x70] sm:$0xf] }
 0x147   : > { %v16222_v3 = vpop.f32.mrf.mxu0  ;;  %v4671_v0 = vrot.slane %v4670_v10, 4  ;;  %v4693_v41 = vrot.slane %v4691_v27, 5  ;;  %v4699_v47 = vrot.slane %v4697_v35, 5  ;;  %v4707_v48 = vshll.u32 %v13004_v60, 16  ;;  %14340 = vmatprep.subr.bf16.mxu0 %v14987_v31  ;;  %v13007_v10 = vld [vmem:[%s15458_s10 + $0x68] sm:$0x1] }
 0x148   : > { %v16244_v1 = vpop.f32.mrf.mxu1  ;;  %v4703_v42 = vrot.slane %v4701_v36, 4  ;;  %14305 = vmatmul.mubr.bf16.gmra.mxu1 %v13054_v20  ;;  %v4681_v57 = vrot.slane %v4680_v18, 4  ;;  %v16317_v23 = vadd.f32 %v16205_v22, %v16186_v59  ;;  %v16321_v2 = vadd.f32 %v16220_v33, %v16197_v12  ;;  %v13010_v20 = vld [vmem:[%s15458_s10 + $0x74] sm:$0x1] }
 0x149   : > { %v16235_v55 = vpop.f32.mrf.mxu0  ;;  %v4676_v50 = vsel %vm15478_vm2, %v4671_v0, %v4675_v5  ;;  %14261 = vmatmul.mubr.bf16.gmra.mxu0 %v14980_v4  ;;  %v4694_v60 = vor.u32 %v4693_v41, %v4690_v25  ;;  %v4709_v9 = vrot.slane %v4707_v48, 5  ;;  %v16327_v5 = vadd.f32 %v16225_v45, %v16216_v29  ;;  %v14983_v45 = vld [vmem:[%s15458_s10 + $0x6c] sm:$0xff]  }
 0x14a   : > { %v16253_v26 = vpop.f32.mrf.mxu1  ;;  %v4704_v56 = vor.u32 %v4703_v42, %v4699_v47  ;;  %v4686_v59 = vsel %vm15478_vm2, %v4681_v57, %v4685_v15  ;;  %14264 = vmatprep.mubr.bf16.mxu0 %v14982_v19  ;;  %v4712_v12 = vshrl.u32 %v13005_v40, 16  ;;  %v4715_v22 = vshll.u32 %v13005_v40, 16  ;;  %14341 = vmatpush3.bf16.msra.mxu0 %v14987_v31  ;;  %v14993_v15 = vld [vmem:[%s19084_s2 + $0x208] sm:$0xff]  }
 0x14b   : > { %v16248_v13 = vpop.f32.mrf.mxu0  ;;  %v4721_v33 = vshll.u32 %v13006_v49, 16  ;;  %v13055_v27 = vcombine.low %v4676_v50, %v4686_v59  ;;  %v4695_v35 = vrot.slane %v4694_v60, 4  ;;  %v4725_v36 = vshrl.u32 %v13006_v49, 16  ;;  %14342 = vmatprep.subr.bf16.mxu0 %v14990_v63  ;;  %v14985_v50 = vld [vmem:[%s15458_s10 + $0x78] sm:$0xff]  }
 0x14c   : > { %v16268_v58 = vpop.f32.mrf.mxu1  ;;  %v4705_v29 = vrot.slane %v4704_v56, 4  ;;  %v4714_v19 = vrot.slane %v4712_v12, 4  ;;  %v4717_v40 = vrot.slane %v4715_v22, 5  ;;  %v4731_v31 = vshll.u32 %v13007_v10, 16 }
 0x14d   : > { %v16263_v32 = vpop.f32.mrf.mxu0  ;;  %v4723_v0 = vrot.slane %v4721_v33, 5  ;;  %14308 = vmatprep.mubr.bf16.mxu1 %v13055_v27  ;;  %v4700_v41 = vsel %vm15478_vm2, %v4695_v35, %v4699_v47  ;;  %v4727_v48 = vrot.slane %v4725_v36, 4  ;;  %v16353_v49 = vadd.f32 %v16244_v1, %v16222_v3  ;;  %v14996_v3 = vld [vmem:[%s19084_s2 + $0x200] sm:$0xff]  }
 0x14e   : > { %v16280_v54 = vpop.f32.mrf.mxu1  ;;  %v4710_v42 = vsel %vm15478_vm2, %v4705_v29, %v4709_v9  ;;  %v4718_v60 = vor.u32 %v4717_v40, %v4714_v19  ;;  %v4733_v56 = vrot.slane %v4731_v31, 5  ;;  %v4736_v10 = vshrl.u32 %v13008_v51, 16  ;;  %14343 = vmatpush3.bf16.msra.mxu0 %v14990_v63  ;;  %v13011_v29 = vld [vmem:[%s15458_s10 + $0x78] sm:$0xf] }
 0x14f   : > { %v16276_v37 = vpop.f32.mrf.mxu0  ;;  %v13056_v57 = vcombine.low %v4700_v41, %v4710_v42  ;;  %v4728_v47 = vor.u32 %v4727_v48, %v4723_v0  ;;  %v4739_v22 = vshll.u32 %v13008_v51, 16  ;;  %v4745_v33 = vshll.u32 %v13009_v16, 16  ;;  %14344 = vmatprep.subr.bf16.mxu0 %v14993_v15  ;;  %v13012_v41 = vld [vmem:[%s15458_s10 + $0x7c] sm:$0xf] }
 0x150   : > { %v16295_v7 = vpop.f32.mrf.mxu1  ;;  %v4749_v9 = vshrl.u32 %v13009_v16, 16  ;;  %v4719_v1 = vrot.slane %v4718_v60, 4  ;;  %v4738_v27 = vrot.slane %v4736_v10, 4  ;;  %v4755_v35 = vshll.u32 %v13010_v20, 16 }
 0x151   : > { %v16286_v62 = vpop.f32.mrf.mxu0  ;;  %14309 = vmatmul.mubr.bf16.gmra.mxu1 %v13056_v57  ;;  %v16365_v63 = vadd.f32 %v16253_v26, %v16235_v55  ;;  %14265 = vmatmul.mubr.bf16.gmra.mxu0 %v14983_v45  ;;  %v4729_v16 = vrot.slane %v4728_v47, 4  ;;  %v4741_v19 = vrot.slane %v4739_v22, 5  ;;  %v4747_v40 = vrot.slane %v4745_v33, 5  ;;  %v13013_v45 = vld [vmem:[%s15458_s10 + $0x80] sm:$0x1] }
 0x152   : > { %v16303_v44 = vpop.f32.mrf.mxu1  ;;  %v4751_v31 = vrot.slane %v4749_v9, 4  ;;  %v4724_v20 = vsel %vm15478_vm2, %v4719_v1, %v4723_v0  ;;  %v4757_v42 = vrot.slane %v4755_v35, 5  ;;  %v16377_v55 = vadd.f32 %v16268_v58, %v16248_v13  ;;  %14268 = vmatprep.mubr.bf16.mxu0 %v14985_v50  ;;  %14345 = vmatpush3.bf16.msra.mxu0 %v14993_v15  ;;  %v13014_v47 = vld [vmem:[%s15458_s10 + $0x84] sm:$0xf]  ;;  %v13016_v33 = vld [vmem:[%s15458_s10 + $0x8c] sm:$0x1] }
 0x153   : > { %v16298_v21 = vpop.f32.mrf.mxu0  ;;  %v16381_v26 = vadd.f32 %v16280_v54, %v16263_v32  ;;  %v4734_v57 = vsel %vm15478_vm2, %v4729_v16, %v4733_v56  ;;  %v4742_v0 = vor.u32 %v4741_v19, %v4738_v27  ;;  %v4760_v10 = vshrl.u32 %v13011_v29, 16  ;;  %14346 = vmatprep.subr.bf16.mxu0 %v14996_v3  ;;  %v14986_v58 = vld [vmem:[%s15458_s10 + $0x84] sm:$0xff]  }
 0x154   : > { %19115 = vst [vmem:[#allocation15_spill] sm:$0xff] %v16298_v21  ;;  %v16311_v53 = vpop.f32.mrf.mxu1  ;;  %v4752_v60 = vor.u32 %v4751_v31, %v4747_v40  ;;  %v13057_v13 = vcombine.low %v4724_v20, %v4734_v57  ;;  %v4763_v50 = vshll.u32 %v13011_v29, 16  ;;  %v4769_v22 = vshll.u32 %v13012_v41, 16  ;;  %v13015_v54 = vld [vmem:[%s15458_s10 + $0x88] sm:$0xf]  ;;  %v14988_v20 = vld [vmem:[%s15458_s10 + $0x90] sm:$0xff]  }
 0x155   : > { %v16308_v39 = vpop.f32.mrf.mxu0  ;;  %19116 = vst [vmem:[#allocation16_spill] sm:$0xff] %v16311_v53  ;;  %19119 = vst [vmem:[#allocation19_spill] sm:$0xff] %v16381_v26  ;;  %v4773_v32 = vshrl.u32 %v13012_v41, 16  ;;  %v4743_v1 = vrot.slane %v4742_v0, 4  ;;  %v4762_v56 = vrot.slane %v4760_v10, 4  ;;  %v4779_v27 = vshll.u32 %v13013_v45, 16 }
 0x156   : > { %v16334_v4 = vpop.f32.mrf.mxu1  ;;  %v4753_v35 = vrot.slane %v4752_v60, 4  ;;  %14312 = vmatprep.mubr.bf16.mxu1 %v13057_v13  ;;  %v4765_v16 = vrot.slane %v4763_v50, 5  ;;  %v4771_v19 = vrot.slane %v4769_v22, 5  ;;  %v16398_v29 = vadd.f32 %v16295_v7, %v16276_v37  ;;  %14347 = vmatpush3.bf16.msra.mxu0 %v14996_v3  ;;  %v13027_v21 = vld [vmem:[%s15458_s10 + $0xb8] sm:$0xf] }
 0x157   : > { %v16323_v61 = vpop.f32.mrf.mxu0  ;;  %v4775_v31 = vrot.slane %v4773_v32, 4  ;;  %v4748_v0 = vsel %vm15478_vm2, %v4743_v1, %v4747_v40  ;;  %v4781_v60 = vrot.slane %v4779_v27, 5  ;;  %v4784_v10 = vshrl.u32 %v13014_v47, 16  ;;  %v13017_v1 = vld [vmem:[%s15458_s10 + $0x90] sm:$0xf] }
 0x158   : > { %v16343_v18 = vpop.f32.mrf.mxu1  ;;  %19121 = vst [vmem:[#allocation21_spill] sm:$0xff] %v16398_v29  ;;  %v4758_v45 = vsel %vm15478_vm2, %v4753_v35, %v4757_v42  ;;  %v4766_v50 = vor.u32 %v4765_v16, %v4762_v56  ;;  %v4787_v37 = vshll.u32 %v13014_v47, 16  ;;  %v4803_v40 = vshll.u32 %v13016_v33, 16  ;;  %v13018_v27 = vld [vmem:[%s15458_s10 + $0x94] sm:$0xf] }
 0x159   : > { %v16336_v28 = vpop.f32.mrf.mxu0  ;;  %v13058_v13 = vcombine.low %v4748_v0, %v4758_v45  ;;  %v4776_v22 = vor.u32 %v4775_v31, %v4771_v19  ;;  %14269 = vmatmul.mubr.bf16.gmra.mxu0 %v14986_v58  ;;  %v4786_v3 = vrot.slane %v4784_v10, 4  ;;  %v16416_v47 = vadd.f32 %v16303_v44, %v16286_v62  ;;  %v14989_v0 = vld [vmem:[%s15458_s10 + $0x9c] sm:$0xff]   ;;  %v13019_v45 = vld [vmem:[%s15458_s10 + $0x98] sm:$0x1] }
 0x15a   : > { %v16356_v59 = vpop.f32.mrf.mxu1  ;;  %v4767_v42 = vrot.slane %v4766_v50, 4  ;;  %v4789_v56 = vrot.slane %v4787_v37, 5  ;;  %14272 = vmatprep.mubr.bf16.mxu0 %v14988_v20  ;;  %v4805_v31 = vrot.slane %v4803_v40, 5  ;;  %v16431_v44 = vadd.f32 %v16334_v4, %v16308_v39  ;;  %v13020_v20 = vld [vmem:[%s15458_s10 + $0x9c] sm:$0xf]  ;;  %v14991_v50 = vld [vmem:[%s15458_s10 + $0xa8] sm:$0xff]  }
 0x15b   : > { %v16345_v25 = vpop.f32.mrf.mxu0  ;;  %14313 = vmatmul.mubr.bf16.gmra.mxu1 %v13058_v13  ;;  %v4777_v35 = vrot.slane %v4776_v22, 4  ;;  %19122 = vst [vmem:[#allocation22_spill] sm:$0xff] %v16416_v47  ;;  %v13021_v40 = vld [vmem:[%s15458_s10 + $0xa0] sm:$0xf]  ;;  %v4827_v53 = vshll.u32 %v13019_v45, 16 }
 0x15c   : > { %19117 = vst [vmem:[#allocation17_spill] sm:$0xff] %v16345_v25  ;;  %v16368_v36 = vpop.f32.mrf.mxu1  ;;  %v4772_v10 = vsel %vm15478_vm2, %v4767_v42, %v4771_v19  ;;  %v4790_v62 = vor.u32 %v4789_v56, %v4786_v3  ;;  %19124 = vst [vmem:[#allocation24_spill] sm:$0xff] %v16431_v44  ;;  %v4817_v19 = vshll.u32 %v13018_v27, 16  ;;  %v4821_v42 = vshrl.u32 %v13018_v27, 16 }
 0x15d   : > { %v16358_v12 = vpop.f32.mrf.mxu0  ;;  %19118 = vst [vmem:[#allocation18_spill] sm:$0xff] %v16368_v36  ;;  %v4797_v36 = vshrl.u32 %v13015_v54, 16  ;;  %v4782_v13 = vsel %vm15478_vm2, %v4777_v35, %v4781_v60  ;;  %v16442_v35 = vadd.f32 %v16343_v18, %v16323_v61 }
 0x15e   : > { %v16392_v9 = vpop.f32.mrf.mxu1  ;;  %v13059_v22 = vcombine.low %v4772_v10, %v4782_v13  ;;  %v4791_v25 = vrot.slane %v4790_v62, 4  ;;  %v4819_v56 = vrot.slane %v4817_v19, 5  ;;  %v4829_v10 = vrot.slane %v4827_v53, 5  ;;  %v13022_v13 = vld [vmem:[%s15458_s10 + $0xa4] sm:$0x1] }
 0x15f   : > { %v16370_v51 = vpop.f32.mrf.mxu0  ;;  %v4799_v33 = vrot.slane %v4797_v36, 4  ;;  %v4811_v36 = vshll.u32 %v13017_v1, 16  ;;  %19126 = vst [vmem:[#allocation26_spill] sm:$0xff] %v16442_v35  ;;  %v13029_v35 = vld [vmem:[%s15458_s10 + $0xc0] sm:$0xf] }
 0x160   : > { %v16401_v41 = vpop.f32.mrf.mxu1  ;;  %14316 = vmatprep.mubr.bf16.mxu1 %v13059_v22  ;;  %v4832_v22 = vshrl.u32 %v13020_v20, 16 }
 0x161   : > { %v16384_v48 = vpop.f32.mrf.mxu0  ;;  %v4813_v4 = vrot.slane %v4811_v36, 5  ;;  %14273 = vmatmul.mubr.bf16.gmra.mxu0 %v14989_v0  ;;  %v13023_v0 = vld [vmem:[%s15458_s10 + $0xa8] sm:$0xf] }
 0x162   : > { %v16409_v7 = vpop.f32.mrf.mxu1  ;;  %14276 = vmatprep.mubr.bf16.mxu0 %v14991_v50  ;;  %v4834_v19 = vrot.slane %v4832_v22, 4  ;;  %v13024_v50 = vld [vmem:[%s15458_s10 + $0xac] sm:$0xf]  ;;  %v13025_v22 = vld [vmem:[%s15458_s10 + $0xb0] sm:$0x1] }
 0x163   : > { %v16394_v15 = vpop.f32.mrf.mxu0 }
 0x164   : > { %19120 = vst [vmem:[#allocation20_spill] sm:$0xff] %v16394_v15  ;;  %v4793_v15 = vshll.u32 %v13015_v54, 16  ;;  %v16419_v58 = vpop.f32.mrf.mxu1 }
 0x165   : > { %v16403_v57 = vpop.f32.mrf.mxu0  ;;  %19123 = vst [vmem:[#allocation23_spill] sm:$0xff] %v16419_v58 }
 0x166   : > { %v4795_v54 = vrot.slane %v4793_v15, 5  ;;  %v4808_v15 = vshrl.u32 %v13017_v1, 16  ;;  %v16438_v60 = vpop.f32.mrf.mxu1 }
 0x167   : > { %v16411_v32 = vpop.f32.mrf.mxu0 }
 0x168   : > { %v4800_v37 = vor.u32 %v4799_v33, %v4795_v54  ;;  %v4810_v39 = vrot.slane %v4808_v15, 4  ;;  %v4796_v1 = vsel %vm15478_vm2, %v4791_v25, %v4795_v54  ;;  %v4823_v33 = vrot.slane %v4821_v42, 4  ;;  %v16447_v62 = vpop.f32.mrf.mxu1 }
 0x169   : > { %v16421_v16 = vpop.f32.mrf.mxu0  ;;  %v4841_v25 = vshll.u32 %v13021_v40, 16  ;;  %v4845_v54 = vshrl.u32 %v13021_v40, 16  ;;  %v4851_v42 = vshll.u32 %v13022_v13, 16  ;;  %v16460_v40 = vadd.f32 %v16356_v59, %v16336_v28 }
 0x16a   : > { %v4801_v3 = vrot.slane %v4800_v37, 4  ;;  %v4814_v45 = vor.u32 %v4813_v4, %v4810_v39  ;;  %v4835_v37 = vshll.u32 %v13020_v20, 16  ;;  %v4824_v18 = vor.u32 %v4823_v33, %v4819_v56  ;;  %v16453_v53 = vpop.f32.mrf.mxu1 }
 0x16b   : > { %v16436_v58 = vpop.f32.mrf.mxu0  ;;  %v4843_v39 = vrot.slane %v4841_v25, 5  ;;  %v4847_v4 = vrot.slane %v4845_v54, 4  ;;  %19127 = vst [vmem:[#allocation27_spill] sm:$0xff] %v16460_v40  ;;  %v16475_v28 = vadd.f32 %v16392_v9, %v16358_v12  ;;  %v4856_v59 = vshrl.u32 %v13023_v0, 16  ;;  %v14994_v25 = vld [vmem:[%s15458_s10 + $0xc0] sm:$0xff]  }
 0x16c   : > { %19125 = vst [vmem:[#allocation25_spill] sm:$0xff] %v16436_v58  ;;  %v4806_v27 = vsel %vm15478_vm2, %v4801_v3, %v4805_v31  ;;  %v4815_v36 = vrot.slane %v4814_v45, 4  ;;  %v4837_v31 = vrot.slane %v4835_v37, 5  ;;  %v4825_v20 = vrot.slane %v4824_v18, 4  ;;  %v14992_v45 = vld [vmem:[%s15458_s10 + $0xb4] sm:$0xff]  }
 0x16d   : > { %v16451_v15 = vpop.f32.mrf.mxu0  ;;  %v13060_v61 = vcombine.low %v4796_v1, %v4806_v27  ;;  %v16463_v1 = vpop.f32.mrf.mxu1  ;;  %v4853_v27 = vrot.slane %v4851_v42, 5  ;;  %v4848_v18 = vor.u32 %v4847_v4, %v4843_v39  ;;  %19129 = vst [vmem:[#allocation29_spill] sm:$0xff] %v16475_v28  ;;  %v13026_v42 = vld [vmem:[%s15458_s10 + $0xb4] sm:$0xf]  ;;  %v4875_v4 = vshll.u32 %v13025_v22, 16  ;;  %14277 = vmatmul.mubr.bf16.gmra.mxu0 %v14992_v45 }
 0x16e   : > { %19128 = vst [vmem:[#allocation28_spill] sm:$0xff] %v16463_v1  ;;  %v4820_v33 = vsel %vm15478_vm2, %v4815_v36, %v4819_v56  ;;  %v4838_v13 = vor.u32 %v4837_v31, %v4834_v19  ;;  %v4859_v19 = vshll.u32 %v13023_v0, 16  ;;  %v4865_v31 = vshll.u32 %v13024_v50, 16  ;;  %14280 = vmatprep.mubr.bf16.mxu0 %v14994_v25 }
 0x16f   : > { %v16456_v3 = vpop.f32.mrf.mxu0  ;;  %14317 = vmatmul.mubr.bf16.gmra.mxu1 %v13060_v61  ;;  %v4830_v61 = vsel %vm15478_vm2, %v4825_v20, %v4829_v10  ;;  %v16478_v54 = vpop.f32.mrf.mxu1  ;;  %v4849_v58 = vrot.slane %v4848_v18, 4  ;;  %v4858_v10 = vrot.slane %v4856_v59, 4  ;;  %v4869_v20 = vshrl.u32 %v13024_v50, 16 }
 0x170   : > { %v13061_v56 = vcombine.low %v4820_v33, %v4830_v61  ;;  %v4839_v36 = vrot.slane %v4838_v13, 4  ;;  %v4861_v9 = vrot.slane %v4859_v19, 5  ;;  %v4867_v33 = vrot.slane %v4865_v31, 5  ;;  %v13028_v13 = vld [vmem:[%s15458_s10 + $0xbc] sm:$0x1] }
 0x171   : > { %v16469_v37 = vpop.f32.mrf.mxu0  ;;  %v16484_v40 = vpop.f32.mrf.mxu1  ;;  %v16490_v0 = vadd.f32 %v16401_v41, %v16370_v51  ;;  %v4854_v50 = vsel %vm15478_vm2, %v4849_v58, %v4853_v27  ;;  %v4871_v22 = vrot.slane %v4869_v20, 4  ;;  %v4877_v18 = vrot.slane %v4875_v4, 5  ;;  %v13030_v4 = vld [vmem:[%s15458_s10 + $0xc4] sm:$0xf] }
 0x172   : > { %14320 = vmatprep.mubr.bf16.mxu1 %v13061_v56  ;;  %v4844_v12 = vsel %vm15478_vm2, %v4839_v36, %v4843_v39  ;;  %v4880_v59 = vshrl.u32 %v13026_v42, 16  ;;  %v4862_v45 = vor.u32 %v4861_v9, %v4858_v10  ;;  %v4883_v36 = vshll.u32 %v13026_v42, 16  ;;  %v14995_v42 = vld [vmem:[%s15458_s10 + $0xcc] sm:$0xff]  }
 0x173   : > { %v16481_v1 = vpop.f32.mrf.mxu0  ;;  %19130 = vst [vmem:[#allocation30_spill] sm:$0xff] %v16490_v0  ;;  %v16497_v56 = vpop.f32.mrf.mxu1  ;;  %v13062_v39 = vcombine.low %v4844_v12, %v4854_v50  ;;  %v4889_v51 = vshll.u32 %v13027_v21, 16  ;;  %v4872_v19 = vor.u32 %v4871_v22, %v4867_v33  ;;  %v4893_v0 = vshrl.u32 %v13027_v21, 16 }
 0x174   : > { %v4882_v31 = vrot.slane %v4880_v59, 4  ;;  %v4899_v28 = vshll.u32 %v13028_v13, 16  ;;  %v4863_v27 = vrot.slane %v4862_v45, 4  ;;  %v4885_v25 = vrot.slane %v4883_v36, 5 }
 0x175   : > { %v16493_v61 = vpop.f32.mrf.mxu0  ;;  %v16502_v58 = vpop.f32.mrf.mxu1  ;;  %v4891_v20 = vrot.slane %v4889_v51, 5  ;;  %v16506_v10 = vadd.f32 %v16409_v7, %v16384_v48  ;;  %v4873_v9 = vrot.slane %v4872_v19, 4  ;;  %v4895_v21 = vrot.slane %v4893_v0, 4  ;;  %v13031_v48 = vld [vmem:[%s15458_s10 + $0xc8] sm:$0x1]  ;;  %14281 = vmatmul.mubr.bf16.gmra.mxu0 %v14995_v42 }
 0x176   : > { %19131 = vst [vmem:[#allocation31_spill] sm:$0xff] %v16502_v58  ;;  %v4901_v13 = vrot.slane %v4899_v28, 5  ;;  %v4868_v22 = vsel %vm15478_vm2, %v4863_v27, %v4867_v33  ;;  %v4886_v59 = vor.u32 %v4885_v25, %v4882_v31  ;;  %v4904_v7 = vshrl.u32 %v13029_v35, 16  ;;  %v13032_v19 = vld [vmem:[%s15458_s10 + $0xcc] sm:$0xf] }
 0x177   : > { %v16499_v41 = vpop.f32.mrf.mxu0  ;;  %14321 = vmatmul.mubr.bf16.gmra.mxu1 %v13062_v39  ;;  %19132 = vst [vmem:[#allocation32_spill] sm:$0xff] %v16506_v10  ;;  %v16512_v50 = vpop.f32.mrf.mxu1  ;;  %v16518_v39 = vadd.f32 %v16438_v60, %v16403_v57  ;;  %v4878_v36 = vsel %vm15478_vm2, %v4873_v9, %v4877_v18  ;;  %v4896_v0 = vor.u32 %v4895_v21, %v4891_v20  ;;  %v4907_v28 = vshll.u32 %v13029_v35, 16  ;;  %v13033_v18 = vld [vmem:[%s15458_s10 + $0xd0] sm:$0xf] }
 0x178   : > { %v4913_v51 = vshll.u32 %v13030_v4, 16  ;;  %v13063_v33 = vcombine.low %v4868_v22, %v4878_v36  ;;  %v4887_v31 = vrot.slane %v4886_v59, 4  ;;  %v4906_v57 = vrot.slane %v4904_v7, 4 }
 0x179   : > { %v16510_v12 = vpop.f32.mrf.mxu0  ;;  %19133 = vst [vmem:[#allocation33_spill] sm:$0xff] %v16518_v39  ;;  %v16526_v58 = vpop.f32.mrf.mxu1  ;;  %v4917_v60 = vshrl.u32 %v13030_v4, 16  ;;  %v4897_v25 = vrot.slane %v4896_v0, 4  ;;  %v4909_v39 = vrot.slane %v4907_v28, 5  ;;  %v4923_v44 = vshll.u32 %v13031_v48, 16 }
 0x17a   : > { %v4915_v10 = vrot.slane %v4913_v51, 5  ;;  %14324 = vmatprep.mubr.bf16.mxu1 %v13063_v33  ;;  %v4892_v35 = vsel %vm15478_vm2, %v4887_v31, %v4891_v20  ;;  %v16537_v42 = vadd.f32 %v16447_v62, %v16411_v32  ;;  %v13034_v4 = vld [vmem:[%s15458_s10 + $0xd4] sm:$0x1]  ;;  %v4928_v22 = vshrl.u32 %v13032_v19, 16  ;;  %v13076_v32 = vld [vmem:[%s15458_s10 + $0x1c] sm:$0xf] }
 0x17b   : > { %v16521_v45 = vpop.f32.mrf.mxu0  ;;  %v16531_v9 = vpop.f32.mrf.mxu1  ;;  %v4919_v21 = vrot.slane %v4917_v60, 4  ;;  %v4902_v48 = vsel %vm15478_vm2, %v4897_v25, %v4901_v13  ;;  %v4910_v7 = vor.u32 %v4909_v39, %v4906_v57  ;;  %v4925_v36 = vrot.slane %v4923_v44, 5  ;;  %v13075_v60 = vld [vmem:[%s15458_s10 + $0x18] sm:$0xe]  ;;  %v13077_v25 = vld [vmem:[%s15458_s10 + $0x20] sm:$0x1] }
 0x17c   : > { %19134 = vst [vmem:[#allocation34_spill] sm:$0xff] %v16537_v42  ;;  %v4931_v0 = vshll.u32 %v13032_v19, 16  ;;  %v13064_v20 = vcombine.low %v4892_v35, %v4902_v48  ;;  %v4930_v33 = vrot.slane %v4928_v22, 4  ;;  %v4937_v31 = vshll.u32 %v13033_v18, 16 }
 0x17d   : > { %v16528_v27 = vpop.f32.mrf.mxu0  ;;  %v16544_v28 = vpop.f32.mrf.mxu1  ;;  %v4920_v51 = vor.u32 %v4919_v21, %v4915_v10  ;;  %v4911_v42 = vrot.slane %v4910_v7, 4  ;;  %v4941_v29 = vshrl.u32 %v13033_v18, 16  ;;  %v4947_v13 = vshll.u32 %v13034_v4, 16  ;;  %v13078_v4 = vld [vmem:[%s15458_s10 + $0x24] sm:$0xe] }
 0x17e   : > { %19135 = vst [vmem:[#allocation35_spill] sm:$0xff] %v16544_v28  ;;  %v4933_v47 = vrot.slane %v4931_v0, 5  ;;  %v4939_v19 = vrot.slane %v4937_v31, 5  ;;  %v16555_v57 = vadd.f32 %v16453_v53, %v16421_v16  ;;  %v13079_v7 = vld [vmem:[%s15458_s10 + $0x28] sm:$0xf]  ;;  %v5435_v31 = vrot.slane %v13076_v32, 5 }
 0x17f   : > { %v16540_v59 = vpop.f32.mrf.mxu0  ;;  %v16551_v39 = vpop.f32.mrf.mxu1  ;;  %14325 = vmatmul.mubr.bf16.gmra.mxu1 %v13064_v20  ;;  %v4921_v44 = vrot.slane %v4920_v51, 4  ;;  %v4916_v21 = vsel %vm15478_vm2, %v4911_v42, %v4915_v10  ;;  %v4943_v48 = vrot.slane %v4941_v29, 4  ;;  %v4949_v18 = vrot.slane %v4947_v13, 5  ;;  %v13080_v16 = vld [vmem:[%s15458_s10 + $0x2c] sm:$0x1] }
 0x180   : > { %19136 = vst [vmem:[#allocation36_spill] sm:$0xff] %v16555_v57  ;;  %v4934_v22 = vor.u32 %v4933_v47, %v4930_v33  ;;  %v13123_v51 = vrot.slane %v13075_v60, 9  ;;  %v5438_v28 = vrot.slane %v13077_v25, 5  ;;  %v2143_v29 = vadd.f32 %v16451_v15, %v16165_v24  ;;  %v13081_v15 = vld [vmem:[%s15458_s10 + $0x30] sm:$0xe] }
 0x181   : > { %v16548_v62 = vpop.f32.mrf.mxu0  ;;  %v16563_v0 = vpop.f32.mrf.mxu1  ;;  %v4926_v20 = vsel %vm15478_vm2, %v4921_v44, %v4925_v36  ;;  %v4944_v10 = vor.u32 %v4943_v48, %v4939_v19  ;;  %v5437_v36 = vrot.slane %v5435_v31, 4  ;;  %v13124_v33 = vrot.slane %v13078_v4, 9  ;;  %v13083_v4 = vld [vmem:[%s15458_s10 + $0x38] sm:$0x1] }
 0x182   : > { %v13065_v57 = vcombine.low %v4916_v21, %v4926_v20  ;;  %v4935_v26 = vrot.slane %v4934_v22, 4  ;;  %v5436_v42 = vsel %vm15658_vm5, %v13123_v51, %v5435_v31  ;;  %v5442_v60 = vrot.slane %v13079_v7, 5  ;;  %v13084_v51 = vld [vmem:[%s15458_s10 + $0x3c] sm:$0xe]  ;;  %v13085_v31 = vld [vmem:[%s15458_s10 + $0x40] sm:$0xf] }
 0x183   : > { %v16557_v35 = vpop.f32.mrf.mxu0  ;;  %v16572_v47 = vpop.f32.mrf.mxu1  ;;  %v4945_v25 = vrot.slane %v4944_v10, 4  ;;  %v5445_v44 = vrot.slane %v13080_v16, 5  ;;  %v2141_v24 = vadd.f32 %v16456_v3, %v16181_v43  ;;  %v5439_v22 = vsel %vm15658_vm5, %v5437_v36, %v5438_v28 }
 0x184   : > { %14328 = vmatprep.mubr.bf16.mxu1 %v13065_v57  ;;  %v4940_v13 = vsel %vm15478_vm2, %v4935_v26, %v4939_v19  ;;  %v5443_v48 = vsel %vm15658_vm5, %v13124_v33, %v5442_v60  ;;  %v5444_v57 = vrot.slane %v5442_v60, 4  ;;  %v16590_v26 = vadd.f32 %v16478_v54, %v2143_v29  ;;  %v13082_v19 = vld [vmem:[%s15458_s10 + $0x34] sm:$0xf]  ;;  %v13087_v60 = vld [vmem:[%s15458_s10 + $0x48] sm:$0xe] }
 0x185   : > { %v16568_v53 = vpop.f32.mrf.mxu0  ;;  %v16583_v21 = vpop.f32.mrf.mxu1  ;;  %v4950_v43 = vsel %vm15478_vm2, %v4945_v25, %v4949_v18  ;;  %v13155_v3 = vcombine.low %v5436_v42, %v5439_v22  ;;  %v2144_v20 = vadd.f32 %v16469_v37, %v16194_v8  ;;  %v16601_v28 = vadd.f32 %v16484_v40, %v2141_v24  ;;  %v13086_v8 = vld [vmem:[%s15458_s10 + $0x44] sm:$0x1]  ;;  %v13089_v24 = vld [vmem:[%s15458_s10 + $0x50] sm:$0x1] }
 0x186   : > { %19137 = vst [vmem:[#allocation37_spill] sm:$0xff] %v16583_v21  ;;  %v13066_v16 = vcombine.low %v4940_v13, %v4950_v43  ;;  %v5446_v10 = vsel %vm15658_vm5, %v5444_v57, %v5445_v44  ;;  %v16611_v18 = vadd.f32 %v16481_v1, %v16201_v17  ;;  %v13125_v29 = vrot.slane %v13081_v15, 9  ;;  %v13088_v13 = vld [vmem:[%s15458_s10 + $0x4c] sm:$0xf]  ;;  %v16836_v21 = vld [vmem:[%s15458_s10 + $0xd4] sm:$0x1] }
 0x187   : > { %v16576_v32 = vpop.f32.mrf.mxu0  ;;  %v16605_v54 = vpop.f32.mrf.mxu1  ;;  %14348 = vmatprep.mubr.bf16.mxu0 %v13155_v3  ;;  %v13156_v40 = vcombine.low %v5443_v48, %v5446_v10  ;;  %v16617_v42 = vadd.f32 %v16497_v56, %v2144_v20  ;;  %v5449_v36 = vrot.slane %v13082_v19, 5  ;;  %v5452_v33 = vrot.slane %v13083_v4, 5  ;;  %v13090_v19 = vld [vmem:[%s15458_s10 + $0x54] sm:$0xe]  ;;  %v13091_v4 = vld [vmem:[%s15458_s10 + $0x58] sm:$0xf] }
 0x188   : > { %14329 = vmatmul.mubr.bf16.gmra.mxu1 %v13066_v16  ;;  %v2147_v17 = vadd.f32 %v16493_v61, %v16211_v14  ;;  %v13126_v1 = vrot.slane %v13084_v51, 9  ;;  %v5456_v44 = vrot.slane %v13085_v31, 5  ;;  %v5459_v48 = vrot.slane %v13086_v8, 5  ;;  %v13092_v51 = vld [vmem:[%s15458_s10 + $0x5c] sm:$0x1] }
 0x189   : > { %v16594_v7 = vpop.f32.mrf.mxu0  ;;  %v16621_v25 = vpop.f32.mrf.mxu1  ;;  %14349 = vmatmul.mubr.bf16.vlgmr.msra.gmra.mxu0 %v13156_v40  ;;  %v5450_v56 = vsel %vm15658_vm5, %v13125_v29, %v5449_v36  ;;  %v5451_v22 = vrot.slane %v5449_v36, 4  ;;  %v2145_v57 = vadd.f32 %v16499_v41, %v16232_v52  ;;  %v2148_v20 = vadd.f32 %v16510_v12, %v16257_v34  ;;  %v13093_v40 = vld [vmem:[%s15458_s10 + $0x60] sm:$0xe] }
 0x18a   : > { %v5457_v14 = vsel %vm15658_vm5, %v13126_v1, %v5456_v44  ;;  %v5458_v61 = vrot.slane %v5456_v44, 4  ;;  %v16639_v3 = vadd.f32 %v16512_v50, %v2147_v17  ;;  %v16653_v16 = vadd.f32 %v16521_v45, %v16261_v30  ;;  %v13094_v45 = vld [vmem:[%s15458_s10 + $0x64] sm:$0xf] }
 0x18b   : > { %v16614_v37 = vpop.f32.mrf.mxu0  ;;  %v16634_v43 = vpop.f32.mrf.mxu1  ;;  %v5453_v52 = vsel %vm15658_vm5, %v5451_v22, %v5452_v33  ;;  %v16649_v41 = vadd.f32 %v16526_v58, %v2145_v57  ;;  %v13127_v50 = vrot.slane %v13087_v60, 9  ;;  %v16660_v12 = vadd.f32 %v16531_v9, %v2148_v20  ;;  %v13095_v60 = vld [vmem:[%s15458_s10 + $0x68] sm:$0x1] }
 0x18c   : > { %19138 = vst [vmem:[#allocation38_spill] sm:$0xff] %v16653_v16  ;;  %v13157_v29 = vcombine.low %v5450_v56, %v5453_v52  ;;  %v5460_v34 = vsel %vm15658_vm5, %v5458_v61, %v5459_v48  ;;  %v5463_v8 = vrot.slane %v13088_v13, 5  ;;  %v5466_v33 = vrot.slane %v13089_v24, 5  ;;  %v13097_v56 = vld [vmem:[%s15458_s10 + $0x70] sm:$0xf] }
 0x18d   : > { %v16626_v15 = vpop.f32.mrf.mxu0  ;;  %v16655_v10 = vpop.f32.mrf.mxu1  ;;  %v13158_v58 = vcombine.low %v5457_v14, %v5460_v34  ;;  %v2151_v30 = vadd.f32 %v16528_v27, %v16274_v11  ;;  %v13128_v13 = vrot.slane %v13090_v19, 9  ;;  %v5470_v44 = vrot.slane %v13091_v4, 5  ;;  %v13099_v34 = vld [vmem:[%s15458_s10 + $0x78] sm:$0xe] }
 0x18e   : > { %19139 = vst [vmem:[#allocation39_spill] sm:$0xff] %v16655_v10  ;;  %14352 = vmatprep.mubr.bf16.mxu0 %v13157_v29  ;;  %v5464_v1 = vsel %vm15658_vm5, %v13127_v50, %v5463_v8  ;;  %v5465_v9 = vrot.slane %v5463_v8, 4  ;;  %v5473_v24 = vrot.slane %v13092_v51, 5  ;;  %v2149_v11 = vadd.f32 %v16540_v59, %v16293_v6  ;;  %v13096_v59 = vld [vmem:[%s15458_s10 + $0x6c] sm:$0xe] }
 0x18f   : > { %v16644_v31 = vpop.f32.mrf.mxu0  ;;  %v16669_v17 = vpop.f32.mrf.mxu1  ;;  %v16679_v27 = vadd.f32 %v16551_v39, %v2151_v30  ;;  %v2152_v48 = vadd.f32 %v16548_v62, %v16317_v23  ;;  %v5471_v19 = vsel %vm15658_vm5, %v13128_v13, %v5470_v44  ;;  %v5472_v4 = vrot.slane %v5470_v44, 4  ;;  %v13098_v39 = vld [vmem:[%s15458_s10 + $0x74] sm:$0x1]  ;;  %v13100_v8 = vld [vmem:[%s15458_s10 + $0x7c] sm:$0xf] }
 0x190   : > { %v5467_v14 = vsel %vm15658_vm5, %v5465_v9, %v5466_v33  ;;  %v16691_v6 = vadd.f32 %v16557_v35, %v16321_v2  ;;  %v16698_v62 = vadd.f32 %v16563_v0, %v2149_v11  ;;  %v13129_v51 = vrot.slane %v13093_v40, 9  ;;  %v13101_v33 = vld [vmem:[%s15458_s10 + $0x80] sm:$0x1] }
 0x191   : > { %v16663_v36 = vpop.f32.mrf.mxu0  ;;  %v16683_v57 = vpop.f32.mrf.mxu1  ;;  %14353 = vmatmul.mubr.bf16.gmra.mxu0 %v13158_v58  ;;  %v13159_v23 = vcombine.low %v5464_v1, %v5467_v14  ;;  %v16701_v20 = vadd.f32 %v16572_v47, %v2152_v48  ;;  %v5474_v2 = vsel %vm15658_vm5, %v5472_v4, %v5473_v24  ;;  %v5477_v35 = vrot.slane %v13094_v45, 5  ;;  %v13104_v4 = vld [vmem:[%s15458_s10 + $0x8c] sm:$0x1] }
 0x192   : > { %19140 = vst [vmem:[#allocation40_spill] sm:$0xff] %v16691_v6  ;;  %v5480_v50 = vrot.slane %v13095_v60, 5  ;;  %v2155_v29 = vadd.f32 %v16568_v53, %v16327_v5  ;;  %v5484_v0 = vrot.slane %v13097_v56, 5  ;;  %v13160_v40 = vcombine.low %v5471_v19, %v5474_v2  ;;  %v16719_v60 = vld [vmem:[%s15458_s10 + $0x88] sm:$0xf] }
 0x193   : > { %v16674_v22 = vpop.f32.mrf.mxu0  ;;  %v14127_v52 = vpop.f32.mrf.mxu1  ;;  %14356 = vmatprep.mubr.bf16.mxu0 %v13159_v23  ;;  %v5478_v30 = vsel %vm15658_vm5, %v13129_v51, %v5477_v35  ;;  %v5479_v1 = vrot.slane %v5477_v35, 4  ;;  %v2153_v45 = vadd.f32 %v16576_v32, %v16353_v49  ;;  %v13130_v53 = vrot.slane %v13096_v59, 9  ;;  %v13102_v19 = vld [vmem:[%s15458_s10 + $0x84] sm:$0xe]  ;;  %v13105_v2 = vld [vmem:[%s15458_s10 + $0x90] sm:$0xe] }
 0x194   : > { %v5487_v9 = vrot.slane %v13098_v39, 5  ;;  %v16722_v13 = vadd.f32 %v16605_v54, %v2155_v29  ;;  %v2156_v44 = vadd.f32 %v16594_v7, %v16365_v63  ;;  %v5486_v11 = vrot.slane %v5484_v0, 4  ;;  %v19143_v39 = vld [vmem:[#allocation19_spill] sm:$0xff]  ;;  %v13106_v35 = vld [vmem:[%s15458_s10 + $0x94] sm:$0xf] }
 0x195   : > { %v16695_v61 = vpop.f32.mrf.mxu0  ;;  %v16712_v47 = vpop.f32.mrf.mxu1  ;;  %v5481_v24 = vsel %vm15658_vm5, %v5479_v1, %v5480_v50  ;;  %v16729_v49 = vadd.f32 %v16621_v25, %v2153_v45  ;;  %v16733_v32 = vadd.f32 %v16614_v37, %v16377_v55  ;;  %v13131_v63 = vrot.slane %v13099_v34, 9  ;;  %v19144_v34 = vld [vmem:[#allocation21_spill] sm:$0xff] }
 0x196   : > { %19141 = vst [vmem:[#allocation41_spill] sm:$0xff] %v16712_v47  ;;  %v13161_v54 = vcombine.low %v5478_v30, %v5481_v24  ;;  %v16738_v14 = vadd.f32 %v16634_v43, %v2156_v44  ;;  %v5491_v7 = vrot.slane %v13100_v8, 5  ;;  %v5494_v25 = vrot.slane %v13101_v33, 5  ;;  %v19145_v33 = vld [vmem:[#allocation22_spill] sm:$0xff]  ;;  %v19154_v47 = vld [vmem:[#allocation32_spill] sm:$0xff] }
 0x197   : > { %v16709_v58 = vpop.f32.mrf.mxu0  ;;  %v14130_v56 = vpop.f32.mrf.mxu1  ;;  %19142 = vst [vmem:[#allocation42_spill] sm:$0xff] %v16733_v32  ;;  %v2159_v23 = vadd.f32 %v16626_v15, %v19143_v39  ;;  %v5485_v37 = vsel %vm15658_vm5, %v13130_v53, %v5484_v0  ;;  %v5498_v43 = vrot.slane %v16719_v60, 5  ;;  %v5488_v29 = vsel %vm15658_vm5, %v5486_v11, %v5487_v9  ;;  %v13107_v0 = vld [vmem:[%s15458_s10 + $0x98] sm:$0x1]  ;;  %v16764_v60 = vld [vmem:[%s15458_s10 + $0xa0] sm:$0xf] }
 0x198   : > { %v5493_v51 = vrot.slane %v5491_v7, 4  ;;  %v2157_v8 = vadd.f32 %v16644_v31, %v19144_v34  ;;  %v5492_v1 = vsel %vm15658_vm5, %v13131_v63, %v5491_v7  ;;  %v13132_v31 = vrot.slane %v13102_v19, 9  ;;  %v19147_v63 = vld [vmem:[#allocation24_spill] sm:$0xff]  ;;  %v13110_v34 = vld [vmem:[%s15458_s10 + $0xa4] sm:$0x1] }
 0x199   : > { %v14083_v5 = vpop.f32.mrf.mxu0  ;;  %v2545_v59 = vpop.f32.mrf.mxu1  ;;  %14357 = vmatmul.mubr.bf16.gmra.mxu0 %v13160_v40  ;;  %v16754_v15 = vadd.f32 %v16669_v17, %v2159_v23  ;;  %v2160_v40 = vadd.f32 %v16663_v36, %v19145_v33  ;;  %v5501_v17 = vrot.slane %v13104_v4, 5  ;;  %v13162_v24 = vcombine.low %v5485_v37, %v5488_v29  ;;  %v13108_v4 = vld [vmem:[%s15458_s10 + $0x9c] sm:$0xe]  ;;  %v19149_v37 = vld [vmem:[#allocation26_spill] sm:$0xff]  ;;  %v19150_v33 = vld [vmem:[#allocation27_spill] sm:$0xff] }
 0x19a   : > { %14360 = vmatprep.mubr.bf16.mxu0 %v13161_v54  ;;  %v5495_v45 = vsel %vm15658_vm5, %v5493_v51, %v5494_v25  ;;  %v16769_v9 = vadd.f32 %v16683_v57, %v2157_v8  ;;  %v5500_v11 = vrot.slane %v5498_v43, 4  ;;  %v5505_v54 = vrot.slane %v13106_v35, 5  ;;  %v16776_v25 = vld [vmem:[%s15458_s10 + $0xac] sm:$0xf] }
 0x19b   : > { %v16735_v48 = vpop.f32.mrf.mxu0  ;;  %v14131_v50 = vpop.f32.mrf.mxu1  ;;  %v16771_v36 = vadd.f32 %v14127_v52, %v2160_v40  ;;  %v2163_v7 = vadd.f32 %v16695_v61, %v19147_v63  ;;  %v13163_v23 = vcombine.low %v5492_v1, %v5495_v45  ;;  %v13133_v19 = vrot.slane %v13105_v2, 9  ;;  %v13111_v2 = vld [vmem:[%s15458_s10 + $0xa8] sm:$0xe]  ;;  %v13113_v63 = vld [vmem:[%s15458_s10 + $0xb0] sm:$0x1] }
 0x19c   : > { %v5507_v57 = vrot.slane %v5505_v54, 4  ;;  %v5508_v52 = vrot.slane %v13107_v0, 5  ;;  %v2161_v35 = vadd.f32 %v16709_v58, %v19149_v37  ;;  %v5512_v61 = vrot.slane %v16764_v60, 5  ;;  %v16797_v37 = vld [vmem:[%s15458_s10 + $0xb8] sm:$0xf] }
 0x19d   : > { %v14086_v55 = vpop.f32.mrf.mxu0  ;;  %v16766_v53 = vpop.f32.mrf.mxu1  ;;  %v16785_v8 = vadd.f32 %v14130_v56, %v2163_v7  ;;  %v2164_v40 = vadd.f32 %v14083_v5, %v19150_v33  ;;  %v5499_v45 = vsel %vm15658_vm5, %v13132_v31, %v5498_v43  ;;  %v5502_v0 = vsel %vm15658_vm5, %v5500_v11, %v5501_v17  ;;  %v19151_v11 = vld [vmem:[#allocation29_spill] sm:$0xff]  ;;  %v16830_v32 = vld [vmem:[%s15458_s10 + $0xcc] sm:$0xe] }
 0x19e   : > { %19146 = vst [vmem:[#allocation19_spill] sm:$0xff] %v16766_v53  ;;  %v16793_v58 = vadd.f32 %v2545_v59, %v2161_v35  ;;  %v5519_v60 = vrot.slane %v16776_v25, 5  ;;  %v5506_v31 = vsel %vm15658_vm5, %v13133_v19, %v5505_v54  ;;  %v5509_v59 = vsel %vm15658_vm5, %v5507_v57, %v5508_v52  ;;  %v16820_v19 = vld [vmem:[%s15458_s10 + $0xc0] sm:$0xe]  ;;  %v16823_v57 = vld [vmem:[%s15458_s10 + $0xc8] sm:$0x1] }
 0x19f   : > { %v2110_v30 = vpop.f32.mrf.mxu0  ;;  %v14134_v39 = vpop.f32.mrf.mxu1  ;;  %v16799_v5 = vadd.f32 %v14131_v50, %v2164_v40  ;;  %v13134_v17 = vrot.slane %v13108_v4, 9  ;;  %v2167_v7 = vadd.f32 %v14086_v55, %v19151_v11  ;;  %v16814_v50 = vld [vmem:[%s15458_s10 + $0xc4] sm:$0xf]  ;;  %v13164_v25 = vcombine.low %v5499_v45, %v5502_v0  ;;  %v16833_v45 = vld [vmem:[%s15458_s10 + $0xd0] sm:$0xf] }
 0x1a0   : > { %v5514_v33 = vrot.slane %v5512_v61, 4  ;;  %v5515_v40 = vrot.slane %v13110_v34, 5  ;;  %v13135_v52 = vrot.slane %v13111_v2, 9  ;;  %v19153_v55 = vld [vmem:[#allocation30_spill] sm:$0xff]  ;;  %v13165_v34 = vcombine.low %v5506_v31, %v5509_v59  ;;  %v19157_v59 = vld [vmem:[#allocation33_spill] sm:$0xff] }
 0x1a1   : > { %v14087_v44 = vpop.f32.mrf.mxu0  ;;  %v2561_v29 = vpop.f32.mrf.mxu1  ;;  %14361 = vmatmul.mubr.bf16.gmra.mxu0 %v13162_v24  ;;  %v16803_v24 = vld [vmem:[%s15458_s10 + $0xb4] sm:$0xe]  ;;  %v2165_v11 = vadd.f32 %v2110_v30, %v19153_v55  ;;  %v16826_v53 = vadd.f32 %v14134_v39, %v2167_v7  ;;  %v5522_v54 = vrot.slane %v13113_v63, 5  ;;  %v5513_v2 = vsel %vm15658_vm5, %v13134_v17, %v5512_v61 }
 0x1a2   : > { %14364 = vmatprep.mubr.bf16.mxu0 %v13163_v23  ;;  %v16811_v23 = vld [vmem:[%s15458_s10 + $0xbc] sm:$0x1]  ;;  %v2168_v10 = vadd.f32 %v14087_v44, %v19154_v47  ;;  %v13136_v30 = vrot.slane %v16803_v24, 9  ;;  %v19156_v7 = vrot.slane %v16797_v37, 5  ;;  %v5533_v63 = vrot.slane %v16814_v50, 5  ;;  %v19158_v50 = vld [vmem:[#allocation34_spill] sm:$0xff] }
 0x1a3   : > { %v16779_v51 = vpop.f32.mrf.mxu0  ;;  %v14135_v56 = vpop.f32.mrf.mxu1  ;;  %v16843_v39 = vadd.f32 %v2561_v29, %v2165_v11  ;;  %v5529_v31 = vrot.slane %v16811_v23, 5  ;;  %v5516_v61 = vsel %vm15658_vm5, %v5514_v33, %v5515_v40  ;;  %v13137_v29 = vrot.slane %v16820_v19, 9  ;;  %v19159_v19 = vld [vmem:[#allocation36_spill] sm:$0xff] }
 0x1a4   : > { %19148 = vst [vmem:[#allocation21_spill] sm:$0xff] %v16779_v51  ;;  %v16845_v47 = vadd.f32 %v14135_v56, %v2168_v10  ;;  %v5528_v55 = vrot.slane %v19156_v7, 4  ;;  %v14997_v51 = vld [vmem:[#allocation7 + $0x38] sm:$0xff]   ;;  %v5520_v10 = vsel %vm15658_vm5, %v13135_v52, %v5519_v60  ;;  %v5536_v56 = vrot.slane %v16823_v57, 5 }
 0x1a5   : > { %v14090_v1 = vpop.f32.mrf.mxu0  ;;  %v16816_v35 = vpop.f32.mrf.mxu1  ;;  %v5540_v23 = vrot.slane %v16833_v45, 5  ;;  %14380 = vmatprep.subr.bf16.mxu1 %v14997_v51  ;;  %v5535_v33 = vrot.slane %v5533_v63, 4 }
 0x1a6   : > { %19152 = vst [vmem:[#allocation22_spill] sm:$0xff] %v16816_v35  ;;  %v5521_v35 = vrot.slane %v5519_v60, 4  ;;  %v2171_v16 = vadd.f32 %v14090_v1, %v19157_v59  ;;  %v13138_v1 = vrot.slane %v16830_v32, 9  ;;  %v5543_v60 = vrot.slane %v16836_v21, 5  ;;  %14381 = vmatpush3.bf16.msra.mxu1 %v14997_v51 }
 0x1a7   : > { %v2126_v43 = vpop.f32.mrf.mxu0  ;;  %v14138_v0 = vpop.f32.mrf.mxu1 }
 0x1a8   : > { %v5523_v17 = vsel %vm15658_vm5, %v5521_v35, %v5522_v54  ;;  %v16864_v40 = vadd.f32 %v14138_v0, %v2171_v16  ;;  %v13166_v54 = vcombine.low %v5513_v2, %v5516_v61  ;;  %v14998_v61 = vld [vmem:[#allocation7 + $0x30] sm:$0xff]  }
 0x1a9   : > { %v14091_v4 = vpop.f32.mrf.mxu0  ;;  %v2577_v44 = vpop.f32.mrf.mxu1  ;;  %14365 = vmatmul.mubr.bf16.gmra.mxu0 %v13164_v25  ;;  %v2169_v25 = vadd.f32 %v2126_v43, %v19158_v50  ;;  %v13167_v16 = vcombine.low %v5520_v10, %v5523_v17  ;;  %v5534_v10 = vsel %vm15658_vm5, %v13137_v29, %v5533_v63  ;;  %14382 = vmatprep.subr.bf16.mxu1 %v14998_v61 }
 0x1aa   : > { %14368 = vmatprep.mubr.bf16.mxu0 %v13165_v34  ;;  %v2172_v57 = vadd.f32 %v14091_v4, %v19159_v19  ;;  %14383 = vmatpush3.bf16.msra.mxu1 %v14998_v61 }
 0x1ab   : > { %v16838_v6 = vpop.f32.mrf.mxu0  ;;  %v14139_v24 = vpop.f32.mrf.mxu1  ;;  %v16869_v34 = vadd.f32 %v2577_v44, %v2169_v25 }
 0x1ac   : > { %19155 = vst [vmem:[#allocation24_spill] sm:$0xff] %v16838_v6  ;;  %v16874_v43 = vadd.f32 %v14139_v24, %v2172_v57  ;;  %v5537_v24 = vsel %vm15658_vm5, %v5535_v33, %v5536_v56 }
 0x1ad   : > { %v14158_v6 = vpop.f32.mrf.mxu0  ;;  %v16867_v52 = vpop.f32.mrf.mxu1 }
 0x1ae   : > { %v16872_v32 = vadd.f32 %v14158_v6, %v16590_v26 }
 0x1af   : > { %v3283_v11 = vpop.f32.mrf.mxu0  ;;  %v16879_v21 = vpop.f32.mrf.mxu1 }
 0x1b0   : > { %v16877_v45 = vadd.f32 %v3283_v11, %v16601_v28  ;;  %v19160_v28 = vmov %v19156_v7  ;;  %v5542_v7 = vrot.slane %v5540_v23, 4 }
 0x1b1   : > { %v14159_v35 = vpop.f32.mrf.mxu0  ;;  %v16886_v51 = vpop.f32.mrf.mxu1  ;;  %14369 = vmatmul.mubr.bf16.gmra.mxu0 %v13166_v54  ;;  %v5527_v2 = vsel %vm15658_vm5, %v13136_v30, %v19160_v28 }
 0x1b2   : > { %v16882_v4 = vadd.f32 %v14159_v35, %v16617_v42  ;;  %14372 = vmatprep.mubr.bf16.mxu0 %v13167_v16  ;;  %v5530_v42 = vsel %vm15658_vm5, %v5528_v55, %v5529_v31  ;;  %v13169_v31 = vcombine.low %v5534_v10, %v5537_v24  ;;  %v5544_v56 = vsel %vm15658_vm5, %v5542_v7, %v5543_v60 }
 0x1b3   : > { %v16884_v0 = vpop.f32.mrf.mxu0  ;;  %v16888_v26 = vpop.f32.mrf.mxu1  ;;  %v13168_v30 = vcombine.low %v5527_v2, %v5530_v42 }
 0x1b5   : > { %v14162_v44 = vpop.f32.mrf.mxu0 }
 0x1b6   : > { %v16891_v6 = vadd.f32 %v14162_v44, %v16639_v3  ;;  %v16903_v3 = vpop.f32.mrf.mxu1 }
 0x1b7   : > { %v3299_v59 = vpop.f32.mrf.mxu0 }
 0x1b8   : > { %v16906_v17 = vadd.f32 %v3299_v59, %v16649_v41  ;;  %v16908_v50 = vpop.f32.mrf.mxu1  ;;  %v5541_v41 = vsel %vm15658_vm5, %v13138_v1, %v5540_v23 }
 0x1b9   : > { %v14163_v37 = vpop.f32.mrf.mxu0  ;;  %14373 = vmatmul.mubr.bf16.gmra.mxu0 %v13168_v30  ;;  %v13170_v19 = vcombine.low %v5541_v41, %v5544_v56 }
 0x1ba   : > { %v3417_v55 = vadd.f32 %v14163_v37, %v16660_v12  ;;  %v16911_v25 = vpop.f32.mrf.mxu1  ;;  %14376 = vmatprep.mubr.bf16.mxu0 %v13169_v31  ;;  %v14999_v12 = vld [vmem:[#allocation7 + $0x28] sm:$0xff]  }
 0x1bb   : > { %v16913_v63 = vpop.f32.mrf.mxu0  ;;  %14384 = vmatprep.subr.bf16.mxu1 %v14999_v12 }
 0x1bc   : > { %v14211_v29 = vpop.f32.mrf.mxu1  ;;  %14385 = vmatpush3.bf16.msra.mxu1 %v14999_v12 }
 0x1bd   : > { %v16919_v11 = vadd.f32 %v14211_v29, %v3417_v55  ;;  %v14166_v57 = vpop.f32.mrf.mxu0 }
 0x1be   : > { %v16921_v33 = vpop.f32.mrf.mxu1  ;;  %v3420_v54 = vadd.f32 %v14166_v57, %v16679_v27  ;;  %v15000_v27 = vld [vmem:[#allocation7 + $0x20] sm:$0xff]   ;;  %v15249_v57 = vmov 0  }
 0x1bf   : > { %19161 = vst [vmem:[#allocation26_spill] sm:$0xff] %v16921_v33  ;;  %v3315_v16 = vpop.f32.mrf.mxu0  ;;  %14386 = vmatprep.subr.bf16.mxu1 %v15000_v27  ;;  %6040 = vst [vmem:[#allocation2 + $0x18] sm:$0xf] %v15249_v57 }
 0x1c0   : > { %v14214_v35 = vpop.f32.mrf.mxu1  ;;  %v3418_v28 = vadd.f32 %v3315_v16, %v16698_v62  ;;  %14387 = vmatpush3.bf16.msra.mxu1 %v15000_v27  ;;  %6034 = vst [vmem:[#allocation2] sm:$0xf] %v15249_v57  ;;  %6035 = vst [vmem:[#allocation2 + $0x4] sm:$0xf] %v15249_v57 }
 0x1c1   : > { %v16925_v1 = vadd.f32 %v14214_v35, %v3420_v54  ;;  %14377 = vmatmul.mubr.bf16.gmra.mxu0 %v13170_v19  ;;  %v14167_v23 = vpop.f32.mrf.mxu0  ;;  %6036 = vst [vmem:[#allocation2 + $0x8] sm:$0x1] %v15249_v57  ;;  %6037 = vst [vmem:[#allocation2 + $0xc] sm:$0xf] %v15249_v57  ;;  %v15003_v54 = vld [vmem:[#allocation7 + $0x78] sm:$0xff]  }
 0x1c2   : > { %v3909_v44 = vpop.f32.mrf.mxu1  ;;  %v3421_v2 = vadd.f32 %v14167_v23, %v16701_v20  ;;  %6038 = vst [vmem:[#allocation2 + $0x10] sm:$0xf] %v15249_v57  ;;  %6039 = vst [vmem:[#allocation2 + $0x14] sm:$0x1] %v15249_v57  ;;  %14428 = vmatprep.subr.bf16.mxu0 %v15003_v54 }
 0x1c3   : > { %v16928_v42 = vadd.f32 %v3909_v44, %v3418_v28  ;;  %v16930_v7 = vpop.f32.mrf.mxu0  ;;  %6041 = vst [vmem:[#allocation2 + $0x1c] sm:$0xf] %v15249_v57  ;;  %6042 = vst [vmem:[#allocation2 + $0x20] sm:$0x1] %v15249_v57  ;;  %14429 = vmatpush3.bf16.msra.mxu0 %v15003_v54  ;;  %v15005_v54 = vld [vmem:[#allocation7 + $0x8] sm:$0xff]  }
 0x1c4   : > { %v14215_v60 = vpop.f32.mrf.mxu1  ;;  %6043 = vst [vmem:[#allocation2 + $0x24] sm:$0xf] %v15249_v57  ;;  %6044 = vst [vmem:[#allocation2 + $0x28] sm:$0xf] %v15249_v57 }
 0x1c5   : > { %v16932_v59 = vadd.f32 %v14215_v60, %v3421_v2  ;;  %v14170_v10 = vpop.f32.mrf.mxu0  ;;  %6045 = vst [vmem:[#allocation2 + $0x2c] sm:$0x1] %v15249_v57  ;;  %6046 = vst [vmem:[#allocation2 + $0x30] sm:$0xf] %v15249_v57 }
 0x1c6   : > { %v16934_v61 = vpop.f32.mrf.mxu1  ;;  %v3424_v62 = vadd.f32 %v14170_v10, %v16722_v13  ;;  %6047 = vst [vmem:[#allocation2 + $0x34] sm:$0xf] %v15249_v57  ;;  %6048 = vst [vmem:[#allocation2 + $0x38] sm:$0x1] %v15249_v57 }
 0x1c7   : > { %19162 = vst [vmem:[#allocation27_spill] sm:$0xff] %v16934_v61  ;;  %v3331_v37 = vpop.f32.mrf.mxu0  ;;  %6049 = vst [vmem:[#allocation2 + $0x3c] sm:$0xf] %v15249_v57 }
 0x1c8   : > { %v14218_v24 = vpop.f32.mrf.mxu1  ;;  %v3422_v30 = vadd.f32 %v3331_v37, %v16729_v49  ;;  %6050 = vst [vmem:[#allocation2 + $0x40] sm:$0xf] %v15249_v57  ;;  %6051 = vst [vmem:[#allocation2 + $0x44] sm:$0x1] %v15249_v57 }
 0x1c9   : > { %v16938_v55 = vadd.f32 %v14218_v24, %v3424_v62  ;;  %v14171_v31 = vpop.f32.mrf.mxu0  ;;  %6052 = vst [vmem:[#allocation2 + $0x48] sm:$0xf] %v15249_v57  ;;  %6053 = vst [vmem:[#allocation2 + $0x4c] sm:$0xf] %v15249_v57  ;;  %v15001_v62 = vld [vmem:[#allocation7 + $0x18] sm:$0xff]   ;;  %v15004_v24 = vld [vmem:[#allocation7 + $0x70] sm:$0xff]  }
 0x1ca   : > { %v3925_v20 = vpop.f32.mrf.mxu1  ;;  %v3425_v29 = vadd.f32 %v14171_v31, %v16738_v14  ;;  %6054 = vst [vmem:[#allocation2 + $0x50] sm:$0x1] %v15249_v57  ;;  %6055 = vst [vmem:[#allocation2 + $0x54] sm:$0xf] %v15249_v57  ;;  %14388 = vmatprep.subr.bf16.mxu1 %v15001_v62  ;;  %14430 = vmatprep.subr.bf16.mxu0 %v15004_v24 }
 0x1cb   : > { %v16941_v41 = vadd.f32 %v3925_v20, %v3422_v30  ;;  %v16945_v19 = vpop.f32.mrf.mxu0  ;;  %6056 = vst [vmem:[#allocation2 + $0x58] sm:$0xf] %v15249_v57  ;;  %6057 = vst [vmem:[#allocation2 + $0x5c] sm:$0x1] %v15249_v57  ;;  %14389 = vmatpush3.bf16.msra.mxu1 %v15001_v62  ;;  %14431 = vmatpush3.bf16.msra.mxu0 %v15004_v24  ;;  %v15006_v30 = vld [vmem:[#allocation7 + $0x68] sm:$0xff]   ;;  %v15002_v20 = vld [vmem:[#allocation7 + $0x10] sm:$0xff]  }
 0x1cc   : > { %v14219_v56 = vpop.f32.mrf.mxu1  ;;  %6058 = vst [vmem:[#allocation2 + $0x60] sm:$0xf] %v15249_v57  ;;  %6059 = vst [vmem:[#allocation2 + $0x64] sm:$0xf] %v15249_v57  ;;  %14432 = vmatprep.subr.bf16.mxu0 %v15006_v30  ;;  %14390 = vmatprep.subr.bf16.mxu1 %v15002_v20  ;;  %v15008_v62 = vld [vmem:[#allocation7] sm:$0xff]  }
 0x1cd   : > { %v16943_v12 = vadd.f32 %v14219_v56, %v3425_v29  ;;  %6060 = vst [vmem:[#allocation2 + $0x68] sm:$0x1] %v15249_v57  ;;  %6061 = vst [vmem:[#allocation2 + $0x6c] sm:$0xf] %v15249_v57 }
 0x1ce   : > { %6062 = vst [vmem:[#allocation2 + $0x70] sm:$0xf] %v15249_v57  ;;  %6063 = vst [vmem:[#allocation2 + $0x74] sm:$0x1] %v15249_v57  ;;  %v16947_v13 = vpop.f32.mrf.mxu1 }
 0x1cf   : > { %6064 = vst [vmem:[#allocation2 + $0x78] sm:$0xf] %v15249_v57  ;;  %6065 = vst [vmem:[#allocation2 + $0x7c] sm:$0xf] %v15249_v57  ;;  %14433 = vmatpush3.bf16.msra.mxu0 %v15006_v30  ;;  %14391 = vmatpush3.bf16.msra.mxu1 %v15002_v20  ;;  %v15010_v20 = vld [vmem:[#allocation7 + $0x50] sm:$0xff]  }
 0x1d0   : > { %6066 = vst [vmem:[#allocation2 + $0x80] sm:$0x1] %v15249_v57  ;;  %6067 = vst [vmem:[#allocation2 + $0x84] sm:$0xf] %v15249_v57  ;;  %14392 = vmatprep.subr.bf16.mxu1 %v15005_v54 }
 0x1d1   : > { %6068 = vst [vmem:[#allocation2 + $0x88] sm:$0xf] %v15249_v57  ;;  %6069 = vst [vmem:[#allocation2 + $0x8c] sm:$0x1] %v15249_v57 }
 0x1d2   : > { %6070 = vst [vmem:[#allocation2 + $0x90] sm:$0xf] %v15249_v57  ;;  %6071 = vst [vmem:[#allocation2 + $0x94] sm:$0xf] %v15249_v57  ;;  %v14174_v49 = vpop.f32.mrf.mxu0  ;;  %v14222_v35 = vpop.f32.mrf.mxu1 }
 0x1d3   : > { %6072 = vst [vmem:[#allocation2 + $0x98] sm:$0x1] %v15249_v57  ;;  %6073 = vst [vmem:[#allocation2 + $0x9c] sm:$0xf] %v15249_v57  ;;  %v3428_v14 = vadd.f32 %v14174_v49, %v16754_v15  ;;  %14393 = vmatpush3.bf16.msra.mxu1 %v15005_v54 }
 0x1d4   : > { %6074 = vst [vmem:[#allocation2 + $0xa0] sm:$0xf] %v15249_v57  ;;  %6075 = vst [vmem:[#allocation2 + $0xa4] sm:$0x1] %v15249_v57  ;;  %v3347_v16 = vpop.f32.mrf.mxu0  ;;  %v3941_v23 = vpop.f32.mrf.mxu1  ;;  %14394 = vmatprep.subr.bf16.mxu1 %v15008_v62 }
 0x1d5   : > { %6076 = vst [vmem:[#allocation2 + $0xa8] sm:$0xf] %v15249_v57  ;;  %6077 = vst [vmem:[#allocation2 + $0xac] sm:$0xf] %v15249_v57  ;;  %v3426_v44 = vadd.f32 %v3347_v16, %v16769_v9  ;;  %v16951_v28 = vadd.f32 %v14222_v35, %v3428_v14 }
 0x1d6   : > { %6078 = vst [vmem:[#allocation2 + $0xb0] sm:$0x1] %v15249_v57  ;;  %6079 = vst [vmem:[#allocation2 + $0xb4] sm:$0xf] %v15249_v57  ;;  %v14175_v60 = vpop.f32.mrf.mxu0  ;;  %v14223_v10 = vpop.f32.mrf.mxu1 }
 0x1d7   : > { %6080 = vst [vmem:[#allocation2 + $0xb8] sm:$0xf] %v15249_v57  ;;  %6081 = vst [vmem:[#allocation2 + $0xbc] sm:$0x1] %v15249_v57  ;;  %v3429_v2 = vadd.f32 %v14175_v60, %v16771_v36  ;;  %v16954_v27 = vadd.f32 %v3941_v23, %v3426_v44  ;;  %14395 = vmatpush3.bf16.msra.mxu1 %v15008_v62 }
 0x1d8   : > { %6082 = vst [vmem:[#allocation2 + $0xc0] sm:$0xf] %v15249_v57  ;;  %6083 = vst [vmem:[#allocation2 + $0xc4] sm:$0xf] %v15249_v57  ;;  %v16958_v15 = vpop.f32.mrf.mxu0  ;;  %v16960_v9 = vpop.f32.mrf.mxu1 }
 0x1d9   : > { %6084 = vst [vmem:[#allocation2 + $0xc8] sm:$0x1] %v15249_v57  ;;  %6085 = vst [vmem:[#allocation2 + $0xcc] sm:$0xf] %v15249_v57  ;;  %v16956_v37 = vadd.f32 %v14223_v10, %v3429_v2 }
 0x1da   : > { %6086 = vst [vmem:[#allocation2 + $0xd0] sm:$0xf] %v15249_v57  ;;  %6087 = vst [vmem:[#allocation2 + $0xd4] sm:$0x1] %v15249_v57  ;;  %v14178_v31 = vpop.f32.mrf.mxu0  ;;  %v14226_v29 = vpop.f32.mrf.mxu1  ;;  %v15007_v57 = vld [vmem:[#allocation7 + $0x60] sm:$0xff]  }
 0x1db   : > { %19163 = vst [vmem:[#allocation29_spill] sm:$0xff] %v16947_v13  ;;  %19164 = vst [vmem:[#allocation30_spill] sm:$0xff] %v16960_v9  ;;  %v3432_v36 = vadd.f32 %v14178_v31, %v16785_v8  ;;  %14434 = vmatprep.subr.bf16.mxu0 %v15007_v57 }
 0x1dc   : > { %v3363_v56 = vpop.f32.mrf.mxu0  ;;  %v3957_v35 = vpop.f32.mrf.mxu1  ;;  %14435 = vmatpush3.bf16.msra.mxu0 %v15007_v57  ;;  %v15011_v57 = vld [vmem:[#allocation2] sm:$0xff]  }
 0x1dd   : > { %v3430_v49 = vadd.f32 %v3363_v56, %v16793_v58  ;;  %v16964_v14 = vadd.f32 %v14226_v29, %v3432_v36  ;;  %v15009_v58 = vld [vmem:[#allocation7 + $0x58] sm:$0xff]   ;;  %14396 = vmatprep.mubr.bf16.mxu1 %v15011_v57 }
 0x1de   : > { %v14179_v16 = vpop.f32.mrf.mxu0  ;;  %v14227_v60 = vpop.f32.mrf.mxu1  ;;  %14436 = vmatprep.subr.bf16.mxu0 %v15009_v58 }
 0x1df   : > { %v3433_v44 = vadd.f32 %v14179_v16, %v16799_v5  ;;  %v16967_v23 = vadd.f32 %v3957_v35, %v3430_v49 }
 0x1e0   : > { %v16971_v2 = vpop.f32.mrf.mxu0  ;;  %v16973_v10 = vpop.f32.mrf.mxu1  ;;  %14437 = vmatpush3.bf16.msra.mxu0 %v15009_v58  ;;  %v7107_v58 = vld [vmem:[#allocation2 + $0x4] sm:$0xf] }
 0x1e1   : > { %v16969_v8 = vadd.f32 %v14227_v60, %v3433_v44  ;;  %19165 = vst [vmem:[#allocation32_spill] sm:$0xff] %v16973_v10  ;;  %14438 = vmatprep.subr.bf16.mxu0 %v15010_v20 }
 0x1e4   : > { %14439 = vmatpush3.bf16.msra.mxu0 %v15010_v20  ;;  %v15016_v20 = vld [vmem:[#allocation7 + $0x40] sm:$0xff]  }
 0x1e5   : > { %v14182_v24 = vpop.f32.mrf.mxu0 }
 0x1e6   : > { %v3436_v30 = vadd.f32 %v14182_v24, %v16826_v53  ;;  %v14230_v5 = vpop.f32.mrf.mxu1  ;;  %v15015_v53 = vld [vmem:[#allocation7 + $0x48] sm:$0xff]  }
 0x1e7   : > { %v3379_v31 = vpop.f32.mrf.mxu0  ;;  %14440 = vmatprep.subr.bf16.mxu0 %v15015_v53 }
 0x1e8   : > { %v3434_v36 = vadd.f32 %v3379_v31, %v16843_v39  ;;  %v16977_v29 = vadd.f32 %v14230_v5, %v3436_v30  ;;  %v3973_v56 = vpop.f32.mrf.mxu1  ;;  %v7106_v39 = vld [vmem:[#allocation2] sm:$0xf]  ;;  %14441 = vmatpush3.bf16.msra.mxu0 %v15015_v53  ;;  %v7164_v5 = vshll.u32 %v7107_v58, 16 }
 0x1e9   : > { %v14183_v49 = vpop.f32.mrf.mxu0  ;;  %v7155_v24 = vshrl.u32 %v7106_v39, 16  ;;  %v7158_v30 = vshll.u32 %v7106_v39, 16  ;;  %14442 = vmatprep.subr.bf16.mxu0 %v15016_v20 }
 0x1ea   : > { %v3437_v35 = vadd.f32 %v14183_v49, %v16845_v47  ;;  %v16980_v54 = vadd.f32 %v3973_v56, %v3434_v36  ;;  %v14231_v16 = vpop.f32.mrf.mxu1  ;;  %v7168_v47 = vshrl.u32 %v7107_v58, 16  ;;  %v7166_v56 = vrot.slane %v7164_v5, 5  ;;  %v7108_v49 = vld [vmem:[#allocation2 + $0x8] sm:$0x1] }
 0x1eb   : > { %v16984_v60 = vpop.f32.mrf.mxu0  ;;  %v7157_v31 = vrot.slane %v7155_v24, 4  ;;  %v7160_v36 = vrot.slane %v7158_v30, 5  ;;  %v7174_v9 = vshll.u32 %v7108_v49, 16 }
 0x1ec   : > { %v16982_v44 = vadd.f32 %v14231_v16, %v3437_v35  ;;  %v16986_v62 = vpop.f32.mrf.mxu1  ;;  %v7170_v35 = vrot.slane %v7168_v47, 4  ;;  %14443 = vmatpush3.bf16.msra.mxu0 %v15016_v20 }
 0x1ed   : > { %19166 = vst [vmem:[#allocation33_spill] sm:$0xff] %v16986_v62  ;;  %v7161_v10 = vor.u32 %v7160_v36, %v7157_v31  ;;  %v7176_v30 = vrot.slane %v7174_v9, 5  ;;  %v17009_v36 = vld [vmem:[#allocation7 + $0xb8] sm:$0xff]  }
 0x1ee   : > { %v7171_v53 = vor.u32 %v7170_v35, %v7166_v56  ;;  %19167 = vst [vmem:[#allocation34_spill] sm:$0xff] %v17009_v36  ;;  %14476 = vmatprep.subr.bf16.mxu1 %v17009_v36 }
 0x1ef   : > { %v7162_v24 = vrot.slane %v7161_v10, 4 }
 0x1f0   : > { %v7172_v61 = vrot.slane %v7171_v53, 4 }
 0x1f1   : > { %v14186_v57 = vpop.f32.mrf.mxu0  ;;  %v7167_v20 = vsel %vm15478_vm2, %v7162_v24, %v7166_v56 }
 0x1f2   : > { %v3440_v16 = vadd.f32 %v14186_v57, %v16864_v40  ;;  %v14234_v46 = vpop.f32.mrf.mxu1 }
 0x1f3   : > { %v3395_v62 = vpop.f32.mrf.mxu0 }
 0x1f4   : > { %v3438_v39 = vadd.f32 %v3395_v62, %v16869_v34  ;;  %v16990_v13 = vadd.f32 %v14234_v46, %v3440_v16  ;;  %v3989_v58 = vpop.f32.mrf.mxu1  ;;  %v7177_v34 = vsel %vm15478_vm2, %v7172_v61, %v7176_v30 }
 0x1f5   : > { %v14187_v5 = vpop.f32.mrf.mxu0  ;;  %v13236_v62 = vcombine.low %v7167_v20, %v7177_v34 }
 0x1f6   : > { %v3441_v33 = vadd.f32 %v14187_v5, %v16874_v43  ;;  %v16993_v47 = vadd.f32 %v3989_v58, %v3438_v39  ;;  %v14235_v40 = vpop.f32.mrf.mxu1 }
 0x1f7   : > { %v16997_v31 = vpop.f32.mrf.mxu0  ;;  %14444 = vmatprep.mubr.bf16.mxu0 %v13236_v62 }
 0x1f8   : > { %v17001_v46 = vadd.f32 %v14235_v40, %v3441_v33  ;;  %v17005_v9 = vpop.f32.mrf.mxu1 }
 0x1f9   : > { %v17003_v10 = vpop.f32.mrf.mxu0 }
 0x1fb   : > { %v17007_v43 = vpop.f32.mrf.mxu0 }
 0x1fd   : > { %v17011_v57 = vpop.f32.mrf.mxu0 }
 0x1fe   : > { %v17014_v56 = vpop.f32.mrf.mxu1 }
 0x1ff   : > { %v17016_v49 = vpop.f32.mrf.mxu0 }
 0x200   : > { %v17018_v33 = vpop.f32.mrf.mxu1 }
 0x201   : > { %v17020_v61 = vpop.f32.mrf.mxu0 }
 0x202   : > { %v17022_v35 = vpop.f32.mrf.mxu1 }
 0x203   : > { %v17024_v16 = vpop.f32.mrf.mxu0 }
 0x204   : > { %v17026_v53 = vpop.f32.mrf.mxu1 }
 0x205   : > { %19168 = vst [vmem:[#allocation36_spill] sm:$0xff] %v17026_v53  ;;  %v14259_v39 = vpop.f32.mrf.mxu0 }
 0x206   : > { %v17029_v58 = vadd.f32 %v14259_v39, %v16919_v11 }
 0x207   : > { %v17031_v24 = vpop.f32.mrf.mxu0 }
 0x208   : > { %19169 = vst [vmem:[#allocation43_spill] sm:$0xff] %v17029_v58  ;;  %v17033_v30 = vpop.f32.mrf.mxu1 }
 0x209   : > { %19170 = vst [vmem:[#allocation44_spill] sm:$0xff] %v17033_v30  ;;  %v14262_v5 = vpop.f32.mrf.mxu0 }
 0x20a   : > { %v17035_v40 = vpop.f32.mrf.mxu1  ;;  %v17038_v20 = vadd.f32 %v14262_v5, %v16925_v1 }
 0x20b   : > { %19171 = vst [vmem:[#allocation45_spill] sm:$0xff] %v17035_v40  ;;  %v4360_v34 = vpop.f32.mrf.mxu0 }
 0x20c   : > { %19172 = vst [vmem:[#allocation46_spill] sm:$0xff] %v17038_v20  ;;  %v17040_v62 = vpop.f32.mrf.mxu1  ;;  %v17043_v38 = vadd.f32 %v4360_v34, %v16928_v42 }
 0x20d   : > { %v14263_v36 = vpop.f32.mrf.mxu0 }
 0x20e   : > { %19173 = vst [vmem:[#allocation47_spill] sm:$0xff] %v17043_v38  ;;  %v17045_v53 = vpop.f32.mrf.mxu1  ;;  %v17048_v11 = vadd.f32 %v14263_v36, %v16932_v59 }
 0x20f   : > { %v17050_v39 = vpop.f32.mrf.mxu0 }
 0x210   : > { %19174 = vst [vmem:[#allocation48_spill] sm:$0xff] %v17048_v11 }
 0x211   : > { %v17052_v58 = vpop.f32.mrf.mxu1  ;;  %v14266_v40 = vpop.f32.mrf.mxu0 }
 0x212   : > { %19175 = vst [vmem:[#allocation49_spill] sm:$0xff] %v17052_v58  ;;  %v17057_v1 = vadd.f32 %v14266_v40, %v16938_v55 }
 0x213   : > { %v17054_v30 = vpop.f32.mrf.mxu1  ;;  %v4376_v5 = vpop.f32.mrf.mxu0 }
 0x214   : > { %19176 = vst [vmem:[#allocation50_spill] sm:$0xff] %v17057_v1  ;;  %v17062_v42 = vadd.f32 %v4376_v5, %v16941_v41 }
 0x215   : > { %v17059_v20 = vpop.f32.mrf.mxu1  ;;  %v14267_v34 = vpop.f32.mrf.mxu0 }
 0x216   : > { %19177 = vst [vmem:[#allocation51_spill] sm:$0xff] %v17062_v42  ;;  %v17067_v59 = vadd.f32 %v14267_v34, %v16943_v12 }
 0x217   : > { %v17064_v38 = vpop.f32.mrf.mxu1  ;;  %v17069_v36 = vpop.f32.mrf.mxu0 }
 0x218   : > { %19178 = vst [vmem:[#allocation52_spill] sm:$0xff] %v17067_v59 }
 0x219   : > { %v14270_v11 = vpop.f32.mrf.mxu0 }
 0x21a   : > { %v17074_v55 = vadd.f32 %v14270_v11, %v16951_v28 }
 0x21b   : > { %v17071_v58 = vpop.f32.mrf.mxu1  ;;  %v4392_v40 = vpop.f32.mrf.mxu0 }
 0x21c   : > { %19179 = vst [vmem:[#allocation53_spill] sm:$0xff] %v17071_v58  ;;  %19180 = vst [vmem:[#allocation54_spill] sm:$0xff] %v17074_v55  ;;  %v17079_v41 = vadd.f32 %v4392_v40, %v16954_v27 }
 0x21d   : > { %v17076_v1 = vpop.f32.mrf.mxu1  ;;  %v14271_v5 = vpop.f32.mrf.mxu0 }
 0x21e   : > { %19181 = vst [vmem:[#allocation55_spill] sm:$0xff] %v17076_v1  ;;  %19182 = vst [vmem:[#allocation56_spill] sm:$0xff] %v17079_v41  ;;  %v17084_v12 = vadd.f32 %v14271_v5, %v16956_v37  ;;  %v19213_v1 = vld [vmem:[#allocation24_spill] sm:$0xff] }
 0x21f   : > { %v17081_v42 = vpop.f32.mrf.mxu1  ;;  %v17086_v34 = vpop.f32.mrf.mxu0 }
 0x220   : > { %19183 = vst [vmem:[#allocation57_spill] sm:$0xff] %v17081_v42  ;;  %19184 = vst [vmem:[#allocation58_spill] sm:$0xff] %v17084_v12 }
 0x221   : > { %v17088_v59 = vpop.f32.mrf.mxu1  ;;  %v14274_v58 = vpop.f32.mrf.mxu0 }
 0x222   : > { %19185 = vst [vmem:[#allocation59_spill] sm:$0xff] %v17088_v59  ;;  %v17091_v28 = vadd.f32 %v14274_v58, %v16964_v14 }
 0x223   : > { %v4408_v11 = vpop.f32.mrf.mxu0 }
 0x224   : > { %19186 = vst [vmem:[#allocation60_spill] sm:$0xff] %v17091_v28  ;;  %v17096_v27 = vadd.f32 %v4408_v11, %v16967_v23  ;;  %v19200_v28 = vld [vmem:[#allocation15_spill] sm:$0xff] }
 0x225   : > { %v14275_v40 = vpop.f32.mrf.mxu0 }
 0x226   : > { %19188 = vst [vmem:[#allocation62_spill] sm:$0xff] %v17096_v27  ;;  %v17101_v37 = vadd.f32 %v14275_v40, %v16969_v8 }
 0x227   : > { %v17103_v5 = vpop.f32.mrf.mxu0 }
 0x228   : > { %19190 = vst [vmem:[#allocation64_spill] sm:$0xff] %v17101_v37  ;;  %19191 = vst [vmem:[#allocation65_spill] sm:$0xff] %v17103_v5  ;;  %v19208_v5 = vld [vmem:[#allocation28_spill] sm:$0xff] }
 0x22d   : > { %v14278_v59 = vpop.f32.mrf.mxu0 }
 0x22e   : > { %v17110_v14 = vadd.f32 %v14278_v59, %v16977_v29  ;;  %v19203_v59 = vld [vmem:[#allocation17_spill] sm:$0xff] }
 0x22f   : > { %v17093_v55 = vpop.f32.mrf.mxu1  ;;  %v4424_v58 = vpop.f32.mrf.mxu0 }
 0x230   : > { %19187 = vst [vmem:[#allocation61_spill] sm:$0xff] %v17093_v55  ;;  %19194 = vst [vmem:[#allocation68_spill] sm:$0xff] %v17110_v14  ;;  %v17113_v23 = vadd.f32 %v4424_v58, %v16980_v54  ;;  %v19204_v14 = vld [vmem:[#allocation18_spill] sm:$0xff]  ;;  %v19205_v58 = vld [vmem:[#allocation20_spill] sm:$0xff] }
 0x231   : > { %v17098_v41 = vpop.f32.mrf.mxu1  ;;  %v14279_v27 = vpop.f32.mrf.mxu0  ;;  %v1565_v54 = vadd.f32 %v19204_v14, %v19203_v59  ;;  %v19207_v55 = vld [vmem:[#allocation25_spill] sm:$0xff] }
 0x232   : > { %19189 = vst [vmem:[#allocation63_spill] sm:$0xff] %v17098_v41  ;;  %19195 = vst [vmem:[#allocation69_spill] sm:$0xff] %v17113_v23  ;;  %v17118_v8 = vadd.f32 %v14279_v27, %v16982_v44  ;;  %v19206_v23 = vld [vmem:[#allocation23_spill] sm:$0xff]  ;;  %v1573_v44 = vadd.f32 %v19208_v5, %v19207_v55  ;;  %v19212_v14 = vld [vmem:[#allocation21_spill] sm:$0xff] }
 0x233   : > { %v17105_v12 = vpop.f32.mrf.mxu1  ;;  %v17122_v37 = vpop.f32.mrf.mxu0  ;;  %v19216_v5 = vld [vmem:[#allocation35_spill] sm:$0xff] }
 0x234   : > { %19192 = vst [vmem:[#allocation66_spill] sm:$0xff] %v17105_v12  ;;  %19197 = vst [vmem:[#allocation71_spill] sm:$0xff] %v17118_v8  ;;  %v19201_v12 = vld [vmem:[#allocation16_spill] sm:$0xff]  ;;  %v19210_v8 = vld [vmem:[#allocation31_spill] sm:$0xff] }
 0x235   : > { %v17107_v42 = vpop.f32.mrf.mxu1  ;;  %19199 = vst [vmem:[#allocation73_spill] sm:$0xff] %v17122_v37  ;;  %v14282_v29 = vpop.f32.mrf.mxu0  ;;  %v2162_v37 = vadd.f32 %v16735_v48, %v1565_v54  ;;  %v19219_v48 = vld [vmem:[#allocation42_spill] sm:$0xff]  ;;  %v19220_v54 = vld [vmem:[#allocation39_spill] sm:$0xff] }
 0x236   : > { %19193 = vst [vmem:[#allocation67_spill] sm:$0xff] %v17107_v42  ;;  %v1561_v42 = vadd.f32 %v19201_v12, %v19200_v28  ;;  %v17135_v27 = vadd.f32 %v14282_v29, %v16990_v13  ;;  %v19215_v13 = vld [vmem:[#allocation38_spill] sm:$0xff] }
 0x237   : > { %v17115_v11 = vpop.f32.mrf.mxu1  ;;  %v2597_v29 = vadd.f32 %v19216_v5, %v19215_v13 }
 0x238   : > { %19196 = vst [vmem:[#allocation70_spill] sm:$0xff] %v17115_v11  ;;  %v1569_v11 = vadd.f32 %v19206_v23, %v19205_v58  ;;  %19209 = vst [vmem:[#allocation16_spill] sm:$0xff] %v17135_v27  ;;  %v2158_v12 = vadd.f32 %v16674_v22, %v1561_v42  ;;  %v2170_v23 = vadd.f32 %v19213_v1, %v1573_v44  ;;  %v19217_v42 = vld [vmem:[#allocation40_spill] sm:$0xff] }
 0x239   : > { %v17120_v40 = vpop.f32.mrf.mxu1 }
 0x23a   : > { %19198 = vst [vmem:[#allocation72_spill] sm:$0xff] %v17120_v40  ;;  %v2593_v40 = vadd.f32 %v19210_v8, %v16611_v18  ;;  %v2166_v59 = vadd.f32 %v19212_v14, %v1569_v11  ;;  %v19218_v8 = vld [vmem:[#allocation37_spill] sm:$0xff]  ;;  %v2605_v11 = vadd.f32 %v19220_v54, %v19219_v48  ;;  %v2621_v13 = vadd.f32 %v16867_v52, %v2170_v23  ;;  %v19230_v54 = vld [vmem:[#allocation36_spill] sm:$0xff] }
 0x23b   : > { %v17126_v41 = vpop.f32.mrf.mxu1  ;;  %v2601_v27 = vadd.f32 %v19218_v8, %v19217_v42  ;;  %v19221_v14 = vld [vmem:[#allocation41_spill] sm:$0xff]  ;;  %v4010_v52 = vadd.f32 %v16908_v50, %v16891_v6 }
 0x23c   : > { %19202 = vst [vmem:[#allocation15_spill] sm:$0xff] %v17126_v41  ;;  %v4440_v41 = vpop.f32.mrf.mxu0  ;;  %v3411_v18 = vadd.f32 %v16884_v0, %v2593_v40  ;;  %v2609_v1 = vadd.f32 %v19221_v14, %v2158_v12  ;;  %v3415_v0 = vadd.f32 %v16913_v63, %v2597_v29  ;;  %v4004_v40 = vadd.f32 %v16886_v51, %v16877_v45 }
 0x23d   : > { %v17140_v28 = vpop.f32.mrf.mxu1  ;;  %v17146_v58 = vadd.f32 %v4440_v41, %v16993_v47  ;;  %v19222_v47 = vld [vmem:[#allocation19_spill] sm:$0xff]  ;;  %v3419_v12 = vadd.f32 %v16930_v7, %v2601_v27  ;;  %v3423_v63 = vadd.f32 %v16945_v19, %v2605_v11 }
 0x23e   : > { %19211 = vst [vmem:[#allocation17_spill] sm:$0xff] %v17140_v28  ;;  %v14283_v55 = vpop.f32.mrf.mxu0  ;;  %v2613_v41 = vadd.f32 %v19222_v47, %v2162_v37  ;;  %v4005_v37 = vadd.f32 %v16903_v3, %v3411_v18  ;;  %v4455_v6 = vadd.f32 %v17007_v43, %v4004_v40  ;;  %v19225_v19 = vld [vmem:[#allocation27_spill] sm:$0xff]  ;;  %v19228_v43 = vld [vmem:[#allocation32_spill] sm:$0xff] }
 0x23f   : > { %19214 = vst [vmem:[#allocation18_spill] sm:$0xff] %v17146_v58  ;;  %v17152_v22 = vadd.f32 %v14283_v55, %v17001_v46  ;;  %v17159_v44 = vpop.f32.mrf.mxu1  ;;  %v19223_v58 = vld [vmem:[#allocation22_spill] sm:$0xff]  ;;  %v4006_v46 = vadd.f32 %v16879_v21, %v16872_v32  ;;  %v4007_v55 = vadd.f32 %v16888_v26, %v16882_v4  ;;  %v4008_v32 = vadd.f32 %v16911_v25, %v16906_v17 }
 0x240   : > { %v2617_v28 = vadd.f32 %v19223_v58, %v2166_v59  ;;  %v3427_v59 = vadd.f32 %v16958_v15, %v2609_v1  ;;  %v3431_v45 = vadd.f32 %v16971_v2, %v2613_v41  ;;  %v3439_v4 = vadd.f32 %v16997_v31, %v2621_v13  ;;  %v19224_v26 = vld [vmem:[#allocation26_spill] sm:$0xff]  ;;  %v19226_v31 = vld [vmem:[#allocation29_spill] sm:$0xff]  ;;  %v4443_v58 = vpop.f32.mrf.mxu0  ;;  %v19233_v41 = vld [vmem:[#allocation43_spill] sm:$0xff] }
 0x241   : > { %v17172_v5 = vpop.f32.mrf.mxu1  ;;  %v4009_v3 = vadd.f32 %v19224_v26, %v3415_v0  ;;  %v4457_v7 = vadd.f32 %v17003_v10, %v4006_v46  ;;  %v4458_v50 = vadd.f32 %v17011_v57, %v4007_v55  ;;  %v4013_v15 = vadd.f32 %v19225_v19, %v3419_v12  ;;  %v19229_v57 = vld [vmem:[#allocation33_spill] sm:$0xff]  ;;  %v19237_v55 = vld [vmem:[#allocation48_spill] sm:$0xff] }
 0x242   : > { %v3435_v21 = vadd.f32 %v16984_v60, %v2617_v28  ;;  %v4456_v17 = vadd.f32 %v17016_v49, %v4005_v37  ;;  %v4461_v25 = vadd.f32 %v17020_v61, %v4010_v52  ;;  %v4459_v2 = vadd.f32 %v17024_v16, %v4008_v32  ;;  %v19227_v28 = vld [vmem:[#allocation30_spill] sm:$0xff]  ;;  %v19232_v1 = vld [vmem:[#allocation45_spill] sm:$0xff]  ;;  %v19241_v32 = vld [vmem:[#allocation55_spill] sm:$0xff] }
 0x243   : > { %v17184_v51 = vpop.f32.mrf.mxu1  ;;  %v4017_v27 = vadd.f32 %v19226_v31, %v3423_v63  ;;  %v4021_v23 = vadd.f32 %v19227_v28, %v3427_v59  ;;  %v4460_v10 = vadd.f32 %v17031_v24, %v4009_v3  ;;  %v4025_v29 = vadd.f32 %v19228_v43, %v3431_v45  ;;  %v19231_v24 = vld [vmem:[#allocation44_spill] sm:$0xff]  ;;  %v19235_v13 = vld [vmem:[#allocation49_spill] sm:$0xff]  ;;  %v19238_v37 = vld [vmem:[#allocation50_spill] sm:$0xff] }
 0x244   : > { %v4029_v18 = vadd.f32 %v19229_v57, %v3435_v21  ;;  %v4033_v42 = vadd.f32 %v17005_v9, %v3439_v4  ;;  %v4464_v49 = vadd.f32 %v17050_v39, %v4013_v15  ;;  %v5275_v61 = vadd.f32 %v17014_v56, %v4457_v7  ;;  %v19239_v52 = vld [vmem:[#allocation53_spill] sm:$0xff]  ;;  %v19242_v21 = vld [vmem:[#allocation52_spill] sm:$0xff]  ;;  %v19252_v57 = vld [vmem:[#allocation67_spill] sm:$0xff] }
 0x245   : > { %v17194_v60 = vpop.f32.mrf.mxu1  ;;  %v5273_v16 = vadd.f32 %v17018_v33, %v4455_v6  ;;  %v5276_v8 = vadd.f32 %v17022_v35, %v4458_v50  ;;  %v4468_v48 = vadd.f32 %v17069_v36, %v4017_v27  ;;  %v5274_v11 = vadd.f32 %v19230_v54, %v4456_v17  ;;  %v19234_v33 = vld [vmem:[#allocation46_spill] sm:$0xff]  ;;  %v19236_v36 = vld [vmem:[#allocation47_spill] sm:$0xff]  ;;  %v19243_v4 = vld [vmem:[#allocation57_spill] sm:$0xff] }
 0x246   : > { %v5279_v14 = vadd.f32 %v19231_v24, %v4461_v25  ;;  %v17210_v47 = vadd.f32 %v19232_v1, %v4459_v2  ;;  %v17214_v9 = vadd.f32 %v17040_v62, %v19233_v41  ;;  %v17217_v56 = vadd.f32 %v17045_v53, %v4460_v10  ;;  %v17231_v62 = vld [vmem:[%s19086_s4] ss:$0 sm:$0xff]  ;;  %v19247_v19 = vld [vmem:[#allocation61_spill] sm:$0xff]  ;;  %v19248_v17 = vld [vmem:[#allocation56_spill] sm:$0xff] }
 0x247   : > { %v17221_v35 = vadd.f32 %v19235_v13, %v19234_v33  ;;  %v17225_v0 = vadd.f32 %v17054_v30, %v19236_v36  ;;  %v4472_v46 = vadd.f32 %v17086_v34, %v4021_v23  ;;  %v17235_v53 = vadd.f32 %v17059_v20, %v19237_v55  ;;  %v19240_v34 = vld [vmem:[#allocation51_spill] sm:$0xff]  ;;  %v19246_v50 = vld [vmem:[#allocation54_spill] sm:$0xff]  ;;  %v19255_v54 = vld [vmem:[#allocation73_spill] sm:$0xff] }
 0x248   : > { %v14330_v39 = vpop.f32.mrf.mxu1  ;;  %v17238_v12 = vadd.f32 %v17064_v38, %v4464_v49  ;;  %v17242_v63 = vadd.f32 %v19239_v52, %v19238_v37  ;;  %v17246_v45 = vadd.f32 %v19241_v32, %v19240_v34  ;;  %v17250_v26 = vadd.f32 %v19243_v4, %v19242_v21  ;;  %v19244_v20 = vld [vmem:[#allocation59_spill] sm:$0xff]  ;;  %v19245_v38 = vld [vmem:[#allocation65_spill] sm:$0xff]  ;;  %v19250_v23 = vld [vmem:[#allocation58_spill] sm:$0xff] }
 0x249   : > { %v14350_v40 = vpop.f32.mrf.mxu0  ;;  %v17253_v3 = vadd.f32 %v19244_v20, %v4468_v48  ;;  %v4476_v7 = vadd.f32 %v19245_v38, %v4025_v29  ;;  %v17258_v15 = vadd.f32 %v19247_v19, %v19246_v50  ;;  %v19249_v25 = vld [vmem:[#allocation63_spill] sm:$0xff]  ;;  %v19251_v10 = vld [vmem:[#allocation66_spill] sm:$0xff]  ;;  %v17270_v49 = vadd.f32 %v19252_v57, %v4472_v46  ;;  %v19253_v29 = vld [vmem:[#allocation60_spill] sm:$0xff] }
 0x24a   : > { %v5258_v30 = vpop.f32.mrf.mxu1  ;;  %v5869_v59 = vadd.f32 %v14350_v40, %v5275_v61  ;;  %v17262_v2 = vadd.f32 %v19249_v25, %v19248_v17  ;;  %v17267_v43 = vadd.f32 %v19251_v10, %v19250_v23  ;;  %v19254_v61 = vld [vmem:[#allocation70_spill] sm:$0xff]  ;;  %v4480_v24 = vadd.f32 %v19255_v54, %v4029_v18  ;;  %v19257_v33 = vld [vmem:[#allocation72_spill] sm:$0xff]  ;;  %v19259_v55 = vld [vmem:[#allocation15_spill] sm:$0xff] }
 0x24b   : > { %v5740_v6 = vpop.f32.mrf.mxu0  ;;  %v17274_v48 = vadd.f32 %v19254_v61, %v19253_v29  ;;  %v19256_v41 = vld [vmem:[#allocation62_spill] sm:$0xff]  ;;  %v19258_v46 = vld [vmem:[#allocation64_spill] sm:$0xff]  ;;  %v19260_v52 = vld [vmem:[#allocation17_spill] sm:$0xff]  ;;  %v4484_v32 = vadd.f32 %v4443_v58, %v4033_v42 }
 0x24c   : > { %v14331_v31 = vpop.f32.mrf.mxu1  ;;  %v5972_v27 = vadd.f32 %v17231_v62, %v5869_v59  ;;  %v5867_v28 = vadd.f32 %v5740_v6, %v5273_v16  ;;  %v17279_v13 = vadd.f32 %v19257_v33, %v19256_v41  ;;  %v17284_v37 = vadd.f32 %v19259_v55, %v19258_v46  ;;  %v19261_v18 = vld [vmem:[#allocation68_spill] sm:$0xff]  ;;  %v19262_v50 = vld [vmem:[#allocation69_spill] sm:$0xff]  ;;  %v19263_v17 = vld [vmem:[#allocation71_spill] sm:$0xff] }
 0x24d   : > { %v14351_v1 = vpop.f32.mrf.mxu0  ;;  %v17287_v59 = vadd.f32 %v19260_v52, %v4476_v7  ;;  %v17291_v34 = vadd.f32 %v17159_v44, %v19261_v18  ;;  %v17296_v19 = vadd.f32 %v17172_v5, %v19262_v50  ;;  %v17300_v7 = vadd.f32 %v17184_v51, %v19263_v17  ;;  %v19264_v44 = vld [vmem:[#allocation16_spill] sm:$0xff]  ;;  %v6511_v52 = vld [vmem:[#allocation2 + $0xc] sm:$0xf] }
 0x24e   : > { %v6004_v16 = vmax.f32 %v5972_v27, 0.0  ;;  %v5970_v36 = vadd.f32 %v17231_v62, %v5867_v28  ;;  %v5870_v40 = vadd.f32 %v14351_v1, %v5276_v8  ;;  %v5261_v4 = vpop.f32.mrf.mxu1  ;;  %v17303_v25 = vadd.f32 %v17194_v60, %v4480_v24  ;;  %v17308_v27 = vld [vmem:[#allocation7 + $0xf8] sm:$0xff]   ;;  %v19265_v28 = vld [vmem:[#allocation18_spill] sm:$0xff] }
 0x24f   : > { %v5743_v21 = vpop.f32.mrf.mxu0  ;;  %v17306_v58 = vadd.f32 %v14330_v39, %v19264_v44  ;;  %v17311_v23 = vadd.f32 %v5258_v30, %v19265_v28  ;;  %v17314_v57 = vadd.f32 %v14331_v31, %v17152_v22  ;;  %v17316_v51 = vadd.f32 %v5261_v4, %v4484_v32  ;;  %14524 = vmatprep.subr.bf16.mxu0 %v17308_v27  ;;  %v6520_v22 = vld [vmem:[#allocation2 + $0x18] sm:$0xf]  ;;  %v6524_v44 = vld [vmem:[#allocation2 + $0x20] sm:$0x1] }
 0x250   : > { %v13485_v20 = vpack.c.bf16 %v6004_v16, %v6004_v16  ;;  %v6002_v38 = vmax.f32 %v5970_v36, 0.0  ;;  %v5973_v6 = vadd.f32 %v17231_v62, %v5870_v40  ;;  %v5868_v8 = vadd.f32 %v5743_v21, %v5274_v11 }
 0x251   : > { %v14354_v42 = vpop.f32.mrf.mxu0 }
 0x252   : > { %v6205_v11 = vshrl.u32 %v13485_v20, 16  ;;  %v13483_v10 = vpack.c.bf16 %v6002_v38, %v6002_v38  ;;  %v6005_v5 = vmax.f32 %v5973_v6, 0.0  ;;  %v5971_v60 = vadd.f32 %v17231_v62, %v5868_v8 }
 0x253   : > { %v5873_v29 = vadd.f32 %v14354_v42, %v5279_v14  ;;  %v5756_v61 = vpop.f32.mrf.mxu0  ;;  %v6208_v54 = vshll.u32 %v13485_v20, 16 }
 0x254   : > { %v6207_v39 = vrot.slane %v6205_v11, 7  ;;  %v6188_v24 = vshrl.u32 %v13483_v10, 16  ;;  %v13486_v1 = vpack.c.bf16 %v6005_v5, %v6005_v5  ;;  %v6191_v31 = vshll.u32 %v13483_v10, 16 }
 0x255   : > { %v6003_v41 = vmax.f32 %v5971_v60, 0.0  ;;  %v5976_v33 = vadd.f32 %v17231_v62, %v5873_v29  ;;  %v5871_v14 = vadd.f32 %v5756_v61, %v17210_v47  ;;  %v14355_v16 = vpop.f32.mrf.mxu0 }
 0x256   : > { %v6210_v36 = vor.u32 %v6208_v54, %v6207_v39  ;;  %v6211_v40 = vrot.slane %v6207_v39, 4  ;;  %v6190_v46 = vrot.slane %v6188_v24, 7  ;;  %v6213_v55 = vshrl.u32 %v13486_v1, 16 }
 0x257   : > { %v6216_v18 = vshll.u32 %v13486_v1, 16  ;;  %v13484_v32 = vpack.c.bf16 %v6003_v41, %v6003_v41  ;;  %v6008_v21 = vmax.f32 %v5976_v33, 0.0  ;;  %v5974_v4 = vadd.f32 %v17231_v62, %v5871_v14  ;;  %v5759_v20 = vpop.f32.mrf.mxu0  ;;  %v6517_v14 = vld [vmem:[#allocation2 + $0x14] sm:$0x1] }
 0x258   : > { %v6521_v38 = vsel %vm17322_vm11, %v6210_v36, %v6520_v22  ;;  %v6193_v6 = vor.u32 %v6191_v31, %v6190_v46  ;;  %v6194_v8 = vrot.slane %v6190_v46, 4  ;;  %v6215_v50 = vrot.slane %v6213_v55, 7 }
 0x259   : > { %6522 = vst [vmem:[#allocation2 + $0x18] sm:$0xf] %v6521_v38  ;;  %v6196_v42 = vshrl.u32 %v13484_v32, 16  ;;  %v6199_v28 = vshll.u32 %v13484_v32, 16  ;;  %v13489_v11 = vpack.c.bf16 %v6008_v21, %v6008_v21  ;;  %v6006_v10 = vmax.f32 %v5974_v4, 0.0  ;;  %v14358_v5 = vpop.f32.mrf.mxu0 }
 0x25a   : > { %v6512_v60 = vsel %vm17322_vm11, %v6193_v6, %v6511_v52  ;;  %v6218_v29 = vor.u32 %v6216_v18, %v6215_v50  ;;  %v6220_v61 = vrot.slane %v6215_v50, 4  ;;  %v5874_v39 = vadd.f32 %v14355_v16, %v17214_v9  ;;  %v6534_v32 = vld [vmem:[#allocation2 + $0x30] sm:$0xf] }
 0x25b   : > { %6513 = vst [vmem:[#allocation2 + $0xc] sm:$0xf] %v6512_v60  ;;  %v6198_v54 = vrot.slane %v6196_v42, 7  ;;  %v6239_v24 = vshrl.u32 %v13489_v11, 16  ;;  %v6242_v1 = vshll.u32 %v13489_v11, 16  ;;  %v13487_v22 = vpack.c.bf16 %v6006_v10, %v6006_v10  ;;  %v5772_v31 = vpop.f32.mrf.mxu0 }
 0x25c   : > { %v6219_v41 = vsel %vm17333_vm12, %v6211_v40, %v6218_v29  ;;  %v6525_v33 = vsel %vm17339_vm13, %v6220_v61, %v6524_v44  ;;  %v5977_v36 = vadd.f32 %v17231_v62, %v5874_v39  ;;  %v5872_v46 = vadd.f32 %v5759_v20, %v17217_v56 }
 0x25d   : > { %6523 = vst [vmem:[#allocation2 + $0x1c] sm:$0xf] %v6219_v41  ;;  %6526 = vst [vmem:[#allocation2 + $0x20] sm:$0x1] %v6525_v33  ;;  %v6201_v9 = vor.u32 %v6199_v28, %v6198_v54  ;;  %v6203_v16 = vrot.slane %v6198_v54, 4  ;;  %v6241_v55 = vrot.slane %v6239_v24, 7  ;;  %v14359_v18 = vpop.f32.mrf.mxu0  ;;  %v5877_v38 = vadd.f32 %v14358_v5, %v17221_v35 }
 0x25e   : > { %v6222_v52 = vshrl.u32 %v13487_v22, 16  ;;  %v6225_v21 = vshll.u32 %v13487_v22, 16  ;;  %v6009_v4 = vmax.f32 %v5977_v36, 0.0  ;;  %v5975_v40 = vadd.f32 %v17231_v62, %v5872_v46  ;;  %v6527_v5 = vld [vmem:[#allocation2 + $0x24] sm:$0xf] }
 0x25f   : > { %v6202_v6 = vsel %vm17333_vm12, %v6194_v8, %v6201_v9  ;;  %v6518_v56 = vsel %vm17339_vm13, %v6203_v16, %v6517_v14  ;;  %v6244_v20 = vor.u32 %v6242_v1, %v6241_v55  ;;  %v6245_v50 = vrot.slane %v6241_v55, 4  ;;  %v5775_v44 = vpop.f32.mrf.mxu0  ;;  %v6538_v46 = vld [vmem:[#allocation2 + $0x38] sm:$0x1] }
 0x260   : > { %6514 = vst [vmem:[#allocation2 + $0x10] sm:$0xf] %v6202_v6  ;;  %6519 = vst [vmem:[#allocation2 + $0x14] sm:$0x1] %v6518_v56  ;;  %v17358_v42 = vrot.slane %v6222_v52, 7  ;;  %v13490_v28 = vpack.c.bf16 %v6009_v4, %v6009_v4  ;;  %v6007_v11 = vmax.f32 %v5975_v40, 0.0  ;;  %v5980_v10 = vadd.f32 %v17231_v62, %v5877_v38 }
 0x261   : > { %v6535_v35 = vsel %vm17322_vm11, %v6244_v20, %v6534_v32  ;;  %v5875_v8 = vadd.f32 %v5772_v31, %v17225_v0  ;;  %v5878_v60 = vadd.f32 %v14359_v18, %v17235_v53  ;;  %v5876_v29 = vadd.f32 %v5775_v44, %v17238_v12  ;;  %v14362_v61 = vpop.f32.mrf.mxu0  ;;  %v15018_v38 = vld [vmem:[#allocation7 + $0xb0] sm:$0xff]  }
 0x262   : > { %6536 = vst [vmem:[#allocation2 + $0x30] sm:$0xf] %v6535_v35  ;;  %v6227_v39 = vor.u32 %v6225_v21, %v17358_v42  ;;  %v6228_v54 = vrot.slane %v17358_v42, 4  ;;  %v6247_v24 = vshrl.u32 %v13490_v28, 16  ;;  %v6250_v1 = vshll.u32 %v13490_v28, 16 }
 0x263   : > { %v13488_v22 = vpack.c.bf16 %v6007_v11, %v6007_v11  ;;  %v6012_v41 = vmax.f32 %v5980_v10, 0.0  ;;  %v5978_v33 = vadd.f32 %v17231_v62, %v5875_v8  ;;  %v5981_v14 = vadd.f32 %v17231_v62, %v5878_v60  ;;  %v5788_v36 = vpop.f32.mrf.mxu0  ;;  %v6531_v10 = vld [vmem:[#allocation2 + $0x2c] sm:$0x1] }
 0x264   : > { %v6528_v0 = vsel %vm17322_vm11, %v6227_v39, %v6527_v5  ;;  %v6249_v53 = vrot.slane %v6247_v24, 7  ;;  %v5979_v12 = vadd.f32 %v17231_v62, %v5876_v29  ;;  %v5881_v31 = vadd.f32 %v14362_v61, %v17242_v63  ;;  %v15014_v8 = vld [vmem:[#allocation2 + $0x18] sm:$0xff]  }
 0x265   : > { %6529 = vst [vmem:[#allocation2 + $0x24] sm:$0xf] %v6528_v0  ;;  %v6230_v9 = vshrl.u32 %v13488_v22, 16  ;;  %v6233_v16 = vshll.u32 %v13488_v22, 16  ;;  %v13493_v55 = vpack.c.bf16 %v6012_v41, %v6012_v41  ;;  %v6010_v52 = vmax.f32 %v5978_v33, 0.0  ;;  %v14363_v18 = vpop.f32.mrf.mxu0 }
 0x266   : > { %v6252_v32 = vor.u32 %v6250_v1, %v6249_v53  ;;  %v6254_v21 = vrot.slane %v6249_v53, 4  ;;  %v6013_v4 = vmax.f32 %v5981_v14, 0.0  ;;  %v6011_v40 = vmax.f32 %v5979_v12, 0.0  ;;  %v6548_v1 = vld [vmem:[#allocation2 + $0x48] sm:$0xf]  ;;  %v19272_v14 = vld [vmem:[#allocation34_spill] sm:$0xff] }
 0x267   : > { %v6232_v6 = vrot.slane %v6230_v9, 7  ;;  %v6273_v56 = vshrl.u32 %v13493_v55, 16  ;;  %v6276_v20 = vshll.u32 %v13493_v55, 16  ;;  %v13491_v44 = vpack.c.bf16 %v6010_v52, %v6010_v52  ;;  %v17374_v42 = vpop.f32.mrf.mxu0  ;;  %v15012_v28 = vld [vmem:[#allocation2 + $0xc] sm:$0xff]   ;;  %v15021_v9 = vld [vmem:[#allocation7 + $0xa8] sm:$0xff]  }
 0x268   : > { %v6253_v63 = vsel %vm17333_vm12, %v6245_v50, %v6252_v32  ;;  %v6539_v11 = vsel %vm17339_vm13, %v6254_v21, %v6538_v46  ;;  %v13494_v35 = vpack.c.bf16 %v6013_v4, %v6013_v4  ;;  %v13492_v5 = vpack.c.bf16 %v6011_v40, %v6011_v40  ;;  %14397 = vmatmul.mubr.bf16.vlgmr.msra.gmra.mxu1 %v15012_v28  ;;  %v6541_v40 = vld [vmem:[#allocation2 + $0x3c] sm:$0xf] }
 0x269   : > { %6537 = vst [vmem:[#allocation2 + $0x34] sm:$0xf] %v6253_v63  ;;  %6540 = vst [vmem:[#allocation2 + $0x38] sm:$0x1] %v6539_v11  ;;  %v6235_v60 = vor.u32 %v6233_v16, %v6232_v6  ;;  %v6237_v29 = vrot.slane %v6232_v6, 4  ;;  %v6275_v61 = vrot.slane %v6273_v56, 7  ;;  %v14366_v24 = vpop.f32.mrf.mxu0  ;;  %14400 = vmatprep.mubr.bf16.mxu1 %v15014_v8  ;;  %14477 = vmatpush3.bf16.msra.mxu1 %v19272_v14 }
 0x26a   : > { %v6256_v39 = vshrl.u32 %v13491_v44, 16  ;;  %v6259_v22 = vshll.u32 %v13491_v44, 16  ;;  %v6281_v41 = vshrl.u32 %v13494_v35, 16  ;;  %v6284_v33 = vshll.u32 %v13494_v35, 16  ;;  %14478 = vmatprep.subr.bf16.mxu1 %v15018_v38  ;;  %v6552_v6 = vld [vmem:[#allocation2 + $0x50] sm:$0x1] }
 0x26b   : > { %v6264_v50 = vshrl.u32 %v13492_v5, 16  ;;  %v6236_v0 = vsel %vm17333_vm12, %v6228_v54, %v6235_v60  ;;  %v6532_v53 = vsel %vm17339_vm13, %v6237_v29, %v6531_v10  ;;  %v6278_v12 = vor.u32 %v6276_v20, %v6275_v61  ;;  %v5804_v21 = vpop.f32.mrf.mxu0  ;;  %v6545_v10 = vld [vmem:[#allocation2 + $0x44] sm:$0x1]  ;;  %v15024_v29 = vld [vmem:[#allocation7 + $0xa0] sm:$0xff]  }
 0x26c   : > { %v6279_v46 = vrot.slane %v6275_v61, 4  ;;  %6530 = vst [vmem:[#allocation2 + $0x28] sm:$0xf] %v6236_v0  ;;  %6533 = vst [vmem:[#allocation2 + $0x2c] sm:$0x1] %v6532_v53  ;;  %v6258_v16 = vrot.slane %v6256_v39, 7  ;;  %v5984_v54 = vadd.f32 %v17231_v62, %v5881_v31  ;;  %v5879_v56 = vadd.f32 %v5788_v36, %v17246_v45 }
 0x26d   : > { %v6283_v55 = vrot.slane %v6281_v41, 7  ;;  %v6266_v52 = vrot.slane %v6264_v50, 7  ;;  %v6267_v32 = vshll.u32 %v13492_v5, 16  ;;  %v6549_v4 = vsel %vm17322_vm11, %v6278_v12, %v6548_v1  ;;  %14479 = vmatpush3.bf16.msra.mxu1 %v15018_v38 }
 0x26e   : > { %v5882_v20 = vadd.f32 %v14363_v18, %v17250_v26  ;;  %6550 = vst [vmem:[#allocation2 + $0x48] sm:$0xf] %v6549_v4  ;;  %v6261_v44 = vor.u32 %v6259_v22, %v6258_v16  ;;  %v6262_v28 = vrot.slane %v6258_v16, 4  ;;  %v6016_v8 = vmax.f32 %v5984_v54, 0.0  ;;  %14480 = vmatprep.subr.bf16.mxu1 %v15021_v9  ;;  %v14367_v18 = vpop.f32.mrf.mxu0  ;;  %v15027_v16 = vld [vmem:[#allocation7 + $0x98] sm:$0xff]  }
 0x26f   : > { %v6286_v63 = vor.u32 %v6284_v33, %v6283_v55  ;;  %v6288_v11 = vrot.slane %v6283_v55, 4  ;;  %v6269_v35 = vor.u32 %v6267_v32, %v6266_v52  ;;  %v6271_v5 = vrot.slane %v6266_v52, 4 }
 0x270   : > { %v5982_v60 = vadd.f32 %v17231_v62, %v5879_v56  ;;  %v6542_v31 = vsel %vm17322_vm11, %v6261_v44, %v6541_v40  ;;  %v5985_v36 = vadd.f32 %v17231_v62, %v5882_v20  ;;  %v13497_v39 = vpack.c.bf16 %v6016_v8, %v6016_v8  ;;  %v6555_v44 = vld [vmem:[#allocation2 + $0x54] sm:$0xf] }
 0x271   : > { %v6287_v45 = vsel %vm17333_vm12, %v6279_v46, %v6286_v63  ;;  %v6553_v26 = vsel %vm17339_vm13, %v6288_v11, %v6552_v6  ;;  %6543 = vst [vmem:[#allocation2 + $0x3c] sm:$0xf] %v6542_v31  ;;  %v6270_v38 = vsel %vm17333_vm12, %v6262_v28, %v6269_v35  ;;  %v6546_v61 = vsel %vm17339_vm13, %v6271_v5, %v6545_v10  ;;  %v5807_v63 = vpop.f32.mrf.mxu0  ;;  %v15030_v11 = vld [vmem:[#allocation7 + $0x90] sm:$0xff]  }
 0x272   : > { %6551 = vst [vmem:[#allocation2 + $0x4c] sm:$0xf] %v6287_v45  ;;  %6554 = vst [vmem:[#allocation2 + $0x50] sm:$0x1] %v6553_v26  ;;  %v6014_v1 = vmax.f32 %v5982_v60, 0.0  ;;  %v6017_v22 = vmax.f32 %v5985_v36, 0.0  ;;  %v5880_v41 = vadd.f32 %v17374_v42, %v17253_v3  ;;  %v5885_v33 = vadd.f32 %v14366_v24, %v17258_v15  ;;  %14481 = vmatpush3.bf16.msra.mxu1 %v15021_v9 }
 0x273   : > { %6544 = vst [vmem:[#allocation2 + $0x40] sm:$0xf] %v6270_v38  ;;  %6547 = vst [vmem:[#allocation2 + $0x44] sm:$0x1] %v6546_v61  ;;  %v5883_v50 = vadd.f32 %v5804_v21, %v17262_v2  ;;  %v6307_v14 = vshrl.u32 %v13497_v39, 16  ;;  %v6310_v0 = vshll.u32 %v13497_v39, 16  ;;  %v5886_v12 = vadd.f32 %v14367_v18, %v17267_v43  ;;  %14482 = vmatprep.subr.bf16.mxu1 %v15024_v29 }
 0x274   : > { %v13495_v53 = vpack.c.bf16 %v6014_v1, %v6014_v1  ;;  %v15017_v46 = vld [vmem:[#allocation2 + $0x24] sm:$0xff]   ;;  %v13498_v55 = vpack.c.bf16 %v6017_v22, %v6017_v22  ;;  %v5983_v52 = vadd.f32 %v17231_v62, %v5880_v41  ;;  %v5988_v32 = vadd.f32 %v17231_v62, %v5885_v33  ;;  %v15019_v42 = vld [vmem:[#allocation2 + $0x30] sm:$0xff]   ;;  %v6562_v21 = vld [vmem:[#allocation2 + $0x60] sm:$0xf] }
 0x275   : > { %v5986_v3 = vadd.f32 %v17231_v62, %v5883_v50  ;;  %v6309_v15 = vrot.slane %v6307_v14, 7  ;;  %v5989_v9 = vadd.f32 %v17231_v62, %v5886_v12  ;;  %14401 = vmatmul.mubr.bf16.gmra.mxu1 %v15017_v46  ;;  %v6566_v26 = vld [vmem:[#allocation2 + $0x68] sm:$0x1]  ;;  %v6559_v22 = vld [vmem:[#allocation2 + $0x5c] sm:$0x1]  ;;  %v14370_v14 = vpop.f32.mrf.mxu0 }
 0x276   : > { %v6290_v24 = vshrl.u32 %v13495_v53, 16  ;;  %v6293_v2 = vshll.u32 %v13495_v53, 16  ;;  %v6315_v4 = vshrl.u32 %v13498_v55, 16  ;;  %v6318_v43 = vshll.u32 %v13498_v55, 16  ;;  %14404 = vmatprep.mubr.bf16.mxu1 %v15019_v42  ;;  %14483 = vmatpush3.bf16.msra.mxu1 %v15024_v29  ;;  %v15035_v53 = vld [vmem:[#allocation7 + $0x88] sm:$0xff]  }
 0x277   : > { %v6015_v40 = vmax.f32 %v5983_v52, 0.0  ;;  %v6020_v6 = vmax.f32 %v5988_v32, 0.0  ;;  %v6312_v54 = vor.u32 %v6310_v0, %v6309_v15  ;;  %v6313_v56 = vrot.slane %v6309_v15, 4  ;;  %14484 = vmatprep.subr.bf16.mxu1 %v15027_v16  ;;  %v7109_v0 = vld [vmem:[#allocation2 + $0xc] sm:$0xf] }
 0x278   : > { %v6292_v20 = vrot.slane %v6290_v24, 7  ;;  %v6018_v28 = vmax.f32 %v5986_v3, 0.0  ;;  %v6317_v10 = vrot.slane %v6315_v4, 7  ;;  %v6021_v8 = vmax.f32 %v5989_v9, 0.0  ;;  %v6569_v15 = vld [vmem:[#allocation2 + $0x6c] sm:$0xf] }
 0x279   : > { %v13496_v35 = vpack.c.bf16 %v6015_v40, %v6015_v40  ;;  %v13501_v5 = vpack.c.bf16 %v6020_v6, %v6020_v6  ;;  %v6563_v60 = vsel %vm17322_vm11, %v6312_v54, %v6562_v21  ;;  %v15022_v32 = vld [vmem:[#allocation2 + $0x48] sm:$0xff]   ;;  %v15040_v9 = vld [vmem:[#allocation7 + $0x80] sm:$0xff]   ;;  %v7110_v40 = vld [vmem:[#allocation2 + $0x10] sm:$0xf]  ;;  %v7179_v6 = vshrl.u32 %v7109_v0, 16 }
 0x27a   : > { %v6295_v31 = vor.u32 %v6293_v2, %v6292_v20  ;;  %v6296_v45 = vrot.slane %v6292_v20, 4  ;;  %v13499_v36 = vpack.c.bf16 %v6018_v28, %v6018_v28  ;;  %v15020_v29 = vld [vmem:[#allocation2 + $0x3c] sm:$0xff]   ;;  %6564 = vst [vmem:[#allocation2 + $0x60] sm:$0xf] %v6563_v60  ;;  %v6320_v18 = vor.u32 %v6318_v43, %v6317_v10  ;;  %14485 = vmatpush3.bf16.msra.mxu1 %v15027_v16  ;;  %v6576_v16 = vld [vmem:[#allocation2 + $0x78] sm:$0xf] }
 0x27b   : > { %v6322_v38 = vrot.slane %v6317_v10, 4  ;;  %v6298_v61 = vshrl.u32 %v13496_v35, 16  ;;  %v6301_v39 = vshll.u32 %v13496_v35, 16  ;;  %v6341_v41 = vshrl.u32 %v13501_v5, 16  ;;  %14486 = vmatprep.subr.bf16.mxu1 %v15030_v11  ;;  %v5820_v35 = vpop.f32.mrf.mxu0 }
 0x27c   : > { %v6556_v1 = vsel %vm17322_vm11, %v6295_v31, %v6555_v44  ;;  %v6344_v33 = vshll.u32 %v13501_v5, 16  ;;  %v6324_v50 = vshrl.u32 %v13499_v36, 16  ;;  %v6321_v12 = vsel %vm17333_vm12, %v6313_v56, %v6320_v18  ;;  %v15043_v18 = vld [vmem:[#allocation7 + $0x138] sm:$0xff]  }
 0x27d   : > { %6557 = vst [vmem:[#allocation2 + $0x54] sm:$0xf] %v6556_v1  ;;  %v6567_v46 = vsel %vm17339_vm13, %v6322_v38, %v6566_v26  ;;  %v6300_v55 = vrot.slane %v6298_v61, 7  ;;  %v6327_v52 = vshll.u32 %v13499_v36, 16  ;;  %6565 = vst [vmem:[#allocation2 + $0x64] sm:$0xf] %v6321_v12  ;;  %v13502_v24 = vpack.c.bf16 %v6021_v8, %v6021_v8  ;;  %14405 = vmatmul.mubr.bf16.gmra.mxu1 %v15020_v29 }
 0x27e   : > { %6568 = vst [vmem:[#allocation2 + $0x68] sm:$0x1] %v6567_v46  ;;  %v6343_v3 = vrot.slane %v6341_v41, 7  ;;  %v17419_v42 = vrot.slane %v6324_v50, 7  ;;  %v5884_v2 = vadd.f32 %v5807_v63, %v17270_v49  ;;  %v5889_v43 = vadd.f32 %v14370_v14, %v17274_v48  ;;  %14408 = vmatprep.mubr.bf16.mxu1 %v15022_v32  ;;  %14487 = vmatpush3.bf16.msra.mxu1 %v15030_v11  ;;  %v7111_v48 = vld [vmem:[#allocation2 + $0x14] sm:$0x1]  ;;  %v17435_v14 = vpop.f32.mrf.mxu0 }
 0x27f   : > { %v6303_v21 = vor.u32 %v6301_v39, %v6300_v55  ;;  %v6305_v4 = vrot.slane %v6300_v55, 4  ;;  %14488 = vmatprep.subr.bf16.mxu1 %v15035_v53  ;;  %v6349_v63 = vshrl.u32 %v13502_v24, 16  ;;  %v6352_v10 = vshll.u32 %v13502_v24, 16  ;;  %v6580_v8 = vld [vmem:[#allocation2 + $0x80] sm:$0x1] }
 0x280   : > { %v6346_v54 = vor.u32 %v6344_v33, %v6343_v3  ;;  %v6347_v56 = vrot.slane %v6343_v3, 4  ;;  %v6329_v20 = vor.u32 %v6327_v52, %v17419_v42  ;;  %v6330_v44 = vrot.slane %v17419_v42, 4  ;;  %v7112_v52 = vld [vmem:[#allocation2 + $0x18] sm:$0xf] }
 0x281   : > { %v6304_v49 = vsel %vm17333_vm12, %v6296_v45, %v6303_v21  ;;  %v6560_v28 = vsel %vm17339_vm13, %v6305_v4, %v6559_v22  ;;  %v5987_v60 = vadd.f32 %v17231_v62, %v5884_v2  ;;  %v5992_v31 = vadd.f32 %v17231_v62, %v5889_v43  ;;  %v6573_v43 = vld [vmem:[#allocation2 + $0x74] sm:$0x1] }
 0x282   : > { %6558 = vst [vmem:[#allocation2 + $0x58] sm:$0xf] %v6304_v49  ;;  %6561 = vst [vmem:[#allocation2 + $0x5c] sm:$0x1] %v6560_v28  ;;  %v6577_v11 = vsel %vm17322_vm11, %v6346_v54, %v6576_v16  ;;  %v6570_v5 = vsel %vm17322_vm11, %v6329_v20, %v6569_v15  ;;  %v6351_v45 = vrot.slane %v6349_v63, 7  ;;  %v7181_v26 = vrot.slane %v7179_v6, 4  ;;  %14489 = vmatpush3.bf16.msra.mxu1 %v15035_v53  ;;  %v5823_v49 = vpop.f32.mrf.mxu0 }
 0x283   : > { %6578 = vst [vmem:[#allocation2 + $0x78] sm:$0xf] %v6577_v11  ;;  %6571 = vst [vmem:[#allocation2 + $0x6c] sm:$0xf] %v6570_v5  ;;  %v7182_v36 = vshll.u32 %v7109_v0, 16  ;;  %v7188_v29 = vshll.u32 %v7110_v40, 16  ;;  %14490 = vmatprep.subr.bf16.mxu1 %v15040_v9  ;;  %v5887_v3 = vadd.f32 %v5820_v35, %v17279_v13  ;;  %v5890_v42 = vadd.f32 %v17435_v14, %v17284_v37 }
 0x284   : > { %v6019_v38 = vmax.f32 %v5987_v60, 0.0  ;;  %v6024_v61 = vmax.f32 %v5992_v31, 0.0  ;;  %v7192_v39 = vshrl.u32 %v7110_v40, 16  ;;  %v7198_v1 = vshll.u32 %v7111_v48, 16  ;;  %v7113_v15 = vld [vmem:[#allocation2 + $0x1c] sm:$0xf] }
 0x285   : > { %v6354_v22 = vor.u32 %v6352_v10, %v6351_v45  ;;  %v6356_v41 = vrot.slane %v6351_v45, 4  ;;  %v7184_v33 = vrot.slane %v7182_v36, 5  ;;  %v7190_v50 = vrot.slane %v7188_v29, 5  ;;  %v6590_v40 = vld [vmem:[#allocation2 + $0x90] sm:$0xf]  ;;  %v15025_v63 = vld [vmem:[#allocation2 + $0x60] sm:$0xff]  }
 0x286   : > { %v13500_v12 = vpack.c.bf16 %v6019_v38, %v6019_v38  ;;  %v13505_v46 = vpack.c.bf16 %v6024_v61, %v6024_v61  ;;  %v7194_v55 = vrot.slane %v7192_v39, 4  ;;  %v7200_v16 = vrot.slane %v7198_v1, 5  ;;  %14491 = vmatpush3.bf16.msra.mxu1 %v15040_v9  ;;  %v15033_v29 = vld [vmem:[#allocation7 + $0xf0] sm:$0xff]   ;;  %v7114_v61 = vld [vmem:[#allocation2 + $0x20] sm:$0x1] }
 0x287   : > { %v6355_v0 = vsel %vm17333_vm12, %v6347_v56, %v6354_v22  ;;  %v6581_v53 = vsel %vm17339_vm13, %v6356_v41, %v6580_v8  ;;  %v7185_v32 = vor.u32 %v7184_v33, %v7181_v26  ;;  %14572 = vmatprep.subr.bf16.mxu1 %v15043_v18  ;;  %v5990_v56 = vadd.f32 %v17231_v62, %v5887_v3  ;;  %v14374_v22 = vpop.f32.mrf.mxu0  ;;  %v7115_v41 = vld [vmem:[#allocation2 + $0x24] sm:$0xf]  ;;  %v7116_v37 = vld [vmem:[#allocation2 + $0x28] sm:$0xf] }
 0x288   : > { %6579 = vst [vmem:[#allocation2 + $0x7c] sm:$0xf] %v6355_v0  ;;  %6582 = vst [vmem:[#allocation2 + $0x80] sm:$0x1] %v6581_v53  ;;  %v6332_v24 = vshrl.u32 %v13500_v12, 16  ;;  %v6335_v2 = vshll.u32 %v13500_v12, 16  ;;  %v7195_v54 = vor.u32 %v7194_v55, %v7190_v50 }
 0x289   : > { %v6375_v21 = vshrl.u32 %v13505_v46, 16  ;;  %v6378_v4 = vshll.u32 %v13505_v46, 16  ;;  %v7186_v6 = vrot.slane %v7185_v32, 4  ;;  %v7203_v20 = vshrl.u32 %v7112_v52, 16  ;;  %v15023_v28 = vld [vmem:[#allocation2 + $0x54] sm:$0xff]  }
 0x28a   : > { %v6334_v13 = vrot.slane %v6332_v24, 7  ;;  %v7206_v9 = vshll.u32 %v7112_v52, 16  ;;  %v7212_v48 = vshll.u32 %v7113_v15, 16  ;;  %v7196_v5 = vrot.slane %v7195_v54, 4  ;;  %14409 = vmatmul.mubr.bf16.gmra.mxu1 %v15023_v28  ;;  %v7117_v28 = vld [vmem:[#allocation2 + $0x2c] sm:$0x1] }
 0x28b   : > { %v17443_v10 = vrot.slane %v6375_v21, 7  ;;  %v7191_v11 = vsel %vm15478_vm2, %v7186_v6, %v7190_v50  ;;  %v6022_v8 = vmax.f32 %v5990_v56, 0.0  ;;  %v7205_v60 = vrot.slane %v7203_v20, 4  ;;  %14412 = vmatprep.mubr.bf16.mxu1 %v15025_v63 }
 0x28c   : > { %v6337_v31 = vor.u32 %v6335_v2, %v6334_v13  ;;  %v6339_v45 = vrot.slane %v6334_v13, 4  ;;  %v7201_v18 = vsel %vm15478_vm2, %v7196_v5, %v7200_v16  ;;  %v7208_v39 = vrot.slane %v7206_v9, 5  ;;  %v15038_v5 = vld [vmem:[#allocation7 + $0xe0] sm:$0xff]  }
 0x28d   : > { %v6380_v26 = vor.u32 %v6378_v4, %v17443_v10  ;;  %v6381_v36 = vrot.slane %v17443_v10, 4  ;;  %v13503_v38 = vpack.c.bf16 %v6022_v8, %v6022_v8  ;;  %v7214_v1 = vrot.slane %v7212_v48, 5  ;;  %v6583_v4 = vld [vmem:[#allocation2 + $0x84] sm:$0xf] }
 0x28e   : > { %v6338_v33 = vsel %vm17333_vm12, %v6330_v44, %v6337_v31  ;;  %v6574_v50 = vsel %vm17339_vm13, %v6339_v45, %v6573_v43  ;;  %v13237_v46 = vcombine.low %v7191_v11, %v7201_v18  ;;  %v7209_v52 = vor.u32 %v7208_v39, %v7205_v60  ;;  %v5836_v11 = vpop.f32.mrf.mxu0 }
 0x28f   : > { %v6591_v12 = vsel %vm17322_vm11, %v6380_v26, %v6590_v40  ;;  %6572 = vst [vmem:[#allocation2 + $0x70] sm:$0xf] %v6338_v33  ;;  %6575 = vst [vmem:[#allocation2 + $0x74] sm:$0x1] %v6574_v50  ;;  %v6358_v55 = vshrl.u32 %v13503_v38, 16  ;;  %v6361_v16 = vshll.u32 %v13503_v38, 16  ;;  %v5888_v44 = vadd.f32 %v5823_v49, %v17287_v59 }
 0x290   : > { %6592 = vst [vmem:[#allocation2 + $0x90] sm:$0xf] %v6591_v12  ;;  %v7216_v0 = vshrl.u32 %v7113_v15, 16  ;;  %14445 = vmatmul.mubr.bf16.vlgmr.msra.gmra.mxu0 %v13237_v46  ;;  %v7222_v53 = vshll.u32 %v7114_v61, 16  ;;  %v5893_v32 = vadd.f32 %v14374_v22, %v17291_v34  ;;  %v7210_v24 = vrot.slane %v7209_v52, 4  ;;  %v15037_v59 = vld [vmem:[#allocation7 + $0xe8] sm:$0xff]  }
 0x291   : > { %v17463_v3 = vrot.slane %v6358_v55, 7  ;;  %v7227_v21 = vshrl.u32 %v7115_v41, 16  ;;  %14525 = vmatpush3.bf16.msra.mxu0 %v17308_v27  ;;  %v5993_v15 = vadd.f32 %v17231_v62, %v5890_v42  ;;  %v5991_v40 = vadd.f32 %v17231_v62, %v5888_v44  ;;  %v17479_v50 = vld [vmem:[#allocation2 + $0x30] sm:$0xf]  ;;  %v6594_v12 = vld [vmem:[#allocation2 + $0x98] sm:$0x1] }
 0x292   : > { %v7218_v2 = vrot.slane %v7216_v0, 4  ;;  %v7224_v43 = vrot.slane %v7222_v53, 5  ;;  %v5996_v6 = vadd.f32 %v17231_v62, %v5893_v32  ;;  %14526 = vmatprep.subr.bf16.mxu0 %v15033_v29  ;;  %v7215_v54 = vsel %vm15478_vm2, %v7210_v24, %v7214_v1  ;;  %v6587_v55 = vld [vmem:[#allocation2 + $0x8c] sm:$0x1]  ;;  %v14375_v53 = vpop.f32.mrf.mxu0  ;;  %v15041_v42 = vld [vmem:[#allocation7 + $0xd8] sm:$0xff]  }
 0x293   : > { %v6363_v34 = vor.u32 %v6361_v16, %v17463_v3  ;;  %v6364_v14 = vrot.slane %v17463_v3, 4  ;;  %v6025_v27 = vmax.f32 %v5993_v15, 0.0  ;;  %v6023_v20 = vmax.f32 %v5991_v40, 0.0  ;;  %v6604_v24 = vld [vmem:[#allocation2 + $0xa8] sm:$0xf] }
 0x294   : > { %v7219_v56 = vor.u32 %v7218_v2, %v7214_v1  ;;  %v6028_v49 = vmax.f32 %v5996_v6, 0.0  ;;  %v7229_v63 = vrot.slane %v7227_v21, 4  ;;  %v7230_v9 = vshll.u32 %v7115_v41, 16  ;;  %v15028_v1 = vld [vmem:[#allocation2 + $0x78] sm:$0xff]   ;;  %v17508_v3 = vld [vmem:[%s19086_s4] ss:$0 sm:$0xff] }
 0x295   : > { %v6584_v13 = vsel %vm17322_vm11, %v6363_v34, %v6583_v4  ;;  %v7236_v48 = vshll.u32 %v7116_v37, 16  ;;  %14527 = vmatpush3.bf16.msra.mxu0 %v15033_v29  ;;  %v13506_v8 = vpack.c.bf16 %v6025_v27, %v6025_v27  ;;  %v13504_v60 = vpack.c.bf16 %v6023_v20, %v6023_v20 }
 0x296   : > { %v7220_v62 = vrot.slane %v7219_v56, 4  ;;  %6585 = vst [vmem:[#allocation2 + $0x84] sm:$0xf] %v6584_v13  ;;  %v13509_v31 = vpack.c.bf16 %v6028_v49, %v6028_v49  ;;  %v7240_v45 = vshrl.u32 %v7116_v37, 16  ;;  %v15026_v26 = vld [vmem:[#allocation2 + $0x6c] sm:$0xff]   ;;  %14528 = vmatprep.subr.bf16.mxu0 %v15037_v59  ;;  %v7232_v38 = vrot.slane %v7230_v9, 5 }
 0x297   : > { %v17477_v61 = vrot.slane %v7236_v48, 5  ;;  %v7246_v39 = vshll.u32 %v7117_v28, 16  ;;  %v6383_v41 = vshrl.u32 %v13506_v8, 16  ;;  %v6386_v33 = vshll.u32 %v13506_v8, 16  ;;  %14413 = vmatmul.mubr.bf16.gmra.mxu1 %v15026_v26  ;;  %v7120_v28 = vld [vmem:[#allocation2 + $0x38] sm:$0x1] }
 0x298   : > { %v7225_v18 = vsel %vm15478_vm2, %v7220_v62, %v7224_v43  ;;  %v6366_v29 = vshrl.u32 %v13504_v60, 16  ;;  %v6369_v46 = vshll.u32 %v13504_v60, 16  ;;  %v6409_v16 = vshrl.u32 %v13509_v31, 16  ;;  %14416 = vmatprep.mubr.bf16.mxu1 %v15028_v1  ;;  %v15042_v48 = vld [vmem:[#allocation7 + $0xd0] sm:$0xff]  }
 0x299   : > { %v13238_v22 = vcombine.low %v7215_v54, %v7225_v18  ;;  %v6412_v52 = vshll.u32 %v13509_v31, 16  ;;  %v7233_v0 = vor.u32 %v7232_v38, %v7229_v63  ;;  %14529 = vmatpush3.bf16.msra.mxu0 %v15037_v59  ;;  %v6385_v44 = vrot.slane %v6383_v41, 7  ;;  %v7119_v59 = vld [vmem:[#allocation2 + $0x34] sm:$0xf]  ;;  %v5839_v63 = vpop.f32.mrf.mxu0 }
 0x29a   : > { %v6368_v32 = vrot.slane %v6366_v29, 7  ;;  %v7242_v2 = vrot.slane %v7240_v45, 4  ;;  %v7248_v21 = vrot.slane %v7246_v39, 5  ;;  %14530 = vmatprep.subr.bf16.mxu0 %v15038_v5  ;;  %v17481_v4 = vrot.slane %v6409_v16, 7  ;;  %v15044_v29 = vld [vmem:[#allocation7 + $0xc8] sm:$0xff]  }
 0x29b   : > { %14448 = vmatprep.mubr.bf16.mxu0 %v13238_v22  ;;  %v7234_v43 = vrot.slane %v7233_v0, 4  ;;  %v5891_v15 = vadd.f32 %v5836_v11, %v17296_v19  ;;  %v7251_v40 = vshrl.u32 %v17479_v50, 16  ;;  %v6388_v6 = vor.u32 %v6386_v33, %v6385_v44  ;;  %v14378_v39 = vpop.f32.mrf.mxu0  ;;  %v17520_v16 = vld [vmem:[#allocation2 + $0x40] sm:$0xf] }
 0x29c   : > { %v6390_v37 = vrot.slane %v6385_v44, 4  ;;  %v6371_v34 = vor.u32 %v6369_v46, %v6368_v32  ;;  %v6373_v54 = vrot.slane %v6368_v32, 4  ;;  %v6414_v56 = vor.u32 %v6412_v52, %v17481_v4 }
 0x29d   : > { %v6415_v27 = vrot.slane %v17481_v4, 4  ;;  %v7239_v20 = vsel %vm15478_vm2, %v7234_v43, %v17477_v61  ;;  %v7243_v49 = vor.u32 %v7242_v2, %v17477_v61  ;;  %14531 = vmatpush3.bf16.msra.mxu0 %v15038_v5  ;;  %v6389_v19 = vsel %vm17333_vm12, %v6381_v36, %v6388_v6  ;;  %v17511_v5 = vld [vmem:[#allocation2 + $0x3c] sm:$0xf] }
 0x29e   : > { %v6595_v13 = vsel %vm17339_vm13, %v6390_v37, %v6594_v12  ;;  %v6372_v62 = vsel %vm17333_vm12, %v6364_v14, %v6371_v34  ;;  %v6588_v9 = vsel %vm17339_vm13, %v6373_v54, %v6587_v55  ;;  %14532 = vmatprep.subr.bf16.mxu0 %v15041_v42  ;;  %6593 = vst [vmem:[#allocation2 + $0x94] sm:$0xf] %v6389_v19  ;;  %v7253_v11 = vrot.slane %v7251_v40, 4 }
 0x29f   : > { %6596 = vst [vmem:[#allocation2 + $0x98] sm:$0x1] %v6595_v13  ;;  %6586 = vst [vmem:[#allocation2 + $0x88] sm:$0xf] %v6372_v62  ;;  %v6605_v10 = vsel %vm17322_vm11, %v6414_v56, %v6604_v24  ;;  %v7244_v36 = vrot.slane %v7243_v49, 4  ;;  %v5994_v14 = vadd.f32 %v17508_v3, %v5891_v15  ;;  %v7254_v8 = vshll.u32 %v17479_v50, 16 }
 0x2a0   : > { %6589 = vst [vmem:[#allocation2 + $0x8c] sm:$0x1] %v6588_v9  ;;  %6606 = vst [vmem:[#allocation2 + $0xa8] sm:$0xf] %v6605_v10  ;;  %v7260_v60 = vshll.u32 %v7119_v59, 16  ;;  %v7264_v31 = vshrl.u32 %v7119_v59, 16  ;;  %v5894_v38 = vadd.f32 %v14375_v53, %v17300_v7  ;;  %v5892_v61 = vadd.f32 %v5839_v63, %v17303_v25 }
 0x2a1   : > { %v7270_v45 = vshll.u32 %v7120_v28, 16  ;;  %v7249_v26 = vsel %vm15478_vm2, %v7244_v36, %v7248_v21  ;;  %v6026_v18 = vmax.f32 %v5994_v14, 0.0  ;;  %14533 = vmatpush3.bf16.msra.mxu0 %v15041_v42  ;;  %v7256_v22 = vrot.slane %v7254_v8, 5  ;;  %v15046_v53 = vld [vmem:[#allocation7 + $0xc0] sm:$0xff]   ;;  %v7123_v14 = vld [vmem:[#allocation2 + $0x44] sm:$0x1] }
 0x2a2   : > { %v13239_v1 = vcombine.low %v7239_v20, %v7249_v26  ;;  %v7262_v41 = vrot.slane %v7260_v60, 5  ;;  %v7266_v33 = vrot.slane %v7264_v31, 4  ;;  %14534 = vmatprep.subr.bf16.mxu0 %v15042_v48  ;;  %v5997_v46 = vadd.f32 %v17508_v3, %v5894_v38  ;;  %v6597_v59 = vld [vmem:[#allocation2 + $0x9c] sm:$0xf]  ;;  %v6608_v31 = vld [vmem:[#allocation2 + $0xb0] sm:$0x1] }
 0x2a3   : > { %v13507_v50 = vpack.c.bf16 %v6026_v18, %v6026_v18  ;;  %v7272_v12 = vrot.slane %v7270_v45, 5  ;;  %v5995_v55 = vadd.f32 %v17508_v3, %v5892_v61  ;;  %v7257_v7 = vor.u32 %v7256_v22, %v7253_v11  ;;  %v5852_v11 = vpop.f32.mrf.mxu0  ;;  %v6601_v38 = vld [vmem:[#allocation2 + $0xa4] sm:$0x1] }
 0x2a4   : > { %14449 = vmatmul.mubr.bf16.gmra.mxu0 %v13239_v1  ;;  %v7267_v52 = vor.u32 %v7266_v33, %v7262_v41  ;;  %v5897_v25 = vadd.f32 %v14378_v39, %v17306_v58  ;;  %v7275_v0 = vshrl.u32 %v17511_v5, 16  ;;  %v6029_v32 = vmax.f32 %v5997_v46, 0.0  ;;  %v6618_v33 = vld [vmem:[#allocation2 + $0xc0] sm:$0xf] }
 0x2a5   : > { %v6392_v42 = vshrl.u32 %v13507_v50, 16  ;;  %v6395_v44 = vshll.u32 %v13507_v50, 16  ;;  %v6027_v24 = vmax.f32 %v5995_v55, 0.0  ;;  %14535 = vmatpush3.bf16.msra.mxu0 %v15042_v48  ;;  %v7258_v2 = vrot.slane %v7257_v7, 4  ;;  %v15031_v54 = vld [vmem:[#allocation2 + $0x90] sm:$0xff]  }
 0x2a6   : > { %v7268_v21 = vrot.slane %v7267_v52, 4  ;;  %v6000_v43 = vadd.f32 %v17508_v3, %v5897_v25  ;;  %v7277_v15 = vrot.slane %v7275_v0, 4  ;;  %v15029_v40 = vld [vmem:[#allocation2 + $0x84] sm:$0xff]   ;;  %14536 = vmatprep.subr.bf16.mxu0 %v15044_v29  ;;  %v13510_v37 = vpack.c.bf16 %v6029_v32, %v6029_v32  ;;  %v7125_v25 = vld [vmem:[#allocation2 + $0x4c] sm:$0xf]  ;;  %v14379_v0 = vpop.f32.mrf.mxu0 }
 0x2a7   : > { %v6394_v6 = vrot.slane %v6392_v42, 7  ;;  %v13508_v34 = vpack.c.bf16 %v6027_v24, %v6027_v24  ;;  %v7278_v58 = vshll.u32 %v17511_v5, 16  ;;  %v7263_v56 = vsel %vm15478_vm2, %v7258_v2, %v7262_v41  ;;  %14417 = vmatmul.mubr.bf16.gmra.mxu1 %v15029_v40  ;;  %v17531_v5 = vld [vmem:[#allocation7 + $0x178] sm:$0xff]  }
 0x2a8   : > { %v7273_v20 = vsel %vm15478_vm2, %v7268_v21, %v7272_v12  ;;  %v6032_v49 = vmax.f32 %v6000_v43, 0.0  ;;  %v7284_v28 = vshll.u32 %v17520_v16, 16  ;;  %v6417_v62 = vshrl.u32 %v13510_v37, 16  ;;  %14420 = vmatprep.mubr.bf16.mxu1 %v15031_v54  ;;  %v7124_v12 = vld [vmem:[#allocation2 + $0x48] sm:$0xf]  ;;  %v5855_v54 = vpop.f32.mrf.mxu0 }
 0x2a9   : > { %v6397_v63 = vor.u32 %v6395_v44, %v6394_v6  ;;  %v6398_v19 = vrot.slane %v6394_v6, 4  ;;  %v13240_v13 = vcombine.low %v7263_v56, %v7273_v20  ;;  %14537 = vmatpush3.bf16.msra.mxu0 %v15044_v29  ;;  %v6420_v9 = vshll.u32 %v13510_v37, 16 }
 0x2aa   : > { %v6400_v48 = vshrl.u32 %v13508_v34, 16  ;;  %v6403_v10 = vshll.u32 %v13508_v34, 16  ;;  %v13513_v36 = vpack.c.bf16 %v6032_v49, %v6032_v49  ;;  %14538 = vmatprep.subr.bf16.mxu0 %v15046_v53  ;;  %v6419_v60 = vrot.slane %v6417_v62, 7 }
 0x2ab   : > { %v6598_v8 = vsel %vm17322_vm11, %v6397_v63, %v6597_v59  ;;  %14452 = vmatprep.mubr.bf16.mxu0 %v13240_v13  ;;  %v7280_v45 = vrot.slane %v7278_v58, 5  ;;  %v7286_v26 = vrot.slane %v7284_v28, 5  ;;  %v7288_v1 = vshrl.u32 %v17520_v16, 16 }
 0x2ac   : > { %6599 = vst [vmem:[#allocation2 + $0x9c] sm:$0xf] %v6598_v8  ;;  %v6402_v18 = vrot.slane %v6400_v48, 7  ;;  %v6443_v61 = vshrl.u32 %v13513_v36, 16  ;;  %v6446_v39 = vshll.u32 %v13513_v36, 16  ;;  %v6422_v22 = vor.u32 %v6420_v9, %v6419_v60 }
 0x2ad   : > { %v6424_v41 = vrot.slane %v6419_v60, 4  ;;  %v7281_v29 = vor.u32 %v7280_v45, %v7277_v15  ;;  %v7294_v50 = vshll.u32 %v7123_v14, 16  ;;  %14539 = vmatpush3.bf16.msra.mxu0 %v15046_v53  ;;  %v7290_v52 = vrot.slane %v7288_v1, 4  ;;  %v7126_v53 = vld [vmem:[#allocation2 + $0x50] sm:$0x1] }
 0x2ae   : > { %v6405_v46 = vor.u32 %v6403_v10, %v6402_v18  ;;  %v6407_v55 = vrot.slane %v6402_v18, 4  ;;  %v17536_v7 = vrot.slane %v6443_v61, 7  ;;  %14620 = vmatprep.subr.bf16.mxu0 %v17531_v5  ;;  %v6423_v16 = vsel %vm17333_vm12, %v6415_v27, %v6422_v22  ;;  %v7128_v36 = vld [vmem:[#allocation2 + $0x58] sm:$0xf] }
 0x2af   : > { %v6609_v42 = vsel %vm17339_vm13, %v6424_v41, %v6608_v31  ;;  %v7282_v44 = vrot.slane %v7281_v29, 4  ;;  %v7296_v32 = vrot.slane %v7294_v50, 5  ;;  %6607 = vst [vmem:[#allocation2 + $0xac] sm:$0xf] %v6423_v16  ;;  %v7291_v43 = vor.u32 %v7290_v52, %v7286_v26  ;;  %v6611_v52 = vld [vmem:[#allocation2 + $0xb4] sm:$0xf] }
 0x2b0   : > { %6610 = vst [vmem:[#allocation2 + $0xb0] sm:$0x1] %v6609_v42  ;;  %v6406_v24 = vsel %vm17333_vm12, %v6398_v19, %v6405_v46  ;;  %v6602_v2 = vsel %vm17339_vm13, %v6407_v55, %v6601_v38  ;;  %v6448_v21 = vor.u32 %v6446_v39, %v17536_v7  ;;  %v6449_v4 = vrot.slane %v17536_v7, 4  ;;  %v7129_v16 = vld [vmem:[#allocation2 + $0x5c] sm:$0x1] }
 0x2b1   : > { %6600 = vst [vmem:[#allocation2 + $0xa0] sm:$0xf] %v6406_v24  ;;  %6603 = vst [vmem:[#allocation2 + $0xa4] sm:$0x1] %v6602_v2  ;;  %v7287_v27 = vsel %vm15478_vm2, %v7282_v44, %v7286_v26  ;;  %v5895_v15 = vadd.f32 %v5852_v11, %v17311_v23  ;;  %v7299_v40 = vshrl.u32 %v7124_v12, 16  ;;  %v7302_v37 = vshll.u32 %v7124_v12, 16 }
 0x2b2   : > { %v6619_v6 = vsel %vm17322_vm11, %v6448_v21, %v6618_v33  ;;  %v7308_v34 = vshll.u32 %v7125_v25, 16  ;;  %v7312_v58 = vshrl.u32 %v7125_v25, 16  ;;  %v7292_v59 = vrot.slane %v7291_v43, 4  ;;  %v7127_v23 = vld [vmem:[#allocation2 + $0x54] sm:$0xf] }
 0x2b3   : > { %6620 = vst [vmem:[#allocation2 + $0xc0] sm:$0xf] %v6619_v6  ;;  %v5998_v56 = vadd.f32 %v17508_v3, %v5895_v15  ;;  %v7301_v20 = vrot.slane %v7299_v40, 4  ;;  %v7318_v49 = vshll.u32 %v7126_v53, 16  ;;  %v7304_v28 = vrot.slane %v7302_v37, 5 }
 0x2b4   : > { %v7310_v63 = vrot.slane %v7308_v34, 5  ;;  %v7314_v19 = vrot.slane %v7312_v58, 4  ;;  %v5898_v13 = vadd.f32 %v14379_v0, %v17314_v57  ;;  %v7297_v62 = vsel %vm15478_vm2, %v7292_v59, %v7296_v32  ;;  %v7130_v2 = vld [vmem:[#allocation2 + $0x60] sm:$0xf]  ;;  %v6622_v43 = vld [vmem:[#allocation2 + $0xc8] sm:$0x1] }
 0x2b5   : > { %v6030_v9 = vmax.f32 %v5998_v56, 0.0  ;;  %v7320_v48 = vrot.slane %v7318_v49, 5  ;;  %v5896_v10 = vadd.f32 %v5855_v54, %v17316_v51  ;;  %v13241_v14 = vcombine.low %v7287_v27, %v7297_v62  ;;  %v6615_v37 = vld [vmem:[#allocation2 + $0xbc] sm:$0x1]  ;;  %v7131_v59 = vld [vmem:[#allocation2 + $0x64] sm:$0xf] }
 0x2b6   : > { %v7305_v11 = vor.u32 %v7304_v28, %v7301_v20  ;;  %v7315_v8 = vor.u32 %v7314_v19, %v7310_v63  ;;  %v6001_v60 = vadd.f32 %v17508_v3, %v5898_v13  ;;  %v7323_v26 = vshrl.u32 %v7127_v23, 16  ;;  %v15036_v46 = vld [vmem:[#allocation2 + $0xa8] sm:$0xff]  }
 0x2b7   : > { %v13511_v31 = vpack.c.bf16 %v6030_v9, %v6030_v9  ;;  %v5999_v45 = vadd.f32 %v17508_v3, %v5896_v10  ;;  %v7326_v18 = vshll.u32 %v7127_v23, 16  ;;  %14453 = vmatmul.mubr.bf16.gmra.mxu0 %v13241_v14  ;;  %v7332_v39 = vshll.u32 %v7128_v36, 16  ;;  %v7132_v49 = vld [vmem:[#allocation2 + $0x68] sm:$0x1]  ;;  %v7133_v14 = vld [vmem:[#allocation2 + $0x6c] sm:$0xf] }
 0x2b8   : > { %v7306_v57 = vrot.slane %v7305_v11, 4  ;;  %v7316_v38 = vrot.slane %v7315_v8, 4  ;;  %v6033_v61 = vmax.f32 %v6001_v60, 0.0  ;;  %v7325_v51 = vrot.slane %v7323_v26, 4  ;;  %v15034_v33 = vld [vmem:[#allocation2 + $0x9c] sm:$0xff]  }
 0x2b9   : > { %v6426_v1 = vshrl.u32 %v13511_v31, 16  ;;  %v6429_v22 = vshll.u32 %v13511_v31, 16  ;;  %v6031_v41 = vmax.f32 %v5999_v45, 0.0  ;;  %v7328_v3 = vrot.slane %v7326_v18, 5  ;;  %14421 = vmatmul.mubr.bf16.gmra.mxu1 %v15034_v33  ;;  %v7137_v33 = vld [vmem:[#allocation2 + $0x7c] sm:$0xf] }
 0x2ba   : > { %v7311_v29 = vsel %vm15478_vm2, %v7306_v57, %v7310_v63  ;;  %v7321_v50 = vsel %vm15478_vm2, %v7316_v38, %v7320_v48  ;;  %v13514_v12 = vpack.c.bf16 %v6033_v61, %v6033_v61  ;;  %v7334_v42 = vrot.slane %v7332_v39, 5  ;;  %14424 = vmatprep.mubr.bf16.mxu1 %v15036_v46  ;;  %v7134_v57 = vld [vmem:[#allocation2 + $0x70] sm:$0xf]  ;;  %v7135_v61 = vld [vmem:[#allocation2 + $0x74] sm:$0x1] }
 0x2bb   : > { %v6428_v55 = vrot.slane %v6426_v1, 7  ;;  %v13242_v25 = vcombine.low %v7311_v29, %v7321_v50  ;;  %v13512_v0 = vpack.c.bf16 %v6031_v41, %v6031_v41  ;;  %v7329_v53 = vor.u32 %v7328_v3, %v7325_v51  ;;  %v7136_v1 = vld [vmem:[#allocation2 + $0x78] sm:$0xf]  ;;  %v7138_v3 = vld [vmem:[#allocation2 + $0x80] sm:$0x1] }
 0x2bc   : > { %v6451_v44 = vshrl.u32 %v13514_v12, 16  ;;  %v6454_v32 = vshll.u32 %v13514_v12, 16  ;;  %v7336_v24 = vshrl.u32 %v7128_v36, 16  ;;  %v7342_v54 = vshll.u32 %v7129_v16, 16 }
 0x2bd   : > { %v6431_v21 = vor.u32 %v6429_v22, %v6428_v55  ;;  %v6432_v27 = vrot.slane %v6428_v55, 4  ;;  %14456 = vmatprep.mubr.bf16.mxu0 %v13242_v25  ;;  %v6434_v15 = vshrl.u32 %v13512_v0, 16  ;;  %v6437_v40 = vshll.u32 %v13512_v0, 16 }
 0x2be   : > { %v6453_v6 = vrot.slane %v6451_v44, 7  ;;  %v7330_v34 = vrot.slane %v7329_v53, 4  ;;  %v7338_v58 = vrot.slane %v7336_v24, 4  ;;  %v7347_v28 = vshrl.u32 %v7130_v2, 16 }
 0x2bf   : > { %v6612_v56 = vsel %vm17322_vm11, %v6431_v21, %v6611_v52  ;;  %v6436_v20 = vrot.slane %v6434_v15, 7  ;;  %v7350_v63 = vshll.u32 %v7130_v2, 16  ;;  %v7344_v10 = vrot.slane %v7342_v54, 5 }
 0x2c0   : > { %6613 = vst [vmem:[#allocation2 + $0xb4] sm:$0xf] %v6612_v56  ;;  %v6456_v19 = vor.u32 %v6454_v32, %v6453_v6  ;;  %v6458_v13 = vrot.slane %v6453_v6, 4  ;;  %v7335_v23 = vsel %vm15478_vm2, %v7330_v34, %v7334_v42  ;;  %v7339_v62 = vor.u32 %v7338_v58, %v7334_v42  ;;  %v7139_v32 = vld [vmem:[#allocation2 + $0x84] sm:$0xf] }
 0x2c1   : > { %v6439_v9 = vor.u32 %v6437_v40, %v6436_v20  ;;  %v6441_v48 = vrot.slane %v6436_v20, 4  ;;  %v7349_v36 = vrot.slane %v7347_v28, 4  ;;  %v7352_v60 = vrot.slane %v7350_v63, 5  ;;  %v7141_v63 = vld [vmem:[#allocation2 + $0x8c] sm:$0x1] }
 0x2c2   : > { %v6457_v30 = vsel %vm17333_vm12, %v6449_v4, %v6456_v19  ;;  %v6623_v11 = vsel %vm17339_vm13, %v6458_v13, %v6622_v43  ;;  %v7340_v8 = vrot.slane %v7339_v62, 4  ;;  %v7356_v26 = vshll.u32 %v7131_v59, 16 }
 0x2c3   : > { %6621 = vst [vmem:[#allocation2 + $0xc4] sm:$0xf] %v6457_v30  ;;  %6624 = vst [vmem:[#allocation2 + $0xc8] sm:$0x1] %v6623_v11  ;;  %v6440_v31 = vsel %vm17333_vm12, %v6432_v27, %v6439_v9  ;;  %v6616_v45 = vsel %vm17339_vm13, %v6441_v48, %v6615_v37  ;;  %v7360_v18 = vshrl.u32 %v7131_v59, 16  ;;  %v7353_v4 = vor.u32 %v7352_v60, %v7349_v36 }
 0x2c4   : > { %6614 = vst [vmem:[#allocation2 + $0xb8] sm:$0xf] %v6440_v31  ;;  %6617 = vst [vmem:[#allocation2 + $0xbc] sm:$0x1] %v6616_v45  ;;  %v7345_v7 = vsel %vm15478_vm2, %v7340_v8, %v7344_v10  ;;  %v7366_v38 = vshll.u32 %v7132_v49, 16  ;;  %v7371_v39 = vshrl.u32 %v7133_v14, 16 }
 0x2c5   : > { %v13243_v22 = vcombine.low %v7335_v23, %v7345_v7  ;;  %v7358_v41 = vrot.slane %v7356_v26, 5  ;;  %v7362_v47 = vrot.slane %v7360_v18, 4  ;;  %v7374_v51 = vshll.u32 %v7133_v14, 16  ;;  %v7140_v27 = vld [vmem:[#allocation2 + $0x88] sm:$0xf] }
 0x2c6   : > { %v7354_v17 = vrot.slane %v7353_v4, 4  ;;  %v7368_v29 = vrot.slane %v7366_v38, 5  ;;  %v7373_v50 = vrot.slane %v7371_v39, 4  ;;  %v7380_v12 = vshll.u32 %v7134_v57, 16  ;;  %v7142_v9 = vld [vmem:[#allocation2 + $0x90] sm:$0xf] }
 0x2c7   : > { %14457 = vmatmul.mubr.bf16.gmra.mxu0 %v13243_v22  ;;  %v7363_v46 = vor.u32 %v7362_v47, %v7358_v41  ;;  %v7376_v55 = vrot.slane %v7374_v51, 5  ;;  %v7384_v52 = vshrl.u32 %v7134_v57, 16  ;;  %v7390_v25 = vshll.u32 %v7135_v61, 16  ;;  %v7143_v30 = vld [vmem:[#allocation2 + $0x94] sm:$0xf] }
 0x2c8   : > { %v7359_v0 = vsel %vm15478_vm2, %v7354_v17, %v7358_v41  ;;  %v7382_v16 = vrot.slane %v7380_v12, 5  ;;  %v7395_v42 = vshrl.u32 %v7136_v1, 16  ;;  %v7398_v44 = vshll.u32 %v7136_v1, 16  ;;  %v7144_v61 = vld [vmem:[#allocation2 + $0x98] sm:$0x1] }
 0x2c9   : > { %v7364_v53 = vrot.slane %v7363_v46, 4  ;;  %v7377_v24 = vor.u32 %v7376_v55, %v7373_v50  ;;  %v7386_v2 = vrot.slane %v7384_v52, 4  ;;  %v7392_v21 = vrot.slane %v7390_v25, 5  ;;  %v7145_v51 = vld [vmem:[#allocation2 + $0x9c] sm:$0xf] }
 0x2ca   : > { %v7397_v43 = vrot.slane %v7395_v42, 4  ;;  %v7400_v15 = vrot.slane %v7398_v44, 5  ;;  %v7404_v40 = vshll.u32 %v7137_v33, 16  ;;  %v7408_v6 = vshrl.u32 %v7137_v33, 16  ;;  %v7146_v12 = vld [vmem:[#allocation2 + $0xa0] sm:$0xf] }
 0x2cb   : > { %v7369_v37 = vsel %vm15478_vm2, %v7364_v53, %v7368_v29  ;;  %v7378_v34 = vrot.slane %v7377_v24, 4  ;;  %v7387_v58 = vor.u32 %v7386_v2, %v7382_v16  ;;  %v7414_v54 = vshll.u32 %v7138_v3, 16  ;;  %v15039_v59 = vld [vmem:[#allocation2 + $0xb4] sm:$0xff]   ;;  %v7147_v24 = vld [vmem:[#allocation2 + $0xa4] sm:$0x1] }
 0x2cc   : > { %v13244_v56 = vcombine.low %v7359_v0, %v7369_v37  ;;  %v7401_v20 = vor.u32 %v7400_v15, %v7397_v43  ;;  %v7406_v49 = vrot.slane %v7404_v40, 5  ;;  %v7410_v28 = vrot.slane %v7408_v6, 4  ;;  %14425 = vmatmul.mubr.bf16.gmra.mxu1 %v15039_v59  ;;  %v7149_v6 = vld [vmem:[#allocation2 + $0xac] sm:$0xf]  ;;  %v7924_v59 = vld [vmem:[#allocation2] sm:$0xe] }
 0x2cd   : > { %v7383_v19 = vsel %vm15478_vm2, %v7378_v34, %v7382_v16  ;;  %v7388_v13 = vrot.slane %v7387_v58, 4  ;;  %v7416_v23 = vrot.slane %v7414_v54, 5  ;;  %v7419_v62 = vshrl.u32 %v7139_v32, 16 }
 0x2ce   : > { %14460 = vmatprep.mubr.bf16.mxu0 %v13244_v56  ;;  %v7402_v48 = vrot.slane %v7401_v20, 4  ;;  %v7411_v10 = vor.u32 %v7410_v28, %v7406_v49  ;;  %v7422_v36 = vshll.u32 %v7139_v32, 16  ;;  %v7428_v14 = vshll.u32 %v7140_v27, 16 }
 0x2cf   : > { %v7393_v11 = vsel %vm15478_vm2, %v7388_v13, %v7392_v21  ;;  %v7421_v8 = vrot.slane %v7419_v62, 4  ;;  %v7432_v60 = vshrl.u32 %v7140_v27, 16  ;;  %v7438_v31 = vshll.u32 %v7141_v63, 16  ;;  %v7148_v21 = vld [vmem:[#allocation2 + $0xa8] sm:$0xf] }
 0x2d0   : > { %v13245_v45 = vcombine.low %v7383_v19, %v7393_v11  ;;  %v7407_v26 = vsel %vm15478_vm2, %v7402_v48, %v7406_v49  ;;  %v7412_v18 = vrot.slane %v7411_v10, 4  ;;  %v7424_v57 = vrot.slane %v7422_v36, 5  ;;  %v7925_v63 = vld [vmem:[#allocation2 + $0x4] sm:$0xf] }
 0x2d1   : > { %v7430_v7 = vrot.slane %v7428_v14, 5  ;;  %v7434_v4 = vrot.slane %v7432_v60, 4  ;;  %v7440_v38 = vrot.slane %v7438_v31, 5  ;;  %v7443_v39 = vshrl.u32 %v7142_v9, 16 }
 0x2d2   : > { %14461 = vmatmul.mubr.bf16.gmra.mxu0 %v13245_v45  ;;  %v7417_v1 = vsel %vm15478_vm2, %v7412_v18, %v7416_v23  ;;  %v7425_v22 = vor.u32 %v7424_v57, %v7421_v8  ;;  %v7446_v41 = vshll.u32 %v7142_v9, 16  ;;  %v7452_v47 = vshll.u32 %v7143_v30, 16  ;;  %v7150_v23 = vld [vmem:[#allocation2 + $0xb0] sm:$0x1]  ;;  %v7927_v45 = vld [vmem:[#allocation2 + $0xc] sm:$0xe] }
 0x2d3   : > { %v13246_v33 = vcombine.low %v7407_v26, %v7417_v1  ;;  %v7435_v17 = vor.u32 %v7434_v4, %v7430_v7  ;;  %v7445_v29 = vrot.slane %v7443_v39, 4  ;;  %v7456_v50 = vshrl.u32 %v7143_v30, 16  ;;  %v7926_v30 = vld [vmem:[#allocation2 + $0x8] sm:$0x1]  ;;  %v7928_v26 = vld [vmem:[#allocation2 + $0x10] sm:$0xf] }
 0x2d4   : > { %v7426_v3 = vrot.slane %v7425_v22, 4  ;;  %v7448_v46 = vrot.slane %v7446_v41, 5  ;;  %v7454_v55 = vrot.slane %v7452_v47, 5  ;;  %v7462_v52 = vshll.u32 %v7144_v61, 16  ;;  %v7929_v22 = vld [vmem:[#allocation2 + $0x14] sm:$0x1] }
 0x2d5   : > { %14464 = vmatprep.mubr.bf16.mxu0 %v13246_v33  ;;  %v7436_v25 = vrot.slane %v7435_v17, 4  ;;  %v7458_v0 = vrot.slane %v7456_v50, 4  ;;  %v7467_v16 = vshrl.u32 %v7145_v51, 16  ;;  %v7470_v42 = vshll.u32 %v7145_v51, 16  ;;  %v7151_v17 = vld [vmem:[#allocation2 + $0xb4] sm:$0xf] }
 0x2d6   : > { %v7431_v44 = vsel %vm15478_vm2, %v7426_v3, %v7430_v7  ;;  %v7449_v32 = vor.u32 %v7448_v46, %v7445_v29  ;;  %v7464_v53 = vrot.slane %v7462_v52, 5  ;;  %v7476_v2 = vshll.u32 %v7146_v12, 16 }
 0x2d7   : > { %v7441_v27 = vsel %vm15478_vm2, %v7436_v25, %v7440_v38  ;;  %v7459_v43 = vor.u32 %v7458_v0, %v7454_v55  ;;  %v7469_v15 = vrot.slane %v7467_v16, 4  ;;  %v7472_v40 = vrot.slane %v7470_v42, 5  ;;  %v7153_v42 = vld [vmem:[#allocation2 + $0xbc] sm:$0x1] }
 0x2d8   : > { %v13247_v37 = vcombine.low %v7431_v44, %v7441_v27  ;;  %v7450_v34 = vrot.slane %v7449_v32, 4  ;;  %v7478_v58 = vrot.slane %v7476_v2, 5  ;;  %v7480_v54 = vshrl.u32 %v7146_v12, 16  ;;  %v7930_v2 = vld [vmem:[#allocation2 + $0x18] sm:$0xe] }
 0x2d9   : > { %v7460_v56 = vrot.slane %v7459_v43, 4  ;;  %v7473_v20 = vor.u32 %v7472_v40, %v7469_v15  ;;  %v7486_v49 = vshll.u32 %v7147_v24, 16  ;;  %v7491_v28 = vshrl.u32 %v7148_v21, 16 }
 0x2da   : > { %14465 = vmatmul.mubr.bf16.gmra.mxu0 %v13247_v37  ;;  %v7455_v19 = vsel %vm15478_vm2, %v7450_v34, %v7454_v55  ;;  %v7482_v13 = vrot.slane %v7480_v54, 4  ;;  %v7494_v62 = vshll.u32 %v7148_v21, 16  ;;  %v7500_v9 = vshll.u32 %v7149_v6, 16  ;;  %v7152_v55 = vld [vmem:[#allocation2 + $0xb8] sm:$0xf] }
 0x2db   : > { %v7465_v48 = vsel %vm15478_vm2, %v7460_v56, %v7464_v53  ;;  %v7474_v10 = vrot.slane %v7473_v20, 4  ;;  %v7488_v36 = vrot.slane %v7486_v49, 5  ;;  %v7493_v14 = vrot.slane %v7491_v28, 4  ;;  %v7931_v21 = vld [vmem:[#allocation2 + $0x1c] sm:$0xf]  ;;  %v15047_v56 = vld [vmem:[#allocation7 + $0x130] sm:$0xff]  }
 0x2dc   : > { %v13248_v11 = vcombine.low %v7455_v19, %v7465_v48  ;;  %v7483_v8 = vor.u32 %v7482_v13, %v7478_v58  ;;  %v7496_v60 = vrot.slane %v7494_v62, 5  ;;  %v7502_v31 = vrot.slane %v7500_v9, 5  ;;  %v7934_v19 = vld [vmem:[#allocation2 + $0x28] sm:$0xf]  ;;  %v7935_v13 = vld [vmem:[#allocation2 + $0x2c] sm:$0x1] }
 0x2dd   : > { %v7479_v18 = vsel %vm15478_vm2, %v7474_v10, %v7478_v58  ;;  %v7504_v57 = vshrl.u32 %v7149_v6, 16  ;;  %v7510_v7 = vshll.u32 %v7150_v23, 16  ;;  %v13260_v4 = vrot.slane %v7924_v59, 9  ;;  %v7932_v6 = vld [vmem:[#allocation2 + $0x20] sm:$0x1] }
 0x2de   : > { %14468 = vmatprep.mubr.bf16.mxu0 %v13248_v11  ;;  %v7484_v38 = vrot.slane %v7483_v8, 4  ;;  %v7497_v61 = vor.u32 %v7496_v60, %v7493_v14  ;;  %v8022_v39 = vrot.slane %v7925_v63, 5  ;;  %v8025_v1 = vrot.slane %v7926_v30, 5  ;;  %v7933_v59 = vld [vmem:[#allocation2 + $0x24] sm:$0xe]  ;;  %v15118_v60 = vld [vmem:[#allocation7 + $0x138] sm:$0xff]  }
 0x2df   : > { %v7506_v41 = vrot.slane %v7504_v57, 4  ;;  %v7512_v47 = vrot.slane %v7510_v7, 5  ;;  %v13261_v51 = vrot.slane %v7927_v45, 9  ;;  %v8029_v33 = vrot.slane %v7928_v26, 5  ;;  %v7936_v48 = vld [vmem:[#allocation2 + $0x30] sm:$0xe] }
 0x2e0   : > { %v7489_v29 = vsel %vm15478_vm2, %v7484_v38, %v7488_v36  ;;  %v7498_v50 = vrot.slane %v7497_v61, 4  ;;  %v8023_v3 = vsel %vm15658_vm5, %v13260_v4, %v8022_v39  ;;  %v8024_v46 = vrot.slane %v8022_v39, 4  ;;  %v7937_v10 = vld [vmem:[#allocation2 + $0x34] sm:$0xf]  ;;  %v15050_v61 = vld [vmem:[#allocation7 + $0x128] sm:$0xff]  }
 0x2e1   : > { %v13249_v52 = vcombine.low %v7479_v18, %v7489_v29  ;;  %v7507_v25 = vor.u32 %v7506_v41, %v7502_v31  ;;  %v8030_v0 = vsel %vm15658_vm5, %v13261_v51, %v8029_v33  ;;  %v8031_v16 = vrot.slane %v8029_v33, 4  ;;  %v7938_v18 = vld [vmem:[#allocation2 + $0x38] sm:$0x1]  ;;  %v7940_v51 = vld [vmem:[#allocation2 + $0x40] sm:$0xf] }
 0x2e2   : > { %v7503_v44 = vsel %vm15478_vm2, %v7498_v50, %v7502_v31  ;;  %v8026_v32 = vsel %vm15658_vm5, %v8024_v46, %v8025_v1  ;;  %v8032_v53 = vrot.slane %v7929_v22, 5  ;;  %v7515_v24 = vshrl.u32 %v7151_v17, 16  ;;  %v7943_v46 = vld [vmem:[#allocation2 + $0x4c] sm:$0xf] }
 0x2e3   : > { %14469 = vmatmul.mubr.bf16.gmra.mxu0 %v13249_v52  ;;  %v7508_v27 = vrot.slane %v7507_v25, 4  ;;  %v13276_v43 = vcombine.low %v8023_v3, %v8026_v32  ;;  %v7518_v15 = vshll.u32 %v7151_v17, 16  ;;  %v7524_v40 = vshll.u32 %v7152_v55, 16  ;;  %v7941_v3 = vld [vmem:[#allocation2 + $0x44] sm:$0x1]  ;;  %v15045_v25 = vld [vmem:[#allocation2 + $0xc] sm:$0xff]  }
 0x2e4   : > { %v8033_v37 = vsel %vm15658_vm5, %v8031_v16, %v8032_v53  ;;  %v7517_v34 = vrot.slane %v7515_v24, 4  ;;  %v7528_v58 = vshrl.u32 %v7152_v55, 16  ;;  %v7534_v54 = vshll.u32 %v7153_v42, 16  ;;  %v7942_v42 = vld [vmem:[#allocation2 + $0x48] sm:$0xe] }
 0x2e5   : > { %v7513_v20 = vsel %vm15478_vm2, %v7508_v27, %v7512_v47  ;;  %14492 = vmatprep.mubr.bf16.mxu1 %v13276_v43  ;;  %v13277_v49 = vcombine.low %v8030_v0, %v8033_v37  ;;  %v7520_v28 = vrot.slane %v7518_v15, 5  ;;  %v7526_v63 = vrot.slane %v7524_v40, 5  ;;  %v7939_v47 = vld [vmem:[#allocation2 + $0x3c] sm:$0xe]  ;;  %v7945_v32 = vld [vmem:[#allocation2 + $0x54] sm:$0xe] }
 0x2e6   : > { %v13250_v23 = vcombine.low %v7503_v44, %v7513_v20  ;;  %v7530_v62 = vrot.slane %v7528_v58, 4  ;;  %v7536_v9 = vrot.slane %v7534_v54, 5  ;;  %v13262_v14 = vrot.slane %v7930_v2, 9  ;;  %v7944_v44 = vld [vmem:[#allocation2 + $0x50] sm:$0x1]  ;;  %v15053_v15 = vld [vmem:[#allocation7 + $0x120] sm:$0xff]  }
 0x2e7   : > { %14493 = vmatmul.mubr.bf16.vlgmr.msra.gmra.mxu1 %v13277_v49  ;;  %v7521_v36 = vor.u32 %v7520_v28, %v7517_v34  ;;  %v8036_v30 = vrot.slane %v7931_v21, 5  ;;  %v8039_v11 = vrot.slane %v7932_v6, 5  ;;  %v13263_v31 = vrot.slane %v7933_v59, 9  ;;  %v7946_v27 = vld [vmem:[#allocation2 + $0x58] sm:$0xf] }
 0x2e8   : > { %14472 = vmatprep.mubr.bf16.mxu0 %v13250_v23  ;;  %v7531_v8 = vor.u32 %v7530_v62, %v7526_v63  ;;  %14573 = vmatpush3.bf16.msra.mxu1 %v15118_v60  ;;  %v8043_v45 = vrot.slane %v7934_v19, 5  ;;  %v8046_v26 = vrot.slane %v7935_v13, 5  ;;  %v13264_v4 = vrot.slane %v7936_v48, 9  ;;  %v7947_v43 = vld [vmem:[#allocation2 + $0x5c] sm:$0x1] }
 0x2e9   : > { %v7522_v57 = vrot.slane %v7521_v36, 4  ;;  %v8038_v7 = vrot.slane %v8036_v30, 4  ;;  %14574 = vmatprep.subr.bf16.mxu1 %v15047_v56  ;;  %v8050_v38 = vrot.slane %v7937_v10, 5  ;;  %v8037_v1 = vsel %vm15658_vm5, %v13262_v14, %v8036_v30  ;;  %v7948_v34 = vld [vmem:[#allocation2 + $0x60] sm:$0xe] }
 0x2ea   : > { %v7532_v39 = vrot.slane %v7531_v8, 4  ;;  %v8044_v22 = vsel %vm15658_vm5, %v13263_v31, %v8043_v45  ;;  %v8045_v41 = vrot.slane %v8043_v45, 4  ;;  %v8053_v50 = vrot.slane %v7938_v18, 5  ;;  %v7949_v58 = vld [vmem:[#allocation2 + $0x64] sm:$0xf]  ;;  %v15056_v31 = vld [vmem:[#allocation7 + $0x118] sm:$0xff]  }
 0x2eb   : > { %v7527_v33 = vsel %vm15478_vm2, %v7522_v57, %v7526_v63  ;;  %v8040_v17 = vsel %vm15658_vm5, %v8038_v7, %v8039_v11  ;;  %v8052_v29 = vrot.slane %v8050_v38, 4  ;;  %v8051_v16 = vsel %vm15658_vm5, %v13264_v4, %v8050_v38  ;;  %v7950_v20 = vld [vmem:[#allocation2 + $0x68] sm:$0x1]  ;;  %v7951_v13 = vld [vmem:[#allocation2 + $0x6c] sm:$0xe] }
 0x2ec   : > { %v7537_v55 = vsel %vm15478_vm2, %v7532_v39, %v7536_v9  ;;  %v13278_v52 = vcombine.low %v8037_v1, %v8040_v17  ;;  %v8047_v0 = vsel %vm15658_vm5, %v8045_v41, %v8046_v26  ;;  %14575 = vmatpush3.bf16.msra.mxu1 %v15047_v56  ;;  %v8057_v21 = vrot.slane %v7940_v51, 5  ;;  %v7952_v23 = vld [vmem:[#allocation2 + $0x70] sm:$0xf]  ;;  %v7953_v36 = vld [vmem:[#allocation2 + $0x74] sm:$0x1]  ;;  %v15048_v26 = vld [vmem:[#allocation2 + $0x18] sm:$0xff]  }
 0x2ed   : > { %v13251_v53 = vcombine.low %v7527_v33, %v7537_v55  ;;  %v13279_v24 = vcombine.low %v8044_v22, %v8047_v0  ;;  %v8054_v2 = vsel %vm15658_vm5, %v8052_v29, %v8053_v50  ;;  %14576 = vmatprep.subr.bf16.mxu1 %v15050_v61  ;;  %v13265_v6 = vrot.slane %v7939_v47, 9  ;;  %v7954_v14 = vld [vmem:[#allocation2 + $0x78] sm:$0xe]  ;;  %v7955_v45 = vld [vmem:[#allocation2 + $0x7c] sm:$0xf]  ;;  %v15049_v39 = vld [vmem:[#allocation2 + $0x24] sm:$0xff]  }
 0x2ee   : > { %14496 = vmatprep.mubr.bf16.mxu1 %v13278_v52  ;;  %v13280_v40 = vcombine.low %v8051_v16, %v8054_v2  ;;  %v8064_v37 = vrot.slane %v7943_v46, 5  ;;  %v8059_v54 = vrot.slane %v8057_v21, 4  ;;  %v8060_v59 = vrot.slane %v7941_v3, 5  ;;  %v7956_v38 = vld [vmem:[#allocation2 + $0x80] sm:$0x1]  ;;  %v15059_v46 = vld [vmem:[#allocation7 + $0x110] sm:$0xff]  }
 0x2ef   : > { %14473 = vmatmul.mubr.bf16.gmra.mxu0 %v13251_v53  ;;  %14497 = vmatmul.mubr.bf16.gmra.mxu1 %v13279_v24  ;;  %v13266_v56 = vrot.slane %v7942_v42, 9  ;;  %v8058_v49 = vsel %vm15658_vm5, %v13265_v6, %v8057_v21  ;;  %v8067_v63 = vrot.slane %v7944_v44, 5  ;;  %v8071_v19 = vrot.slane %v7946_v27, 5  ;;  %v7958_v51 = vld [vmem:[#allocation2 + $0x88] sm:$0xf] }
 0x2f0   : > { %14540 = vmatprep.mubr.bf16.mxu0 %v15045_v25  ;;  %14500 = vmatprep.mubr.bf16.mxu1 %v13280_v40  ;;  %v8066_v28 = vrot.slane %v8064_v37, 4  ;;  %v8061_v62 = vsel %vm15658_vm5, %v8059_v54, %v8060_v59  ;;  %v13267_v48 = vrot.slane %v7945_v32, 9  ;;  %v8078_v10 = vrot.slane %v7949_v58, 5  ;;  %v7960_v33 = vld [vmem:[#allocation2 + $0x90] sm:$0xe]  ;;  %v15063_v44 = vld [vmem:[#allocation7 + $0x170] sm:$0xff]  }
 0x2f1   : > { %v8065_v9 = vsel %vm15658_vm5, %v13266_v56, %v8064_v37  ;;  %14577 = vmatpush3.bf16.msra.mxu1 %v15050_v61  ;;  %v8073_v11 = vrot.slane %v8071_v19, 4  ;;  %v8074_v8 = vrot.slane %v7947_v43, 5  ;;  %v13268_v60 = vrot.slane %v7948_v34, 9  ;;  %v7957_v61 = vld [vmem:[#allocation2 + $0x84] sm:$0xe] }
 0x2f2   : > { %v8068_v30 = vsel %vm15658_vm5, %v8066_v28, %v8067_v63  ;;  %14578 = vmatprep.subr.bf16.mxu1 %v15053_v15  ;;  %v13281_v18 = vcombine.low %v8058_v49, %v8061_v62  ;;  %v17645_v57 = vsel %vm15658_vm5, %v13267_v48, %v8071_v19  ;;  %v8080_v7 = vrot.slane %v8078_v10, 4  ;;  %v7961_v55 = vld [vmem:[#allocation2 + $0x94] sm:$0xf]  ;;  %v7959_v42 = vld [vmem:[#allocation2 + $0x8c] sm:$0x1]  ;;  %v17675_v58 = vld [vmem:[#allocation7 + $0x108] sm:$0xff]  }
 0x2f3   : > { %v8081_v4 = vrot.slane %v7950_v20, 5  ;;  %v13282_v1 = vcombine.low %v8065_v9, %v8068_v30  ;;  %v17649_v22 = vsel %vm15658_vm5, %v8073_v11, %v8074_v8  ;;  %v17653_v41 = vsel %vm15658_vm5, %v13268_v60, %v8078_v10  ;;  %v7962_v21 = vld [vmem:[#allocation2 + $0x98] sm:$0x1]  ;;  %v7963_v27 = vld [vmem:[#allocation2 + $0x9c] sm:$0xe]  ;;  %v15066_v63 = vld [vmem:[#allocation7 + $0x168] sm:$0xff]  }
 0x2f4   : > { %v8085_v47 = vrot.slane %v7952_v23, 5  ;;  %v13269_v29 = vrot.slane %v7951_v13, 9  ;;  %v8088_v50 = vrot.slane %v7953_v36, 5  ;;  %v8092_v3 = vrot.slane %v7955_v45, 5  ;;  %v7964_v37 = vld [vmem:[#allocation2 + $0xa0] sm:$0xf] }
 0x2f5   : > { %v17657_v17 = vsel %vm15658_vm5, %v8080_v7, %v8081_v4  ;;  %14579 = vmatpush3.bf16.msra.mxu1 %v15053_v15  ;;  %v13283_v52 = vcombine.low %v17645_v57, %v17649_v22  ;;  %v13270_v0 = vrot.slane %v7954_v14, 9  ;;  %v8095_v16 = vrot.slane %v7956_v38, 5  ;;  %v7965_v34 = vld [vmem:[#allocation2 + $0xa4] sm:$0x1]  ;;  %v7966_v54 = vld [vmem:[#allocation2 + $0xa8] sm:$0xe] }
 0x2f6   : > { %v8087_v25 = vrot.slane %v8085_v47, 4  ;;  %14580 = vmatprep.subr.bf16.mxu1 %v15056_v31  ;;  %v13284_v32 = vcombine.low %v17653_v41, %v17657_v17  ;;  %v17665_v53 = vsel %vm15658_vm5, %v13269_v29, %v8085_v47  ;;  %v8094_v24 = vrot.slane %v8092_v3, 4  ;;  %v7967_v28 = vld [vmem:[#allocation2 + $0xac] sm:$0xf]  ;;  %v7968_v9 = vld [vmem:[#allocation2 + $0xb0] sm:$0x1] }
 0x2f7   : > { %14541 = vmatmul.mubr.bf16.vlgmr.msra.gmra.mxu0 %v15048_v26  ;;  %14501 = vmatmul.mubr.bf16.gmra.mxu1 %v13281_v18  ;;  %v8099_v2 = vrot.slane %v7958_v51, 5  ;;  %v17673_v15 = vsel %vm15658_vm5, %v13270_v0, %v8092_v3  ;;  %v13271_v40 = vrot.slane %v7957_v61, 9  ;;  %v8106_v6 = vrot.slane %v7961_v55, 5  ;;  %v8968_v48 = vld [vmem:[#allocation2 + $0xc] sm:$0xf]  ;;  %v15051_v8 = vld [vmem:[#allocation2 + $0x30] sm:$0xff]  }
 0x2f8   : > { %14544 = vmatprep.mubr.bf16.mxu0 %v15049_v39  ;;  %14504 = vmatprep.mubr.bf16.mxu1 %v13282_v1  ;;  %v17669_v43 = vsel %vm15658_vm5, %v8087_v25, %v8088_v50  ;;  %v17679_v59 = vsel %vm15658_vm5, %v8094_v24, %v8095_v16  ;;  %v8102_v20 = vrot.slane %v7959_v42, 5  ;;  %v13272_v49 = vrot.slane %v7960_v33, 9  ;;  %v7970_v30 = vld [vmem:[#allocation2 + $0xb8] sm:$0xf]  ;;  %v8969_v11 = vld [vmem:[#allocation2 + $0x10] sm:$0xf] }
 0x2f9   : > { %14581 = vmatpush3.bf16.msra.mxu1 %v15056_v31  ;;  %v8101_v56 = vrot.slane %v8099_v2, 4  ;;  %14621 = vmatpush3.bf16.msra.mxu0 %v17531_v5  ;;  %v13285_v19 = vcombine.low %v17665_v53, %v17669_v43  ;;  %v17686_v13 = vsel %vm15658_vm5, %v13271_v40, %v8099_v2  ;;  %v8108_v23 = vrot.slane %v8106_v6, 4  ;;  %v7969_v18 = vld [vmem:[#allocation2 + $0xb4] sm:$0xe]  ;;  %v15052_v7 = vld [vmem:[#allocation2 + $0x3c] sm:$0xff]  }
 0x2fa   : > { %14582 = vmatprep.subr.bf16.mxu1 %v15059_v46  ;;  %v8109_v62 = vrot.slane %v7962_v21, 5  ;;  %14622 = vmatprep.subr.bf16.mxu0 %v15063_v44  ;;  %v13286_v10 = vcombine.low %v17673_v15, %v17679_v59  ;;  %v17696_v36 = vsel %vm15658_vm5, %v13272_v49, %v8106_v6  ;;  %v8113_v14 = vrot.slane %v7964_v37, 5  ;;  %v7971_v1 = vld [vmem:[#allocation2 + $0xbc] sm:$0x1]  ;;  %v8971_v42 = vld [vmem:[#allocation2 + $0x18] sm:$0xf] }
 0x2fb   : > { %v17692_v5 = vsel %vm15658_vm5, %v8101_v56, %v8102_v20  ;;  %v13273_v31 = vrot.slane %v7963_v27, 9  ;;  %v8116_v45 = vrot.slane %v7965_v34, 5  ;;  %v8120_v26 = vrot.slane %v7967_v28, 5  ;;  %v15068_v29 = vld [vmem:[#allocation7 + $0x160] sm:$0xff]   ;;  %v15071_v6 = vld [vmem:[#allocation7 + $0x158] sm:$0xff]  }
 0x2fc   : > { %v17700_v60 = vsel %vm15658_vm5, %v8108_v23, %v8109_v62  ;;  %v13287_v4 = vcombine.low %v17686_v13, %v17692_v5  ;;  %v8115_v38 = vrot.slane %v8113_v14, 4  ;;  %v13274_v61 = vrot.slane %v7966_v54, 9  ;;  %v15069_v3 = vld [vmem:[#allocation7 + $0x100] sm:$0xff]   ;;  %v17734_v34 = vld [vmem:[#allocation7 + $0x1b8] sm:$0xff]   ;;  %v8974_v28 = vld [vmem:[#allocation2 + $0x24] sm:$0xf] }
 0x2fd   : > { %14583 = vmatpush3.bf16.msra.mxu1 %v15059_v46  ;;  %14623 = vmatpush3.bf16.msra.mxu0 %v15063_v44  ;;  %v8123_v39 = vrot.slane %v7968_v9, 5  ;;  %v13288_v47 = vcombine.low %v17696_v36, %v17700_v60  ;;  %v17708_v51 = vsel %vm15658_vm5, %v13273_v31, %v8113_v14  ;;  %v8122_v33 = vrot.slane %v8120_v26, 4  ;;  %v8970_v46 = vld [vmem:[#allocation2 + $0x14] sm:$0x1]  ;;  %v8972_v24 = vld [vmem:[#allocation2 + $0x1c] sm:$0xf] }
 0x2fe   : > { %14584 = vmatprep.subr.bf16.mxu1 %v17675_v58  ;;  %14624 = vmatprep.subr.bf16.mxu0 %v15066_v63  ;;  %v8127_v50 = vrot.slane %v7970_v30, 5  ;;  %v17716_v55 = vsel %vm15658_vm5, %v8115_v38, %v8116_v45  ;;  %v9017_v25 = vshrl.u32 %v8968_v48, 16  ;;  %v9020_v0 = vshll.u32 %v8968_v48, 16  ;;  %v8975_v14 = vld [vmem:[#allocation2 + $0x28] sm:$0xf]  ;;  %v15055_v30 = vld [vmem:[#allocation2 + $0x54] sm:$0xff]  }
 0x2ff   : > { %14545 = vmatmul.mubr.bf16.gmra.mxu0 %v15051_v8  ;;  %14505 = vmatmul.mubr.bf16.gmra.mxu1 %v13283_v52  ;;  %v9026_v16 = vshll.u32 %v8969_v11, 16  ;;  %v13289_v44 = vcombine.low %v17708_v51, %v17716_v55  ;;  %v17725_v57 = vsel %vm15658_vm5, %v13274_v61, %v8120_v26  ;;  %v13275_v22 = vrot.slane %v7969_v18, 9  ;;  %v8976_v26 = vld [vmem:[#allocation2 + $0x2c] sm:$0x1]  ;;  %v9790_v13 = vld [vmem:[#allocation2 + $0x1c] sm:$0xf] }
 0x300   : > { %14548 = vmatprep.mubr.bf16.mxu0 %v15052_v7  ;;  %14508 = vmatprep.mubr.bf16.mxu1 %v13284_v32  ;;  %v8130_v52 = vrot.slane %v7971_v1, 5  ;;  %v17729_v2 = vsel %vm15658_vm5, %v8122_v33, %v8123_v39  ;;  %v8129_v21 = vrot.slane %v8127_v50, 4  ;;  %v9019_v41 = vrot.slane %v9017_v25, 4  ;;  %v15073_v7 = vld [vmem:[#allocation7 + $0x150] sm:$0xff]  }
 0x301   : > { %14585 = vmatpush3.bf16.msra.mxu1 %v17675_v58  ;;  %14625 = vmatpush3.bf16.msra.mxu0 %v15066_v63  ;;  %v9022_v17 = vrot.slane %v9020_v0, 5  ;;  %v17732_v32 = vrot.slane %v9026_v16, 5  ;;  %v9030_v27 = vshrl.u32 %v8969_v11, 16  ;;  %v9036_v40 = vshll.u32 %v8970_v46, 16  ;;  %v8973_v58 = vld [vmem:[#allocation2 + $0x20] sm:$0x1] }
 0x302   : > { %14626 = vmatprep.subr.bf16.mxu0 %v15068_v29  ;;  %14586 = vmatprep.subr.bf16.mxu1 %v15069_v3  ;;  %v9041_v37 = vshrl.u32 %v8971_v42, 16  ;;  %v17738_v54 = vsel %vm15658_vm5, %v13275_v22, %v8127_v50  ;;  %v9044_v20 = vshll.u32 %v8971_v42, 16  ;;  %v9050_v49 = vshll.u32 %v8972_v24, 16  ;;  %v15054_v63 = vld [vmem:[#allocation2 + $0x48] sm:$0xff]   ;;  %v9787_v42 = vld [vmem:[#allocation2 + $0x10] sm:$0xf] }
 0x303   : > { %v9023_v56 = vor.u32 %v9022_v17, %v9019_v41  ;;  %v13290_v23 = vcombine.low %v17725_v57, %v17729_v2  ;;  %v9032_v62 = vrot.slane %v9030_v27, 4  ;;  %v9054_v48 = vshrl.u32 %v8972_v24, 16  ;;  %v17750_v1 = vld [vmem:[#allocation2 + $0xc] sm:$0xe]  ;;  %v9788_v24 = vld [vmem:[#allocation2 + $0x14] sm:$0x1] }
 0x304   : > { %v9043_v9 = vrot.slane %v9041_v37, 4  ;;  %v17744_v11 = vsel %vm15658_vm5, %v8129_v21, %v8130_v52  ;;  %v9038_v8 = vrot.slane %v9036_v40, 5  ;;  %v9046_v31 = vrot.slane %v9044_v20, 5  ;;  %v15076_v52 = vld [vmem:[#allocation7 + $0x148] sm:$0xff]   ;;  %v8977_v21 = vld [vmem:[#allocation2 + $0x30] sm:$0xf] }
 0x305   : > { %14627 = vmatpush3.bf16.msra.mxu0 %v15068_v29  ;;  %14587 = vmatpush3.bf16.msra.mxu1 %v15069_v3  ;;  %v17746_v45 = vrot.slane %v9050_v49, 5  ;;  %v9033_v18 = vor.u32 %v9032_v62, %v17732_v32  ;;  %v9056_v38 = vrot.slane %v9054_v48, 4  ;;  %v9065_v61 = vshrl.u32 %v8974_v28, 16  ;;  %v15057_v17 = vld [vmem:[#allocation2 + $0x60] sm:$0xff]   ;;  %v15077_v62 = vld [vmem:[#allocation7 + $0x140] sm:$0xff]  }
 0x306   : > { %14628 = vmatprep.subr.bf16.mxu0 %v15071_v6  ;;  %14668 = vmatprep.subr.bf16.mxu1 %v17734_v34  ;;  %v9068_v39 = vshll.u32 %v8974_v28, 16  ;;  %v9024_v33 = vrot.slane %v9023_v56, 4  ;;  %v9047_v29 = vor.u32 %v9046_v31, %v9043_v9  ;;  %v9060_v50 = vshll.u32 %v8973_v58, 16  ;;  %v8978_v56 = vld [vmem:[#allocation2 + $0x34] sm:$0xf]  ;;  %v15058_v58 = vld [vmem:[#allocation2 + $0x6c] sm:$0xff]  }
 0x307   : > { %14549 = vmatmul.mubr.bf16.gmra.mxu0 %v15054_v63  ;;  %14509 = vmatmul.mubr.bf16.gmra.mxu1 %v13285_v19  ;;  %v9074_v3 = vshll.u32 %v8975_v14, 16  ;;  %v9034_v46 = vrot.slane %v9033_v18, 4  ;;  %v9057_v25 = vor.u32 %v9056_v38, %v17746_v45  ;;  %v9067_v0 = vrot.slane %v9065_v61, 4  ;;  %v8979_v9 = vld [vmem:[#allocation2 + $0x38] sm:$0x1] }
 0x308   : > { %14552 = vmatprep.mubr.bf16.mxu0 %v15055_v30  ;;  %14512 = vmatprep.mubr.bf16.mxu1 %v13286_v10  ;;  %v9070_v16 = vrot.slane %v9068_v39, 5  ;;  %v13291_v22 = vcombine.low %v17738_v54, %v17744_v11  ;;  %v9048_v53 = vrot.slane %v9047_v29, 4  ;;  %v9078_v19 = vshrl.u32 %v8975_v14, 16  ;;  %v8980_v48 = vld [vmem:[#allocation2 + $0x3c] sm:$0xf] }
 0x309   : > { %14629 = vmatpush3.bf16.msra.mxu0 %v15071_v6  ;;  %v17761_v43 = vrot.slane %v9074_v3, 5  ;;  %v9039_v15 = vsel %vm15478_vm2, %v9034_v46, %v9038_v8  ;;  %v9058_v59 = vrot.slane %v9057_v25, 4  ;;  %v9084_v41 = vshll.u32 %v8976_v26, 16  ;;  %v8981_v61 = vld [vmem:[#allocation2 + $0x40] sm:$0xf] }
 0x30a   : > { %14630 = vmatprep.subr.bf16.mxu0 %v15073_v7  ;;  %v9071_v10 = vor.u32 %v9070_v16, %v9067_v0  ;;  %v9029_v27 = vsel %vm15478_vm2, %v9024_v33, %v17732_v32  ;;  %v9062_v40 = vrot.slane %v9060_v50, 5  ;;  %v9080_v6 = vrot.slane %v9078_v19, 4  ;;  %v8982_v33 = vld [vmem:[#allocation2 + $0x44] sm:$0x1] }
 0x30b   : > { %v13348_v37 = vrot.slane %v17750_v1, 9  ;;  %v17769_v20 = vcombine.low %v9029_v27, %v9039_v15  ;;  %v9053_v49 = vsel %vm15478_vm2, %v9048_v53, %v17746_v45  ;;  %v9884_v63 = vrot.slane %v9787_v42, 5  ;;  %v17798_v42 = vld [vmem:[#allocation7 + $0x1f8] sm:$0xff]   ;;  %v15060_v53 = vld [vmem:[#allocation2 + $0x78] sm:$0xff]   ;;  %v15062_v15 = vld [vmem:[#allocation2 + $0x84] sm:$0xff]  }
 0x30c   : > { %v9072_v28 = vrot.slane %v9071_v10, 4  ;;  %v9063_v32 = vsel %vm15478_vm2, %v9058_v59, %v9062_v40  ;;  %v9081_v14 = vor.u32 %v9080_v6, %v17761_v43  ;;  %v9089_v30 = vshrl.u32 %v8977_v21, 16 }
 0x30d   : > { %14631 = vmatpush3.bf16.msra.mxu0 %v15073_v7  ;;  %v9092_v8 = vshll.u32 %v8977_v21, 16  ;;  %v9086_v31 = vrot.slane %v9084_v41, 5  ;;  %v9886_v26 = vrot.slane %v9884_v63, 4  ;;  %v9887_v18 = vrot.slane %v9788_v24, 5  ;;  %v9789_v21 = vld [vmem:[#allocation2 + $0x18] sm:$0xe] }
 0x30e   : > { %14632 = vmatprep.subr.bf16.mxu0 %v15076_v52  ;;  %v9098_v38 = vshll.u32 %v8978_v56, 16  ;;  %v9082_v45 = vrot.slane %v9081_v14, 4  ;;  %v9091_v7 = vrot.slane %v9089_v30, 4  ;;  %v9102_v1 = vshrl.u32 %v8978_v56, 16  ;;  %v8983_v14 = vld [vmem:[#allocation2 + $0x48] sm:$0xf] }
 0x30f   : > { %14553 = vmatmul.mubr.bf16.gmra.mxu0 %v15057_v17  ;;  %14513 = vmatmul.mubr.bf16.gmra.mxu1 %v13287_v4  ;;  %v9094_v39 = vrot.slane %v9092_v8, 5  ;;  %v17783_v29 = vcombine.low %v9053_v49, %v9063_v32  ;;  %v9077_v50 = vsel %vm15478_vm2, %v9072_v28, %v17761_v43  ;;  %v9113_v46 = vshrl.u32 %v8980_v48, 16  ;;  %v9791_v17 = vld [vmem:[#allocation2 + $0x20] sm:$0x1]  ;;  %v9793_v49 = vld [vmem:[#allocation2 + $0x28] sm:$0xf] }
 0x310   : > { %14556 = vmatprep.mubr.bf16.mxu0 %v15058_v58  ;;  %14516 = vmatprep.mubr.bf16.mxu1 %v13288_v47  ;;  %v9100_v3 = vrot.slane %v9098_v38, 5  ;;  %v17790_v5 = vsel %vm15658_vm5, %v9886_v26, %v9887_v18  ;;  %v9104_v25 = vrot.slane %v9102_v1, 4  ;;  %v9108_v0 = vshll.u32 %v8979_v9, 16  ;;  %v9792_v58 = vld [vmem:[#allocation2 + $0x24] sm:$0xe] }
 0x311   : > { %14633 = vmatpush3.bf16.msra.mxu0 %v15076_v52  ;;  %v9095_v4 = vor.u32 %v9094_v39, %v9091_v7  ;;  %v9087_v36 = vsel %vm15478_vm2, %v9082_v45, %v9086_v31  ;;  %v17796_v60 = vsel %vm15658_vm5, %v13348_v37, %v9884_v63  ;;  %v9115_v47 = vrot.slane %v9113_v46, 4  ;;  %v9794_v32 = vld [vmem:[#allocation2 + $0x2c] sm:$0x1] }
 0x312   : > { %14634 = vmatprep.subr.bf16.mxu0 %v15077_v62  ;;  %v9116_v16 = vshll.u32 %v8980_v48, 16  ;;  %v9105_v19 = vor.u32 %v9104_v25, %v9100_v3  ;;  %v9122_v52 = vshll.u32 %v8981_v61, 16  ;;  %v9126_v24 = vshrl.u32 %v8981_v61, 16  ;;  %v8984_v26 = vld [vmem:[#allocation2 + $0x4c] sm:$0xf] }
 0x313   : > { %v9096_v43 = vrot.slane %v9095_v4, 4  ;;  %v13364_v59 = vcombine.low %v17796_v60, %v17790_v5  ;;  %v9132_v41 = vshll.u32 %v8982_v33, 16  ;;  %v9891_v27 = vrot.slane %v9790_v13, 5  ;;  %v8986_v61 = vld [vmem:[#allocation2 + $0x54] sm:$0xf] }
 0x314   : > { %v9118_v10 = vrot.slane %v9116_v16, 5  ;;  %v9106_v40 = vrot.slane %v9105_v19, 4  ;;  %v9110_v6 = vrot.slane %v9108_v0, 5  ;;  %v9124_v37 = vrot.slane %v9122_v52, 5  ;;  %v8987_v4 = vld [vmem:[#allocation2 + $0x58] sm:$0xf] }
 0x315   : > { %14635 = vmatpush3.bf16.msra.mxu0 %v15077_v62  ;;  %v9128_v56 = vrot.slane %v9126_v24, 4  ;;  %v17802_v28 = vcombine.low %v9077_v50, %v9087_v36  ;;  %v13349_v9 = vrot.slane %v9789_v21, 9  ;;  %v9893_v48 = vrot.slane %v9891_v27, 4  ;;  %v8988_v16 = vld [vmem:[#allocation2 + $0x5c] sm:$0x1] }
 0x316   : > { %v9119_v63 = vor.u32 %v9118_v10, %v9115_v47  ;;  %14716 = vmatprep.subr.bf16.mxu0 %v17798_v42  ;;  %v9101_v62 = vsel %vm15478_vm2, %v9096_v43, %v9100_v3  ;;  %v9111_v30 = vsel %vm15478_vm2, %v9106_v40, %v9110_v6  ;;  %v9894_v31 = vrot.slane %v9791_v17, 5  ;;  %v9795_v21 = vld [vmem:[#allocation2 + $0x30] sm:$0xe]  ;;  %v15067_v10 = vld [vmem:[#allocation2 + $0x9c] sm:$0xff]   ;;  %v9797_v6 = vld [vmem:[#allocation2 + $0x38] sm:$0x1] }
 0x317   : > { %14557 = vmatmul.mubr.bf16.gmra.mxu0 %v15060_v53  ;;  %14517 = vmatmul.mubr.bf16.gmra.mxu1 %v13289_v44  ;;  %v9129_v8 = vor.u32 %v9128_v56, %v9124_v37  ;;  %v9134_v38 = vrot.slane %v9132_v41, 5  ;;  %v17817_v51 = vsel %vm15658_vm5, %v13349_v9, %v9891_v27  ;;  %v9898_v55 = vrot.slane %v9793_v49, 5  ;;  %v8985_v44 = vld [vmem:[#allocation2 + $0x50] sm:$0x1]  ;;  %v9798_v9 = vld [vmem:[#allocation2 + $0x3c] sm:$0xe] }
 0x318   : > { %14560 = vmatprep.mubr.bf16.mxu0 %v15062_v15  ;;  %14520 = vmatprep.mubr.bf16.mxu1 %v13290_v23  ;;  %v9120_v18 = vrot.slane %v9119_v63, 4  ;;  %v17821_v7 = vsel %vm15658_vm5, %v9893_v48, %v9894_v31  ;;  %v9137_v39 = vshrl.u32 %v8983_v14, 16  ;;  %v9140_v1 = vshll.u32 %v8983_v14, 16  ;;  %v15065_v53 = vld [vmem:[#allocation2 + $0x90] sm:$0xff]  }
 0x319   : > { %v9130_v45 = vrot.slane %v9129_v8, 4  ;;  %v17823_v33 = vcombine.low %v9101_v62, %v9111_v30  ;;  %v13350_v57 = vrot.slane %v9792_v58, 9  ;;  %v9900_v2 = vrot.slane %v9898_v55, 4  ;;  %v9796_v15 = vld [vmem:[#allocation2 + $0x34] sm:$0xf] }
 0x31a   : > { %v9901_v23 = vrot.slane %v9794_v32, 5  ;;  %v9125_v50 = vsel %vm15478_vm2, %v9120_v18, %v9124_v37  ;;  %v9139_v3 = vrot.slane %v9137_v39, 4  ;;  %v9142_v46 = vrot.slane %v9140_v1, 5  ;;  %v9799_v37 = vld [vmem:[#allocation2 + $0x40] sm:$0xf] }
 0x31b   : > { %v9146_v13 = vshll.u32 %v8984_v26, 16  ;;  %v9135_v25 = vsel %vm15478_vm2, %v9130_v45, %v9134_v38  ;;  %v13365_v0 = vcombine.low %v17817_v51, %v17821_v7  ;;  %v9150_v47 = vshrl.u32 %v8984_v26, 16  ;;  %v8989_v30 = vld [vmem:[#allocation2 + $0x60] sm:$0xf]  ;;  %v8990_v1 = vld [vmem:[#allocation2 + $0x64] sm:$0xf] }
 0x31c   : > { %v17833_v36 = vsel %vm15658_vm5, %v9900_v2, %v9901_v23  ;;  %v9143_v43 = vor.u32 %v9142_v46, %v9139_v3  ;;  %v9156_v52 = vshll.u32 %v8985_v44, 16  ;;  %v9161_v24 = vshrl.u32 %v8986_v61, 16  ;;  %v15078_v2 = vld [vmem:[#allocation7 + $0x1b0] sm:$0xff]  }
 0x31d   : > { %v9148_v19 = vrot.slane %v9146_v13, 5  ;;  %v17837_v41 = vsel %vm15658_vm5, %v13350_v57, %v9898_v55  ;;  %v9152_v17 = vrot.slane %v9150_v47, 4  ;;  %v9164_v27 = vshll.u32 %v8986_v61, 16  ;;  %v9800_v55 = vld [vmem:[#allocation2 + $0x44] sm:$0x1]  ;;  %v15072_v57 = vld [vmem:[#allocation2 + $0xb4] sm:$0xff]  }
 0x31e   : > { %v9170_v40 = vshll.u32 %v8987_v4, 16  ;;  %v17842_v56 = vcombine.low %v9125_v50, %v9135_v25  ;;  %v9144_v58 = vrot.slane %v9143_v43, 4  ;;  %v9163_v49 = vrot.slane %v9161_v24, 4  ;;  %v8991_v46 = vld [vmem:[#allocation2 + $0x68] sm:$0x1] }
 0x31f   : > { %14561 = vmatmul.mubr.bf16.gmra.mxu0 %v15065_v53  ;;  %14521 = vmatmul.mubr.bf16.gmra.mxu1 %v13291_v22  ;;  %v9174_v63 = vshrl.u32 %v8987_v4, 16  ;;  %v13366_v48 = vcombine.low %v17837_v41, %v17833_v36  ;;  %v9153_v32 = vor.u32 %v9152_v17, %v9148_v19  ;;  %v9166_v14 = vrot.slane %v9164_v27, 5  ;;  %v8992_v53 = vld [vmem:[#allocation2 + $0x6c] sm:$0xf]  ;;  %v8993_v43 = vld [vmem:[#allocation2 + $0x70] sm:$0xf] }
 0x320   : > { %14564 = vmatprep.mubr.bf16.mxu0 %v15067_v10  ;;  %14588 = vmatprep.mubr.bf16.mxu1 %v17769_v20  ;;  %v17847_v62 = vrot.slane %v9170_v40, 5  ;;  %v9158_v8 = vrot.slane %v9156_v52, 5  ;;  %v9180_v11 = vshll.u32 %v8988_v16, 16  ;;  %v9905_v22 = vrot.slane %v9796_v15, 5  ;;  %v15070_v20 = vld [vmem:[#allocation2 + $0xa8] sm:$0xff]  }
 0x321   : > { %v9176_v54 = vrot.slane %v9174_v63, 4  ;;  %v9149_v31 = vsel %vm15478_vm2, %v9144_v58, %v9148_v19  ;;  %v9154_v26 = vrot.slane %v9153_v32, 4  ;;  %v9167_v18 = vor.u32 %v9166_v14, %v9163_v49  ;;  %v8994_v58 = vld [vmem:[#allocation2 + $0x74] sm:$0x1]  ;;  %v15079_v14 = vld [vmem:[#allocation7 + $0x1a8] sm:$0xff]  }
 0x322   : > { %v13351_v38 = vrot.slane %v9795_v21, 9  ;;  %v9907_v61 = vrot.slane %v9905_v22, 4  ;;  %v9908_v45 = vrot.slane %v9797_v6, 5  ;;  %v9912_v39 = vrot.slane %v9799_v37, 5  ;;  %v9810_v7 = vld [vmem:[#allocation2 + $0x6c] sm:$0xe] }
 0x323   : > { %v9177_v44 = vor.u32 %v9176_v54, %v17847_v62  ;;  %v9159_v23 = vsel %vm15478_vm2, %v9154_v26, %v9158_v8  ;;  %v17854_v50 = vrot.slane %v9167_v18, 4  ;;  %v13352_v3 = vrot.slane %v9798_v9, 9 }
 0x324   : > { %v9185_v13 = vshrl.u32 %v8989_v30, 16  ;;  %v9182_v25 = vrot.slane %v9180_v11, 5  ;;  %v17858_v47 = vsel %vm15658_vm5, %v13351_v38, %v9905_v22  ;;  %v17862_v16 = vsel %vm15658_vm5, %v9907_v61, %v9908_v45  ;;  %v9801_v11 = vld [vmem:[#allocation2 + $0x48] sm:$0xe]  ;;  %v15080_v61 = vld [vmem:[#allocation7 + $0x1a0] sm:$0xff]  }
 0x325   : > { %v9178_v4 = vrot.slane %v9177_v44, 4  ;;  %v17864_v19 = vcombine.low %v9149_v31, %v9159_v23  ;;  %v17868_v52 = vsel %vm15658_vm5, %v13352_v3, %v9912_v39  ;;  %v9914_v24 = vrot.slane %v9912_v39, 4  ;;  %v8995_v23 = vld [vmem:[#allocation2 + $0x78] sm:$0xf] }
 0x326   : > { %v9915_v21 = vrot.slane %v9800_v55, 5  ;;  %v9187_v15 = vrot.slane %v9185_v13, 4  ;;  %v9188_v10 = vshll.u32 %v8989_v30, 16  ;;  %v9194_v17 = vshll.u32 %v8990_v1, 16  ;;  %v9803_v55 = vld [vmem:[#allocation2 + $0x50] sm:$0x1] }
 0x327   : > { %14565 = vmatmul.mubr.bf16.gmra.mxu0 %v15070_v20  ;;  %14589 = vmatmul.mubr.bf16.vlgmr.msra.gmra.mxu1 %v17783_v29  ;;  %v9198_v27 = vshrl.u32 %v8990_v1, 16  ;;  %v9173_v40 = vsel %vm15478_vm2, %v17854_v50, %v17847_v62  ;;  %v13367_v6 = vcombine.low %v17858_v47, %v17862_v16  ;;  %v9204_v37 = vshll.u32 %v8991_v46, 16  ;;  %v9805_v20 = vld [vmem:[#allocation2 + $0x58] sm:$0xf] }
 0x328   : > { %14568 = vmatprep.mubr.bf16.mxu0 %v15072_v57  ;;  %14592 = vmatprep.mubr.bf16.mxu1 %v17802_v28  ;;  %v9209_v49 = vshrl.u32 %v8992_v53, 16  ;;  %v9183_v29 = vsel %vm15478_vm2, %v9178_v4, %v9182_v25  ;;  %v9190_v63 = vrot.slane %v9188_v10, 5  ;;  %v9196_v9 = vrot.slane %v9194_v17, 5  ;;  %v9802_v28 = vld [vmem:[#allocation2 + $0x4c] sm:$0xf]  ;;  %v17885_v22 = vpop.f32.mrf.mxu1 }
 0x329   : > { %14669 = vmatpush3.bf16.msra.mxu1 %v17734_v34  ;;  %v9200_v32 = vrot.slane %v9198_v27, 4  ;;  %v17883_v62 = vsel %vm15658_vm5, %v9914_v24, %v9915_v21  ;;  %v9212_v8 = vshll.u32 %v8992_v53, 16  ;;  %v9218_v54 = vshll.u32 %v8993_v43, 16  ;;  %v15075_v34 = vld [vmem:[#allocation2 + $0xc0] sm:$0xff]   ;;  %v9804_v57 = vld [vmem:[#allocation2 + $0x54] sm:$0xe] }
 0x32a   : > { %14670 = vmatprep.subr.bf16.mxu1 %v15078_v2  ;;  %v9211_v30 = vrot.slane %v9209_v49, 4  ;;  %v9191_v31 = vor.u32 %v9190_v63, %v9187_v15  ;;  %v9222_v18 = vshrl.u32 %v8993_v43, 16  ;;  %v9228_v38 = vshll.u32 %v8994_v58, 16  ;;  %v17889_v50 = vpop.f32.mrf.mxu1  ;;  %v9806_v17 = vld [vmem:[#allocation2 + $0x5c] sm:$0x1] }
 0x32b   : > { %v9201_v26 = vor.u32 %v9200_v32, %v9196_v9  ;;  %v9206_v44 = vrot.slane %v9204_v37, 5  ;;  %v9214_v45 = vrot.slane %v9212_v8, 5  ;;  %v17887_v39 = vrot.slane %v9218_v54, 5  ;;  %v8996_v49 = vld [vmem:[#allocation2 + $0x7c] sm:$0xf] }
 0x32c   : > { %v9919_v1 = vrot.slane %v9802_v28, 5  ;;  %v9192_v3 = vrot.slane %v9191_v31, 4  ;;  %v9224_v13 = vrot.slane %v9222_v18, 4  ;;  %v13353_v4 = vrot.slane %v9801_v11, 9  ;;  %v17899_v27 = vpop.f32.mrf.mxu1  ;;  %v8998_v32 = vld [vmem:[#allocation2 + $0x84] sm:$0xf] }
 0x32d   : > { %14671 = vmatpush3.bf16.msra.mxu1 %v15078_v2  ;;  %v9202_v46 = vrot.slane %v9201_v26, 4  ;;  %v17891_v25 = vcombine.low %v9173_v40, %v9183_v29  ;;  %v9215_v53 = vor.u32 %v9214_v45, %v9211_v30  ;;  %v9922_v24 = vrot.slane %v9803_v55, 5  ;;  %v8997_v29 = vld [vmem:[#allocation2 + $0x80] sm:$0x1]  ;;  %v8999_v11 = vld [vmem:[#allocation2 + $0x88] sm:$0xf] }
 0x32e   : > { %14672 = vmatprep.subr.bf16.mxu1 %v15079_v14  ;;  %v9921_v43 = vrot.slane %v9919_v1, 4  ;;  %v13368_v21 = vcombine.low %v17868_v52, %v17883_v62  ;;  %v9225_v2 = vor.u32 %v9224_v13, %v17887_v39  ;;  %v9230_v10 = vrot.slane %v9228_v38, 5  ;;  %v15082_v45 = vld [vmem:[#allocation7 + $0x190] sm:$0xff]   ;;  %v15090_v62 = vld [vmem:[#allocation7 + $0x1d8] sm:$0xff]  }
 0x32f   : > { %14569 = vmatmul.mubr.bf16.gmra.mxu0 %v15075_v34  ;;  %14593 = vmatmul.mubr.bf16.gmra.mxu1 %v17823_v33  ;;  %v9207_v15 = vsel %vm15478_vm2, %v9202_v46, %v9206_v44  ;;  %v9216_v40 = vrot.slane %v9215_v53, 4  ;;  %v17907_v33 = vsel %vm15658_vm5, %v13353_v4, %v9919_v1  ;;  %v9926_v58 = vrot.slane %v9805_v20, 5  ;;  %v9000_v34 = vld [vmem:[#allocation2 + $0x8c] sm:$0x1] }
 0x330   : > { %14636 = vmatprep.mubr.bf16.mxu0 %v13364_v59  ;;  %14596 = vmatprep.mubr.bf16.mxu1 %v17842_v56  ;;  %v17911_v37 = vsel %vm15658_vm5, %v9921_v43, %v9922_v24  ;;  %v9197_v63 = vsel %vm15478_vm2, %v9192_v3, %v9196_v9  ;;  %v9226_v5 = vrot.slane %v9225_v2, 4  ;;  %v13354_v60 = vrot.slane %v9804_v57, 9  ;;  %v15081_v56 = vld [vmem:[#allocation7 + $0x198] sm:$0xff]   ;;  %v17919_v9 = vpop.f32.mrf.mxu1  ;;  %v15084_v1 = vld [vmem:[#allocation7 + $0x1f0] sm:$0xff]   ;;  %v9807_v43 = vld [vmem:[#allocation2 + $0x60] sm:$0xe] }
 0x331   : > { %14673 = vmatpush3.bf16.msra.mxu1 %v15079_v14  ;;  %v9233_v59 = vshrl.u32 %v8995_v23, 16  ;;  %v17915_v28 = vcombine.low %v9197_v63, %v9207_v15  ;;  %v13369_v30 = vcombine.low %v17907_v33, %v17911_v37  ;;  %v9928_v8 = vrot.slane %v9926_v58, 4  ;;  %v9808_v24 = vld [vmem:[#allocation2 + $0x64] sm:$0xf]  ;;  %v9008_v33 = vld [vmem:[#allocation2 + $0xac] sm:$0xf] }
 0x332   : > { %14674 = vmatprep.subr.bf16.mxu1 %v15080_v61  ;;  %v9236_v54 = vshll.u32 %v8995_v23, 16  ;;  %v9929_v31 = vrot.slane %v9806_v17, 5  ;;  %v9242_v26 = vshll.u32 %v8996_v49, 16  ;;  %v9246_v18 = vshrl.u32 %v8996_v49, 16  ;;  %v9809_v17 = vld [vmem:[#allocation2 + $0x68] sm:$0x1] }
 0x333   : > { %v9235_v14 = vrot.slane %v9233_v59, 4  ;;  %v9221_v38 = vsel %vm15478_vm2, %v9216_v40, %v17887_v39  ;;  %v9231_v55 = vsel %vm15478_vm2, %v9226_v5, %v9230_v10  ;;  %v17928_v20 = vsel %vm15658_vm5, %v13354_v60, %v9926_v58  ;;  %v9811_v60 = vld [vmem:[#allocation2 + $0x70] sm:$0xf] }
 0x334   : > { %v9238_v44 = vrot.slane %v9236_v54, 5  ;;  %v9244_v57 = vrot.slane %v9242_v26, 5  ;;  %v9248_v23 = vrot.slane %v9246_v18, 4  ;;  %v9252_v3 = vshll.u32 %v8997_v29, 16  ;;  %v9001_v59 = vld [vmem:[#allocation2 + $0x90] sm:$0xf] }
 0x335   : > { %14675 = vmatpush3.bf16.msra.mxu1 %v15080_v61  ;;  %v9257_v46 = vshrl.u32 %v8998_v32, 16  ;;  %v17932_v13 = vsel %vm15658_vm5, %v9928_v8, %v9929_v31  ;;  %v9260_v4 = vshll.u32 %v8998_v32, 16  ;;  %v9266_v53 = vshll.u32 %v8999_v11, 16  ;;  %v17938_v40 = vpop.f32.mrf.mxu1  ;;  %v15085_v32 = vld [vmem:[#allocation7 + $0x188] sm:$0xff]  }
 0x336   : > { %v9239_v39 = vor.u32 %v9238_v44, %v9235_v14  ;;  %14676 = vmatprep.subr.bf16.mxu1 %v15081_v56  ;;  %v9249_v61 = vor.u32 %v9248_v23, %v9244_v57  ;;  %v9270_v2 = vshrl.u32 %v8999_v11, 16  ;;  %v9276_v10 = vshll.u32 %v9000_v34, 16  ;;  %v15086_v8 = vld [vmem:[#allocation7 + $0x1e8] sm:$0xff]  }
 0x337   : > { %14637 = vmatmul.mubr.bf16.vlgmr.msra.gmra.mxu0 %v13365_v0  ;;  %14597 = vmatmul.mubr.bf16.gmra.mxu1 %v17864_v19  ;;  %v9259_v15 = vrot.slane %v9257_v46, 4  ;;  %v13332_v58 = vcombine.low %v9221_v38, %v9231_v55  ;;  %v9262_v29 = vrot.slane %v9260_v4, 5  ;;  %v17944_v51 = vrot.slane %v9266_v53, 5  ;;  %v17954_v31 = vpop.f32.mrf.mxu1  ;;  %v9002_v55 = vld [vmem:[#allocation2 + $0x94] sm:$0xf]  ;;  %v15088_v4 = vld [vmem:[#allocation7 + $0x180] sm:$0xff]  }
 0x338   : > { %14640 = vmatprep.mubr.bf16.mxu0 %v13366_v48  ;;  %14600 = vmatprep.mubr.bf16.mxu1 %v17891_v25  ;;  %v9240_v49 = vrot.slane %v9239_v39, 4  ;;  %v9250_v0 = vrot.slane %v9249_v61, 4  ;;  %v9254_v19 = vrot.slane %v9252_v3, 5  ;;  %v9272_v63 = vrot.slane %v9270_v2, 4  ;;  %v15087_v39 = vld [vmem:[#allocation7 + $0x1e0] sm:$0xff]  }
 0x339   : > { %v9933_v5 = vrot.slane %v9808_v24, 5  ;;  %14677 = vmatpush3.bf16.msra.mxu1 %v15081_v56  ;;  %14717 = vmatpush3.bf16.msra.mxu0 %v17798_v42  ;;  %v13370_v36 = vcombine.low %v17928_v20, %v17932_v13  ;;  %v9263_v41 = vor.u32 %v9262_v29, %v9259_v15  ;;  %v17949_v48 = vrot.slane %v9276_v10, 5  ;;  %v9812_v42 = vld [vmem:[#allocation2 + $0x74] sm:$0x1]  ;;  %v9003_v61 = vld [vmem:[#allocation2 + $0x98] sm:$0x1] }
 0x33a   : > { %v13355_v25 = vrot.slane %v9807_v43, 9  ;;  %14678 = vmatprep.subr.bf16.mxu1 %v15082_v45  ;;  %14718 = vmatprep.subr.bf16.mxu0 %v15084_v1  ;;  %v9255_v54 = vsel %vm15478_vm2, %v9250_v0, %v9254_v19  ;;  %v9273_v56 = vor.u32 %v9272_v63, %v17944_v51  ;;  %v9936_v34 = vrot.slane %v9809_v17, 5  ;;  %v9004_v15 = vld [vmem:[#allocation2 + $0x9c] sm:$0xf]  ;;  %v9005_v17 = vld [vmem:[#allocation2 + $0xa0] sm:$0xf] }
 0x33b   : > { %v9935_v11 = vrot.slane %v9933_v5, 4  ;;  %v9245_v14 = vsel %vm15478_vm2, %v9240_v49, %v9244_v57  ;;  %v9264_v26 = vrot.slane %v9263_v41, 4  ;;  %v13356_v18 = vrot.slane %v9810_v7, 9  ;;  %v17975_v49 = vpop.f32.mrf.mxu1  ;;  %v9006_v29 = vld [vmem:[#allocation2 + $0xa4] sm:$0x1] }
 0x33c   : > { %v9940_v38 = vrot.slane %v9811_v60, 5  ;;  %v9274_v44 = vrot.slane %v9273_v56, 4  ;;  %v9281_v3 = vshrl.u32 %v9001_v59, 16  ;;  %v9284_v46 = vshll.u32 %v9001_v59, 16  ;;  %v17995_v60 = vld [vmem:[#allocation7 + $0x238] sm:$0xff]  }
 0x33d   : > { %v17960_v23 = vsel %vm15658_vm5, %v9935_v11, %v9936_v34  ;;  %14679 = vmatpush3.bf16.msra.mxu1 %v15082_v45  ;;  %14719 = vmatpush3.bf16.msra.mxu0 %v15084_v1  ;;  %v17962_v53 = vcombine.low %v9245_v14, %v9255_v54  ;;  %v17966_v57 = vsel %vm15658_vm5, %v13355_v25, %v9933_v5  ;;  %v9943_v24 = vrot.slane %v9812_v42, 5  ;;  %v9814_v5 = vld [vmem:[#allocation2 + $0x7c] sm:$0xf]  ;;  %v9813_v54 = vld [vmem:[#allocation2 + $0x78] sm:$0xe] }
 0x33e   : > { %v9942_v43 = vrot.slane %v9940_v38, 4  ;;  %14680 = vmatprep.subr.bf16.mxu1 %v15085_v32  ;;  %14720 = vmatprep.subr.bf16.mxu0 %v15086_v8  ;;  %v9269_v45 = vsel %vm15478_vm2, %v9264_v26, %v17944_v51  ;;  %v9283_v1 = vrot.slane %v9281_v3, 4  ;;  %v9286_v2 = vrot.slane %v9284_v46, 5  ;;  %v9815_v42 = vld [vmem:[#allocation2 + $0x80] sm:$0x1]  ;;  %v15091_v3 = vld [vmem:[#allocation7 + $0x1d0] sm:$0xff]  }
 0x33f   : > { %14641 = vmatmul.mubr.bf16.gmra.mxu0 %v13367_v6  ;;  %14601 = vmatmul.mubr.bf16.gmra.mxu1 %v17915_v28  ;;  %v9290_v10 = vshll.u32 %v9002_v55, 16  ;;  %v9279_v47 = vsel %vm15478_vm2, %v9274_v44, %v17949_v48  ;;  %v13371_v16 = vcombine.low %v17966_v57, %v17960_v23  ;;  %v17987_v6 = vsel %vm15658_vm5, %v13356_v18, %v9940_v38  ;;  %v9817_v14 = vld [vmem:[#allocation2 + $0x88] sm:$0xf] }
 0x340   : > { %14644 = vmatprep.mubr.bf16.mxu0 %v13368_v21  ;;  %14604 = vmatprep.mubr.bf16.mxu1 %v13332_v58  ;;  %v9294_v28 = vshrl.u32 %v9002_v55, 16  ;;  %v9287_v51 = vor.u32 %v9286_v2, %v9283_v1  ;;  %v9300_v0 = vshll.u32 %v9003_v61, 16  ;;  %v9305_v52 = vshrl.u32 %v9004_v15, 16  ;;  %v9007_v44 = vld [vmem:[#allocation2 + $0xa8] sm:$0xf] }
 0x341   : > { %v17989_v7 = vrot.slane %v9290_v10, 5  ;;  %14681 = vmatpush3.bf16.msra.mxu1 %v15085_v32  ;;  %14721 = vmatpush3.bf16.msra.mxu0 %v15086_v8  ;;  %v17993_v21 = vsel %vm15658_vm5, %v9942_v43, %v9943_v24  ;;  %v9308_v19 = vshll.u32 %v9004_v15, 16  ;;  %v9314_v63 = vshll.u32 %v9005_v17, 16  ;;  %v17997_v32 = vpop.f32.mrf.mxu1  ;;  %v9816_v15 = vld [vmem:[#allocation2 + $0x84] sm:$0xe] }
 0x342   : > { %v9296_v58 = vrot.slane %v9294_v28, 4  ;;  %14722 = vmatprep.subr.bf16.mxu0 %v15087_v39  ;;  %14682 = vmatprep.subr.bf16.mxu1 %v15088_v4  ;;  %v9288_v41 = vrot.slane %v9287_v51, 4  ;;  %v9307_v48 = vrot.slane %v9305_v52, 4  ;;  %v9318_v25 = vshrl.u32 %v9005_v17, 16 }
 0x343   : > { %v9324_v59 = vshll.u32 %v9006_v29, 16  ;;  %v13334_v8 = vcombine.low %v9269_v45, %v9279_v47  ;;  %v9310_v11 = vrot.slane %v9308_v19, 5  ;;  %v9316_v34 = vrot.slane %v9314_v63, 5  ;;  %v9818_v45 = vld [vmem:[#allocation2 + $0x8c] sm:$0x1]  ;;  %v18010_v10 = vpop.f32.mrf.mxu1 }
 0x344   : > { %v9297_v56 = vor.u32 %v9296_v58, %v17989_v7  ;;  %v13372_v26 = vcombine.low %v17987_v6, %v17993_v21  ;;  %v9302_v18 = vrot.slane %v9300_v0, 5  ;;  %v9320_v38 = vrot.slane %v9318_v25, 4  ;;  %v15095_v58 = vld [vmem:[#allocation7 + $0x1c8] sm:$0xff]  }
 0x345   : > { %v9947_v55 = vrot.slane %v9814_v5, 5  ;;  %14723 = vmatpush3.bf16.msra.mxu0 %v15087_v39  ;;  %14683 = vmatpush3.bf16.msra.mxu1 %v15088_v4  ;;  %v9293_v46 = vsel %vm15478_vm2, %v9288_v41, %v17989_v7  ;;  %v9311_v24 = vor.u32 %v9310_v11, %v9307_v48  ;;  %v13357_v61 = vrot.slane %v9813_v54, 9  ;;  %v9010_v7 = vld [vmem:[#allocation2 + $0xb4] sm:$0xf]  ;;  %v9011_v48 = vld [vmem:[#allocation2 + $0xb8] sm:$0xf]  ;;  %v18025_v25 = vpop.f32.mrf.mxu1 }
 0x346   : > { %v9298_v43 = vrot.slane %v9297_v56, 4  ;;  %14724 = vmatprep.subr.bf16.mxu0 %v15090_v62  ;;  %14764 = vmatprep.subr.bf16.mxu1 %v17995_v60  ;;  %v9321_v39 = vor.u32 %v9320_v38, %v9316_v34  ;;  %v9326_v4 = vrot.slane %v9324_v59, 5  ;;  %v9950_v1 = vrot.slane %v9815_v42, 5 }
 0x347   : > { %14645 = vmatmul.mubr.bf16.gmra.mxu0 %v13369_v30  ;;  %14605 = vmatmul.mubr.bf16.gmra.mxu1 %v17962_v53  ;;  %v9954_v2 = vrot.slane %v9817_v14, 5  ;;  %v9312_v47 = vrot.slane %v9311_v24, 4  ;;  %v9949_v28 = vrot.slane %v9947_v55, 4  ;;  %v9329_v37 = vshrl.u32 %v9007_v44, 16 }
 0x348   : > { %14648 = vmatprep.mubr.bf16.mxu0 %v13370_v36  ;;  %14608 = vmatprep.mubr.bf16.mxu1 %v13334_v8  ;;  %v9303_v17 = vsel %vm15478_vm2, %v9298_v43, %v9302_v18  ;;  %v9322_v30 = vrot.slane %v9321_v39, 4  ;;  %v18019_v53 = vsel %vm15658_vm5, %v13357_v61, %v9947_v55  ;;  %v13358_v29 = vrot.slane %v9816_v15, 9  ;;  %v9009_v36 = vld [vmem:[#allocation2 + $0xb0] sm:$0x1]  ;;  %v9012_v8 = vld [vmem:[#allocation2 + $0xbc] sm:$0x1] }
 0x349   : > { %v9957_v51 = vrot.slane %v9818_v45, 5  ;;  %14725 = vmatpush3.bf16.msra.mxu0 %v15090_v62  ;;  %v13335_v0 = vcombine.low %v9293_v46, %v9303_v17  ;;  %v9317_v20 = vsel %vm15478_vm2, %v9312_v47, %v9316_v34  ;;  %v9956_v13 = vrot.slane %v9954_v2, 4  ;;  %v18035_v18 = vld [vmem:[#allocation2 + $0x94] sm:$0xf]  ;;  %v15096_v43 = vld [vmem:[#allocation7 + $0x1c0] sm:$0xff]  }
 0x34a   : > { %v9331_v52 = vrot.slane %v9329_v37, 4  ;;  %14726 = vmatprep.subr.bf16.mxu0 %v15091_v3  ;;  %v9327_v19 = vsel %vm15478_vm2, %v9322_v30, %v9326_v4  ;;  %v9332_v63 = vshll.u32 %v9007_v44, 16  ;;  %v9338_v5 = vshll.u32 %v9008_v33, 16  ;;  %v9819_v39 = vld [vmem:[#allocation2 + $0x90] sm:$0xe]  ;;  %v18044_v4 = vpop.f32.mrf.mxu1 }
 0x34b   : > { %v9342_v41 = vshrl.u32 %v9008_v33, 16  ;;  %v13336_v59 = vcombine.low %v9317_v20, %v9327_v19  ;;  %v18029_v62 = vsel %vm15658_vm5, %v9949_v28, %v9950_v1  ;;  %v18033_v54 = vsel %vm15658_vm5, %v13358_v29, %v9954_v2  ;;  %v9823_v37 = vld [vmem:[#allocation2 + $0xa0] sm:$0xf]  ;;  %v9824_v20 = vld [vmem:[#allocation2 + $0xa4] sm:$0x1] }
 0x34c   : > { %v9353_v56 = vshrl.u32 %v9010_v7, 16  ;;  %v9334_v11 = vrot.slane %v9332_v63, 5  ;;  %v9340_v34 = vrot.slane %v9338_v5, 5  ;;  %v9348_v14 = vshll.u32 %v9009_v36, 16  ;;  %v9013_v29 = vld [vmem:[#allocation2 + $0xc0] sm:$0xf] }
 0x34d   : > { %v9344_v42 = vrot.slane %v9342_v41, 4  ;;  %14727 = vmatpush3.bf16.msra.mxu0 %v15091_v3  ;;  %v18039_v38 = vsel %vm15658_vm5, %v9956_v13, %v9957_v51  ;;  %v9356_v44 = vshll.u32 %v9010_v7, 16  ;;  %v9362_v46 = vshll.u32 %v9011_v48, 16  ;;  %v9821_v3 = vld [vmem:[#allocation2 + $0x98] sm:$0x1]  ;;  %v18056_v13 = vpop.f32.mrf.mxu1 }
 0x34e   : > { %v9355_v55 = vrot.slane %v9353_v56, 4  ;;  %14728 = vmatprep.subr.bf16.mxu0 %v15095_v58  ;;  %v9335_v24 = vor.u32 %v9334_v11, %v9331_v52  ;;  %v9366_v15 = vshrl.u32 %v9011_v48, 16  ;;  %v9372_v45 = vshll.u32 %v9012_v8, 16  ;;  %v9014_v63 = vld [vmem:[#allocation2 + $0xc4] sm:$0xf] }
 0x34f   : > { %14649 = vmatmul.mubr.bf16.gmra.mxu0 %v13371_v16  ;;  %14609 = vmatmul.mubr.bf16.gmra.mxu1 %v13335_v0  ;;  %v9345_v61 = vor.u32 %v9344_v42, %v9340_v34  ;;  %v13373_v1 = vcombine.low %v18019_v53, %v18029_v62  ;;  %v9358_v2 = vrot.slane %v9356_v44, 5  ;;  %v9364_v23 = vrot.slane %v9362_v46, 5  ;;  %v9822_v16 = vld [vmem:[#allocation2 + $0x9c] sm:$0xe]  ;;  %v9825_v42 = vld [vmem:[#allocation2 + $0xa8] sm:$0xe]  ;;  %v18066_v44 = vpop.f32.mrf.mxu1 }
 0x350   : > { %14652 = vmatprep.mubr.bf16.mxu0 %v13372_v26  ;;  %14612 = vmatprep.mubr.bf16.mxu1 %v13336_v59  ;;  %v9961_v57 = vrot.slane %v18035_v18, 5  ;;  %v9336_v17 = vrot.slane %v9335_v24, 4  ;;  %v9350_v28 = vrot.slane %v9348_v14, 5  ;;  %v9368_v33 = vrot.slane %v9366_v15, 4  ;;  %v9015_v59 = vld [vmem:[#allocation2 + $0xc8] sm:$0x1] }
 0x351   : > { %v9346_v47 = vrot.slane %v9345_v61, 4  ;;  %14729 = vmatpush3.bf16.msra.mxu0 %v15095_v58  ;;  %v13374_v30 = vcombine.low %v18033_v54, %v18039_v38  ;;  %v9359_v6 = vor.u32 %v9358_v2, %v9355_v55  ;;  %v13359_v21 = vrot.slane %v9819_v39, 9  ;;  %v9826_v55 = vld [vmem:[#allocation2 + $0xac] sm:$0xf]  ;;  %v9827_v15 = vld [vmem:[#allocation2 + $0xb0] sm:$0x1]  ;;  %v14446_v39 = vpop.f32.mrf.mxu0 }
 0x352   : > { %v9963_v26 = vrot.slane %v9961_v57, 4  ;;  %14730 = vmatprep.subr.bf16.mxu0 %v15096_v43  ;;  %v9369_v51 = vor.u32 %v9368_v33, %v9364_v23  ;;  %v9374_v7 = vrot.slane %v9372_v45, 5  ;;  %v9964_v0 = vrot.slane %v9821_v3, 5  ;;  %v9829_v45 = vld [vmem:[#allocation2 + $0xb8] sm:$0xf] }
 0x353   : > { %v9351_v53 = vsel %vm15478_vm2, %v9346_v47, %v9350_v28  ;;  %v9341_v36 = vsel %vm15478_vm2, %v9336_v17, %v9340_v34  ;;  %v9360_v52 = vrot.slane %v9359_v6, 4  ;;  %v13360_v58 = vrot.slane %v9822_v16, 9  ;;  %v9828_v16 = vld [vmem:[#allocation2 + $0xb4] sm:$0xe]  ;;  %v9830_v17 = vld [vmem:[#allocation2 + $0xbc] sm:$0x1] }
 0x354   : > { %v9968_v19 = vrot.slane %v9823_v37, 5  ;;  %v13337_v5 = vcombine.low %v9341_v36, %v9351_v53  ;;  %v9370_v41 = vrot.slane %v9369_v51, 4  ;;  %v9965_v48 = vsel %vm15658_vm5, %v9963_v26, %v9964_v0  ;;  %v9832_v6 = vld [vmem:[#allocation2 + $0xc4] sm:$0xf] }
 0x355   : > { %v9377_v62 = vshrl.u32 %v9013_v29, 16  ;;  %14731 = vmatpush3.bf16.msra.mxu0 %v15096_v43  ;;  %v9365_v54 = vsel %vm15478_vm2, %v9360_v52, %v9364_v23  ;;  %v9971_v56 = vrot.slane %v9824_v20, 5  ;;  %v9380_v11 = vshll.u32 %v9013_v29, 16  ;;  %v18076_v52 = vpop.f32.mrf.mxu0 }
 0x356   : > { %v9970_v8 = vrot.slane %v9968_v19, 4  ;;  %v9375_v34 = vsel %vm15478_vm2, %v9370_v41, %v9374_v7  ;;  %v9386_v18 = vshll.u32 %v9014_v63, 16  ;;  %v9390_v38 = vshrl.u32 %v9014_v63, 16  ;;  %v10831_v7 = vld [vmem:[#allocation2 + $0x18] sm:$0xf] }
 0x357   : > { %14653 = vmatmul.mubr.bf16.gmra.mxu0 %v13373_v1  ;;  %14613 = vmatmul.mubr.bf16.gmra.mxu1 %v13337_v5  ;;  %v9379_v14 = vrot.slane %v9377_v62, 4  ;;  %v13338_v46 = vcombine.low %v9365_v54, %v9375_v34  ;;  %v9382_v24 = vrot.slane %v9380_v11, 5  ;;  %v9396_v61 = vshll.u32 %v9015_v59, 16  ;;  %v18078_v5 = vld [vmem:[#allocation2 + $0xc8] sm:$0x1] }
 0x358   : > { %14656 = vmatprep.mubr.bf16.mxu0 %v13374_v30  ;;  %v9972_v43 = vsel %vm15658_vm5, %v9970_v8, %v9971_v56  ;;  %v9962_v3 = vsel %vm15658_vm5, %v13359_v21, %v9961_v57  ;;  %v9969_v1 = vsel %vm15658_vm5, %v13360_v58, %v9968_v19  ;;  %v9388_v2 = vrot.slane %v9386_v18, 5  ;;  %v9831_v30 = vld [vmem:[#allocation2 + $0xc0] sm:$0xe]  ;;  %v18074_v57 = vpop.f32.mrf.mxu1  ;;  %v10832_v54 = vld [vmem:[#allocation2 + $0x1c] sm:$0xf] }
 0x359   : > { %v9392_v23 = vrot.slane %v9390_v38, 4  ;;  %14616 = vmatprep.mubr.bf16.mxu1 %v13338_v46  ;;  %v13375_v47 = vcombine.low %v9962_v3, %v9965_v48  ;;  %v13376_v28 = vcombine.low %v9969_v1, %v9972_v43  ;;  %v9383_v33 = vor.u32 %v9382_v24, %v9379_v14  ;;  %v10834_v14 = vld [vmem:[#allocation2 + $0x24] sm:$0xf]  ;;  %v15089_v46 = vld [vmem:[#allocation2 + $0x18] sm:$0xff]  }
 0x35a   : > { %v9975_v37 = vrot.slane %v9826_v55, 5  ;;  %v9398_v29 = vrot.slane %v9396_v61, 5  ;;  %v13361_v53 = vrot.slane %v9825_v42, 9  ;;  %v9982_v51 = vrot.slane %v9829_v45, 5  ;;  %v18092_v18 = vpop.f32.mrf.mxu1  ;;  %v10833_v61 = vld [vmem:[#allocation2 + $0x20] sm:$0x1] }
 0x35b   : > { %v9393_v26 = vor.u32 %v9392_v23, %v9388_v2  ;;  %v9384_v21 = vrot.slane %v9383_v33, 4  ;;  %v9978_v20 = vrot.slane %v9827_v15, 5  ;;  %v13362_v36 = vrot.slane %v9828_v16, 9  ;;  %v18099_v15 = vpop.f32.mrf.mxu0  ;;  %v10835_v23 = vld [vmem:[#allocation2 + $0x28] sm:$0xf] }
 0x35c   : > { %v9977_v0 = vrot.slane %v9975_v37, 4  ;;  %v9984_v19 = vrot.slane %v9982_v51, 4  ;;  %v9985_v63 = vrot.slane %v9830_v17, 5  ;;  %v9989_v41 = vrot.slane %v9832_v6, 5 }
 0x35d   : > { %v9394_v58 = vrot.slane %v9393_v26, 4  ;;  %v9976_v48 = vsel %vm15658_vm5, %v13361_v53, %v9975_v37  ;;  %v13363_v62 = vrot.slane %v9831_v30, 9  ;;  %v10880_v8 = vshrl.u32 %v10831_v7, 16  ;;  %v18104_v53 = vpop.f32.mrf.mxu1 }
 0x35e   : > { %v9979_v59 = vsel %vm15658_vm5, %v9977_v0, %v9978_v20  ;;  %v9389_v56 = vsel %vm15478_vm2, %v9384_v21, %v9388_v2  ;;  %v9983_v42 = vsel %vm15658_vm5, %v13362_v36, %v9982_v51  ;;  %v9986_v34 = vsel %vm15658_vm5, %v9984_v19, %v9985_v63  ;;  %v18106_v20 = vpop.f32.mrf.mxu0  ;;  %v10838_v19 = vld [vmem:[#allocation2 + $0x34] sm:$0xf] }
 0x35f   : > { %14657 = vmatmul.mubr.bf16.gmra.mxu0 %v13375_v47  ;;  %v9399_v11 = vsel %vm15478_vm2, %v9394_v58, %v9398_v29  ;;  %v13377_v55 = vcombine.low %v9976_v48, %v9979_v59  ;;  %v18096_v43 = vsel %vm15658_vm5, %v13363_v62, %v9989_v41  ;;  %v9992_v24 = vrot.slane %v18078_v5, 5  ;;  %v10836_v47 = vld [vmem:[#allocation2 + $0x2c] sm:$0x1]  ;;  %v10837_v29 = vld [vmem:[#allocation2 + $0x30] sm:$0xf]  ;;  %v15092_v62 = vld [vmem:[#allocation2 + $0x24] sm:$0xff]  }
 0x360   : > { %14660 = vmatprep.mubr.bf16.mxu0 %v13376_v28  ;;  %v13339_v38 = vcombine.low %v9389_v56, %v9399_v11  ;;  %v10882_v45 = vrot.slane %v10880_v8, 4  ;;  %v10883_v3 = vshll.u32 %v10831_v7, 16  ;;  %v10889_v1 = vshll.u32 %v10832_v54, 16  ;;  %v18108_v11 = vpop.f32.mrf.mxu1 }
 0x361   : > { %v10893_v2 = vshrl.u32 %v10832_v54, 16  ;;  %v13378_v16 = vcombine.low %v9983_v42, %v9986_v34  ;;  %v18102_v17 = vadd.f32 %v14446_v39, %v17885_v22  ;;  %v10904_v28 = vshrl.u32 %v10834_v14, 16  ;;  %v15098_v34 = vld [vmem:[#allocation7 + $0x230] sm:$0xff]  }
 0x362   : > { %14617 = vmatmul.mubr.bf16.gmra.mxu1 %v13339_v38  ;;  %v10907_v33 = vshll.u32 %v10834_v14, 16  ;;  %v10885_v37 = vrot.slane %v10883_v3, 5  ;;  %v10891_v30 = vrot.slane %v10889_v1, 5  ;;  %v10899_v26 = vshll.u32 %v10833_v61, 16  ;;  %v10839_v14 = vld [vmem:[#allocation2 + $0x38] sm:$0x1] }
 0x363   : > { %14684 = vmatprep.mubr.bf16.mxu1 %v15089_v46  ;;  %v10895_v6 = vrot.slane %v10893_v2, 4  ;;  %v9991_v51 = vrot.slane %v9989_v41, 4  ;;  %v10906_v7 = vrot.slane %v10904_v28, 4  ;;  %v10913_v0 = vshll.u32 %v10835_v23, 16  ;;  %v15094_v3 = vld [vmem:[#allocation2 + $0x30] sm:$0xff]  }
 0x364   : > { %v10909_v21 = vrot.slane %v10907_v33, 5  ;;  %v10886_v36 = vor.u32 %v10885_v37, %v10882_v45  ;;  %v10917_v39 = vshrl.u32 %v10835_v23, 16  ;;  %v10923_v58 = vshll.u32 %v10836_v47, 16  ;;  %v14450_v45 = vpop.f32.mrf.mxu0  ;;  %v10840_v33 = vld [vmem:[#allocation2 + $0x3c] sm:$0xf] }
 0x365   : > { %v10896_v22 = vor.u32 %v10895_v6, %v10891_v30  ;;  %v10915_v5 = vrot.slane %v10913_v0, 5  ;;  %v10928_v48 = vshrl.u32 %v10837_v29, 16  ;;  %v10931_v59 = vshll.u32 %v10837_v29, 16 }
 0x366   : > { %v10910_v63 = vor.u32 %v10909_v21, %v10906_v7  ;;  %v10887_v54 = vrot.slane %v10886_v36, 4  ;;  %v10901_v56 = vrot.slane %v10899_v26, 5  ;;  %v10919_v41 = vrot.slane %v10917_v39, 4  ;;  %v18123_v7 = vpop.f32.mrf.mxu1  ;;  %v15101_v36 = vld [vmem:[#allocation7 + $0x228] sm:$0xff]  }
 0x367   : > { %14661 = vmatmul.mubr.bf16.gmra.mxu0 %v13377_v55  ;;  %v10897_v8 = vrot.slane %v10896_v22, 4  ;;  %v9993_v42 = vsel %vm15658_vm5, %v9991_v51, %v9992_v24  ;;  %v10930_v38 = vrot.slane %v10928_v48, 4  ;;  %v10933_v46 = vrot.slane %v10931_v59, 5  ;;  %v10841_v51 = vld [vmem:[#allocation2 + $0x40] sm:$0xf]  ;;  %v7749_v22 = vpop.f32.mrf.mxu0 }
 0x368   : > { %14664 = vmatprep.mubr.bf16.mxu0 %v13378_v16  ;;  %v10937_v61 = vshll.u32 %v10838_v19, 16  ;;  %v10920_v1 = vor.u32 %v10919_v41, %v10915_v5  ;;  %v10925_v2 = vrot.slane %v10923_v58, 5  ;;  %v10941_v23 = vshrl.u32 %v10838_v19, 16  ;;  %v10842_v58 = vld [vmem:[#allocation2 + $0x44] sm:$0x1]  ;;  %v15104_v41 = vld [vmem:[#allocation7 + $0x220] sm:$0xff]  }
 0x369   : > { %v10902_v55 = vsel %vm15478_vm2, %v10897_v8, %v10901_v56  ;;  %v10892_v16 = vsel %vm15478_vm2, %v10887_v54, %v10891_v30  ;;  %v10911_v47 = vrot.slane %v10910_v63, 4  ;;  %v10934_v28 = vor.u32 %v10933_v46, %v10930_v38  ;;  %v10844_v59 = vld [vmem:[#allocation2 + $0x4c] sm:$0xf]  ;;  %v10845_v46 = vld [vmem:[#allocation2 + $0x50] sm:$0x1] }
 0x36a   : > { %14685 = vmatmul.mubr.bf16.vlgmr.msra.gmra.mxu1 %v15092_v62  ;;  %v18116_v24 = vrot.slane %v10937_v61, 5  ;;  %v10921_v37 = vrot.slane %v10920_v1, 4  ;;  %v10943_v6 = vrot.slane %v10941_v23, 4  ;;  %v10947_v26 = vshll.u32 %v10839_v14, 16 }
 0x36b   : > { %14688 = vmatprep.mubr.bf16.mxu1 %v15094_v3  ;;  %14765 = vmatpush3.bf16.msra.mxu1 %v17995_v60  ;;  %v18121_v29 = vadd.f32 %v18076_v52, %v17889_v50  ;;  %v13379_v30 = vcombine.low %v18096_v43, %v9993_v42  ;;  %v13412_v21 = vcombine.low %v10892_v16, %v10902_v55  ;;  %v10935_v52 = vrot.slane %v10934_v28, 4  ;;  %v10843_v43 = vld [vmem:[#allocation2 + $0x48] sm:$0xf]  ;;  %v18138_v42 = vpop.f32.mrf.mxu1 }
 0x36c   : > { %14766 = vmatprep.subr.bf16.mxu1 %v15098_v34  ;;  %v18128_v0 = vadd.f32 %v18099_v15, %v17899_v27  ;;  %v18131_v60 = vadd.f32 %v14450_v45, %v17938_v40  ;;  %v10926_v50 = vsel %vm15478_vm2, %v10921_v37, %v10925_v2  ;;  %v10944_v39 = vor.u32 %v10943_v6, %v18116_v24  ;;  %v15097_v40 = vld [vmem:[#allocation2 + $0x3c] sm:$0xff]   ;;  %v14451_v45 = vpop.f32.mrf.mxu0  ;;  %v15099_v3 = vld [vmem:[#allocation2 + $0x48] sm:$0xff]  }
 0x36d   : > { %v10952_v19 = vshrl.u32 %v10840_v33, 16  ;;  %v10916_v63 = vsel %vm15478_vm2, %v10911_v47, %v10915_v5  ;;  %v10949_v48 = vrot.slane %v10947_v26, 5  ;;  %v10955_v27 = vshll.u32 %v10840_v33, 16 }
 0x36e   : > { %v10961_v15 = vshll.u32 %v10841_v51, 16  ;;  %v13413_v62 = vcombine.low %v10916_v63, %v10926_v50  ;;  %v10945_v54 = vrot.slane %v10944_v39, 4  ;;  %v10965_v56 = vshrl.u32 %v10841_v51, 16  ;;  %v10846_v51 = vld [vmem:[#allocation2 + $0x54] sm:$0xf]  ;;  %v18155_v39 = vpop.f32.mrf.mxu0 }
 0x36f   : > { %14665 = vmatmul.mubr.bf16.gmra.mxu0 %v13379_v30  ;;  %14767 = vmatpush3.bf16.msra.mxu1 %v15098_v34  ;;  %v10954_v8 = vrot.slane %v10952_v19, 4  ;;  %v10957_v14 = vrot.slane %v10955_v27, 5  ;;  %v10976_v5 = vshrl.u32 %v10843_v43, 16  ;;  %v10979_v61 = vshll.u32 %v10843_v43, 16  ;;  %v18147_v30 = vpop.f32.mrf.mxu1  ;;  %v15100_v27 = vld [vmem:[#allocation2 + $0x54] sm:$0xff]  }
 0x370   : > { %14732 = vmatprep.mubr.bf16.mxu0 %v13412_v21  ;;  %14768 = vmatprep.subr.bf16.mxu1 %v15101_v36  ;;  %v10963_v38 = vrot.slane %v10961_v15, 5  ;;  %v10940_v55 = vsel %vm15478_vm2, %v10935_v52, %v18116_v24  ;;  %v10967_v34 = vrot.slane %v10965_v56, 4  ;;  %v10971_v1 = vshll.u32 %v10842_v58, 16  ;;  %v10847_v58 = vld [vmem:[#allocation2 + $0x58] sm:$0xf] }
 0x371   : > { %v10985_v2 = vshll.u32 %v10844_v59, 16  ;;  %v10950_v23 = vsel %vm15478_vm2, %v10945_v54, %v10949_v48  ;;  %v10958_v16 = vor.u32 %v10957_v14, %v10954_v8  ;;  %v10978_v47 = vrot.slane %v10976_v5, 4  ;;  %v10848_v54 = vld [vmem:[#allocation2 + $0x5c] sm:$0x1]  ;;  %v10849_v14 = vld [vmem:[#allocation2 + $0x60] sm:$0xf] }
 0x372   : > { %14689 = vmatmul.mubr.bf16.gmra.mxu1 %v15097_v40  ;;  %v10981_v28 = vrot.slane %v10979_v61, 5  ;;  %v10968_v33 = vor.u32 %v10967_v34, %v10963_v38  ;;  %v10989_v6 = vshrl.u32 %v10844_v59, 16  ;;  %v10995_v26 = vshll.u32 %v10845_v46, 16  ;;  %v18162_v46 = vpop.f32.mrf.mxu1  ;;  %v15102_v34 = vld [vmem:[#allocation2 + $0x60] sm:$0xff]  }
 0x373   : > { %14692 = vmatprep.mubr.bf16.mxu1 %v15099_v3  ;;  %14769 = vmatpush3.bf16.msra.mxu1 %v15101_v36  ;;  %v18145_v37 = vrot.slane %v10985_v2, 5  ;;  %v10959_v24 = vrot.slane %v10958_v16, 4  ;;  %v18150_v50 = vadd.f32 %v7749_v22, %v17954_v31  ;;  %v18153_v52 = vadd.f32 %v14451_v45, %v17975_v49  ;;  %v15107_v36 = vld [vmem:[#allocation7 + $0x218] sm:$0xff]  }
 0x374   : > { %v10982_v21 = vor.u32 %v10981_v28, %v10978_v47  ;;  %14770 = vmatprep.subr.bf16.mxu1 %v15104_v41  ;;  %v13414_v19 = vcombine.low %v10940_v55, %v10950_v23  ;;  %v10969_v43 = vrot.slane %v10968_v33, 4  ;;  %v10973_v63 = vrot.slane %v10971_v1, 5  ;;  %v10850_v55 = vld [vmem:[#allocation2 + $0x64] sm:$0xf] }
 0x375   : > { %v10991_v48 = vrot.slane %v10989_v6, 4  ;;  %v10964_v15 = vsel %vm15478_vm2, %v10959_v24, %v10963_v38  ;;  %v10997_v59 = vrot.slane %v10995_v26, 5  ;;  %v11000_v40 = vshrl.u32 %v10846_v51, 16  ;;  %v10851_v24 = vld [vmem:[#allocation2 + $0x68] sm:$0x1] }
 0x376   : > { %v11003_v31 = vshll.u32 %v10846_v51, 16  ;;  %v10974_v49 = vsel %vm15478_vm2, %v10969_v43, %v10973_v63  ;;  %v11009_v8 = vshll.u32 %v10847_v58, 16  ;;  %v11013_v56 = vshrl.u32 %v10847_v58, 16 }
 0x377   : > { %14733 = vmatmul.mubr.bf16.vlgmr.msra.gmra.mxu0 %v13413_v62  ;;  %v10992_v22 = vor.u32 %v10991_v48, %v18145_v37  ;;  %14771 = vmatpush3.bf16.msra.mxu1 %v15104_v41  ;;  %v13415_v5 = vcombine.low %v10964_v15, %v10974_v49  ;;  %v10983_v61 = vrot.slane %v10982_v21, 4  ;;  %v14454_v38 = vpop.f32.mrf.mxu0  ;;  %v11002_v45 = vrot.slane %v11000_v40, 4  ;;  %v15110_v62 = vld [vmem:[#allocation7 + $0x210] sm:$0xff]   ;;  %v15113_v15 = vld [vmem:[#allocation7 + $0x208] sm:$0xff]  }
 0x378   : > { %14736 = vmatprep.mubr.bf16.mxu0 %v13414_v19  ;;  %v11005_v3 = vrot.slane %v11003_v31, 5  ;;  %14772 = vmatprep.subr.bf16.mxu1 %v15107_v36  ;;  %v18165_v2 = vadd.f32 %v14454_v38, %v18010_v10  ;;  %v11011_v23 = vrot.slane %v11009_v8, 5  ;;  %v11015_v16 = vrot.slane %v11013_v56, 4  ;;  %v18169_v19 = vpop.f32.mrf.mxu1 }
 0x379   : > { %v10993_v1 = vrot.slane %v10992_v22, 4  ;;  %v11019_v47 = vshll.u32 %v10848_v54, 16  ;;  %v11024_v28 = vshrl.u32 %v10849_v14, 16  ;;  %v11027_v33 = vshll.u32 %v10849_v14, 16  ;;  %v7765_v6 = vpop.f32.mrf.mxu0  ;;  %v10852_v22 = vld [vmem:[#allocation2 + $0x6c] sm:$0xf] }
 0x37a   : > { %14693 = vmatmul.mubr.bf16.gmra.mxu1 %v15100_v27  ;;  %v11006_v41 = vor.u32 %v11005_v3, %v11002_v45  ;;  %v11016_v51 = vor.u32 %v11015_v16, %v11011_v23  ;;  %v11033_v21 = vshll.u32 %v10850_v55, 16  ;;  %v11037_v58 = vshrl.u32 %v10850_v55, 16  ;;  %v10855_v45 = vld [vmem:[#allocation2 + $0x78] sm:$0xf]  ;;  %v18182_v3 = vpop.f32.mrf.mxu1  ;;  %v15103_v55 = vld [vmem:[#allocation2 + $0x6c] sm:$0xff]  }
 0x37b   : > { %14696 = vmatprep.mubr.bf16.mxu1 %v15102_v34  ;;  %v10998_v26 = vsel %vm15478_vm2, %v10993_v1, %v10997_v59  ;;  %14773 = vmatpush3.bf16.msra.mxu1 %v15107_v36  ;;  %v10988_v10 = vsel %vm15478_vm2, %v10983_v61, %v18145_v37  ;;  %v11021_v63 = vrot.slane %v11019_v47, 5  ;;  %v11026_v48 = vrot.slane %v11024_v28, 4  ;;  %v14455_v27 = vpop.f32.mrf.mxu0  ;;  %v10853_v37 = vld [vmem:[#allocation2 + $0x70] sm:$0xf]  ;;  %v15105_v34 = vld [vmem:[#allocation2 + $0x78] sm:$0xff]  }
 0x37c   : > { %v11007_v43 = vrot.slane %v11006_v41, 4  ;;  %14774 = vmatprep.subr.bf16.mxu1 %v15110_v62  ;;  %v11017_v40 = vrot.slane %v11016_v51, 4  ;;  %v11029_v31 = vrot.slane %v11027_v33, 5  ;;  %v11035_v59 = vrot.slane %v11033_v21, 5  ;;  %v15116_v41 = vld [vmem:[#allocation7 + $0x200] sm:$0xff]  }
 0x37d   : > { %v11039_v49 = vrot.slane %v11037_v58, 4  ;;  %v13416_v54 = vcombine.low %v10988_v10, %v10998_v26  ;;  %v11043_v8 = vshll.u32 %v10851_v24, 16  ;;  %v18175_v36 = vadd.f32 %v7765_v6, %v18025_v25  ;;  %v10854_v28 = vld [vmem:[#allocation2 + $0x74] sm:$0x1]  ;;  %v10856_v21 = vld [vmem:[#allocation2 + $0x7c] sm:$0xf]  ;;  %v18190_v10 = vpop.f32.mrf.mxu0 }
 0x37e   : > { %v18178_v56 = vadd.f32 %v14455_v27, %v18044_v4  ;;  %v11022_v14 = vsel %vm15478_vm2, %v11017_v40, %v11021_v63  ;;  %v11030_v61 = vor.u32 %v11029_v31, %v11026_v48  ;;  %v11012_v25 = vsel %vm15478_vm2, %v11007_v43, %v11011_v23  ;;  %v10857_v48 = vld [vmem:[#allocation2 + $0x80] sm:$0x1]  ;;  %v10858_v27 = vld [vmem:[#allocation2 + $0x84] sm:$0xf]  ;;  %v18192_v40 = vpop.f32.mrf.mxu1 }
 0x37f   : > { %14737 = vmatmul.mubr.bf16.gmra.mxu0 %v13415_v5  ;;  %v11040_v38 = vor.u32 %v11039_v49, %v11035_v59  ;;  %v11045_v1 = vrot.slane %v11043_v8, 5  ;;  %v11048_v16 = vshrl.u32 %v10852_v22, 16  ;;  %v11051_v4 = vshll.u32 %v10852_v22, 16  ;;  %14775 = vmatpush3.bf16.msra.mxu1 %v15110_v62 }
 0x380   : > { %14740 = vmatprep.mubr.bf16.mxu0 %v13416_v54  ;;  %v11031_v5 = vrot.slane %v11030_v61, 4  ;;  %v11057_v33 = vshll.u32 %v10853_v37, 16  ;;  %v11061_v6 = vshrl.u32 %v10853_v37, 16  ;;  %14776 = vmatprep.subr.bf16.mxu1 %v15113_v15  ;;  %v13417_v26 = vcombine.low %v11012_v25, %v11022_v14 }
 0x381   : > { %v11041_v47 = vrot.slane %v11040_v38, 4  ;;  %v11050_v51 = vrot.slane %v11048_v16, 4  ;;  %v11053_v24 = vrot.slane %v11051_v4, 5  ;;  %v11072_v58 = vshrl.u32 %v10855_v45, 16 }
 0x382   : > { %14697 = vmatmul.mubr.bf16.gmra.mxu1 %v15103_v55  ;;  %v11036_v23 = vsel %vm15478_vm2, %v11031_v5, %v11035_v59  ;;  %v11059_v43 = vrot.slane %v11057_v33, 5  ;;  %v11063_v63 = vrot.slane %v11061_v6, 4  ;;  %v11067_v22 = vshll.u32 %v10854_v28, 16  ;;  %v18194_v33 = vpop.f32.mrf.mxu1 }
 0x383   : > { %14700 = vmatprep.mubr.bf16.mxu1 %v15105_v34  ;;  %v11046_v62 = vsel %vm15478_vm2, %v11041_v47, %v11045_v1  ;;  %v11054_v49 = vor.u32 %v11053_v24, %v11050_v51  ;;  %v11074_v54 = vrot.slane %v11072_v58, 4  ;;  %14777 = vmatpush3.bf16.msra.mxu1 %v15113_v15  ;;  %v11075_v37 = vshll.u32 %v10855_v45, 16  ;;  %v10859_v47 = vld [vmem:[#allocation2 + $0x88] sm:$0xf]  ;;  %v10860_v51 = vld [vmem:[#allocation2 + $0x8c] sm:$0x1] }
 0x384   : > { %v13418_v31 = vcombine.low %v11036_v23, %v11046_v62  ;;  %v11064_v8 = vor.u32 %v11063_v63, %v11059_v43  ;;  %v11081_v14 = vshll.u32 %v10856_v21, 16  ;;  %v11085_v59 = vshrl.u32 %v10856_v21, 16  ;;  %14778 = vmatprep.subr.bf16.mxu1 %v15116_v41  ;;  %v15106_v15 = vld [vmem:[#allocation2 + $0x84] sm:$0xff]  }
 0x385   : > { %v11055_v61 = vrot.slane %v11054_v49, 4  ;;  %v11091_v38 = vshll.u32 %v10857_v48, 16  ;;  %v11096_v55 = vshrl.u32 %v10858_v27, 16  ;;  %v11099_v34 = vshll.u32 %v10858_v27, 16  ;;  %v10861_v48 = vld [vmem:[#allocation2 + $0x90] sm:$0xf] }
 0x386   : > { %v11065_v1 = vrot.slane %v11064_v8, 4  ;;  %v11077_v16 = vrot.slane %v11075_v37, 5  ;;  %v11083_v4 = vrot.slane %v11081_v14, 5  ;;  %v11087_v5 = vrot.slane %v11085_v59, 4  ;;  %v18206_v37 = vpop.f32.mrf.mxu1 }
 0x387   : > { %14741 = vmatmul.mubr.bf16.gmra.mxu0 %v13417_v26  ;;  %v14458_v25 = vpop.f32.mrf.mxu0  ;;  %v11060_v28 = vsel %vm15478_vm2, %v11055_v61, %v11059_v43  ;;  %v11069_v6 = vrot.slane %v11067_v22, 5  ;;  %v11098_v24 = vrot.slane %v11096_v55, 4  ;;  %14779 = vmatpush3.bf16.msra.mxu1 %v15116_v41  ;;  %v15108_v26 = vld [vmem:[#allocation2 + $0x90] sm:$0xff]   ;;  %v11093_v23 = vrot.slane %v11091_v38, 5 }
 0x388   : > { %14744 = vmatprep.mubr.bf16.mxu0 %v13418_v31  ;;  %v18197_v45 = vadd.f32 %v14458_v25, %v18066_v44  ;;  %v11078_v21 = vor.u32 %v11077_v16, %v11074_v54  ;;  %v11088_v58 = vor.u32 %v11087_v5, %v11083_v4  ;;  %v11101_v63 = vrot.slane %v11099_v34, 5  ;;  %v10862_v38 = vld [vmem:[#allocation2 + $0x94] sm:$0xf]  ;;  %v10863_v16 = vld [vmem:[#allocation2 + $0x98] sm:$0x1] }
 0x389   : > { %v7781_v62 = vpop.f32.mrf.mxu0  ;;  %v11070_v27 = vsel %vm15478_vm2, %v11065_v1, %v11069_v6  ;;  %v11105_v31 = vshll.u32 %v10859_v47, 16  ;;  %v11109_v43 = vshrl.u32 %v10859_v47, 16  ;;  %v11115_v54 = vshll.u32 %v10860_v51, 16  ;;  %v10864_v5 = vld [vmem:[#allocation2 + $0x9c] sm:$0xf] }
 0x38a   : > { %14701 = vmatmul.mubr.bf16.gmra.mxu1 %v15106_v15  ;;  %v18204_v44 = vadd.f32 %v7781_v62, %v18074_v57  ;;  %v11079_v49 = vrot.slane %v11078_v21, 4  ;;  %v11089_v22 = vrot.slane %v11088_v58, 4  ;;  %v11102_v8 = vor.u32 %v11101_v63, %v11098_v24  ;;  %v10865_v24 = vld [vmem:[#allocation2 + $0xa0] sm:$0xf]  ;;  %v18219_v58 = vpop.f32.mrf.mxu1  ;;  %v15111_v62 = vld [vmem:[#allocation2 + $0xa8] sm:$0xff]  }
 0x38b   : > { %14704 = vmatprep.mubr.bf16.mxu1 %v15108_v26  ;;  %v14459_v41 = vpop.f32.mrf.mxu0  ;;  %v11107_v59 = vrot.slane %v11105_v31, 5  ;;  %v11111_v61 = vrot.slane %v11109_v43, 4  ;;  %v11120_v55 = vshrl.u32 %v10861_v48, 16  ;;  %v13419_v34 = vcombine.low %v11060_v28, %v11070_v27 }
 0x38c   : > { %v18209_v14 = vadd.f32 %v14459_v41, %v18092_v18  ;;  %v11084_v57 = vsel %vm15478_vm2, %v11079_v49, %v11083_v4  ;;  %v11094_v25 = vsel %vm15478_vm2, %v11089_v22, %v11093_v23  ;;  %v11103_v1 = vrot.slane %v11102_v8, 4  ;;  %v15109_v23 = vld [vmem:[#allocation2 + $0x9c] sm:$0xff]   ;;  %v10866_v8 = vld [vmem:[#allocation2 + $0xa4] sm:$0x1] }
 0x38d   : > { %v13420_v47 = vcombine.low %v11084_v57, %v11094_v25  ;;  %v18215_v15 = vpop.f32.mrf.mxu0  ;;  %v11112_v6 = vor.u32 %v11111_v61, %v11107_v59  ;;  %v11117_v18 = vrot.slane %v11115_v54, 5  ;;  %v11122_v51 = vrot.slane %v11120_v55, 4 }
 0x38e   : > { %v11108_v28 = vsel %vm15478_vm2, %v11103_v1, %v11107_v59  ;;  %v11123_v26 = vshll.u32 %v10861_v48, 16  ;;  %v11129_v21 = vshll.u32 %v10862_v38, 16  ;;  %v11133_v4 = vshrl.u32 %v10862_v38, 16 }
 0x38f   : > { %14745 = vmatmul.mubr.bf16.gmra.mxu0 %v13419_v34  ;;  %v11113_v63 = vrot.slane %v11112_v6, 4  ;;  %v11139_v27 = vshll.u32 %v10863_v16, 16  ;;  %v11144_v31 = vshrl.u32 %v10864_v5, 16  ;;  %v11147_v43 = vshll.u32 %v10864_v5, 16  ;;  %v10867_v34 = vld [vmem:[#allocation2 + $0xa8] sm:$0xf]  ;;  %v18226_v5 = vpop.f32.mrf.mxu1 }
 0x390   : > { %14748 = vmatprep.mubr.bf16.mxu0 %v13420_v47  ;;  %v11125_v49 = vrot.slane %v11123_v26, 5  ;;  %v11131_v22 = vrot.slane %v11129_v21, 5  ;;  %v11135_v41 = vrot.slane %v11133_v4, 4  ;;  %v11153_v54 = vshll.u32 %v10865_v24, 16 }
 0x391   : > { %v11118_v48 = vsel %vm15478_vm2, %v11113_v63, %v11117_v18  ;;  %v11141_v59 = vrot.slane %v11139_v27, 5  ;;  %v11146_v38 = vrot.slane %v11144_v31, 4  ;;  %v11149_v55 = vrot.slane %v11147_v43, 5  ;;  %v10868_v27 = vld [vmem:[#allocation2 + $0xac] sm:$0xf] }
 0x392   : > { %14705 = vmatmul.mubr.bf16.gmra.mxu1 %v15109_v23  ;;  %v14462_v61 = vpop.f32.mrf.mxu0  ;;  %v13421_v25 = vcombine.low %v11108_v28, %v11118_v48  ;;  %v11126_v1 = vor.u32 %v11125_v49, %v11122_v51  ;;  %v11136_v16 = vor.u32 %v11135_v41, %v11131_v22  ;;  %v11155_v26 = vrot.slane %v11153_v54, 5  ;;  %v10869_v43 = vld [vmem:[#allocation2 + $0xb0] sm:$0x1]  ;;  %v18242_v54 = vpop.f32.mrf.mxu1  ;;  %v15112_v48 = vld [vmem:[#allocation2 + $0xb4] sm:$0xff]  }
 0x393   : > { %v18224_v57 = vadd.f32 %v14462_v61, %v18108_v11  ;;  %14708 = vmatprep.mubr.bf16.mxu1 %v15111_v62  ;;  %v11150_v6 = vor.u32 %v11149_v55, %v11146_v38  ;;  %v11157_v21 = vshrl.u32 %v10865_v24, 16  ;;  %v11163_v4 = vshll.u32 %v10866_v8, 16 }
 0x394   : > { %v7797_v47 = vpop.f32.mrf.mxu0  ;;  %v11127_v23 = vrot.slane %v11126_v1, 4  ;;  %v11137_v18 = vrot.slane %v11136_v16, 4  ;;  %v11168_v31 = vshrl.u32 %v10867_v34, 16  ;;  %v18233_v11 = vadd.f32 %v18106_v20, %v17919_v9  ;;  %v10870_v9 = vld [vmem:[#allocation2 + $0xb4] sm:$0xf] }
 0x395   : > { %v18229_v63 = vadd.f32 %v7797_v47, %v18123_v7  ;;  %v11151_v28 = vrot.slane %v11150_v6, 4  ;;  %v11159_v62 = vrot.slane %v11157_v21, 4  ;;  %v11171_v49 = vshll.u32 %v10867_v34, 16  ;;  %v10871_v21 = vld [vmem:[#allocation2 + $0xb8] sm:$0xf] }
 0x396   : > { %v14463_v51 = vpop.f32.mrf.mxu0  ;;  %v11132_v24 = vsel %vm15478_vm2, %v11127_v23, %v11131_v22  ;;  %v11142_v41 = vsel %vm15478_vm2, %v11137_v18, %v11141_v59  ;;  %v11170_v8 = vrot.slane %v11168_v31, 4  ;;  %v11165_v55 = vrot.slane %v11163_v4, 5 }
 0x397   : > { %14749 = vmatmul.mubr.bf16.gmra.mxu0 %v13421_v25  ;;  %v18240_v7 = vadd.f32 %v14463_v51, %v18138_v42  ;;  %v13422_v20 = vcombine.low %v11132_v24, %v11142_v41  ;;  %v11160_v38 = vor.u32 %v11159_v62, %v11155_v26  ;;  %v11173_v34 = vrot.slane %v11171_v49, 5  ;;  %v15114_v25 = vld [vmem:[#allocation2 + $0xc0] sm:$0xff]   ;;  %v10872_v49 = vld [vmem:[#allocation2 + $0xbc] sm:$0x1] }
 0x398   : > { %v18244_v61 = vpop.f32.mrf.mxu0  ;;  %v11156_v22 = vsel %vm15478_vm2, %v11151_v28, %v11155_v26  ;;  %v11177_v1 = vshll.u32 %v10868_v27, 16  ;;  %v11181_v59 = vshrl.u32 %v10868_v27, 16  ;;  %v11187_v16 = vshll.u32 %v10869_v43, 16  ;;  %v18251_v26 = vpop.f32.mrf.mxu1 }
 0x399   : > { %14752 = vmatprep.mubr.bf16.mxu0 %v13422_v20  ;;  %v11161_v47 = vrot.slane %v11160_v38, 4  ;;  %v11174_v6 = vor.u32 %v11173_v34, %v11170_v8  ;;  %v11192_v23 = vshrl.u32 %v10870_v9, 16  ;;  %v11195_v18 = vshll.u32 %v10870_v9, 16  ;;  %v11649_v8 = vld [vmem:[#allocation2 + $0x18] sm:$0xe] }
 0x39a   : > { %14709 = vmatmul.mubr.bf16.gmra.mxu1 %v15112_v48  ;;  %v14466_v42 = vpop.f32.mrf.mxu0  ;;  %v11179_v4 = vrot.slane %v11177_v1, 5  ;;  %v11183_v51 = vrot.slane %v11181_v59, 4  ;;  %v11189_v62 = vrot.slane %v11187_v16, 5  ;;  %v15115_v48 = vld [vmem:[#allocation2 + $0xcc] sm:$0xff]   ;;  %v11201_v38 = vshll.u32 %v10871_v21, 16 }
 0x39b   : > { %v18249_v31 = vadd.f32 %v14466_v42, %v18162_v46  ;;  %14712 = vmatprep.mubr.bf16.mxu1 %v15114_v25  ;;  %v11166_v27 = vsel %vm15478_vm2, %v11161_v47, %v11165_v55  ;;  %v11175_v28 = vrot.slane %v11174_v6, 4  ;;  %v11194_v24 = vrot.slane %v11192_v23, 4  ;;  %v11650_v34 = vld [vmem:[#allocation2 + $0x1c] sm:$0xf]  ;;  %v11651_v42 = vld [vmem:[#allocation2 + $0x20] sm:$0x1] }
 0x39c   : > { %v7813_v43 = vpop.f32.mrf.mxu0  ;;  %v11197_v41 = vrot.slane %v11195_v18, 5  ;;  %v13423_v20 = vcombine.low %v11156_v22, %v11166_v27  ;;  %v11184_v9 = vor.u32 %v11183_v51, %v11179_v4  ;;  %v11205_v16 = vshrl.u32 %v10871_v21, 16  ;;  %v10873_v47 = vld [vmem:[#allocation2 + $0xc0] sm:$0xf]  ;;  %v18263_v18 = vpop.f32.mrf.mxu1 }
 0x39d   : > { %v18256_v46 = vadd.f32 %v7813_v43, %v18169_v19  ;;  %v11180_v25 = vsel %vm15478_vm2, %v11175_v28, %v11179_v4  ;;  %v11211_v55 = vshll.u32 %v10872_v49, 16  ;;  %v11203_v23 = vrot.slane %v11201_v38, 5  ;;  %v10874_v28 = vld [vmem:[#allocation2 + $0xc4] sm:$0xf] }
 0x39e   : > { %v14467_v1 = vpop.f32.mrf.mxu0  ;;  %v11198_v59 = vor.u32 %v11197_v41, %v11194_v24  ;;  %v11185_v6 = vrot.slane %v11184_v9, 4  ;;  %v13436_v19 = vrot.slane %v11649_v8, 9  ;;  %v11207_v43 = vrot.slane %v11205_v16, 4  ;;  %v10875_v41 = vld [vmem:[#allocation2 + $0xc8] sm:$0x1] }
 0x39f   : > { %19275 = vst [vmem:[#allocation20_spill] sm:$0xff] %v18256_v46  ;;  %14753 = vmatmul.mubr.bf16.gmra.mxu0 %v13423_v20  ;;  %v18261_v22 = vadd.f32 %v14467_v1, %v18182_v3  ;;  %v11213_v46 = vrot.slane %v11211_v55, 5  ;;  %v11747_v4 = vrot.slane %v11650_v34, 5  ;;  %v11750_v24 = vrot.slane %v11651_v42, 5  ;;  %v11652_v34 = vld [vmem:[#allocation2 + $0x24] sm:$0xe] }
 0x3a0   : > { %v7816_v51 = vpop.f32.mrf.mxu0  ;;  %v11199_v27 = vrot.slane %v11198_v59, 4  ;;  %v11190_v21 = vsel %vm15478_vm2, %v11185_v6, %v11189_v62  ;;  %v11216_v3 = vshrl.u32 %v10873_v47, 16  ;;  %v11208_v9 = vor.u32 %v11207_v43, %v11203_v23 }
 0x3a1   : > { %v18268_v49 = vadd.f32 %v7816_v51, %v18192_v40  ;;  %v13424_v20 = vcombine.low %v11180_v25, %v11190_v21  ;;  %v11748_v38 = vsel %vm15658_vm5, %v13436_v19, %v11747_v4  ;;  %v11749_v59 = vrot.slane %v11747_v4, 4  ;;  %v18274_v40 = vpop.f32.mrf.mxu1  ;;  %v11653_v51 = vld [vmem:[#allocation2 + $0x28] sm:$0xf]  ;;  %v11654_v4 = vld [vmem:[#allocation2 + $0x2c] sm:$0x1] }
 0x3a2   : > { %14713 = vmatmul.mubr.bf16.gmra.mxu1 %v15115_v48  ;;  %v11204_v8 = vsel %vm15478_vm2, %v11199_v27, %v11203_v23  ;;  %v11218_v16 = vrot.slane %v11216_v3, 4  ;;  %v11219_v62 = vshll.u32 %v10873_v47, 16  ;;  %v11225_v55 = vshll.u32 %v10874_v28, 16 }
 0x3a3   : > { %19276 = vst [vmem:[#allocation23_spill] sm:$0xff] %v18268_v49  ;;  %v14470_v1 = vpop.f32.mrf.mxu0  ;;  %14756 = vmatprep.mubr.bf16.mxu0 %v13424_v20  ;;  %v11209_v48 = vrot.slane %v11208_v9, 4  ;;  %v11229_v25 = vshrl.u32 %v10874_v28, 16  ;;  %v11235_v6 = vshll.u32 %v10875_v41, 16  ;;  %v11751_v23 = vsel %vm15658_vm5, %v11749_v59, %v11750_v24  ;;  %v10877_v59 = vld [vmem:[#allocation2 + $0xd0] sm:$0xf] }
 0x3a4   : > { %v18277_v42 = vadd.f32 %v14470_v1, %v18194_v33  ;;  %v11221_v19 = vrot.slane %v11219_v62, 5  ;;  %v11227_v27 = vrot.slane %v11225_v55, 5  ;;  %v13437_v21 = vrot.slane %v11652_v34, 9  ;;  %v10876_v33 = vld [vmem:[#allocation2 + $0xcc] sm:$0xf] }
 0x3a5   : > { %v7829_v43 = vpop.f32.mrf.mxu0  ;;  %v11214_v47 = vsel %vm15478_vm2, %v11209_v48, %v11213_v46  ;;  %v13452_v3 = vcombine.low %v11748_v38, %v11751_v23  ;;  %v11231_v20 = vrot.slane %v11229_v25, 4  ;;  %v11237_v49 = vrot.slane %v11235_v6, 5  ;;  %v10878_v23 = vld [vmem:[#allocation2 + $0xd4] sm:$0x1] }
 0x3a6   : > { %19277 = vst [vmem:[#allocation25_spill] sm:$0xff] %v18277_v42  ;;  %v13425_v1 = vcombine.low %v11204_v8, %v11214_v47  ;;  %v11222_v9 = vor.u32 %v11221_v19, %v11218_v16  ;;  %v18284_v28 = vadd.f32 %v7829_v43, %v18206_v37  ;;  %v11754_v24 = vrot.slane %v11653_v51, 5  ;;  %v11655_v47 = vld [vmem:[#allocation2 + $0x30] sm:$0xe] }
 0x3a7   : > { %v14471_v41 = vpop.f32.mrf.mxu0  ;;  %v14494_v42 = vpop.f32.mrf.mxu1  ;;  %14780 = vmatprep.mubr.bf16.mxu1 %v13452_v3  ;;  %v11232_v62 = vor.u32 %v11231_v20, %v11227_v27  ;;  %v11757_v38 = vrot.slane %v11654_v4, 5  ;;  %v11240_v48 = vshrl.u32 %v10876_v33, 16  ;;  %v11249_v19 = vshll.u32 %v10877_v59, 16 }
 0x3a8   : > { %v18287_v34 = vadd.f32 %v14471_v41, %v18219_v58  ;;  %v18290_v46 = vadd.f32 %v14494_v42, %v18102_v17  ;;  %14757 = vmatmul.mubr.bf16.gmra.mxu0 %v13425_v1  ;;  %v11223_v55 = vrot.slane %v11222_v9, 4  ;;  %v11755_v37 = vsel %vm15658_vm5, %v13437_v21, %v11754_v24  ;;  %v11656_v21 = vld [vmem:[#allocation2 + $0x34] sm:$0xf] }
 0x3a9   : > { %v7832_v8 = vpop.f32.mrf.mxu0  ;;  %v11756_v16 = vrot.slane %v11754_v24, 4  ;;  %v8327_v25 = vpop.f32.mrf.mxu1  ;;  %v11233_v6 = vrot.slane %v11232_v62, 4  ;;  %v11243_v58 = vshll.u32 %v10876_v33, 16  ;;  %v11242_v43 = vrot.slane %v11240_v48, 4  ;;  %v11657_v62 = vld [vmem:[#allocation2 + $0x38] sm:$0x1] }
 0x3aa   : > { %v18295_v51 = vadd.f32 %v7832_v8, %v18226_v5  ;;  %v11228_v17 = vsel %vm15478_vm2, %v11223_v55, %v11227_v27  ;;  %v11253_v4 = vshrl.u32 %v10877_v59, 16  ;;  %v11251_v9 = vrot.slane %v11249_v19, 5 }
 0x3ab   : > { %v11758_v42 = vsel %vm15658_vm5, %v11756_v16, %v11757_v38  ;;  %v14495_v3 = vpop.f32.mrf.mxu1  ;;  %v11238_v20 = vsel %vm15478_vm2, %v11233_v6, %v11237_v49  ;;  %v11245_v5 = vrot.slane %v11243_v58, 5  ;;  %v18305_v33 = vadd.f32 %v18155_v39, %v17997_v32  ;;  %v11659_v49 = vld [vmem:[#allocation2 + $0x40] sm:$0xf]  ;;  %v11658_v58 = vld [vmem:[#allocation2 + $0x3c] sm:$0xe] }
 0x3ac   : > { %v13453_v1 = vcombine.low %v11755_v37, %v11758_v42  ;;  %v13426_v41 = vcombine.low %v11228_v17, %v11238_v20  ;;  %v11255_v27 = vrot.slane %v11253_v4, 4  ;;  %v11259_v24 = vshll.u32 %v10878_v23, 16 }
 0x3ad   : > { %v8330_v38 = vpop.f32.mrf.mxu1  ;;  %v11246_v59 = vor.u32 %v11245_v5, %v11242_v43  ;;  %v13438_v55 = vrot.slane %v11655_v47, 9  ;;  %v11761_v8 = vrot.slane %v11656_v21, 5  ;;  %v18308_v16 = vadd.f32 %v8327_v25, %v18121_v29  ;;  %v11660_v25 = vld [vmem:[#allocation2 + $0x44] sm:$0x1] }
 0x3ae   : > { %14781 = vmatmul.mubr.bf16.vlgmr.msra.gmra.mxu1 %v13453_v1  ;;  %14760 = vmatprep.mubr.bf16.mxu0 %v13426_v41  ;;  %v11256_v48 = vor.u32 %v11255_v27, %v11251_v9  ;;  %v11261_v6 = vrot.slane %v11259_v24, 5  ;;  %v18311_v32 = vadd.f32 %v14495_v3, %v18128_v0  ;;  %v18314_v39 = vadd.f32 %v8330_v38, %v18233_v11  ;;  %v11662_v11 = vld [vmem:[#allocation2 + $0x4c] sm:$0xf]  ;;  %v11661_v41 = vld [vmem:[#allocation2 + $0x48] sm:$0xe] }
 0x3af   : > { %v14474_v37 = vpop.f32.mrf.mxu0  ;;  %v14498_v23 = vpop.f32.mrf.mxu1  ;;  %v11247_v17 = vrot.slane %v11246_v59, 4  ;;  %v11763_v42 = vrot.slane %v11761_v8, 4  ;;  %v11764_v29 = vrot.slane %v11657_v62, 5  ;;  %v11762_v4 = vsel %vm15658_vm5, %v13438_v55, %v11761_v8  ;;  %v11663_v59 = vld [vmem:[#allocation2 + $0x50] sm:$0x1] }
 0x3b0   : > { %v18317_v19 = vadd.f32 %v14474_v37, %v18242_v54  ;;  %v11257_v43 = vrot.slane %v11256_v48, 4  ;;  %v18322_v0 = vadd.f32 %v14498_v23, %v18131_v60  ;;  %v11768_v21 = vrot.slane %v11659_v49, 5  ;;  %v11665_v37 = vld [vmem:[#allocation2 + $0x58] sm:$0xf] }
 0x3b1   : > { %v7845_v47 = vpop.f32.mrf.mxu0  ;;  %v8343_v3 = vpop.f32.mrf.mxu1  ;;  %v11252_v20 = vsel %vm15478_vm2, %v11247_v17, %v11251_v9  ;;  %v11765_v54 = vsel %vm15658_vm5, %v11763_v42, %v11764_v29  ;;  %v13439_v5 = vrot.slane %v11658_v58, 9  ;;  %v11771_v38 = vrot.slane %v11660_v25, 5 }
 0x3b2   : > { %v18329_v1 = vadd.f32 %v7845_v47, %v18251_v26  ;;  %v11262_v27 = vsel %vm15478_vm2, %v11257_v43, %v11261_v6  ;;  %v13454_v24 = vcombine.low %v11762_v4, %v11765_v54  ;;  %v11770_v62 = vrot.slane %v11768_v21, 4  ;;  %v11666_v43 = vld [vmem:[#allocation2 + $0x5c] sm:$0x1]  ;;  %v11668_v4 = vld [vmem:[#allocation2 + $0x64] sm:$0xf] }
 0x3b3   : > { %v14475_v60 = vpop.f32.mrf.mxu0  ;;  %v14499_v55 = vpop.f32.mrf.mxu1  ;;  %v13427_v8 = vcombine.low %v11252_v20, %v11262_v27  ;;  %v11769_v49 = vsel %vm15658_vm5, %v13439_v5, %v11768_v21  ;;  %v11775_v26 = vrot.slane %v11662_v11, 5  ;;  %v13440_v6 = vrot.slane %v11661_v41, 9  ;;  %v11667_v20 = vld [vmem:[#allocation2 + $0x60] sm:$0xe]  ;;  %v11669_v41 = vld [vmem:[#allocation2 + $0x68] sm:$0x1] }
 0x3b4   : > { %v18334_v9 = vadd.f32 %v14475_v60, %v18263_v18  ;;  %14784 = vmatprep.mubr.bf16.mxu1 %v13454_v24  ;;  %v11772_v35 = vsel %vm15658_vm5, %v11770_v62, %v11771_v38  ;;  %v18341_v23 = vadd.f32 %v8343_v3, %v18150_v50  ;;  %v18344_v58 = vadd.f32 %v14499_v55, %v18153_v52  ;;  %v11664_v50 = vld [vmem:[#allocation2 + $0x54] sm:$0xe] }
 0x3b5   : > { %v7848_v48 = vpop.f32.mrf.mxu0  ;;  %v8346_v17 = vpop.f32.mrf.mxu1  ;;  %14761 = vmatmul.mubr.bf16.gmra.mxu0 %v13427_v8  ;;  %v13455_v42 = vcombine.low %v11769_v49, %v11772_v35  ;;  %v11777_v29 = vrot.slane %v11775_v26, 4  ;;  %v11778_v25 = vrot.slane %v11663_v59, 5  ;;  %v11782_v3 = vrot.slane %v11665_v37, 5 }
 0x3b6   : > { %v18347_v18 = vadd.f32 %v7848_v48, %v18274_v40  ;;  %v18350_v21 = vadd.f32 %v8346_v17, %v18305_v33  ;;  %v11776_v40 = vsel %vm15658_vm5, %v13440_v6, %v11775_v26  ;;  %v18362_v33 = vld [vmem:[#allocation2 + $0x70] sm:$0xf]  ;;  %v11785_v62 = vrot.slane %v11666_v43, 5  ;;  %v11674_v17 = vld [vmem:[#allocation2 + $0x7c] sm:$0xf] }
 0x3b7   : > { %v14542_v47 = vpop.f32.mrf.mxu0  ;;  %v14502_v11 = vpop.f32.mrf.mxu1  ;;  %14785 = vmatmul.mubr.bf16.gmra.mxu1 %v13455_v42  ;;  %v11779_v54 = vsel %vm15658_vm5, %v11777_v29, %v11778_v25  ;;  %v11784_v60 = vrot.slane %v11782_v3, 4  ;;  %v11789_v38 = vrot.slane %v11668_v4, 5  ;;  %v13441_v55 = vrot.slane %v11664_v50, 9 }
 0x3b8   : > { %v18353_v52 = vadd.f32 %v14542_v47, %v18290_v46  ;;  %v18360_v5 = vadd.f32 %v14502_v11, %v18165_v2  ;;  %v13456_v27 = vcombine.low %v11776_v40, %v11779_v54  ;;  %v13442_v8 = vrot.slane %v11667_v20, 9 }
 0x3b9   : > { %v8777_v24 = vpop.f32.mrf.mxu0  ;;  %v8359_v59 = vpop.f32.mrf.mxu1  ;;  %v11786_v26 = vsel %vm15658_vm5, %v11784_v60, %v11785_v62  ;;  %v11791_v37 = vrot.slane %v11789_v38, 4  ;;  %v11792_v48 = vrot.slane %v11669_v41, 5  ;;  %v11796_v6 = vrot.slane %v18362_v33, 5 }
 0x3ba   : > { %v18365_v46 = vadd.f32 %v8777_v24, %v18308_v16  ;;  %v18368_v49 = vadd.f32 %v8359_v59, %v18175_v36  ;;  %14788 = vmatprep.mubr.bf16.mxu1 %v13456_v27  ;;  %v7869_v16 = vadd.f32 %v18190_v10, %v18056_v13  ;;  %v11783_v25 = vsel %vm15658_vm5, %v13441_v55, %v11782_v3  ;;  %v11675_v3 = vld [vmem:[#allocation2 + $0x80] sm:$0x1]  ;;  %v11670_v27 = vld [vmem:[#allocation2 + $0x6c] sm:$0xe]  ;;  %v18398_v24 = vld [vmem:[#allocation2 + $0x88] sm:$0xf] }
 0x3bb   : > { %v14543_v2 = vpop.f32.mrf.mxu0  ;;  %v14503_v35 = vpop.f32.mrf.mxu1  ;;  %v11790_v43 = vsel %vm15658_vm5, %v13442_v8, %v11789_v38  ;;  %v11793_v4 = vsel %vm15658_vm5, %v11791_v37, %v11792_v48  ;;  %v13457_v13 = vcombine.low %v11783_v25, %v11786_v26  ;;  %v11798_v54 = vrot.slane %v11796_v6, 4  ;;  %v11680_v55 = vld [vmem:[#allocation2 + $0x94] sm:$0xf] }
 0x3bc   : > { %v18376_v42 = vadd.f32 %v14543_v2, %v18311_v32  ;;  %v18379_v36 = vadd.f32 %v14503_v35, %v18178_v56  ;;  %v11672_v32 = vld [vmem:[#allocation2 + $0x74] sm:$0x1]  ;;  %v11803_v56 = vrot.slane %v11674_v17, 5  ;;  %v13458_v20 = vcombine.low %v11790_v43, %v11793_v4 }
 0x3bd   : > { %v8780_v29 = vpop.f32.mrf.mxu0  ;;  %v8362_v47 = vpop.f32.mrf.mxu1  ;;  %v11799_v62 = vrot.slane %v11672_v32, 5  ;;  %v7873_v8 = vadd.f32 %v18215_v15, %v18104_v53  ;;  %v13443_v37 = vrot.slane %v11670_v27, 9  ;;  %v11678_v32 = vld [vmem:[#allocation2 + $0x8c] sm:$0x1]  ;;  %v11679_v27 = vld [vmem:[#allocation2 + $0x90] sm:$0xe] }
 0x3be   : > { %v18388_v11 = vadd.f32 %v8780_v29, %v18314_v39  ;;  %v18390_v10 = vadd.f32 %v8362_v47, %v7869_v16  ;;  %v11673_v39 = vld [vmem:[#allocation2 + $0x78] sm:$0xe]  ;;  %v11805_v38 = vrot.slane %v11803_v56, 4  ;;  %v11810_v16 = vrot.slane %v18398_v24, 5  ;;  %v11683_v24 = vld [vmem:[#allocation2 + $0xa0] sm:$0xf] }
 0x3bf   : > { %v14546_v50 = vpop.f32.mrf.mxu0  ;;  %v14506_v40 = vpop.f32.mrf.mxu1  ;;  %14789 = vmatmul.mubr.bf16.gmra.mxu1 %v13457_v13  ;;  %v11800_v48 = vsel %vm15658_vm5, %v11798_v54, %v11799_v62  ;;  %v13444_v35 = vrot.slane %v11673_v39, 9  ;;  %v11797_v25 = vsel %vm15658_vm5, %v13443_v37, %v11796_v6  ;;  %v13446_v37 = vrot.slane %v11679_v27, 9  ;;  %v11689_v27 = vld [vmem:[#allocation2 + $0xb8] sm:$0xf] }
 0x3c0   : > { %v18393_v41 = vadd.f32 %v14546_v50, %v18322_v0  ;;  %v18396_v33 = vadd.f32 %v14506_v40, %v18197_v45  ;;  %14792 = vmatprep.mubr.bf16.mxu1 %v13458_v20  ;;  %v11806_v0 = vrot.slane %v11675_v3, 5  ;;  %v13459_v47 = vcombine.low %v11797_v25, %v11800_v48  ;;  %v11676_v40 = vld [vmem:[#allocation2 + $0x84] sm:$0xe]  ;;  %v11681_v3 = vld [vmem:[#allocation2 + $0x98] sm:$0x1] }
 0x3c1   : > { %v8793_v60 = vpop.f32.mrf.mxu0  ;;  %v8375_v59 = vpop.f32.mrf.mxu1  ;;  %v11812_v54 = vrot.slane %v11810_v16, 4 }
 0x3c2   : > { %v18403_v2 = vadd.f32 %v8793_v60, %v18341_v23  ;;  %v18406_v45 = vadd.f32 %v8375_v59, %v18204_v44  ;;  %v11807_v53 = vsel %vm15658_vm5, %v11805_v38, %v11806_v0  ;;  %v11817_v44 = vrot.slane %v11680_v55, 5  ;;  %v11686_v38 = vld [vmem:[#allocation2 + $0xac] sm:$0xf] }
 0x3c3   : > { %v14547_v26 = vpop.f32.mrf.mxu0  ;;  %v14507_v17 = vpop.f32.mrf.mxu1  ;;  %v11813_v60 = vrot.slane %v11678_v32, 5  ;;  %v7877_v59 = vadd.f32 %v18244_v61, %v18147_v30  ;;  %v13445_v0 = vrot.slane %v11676_v40, 9  ;;  %v11687_v40 = vld [vmem:[#allocation2 + $0xb0] sm:$0x1] }
 0x3c4   : > { %v18412_v29 = vadd.f32 %v14547_v26, %v18344_v58  ;;  %v18417_v15 = vadd.f32 %v14507_v17, %v18209_v14  ;;  %v11804_v58 = vsel %vm15658_vm5, %v13444_v35, %v11803_v56  ;;  %v11819_v39 = vrot.slane %v11817_v44, 4 }
 0x3c5   : > { %v8796_v23 = vpop.f32.mrf.mxu0  ;;  %v8378_v43 = vpop.f32.mrf.mxu1  ;;  %v13460_v20 = vcombine.low %v11804_v58, %v11807_v53  ;;  %v11814_v26 = vsel %vm15658_vm5, %v11812_v54, %v11813_v60  ;;  %v11824_v35 = vrot.slane %v11683_v24, 5  ;;  %v11811_v53 = vsel %vm15658_vm5, %v13445_v0, %v11810_v16  ;;  %v11684_v58 = vld [vmem:[#allocation2 + $0xa4] sm:$0x1]  ;;  %v11685_v54 = vld [vmem:[#allocation2 + $0xa8] sm:$0xe] }
 0x3c6   : > { %v18422_v4 = vadd.f32 %v8796_v23, %v18350_v21  ;;  %v18426_v13 = vadd.f32 %v8378_v43, %v7873_v8  ;;  %v11820_v8 = vrot.slane %v11681_v3, 5  ;;  %v13461_v43 = vcombine.low %v11811_v53, %v11814_v26 }
 0x3c7   : > { %v14550_v50 = vpop.f32.mrf.mxu0  ;;  %v14510_v14 = vpop.f32.mrf.mxu1  ;;  %14793 = vmatmul.mubr.bf16.gmra.mxu1 %v13459_v47  ;;  %v11838_v26 = vrot.slane %v11689_v27, 5  ;;  %v11688_v27 = vld [vmem:[#allocation2 + $0xb4] sm:$0xe] }
 0x3c8   : > { %v18429_v6 = vadd.f32 %v14550_v50, %v18360_v5  ;;  %v18432_v21 = vadd.f32 %v14510_v14, %v18224_v57  ;;  %14796 = vmatprep.mubr.bf16.mxu1 %v13460_v20  ;;  %v11821_v30 = vsel %vm15658_vm5, %v11819_v39, %v11820_v8  ;;  %v11682_v20 = vld [vmem:[#allocation2 + $0x9c] sm:$0xe]  ;;  %v11826_v14 = vrot.slane %v11824_v35, 4 }
 0x3c9   : > { %v8809_v56 = vpop.f32.mrf.mxu0  ;;  %v8391_v62 = vpop.f32.mrf.mxu1  ;;  %v11827_v39 = vrot.slane %v11684_v58, 5  ;;  %v13447_v8 = vrot.slane %v11682_v20, 9  ;;  %v19279_v58 = vld [vmem:[#allocation23_spill] sm:$0xff] }
 0x3ca   : > { %v18437_v55 = vadd.f32 %v8809_v56, %v18368_v49  ;;  %v18440_v5 = vadd.f32 %v8391_v62, %v18229_v63  ;;  %v11831_v49 = vrot.slane %v11686_v38, 5  ;;  %v11692_v56 = vld [vmem:[#allocation2 + $0xc4] sm:$0xf]  ;;  %v11834_v62 = vrot.slane %v11687_v40, 5  ;;  %v19278_v38 = vld [vmem:[#allocation20_spill] sm:$0xff] }
 0x3cb   : > { %v14551_v57 = vpop.f32.mrf.mxu0  ;;  %v14511_v48 = vpop.f32.mrf.mxu1  ;;  %v11825_v53 = vsel %vm15658_vm5, %v13447_v8, %v11824_v35  ;;  %v11840_v40 = vrot.slane %v11838_v26, 4 }
 0x3cc   : > { %v18445_v17 = vadd.f32 %v14551_v57, %v18379_v36  ;;  %v18450_v61 = vadd.f32 %v14511_v48, %v18240_v7  ;;  %v11818_v36 = vsel %vm15658_vm5, %v13446_v37, %v11817_v44  ;;  %v11833_v3 = vrot.slane %v11831_v49, 4 }
 0x3cd   : > { %v8812_v63 = vpop.f32.mrf.mxu0  ;;  %v8394_v23 = vpop.f32.mrf.mxu1  ;;  %v13462_v50 = vcombine.low %v11818_v36, %v11821_v30  ;;  %v13448_v57 = vrot.slane %v11685_v54, 9  ;;  %v11845_v30 = vrot.slane %v11692_v56, 5  ;;  %v11693_v54 = vld [vmem:[#allocation2 + $0xc8] sm:$0x1] }
 0x3ce   : > { %v18455_v25 = vadd.f32 %v8812_v63, %v18390_v10  ;;  %v18459_v47 = vadd.f32 %v8394_v23, %v7877_v59  ;;  %v11835_v48 = vsel %vm15658_vm5, %v11833_v3, %v11834_v62  ;;  %v19280_v3 = vld [vmem:[#allocation25_spill] sm:$0xff] }
 0x3cf   : > { %v14554_v32 = vpop.f32.mrf.mxu0  ;;  %v14514_v7 = vpop.f32.mrf.mxu1  ;;  %14797 = vmatmul.mubr.bf16.gmra.mxu1 %v13461_v43 }
 0x3d0   : > { %v18462_v16 = vadd.f32 %v14554_v32, %v18396_v33  ;;  %v18465_v10 = vadd.f32 %v14514_v7, %v18249_v31  ;;  %14800 = vmatprep.mubr.bf16.mxu1 %v13462_v50  ;;  %v11828_v31 = vsel %vm15658_vm5, %v11826_v14, %v11827_v39  ;;  %v11690_v50 = vld [vmem:[#allocation2 + $0xbc] sm:$0x1]  ;;  %v11695_v7 = vld [vmem:[#allocation2 + $0xd0] sm:$0xf] }
 0x3d1   : > { %v8825_v44 = vpop.f32.mrf.mxu0  ;;  %v8407_v24 = vpop.f32.mrf.mxu1  ;;  %v13463_v36 = vcombine.low %v11825_v53, %v11828_v31  ;;  %v11852_v62 = vrot.slane %v11695_v7, 5  ;;  %v11694_v31 = vld [vmem:[#allocation2 + $0xcc] sm:$0xe] }
 0x3d2   : > { %v18468_v60 = vadd.f32 %v8825_v44, %v18406_v45  ;;  %v18471_v59 = vadd.f32 %v8407_v24, %v19278_v38  ;;  %v11847_v44 = vrot.slane %v11845_v30, 4  ;;  %v11691_v24 = vld [vmem:[#allocation2 + $0xc0] sm:$0xe] }
 0x3d3   : > { %v14555_v33 = vpop.f32.mrf.mxu0  ;;  %v14515_v0 = vpop.f32.mrf.mxu1  ;;  %v11854_v7 = vrot.slane %v11852_v62, 4 }
 0x3d4   : > { %v18476_v37 = vadd.f32 %v14555_v33, %v18417_v15  ;;  %v18481_v45 = vadd.f32 %v14515_v0, %v18261_v22  ;;  %v11832_v15 = vsel %vm15658_vm5, %v13448_v57, %v11831_v49  ;;  %v11841_v49 = vrot.slane %v11690_v50, 5  ;;  %v11696_v57 = vld [vmem:[#allocation2 + $0xd4] sm:$0x1] }
 0x3d5   : > { %v8828_v63 = vpop.f32.mrf.mxu0  ;;  %v8410_v23 = vpop.f32.mrf.mxu1  ;;  %v13464_v22 = vcombine.low %v11832_v15, %v11835_v48  ;;  %v11848_v33 = vrot.slane %v11693_v54, 5  ;;  %v13449_v0 = vrot.slane %v11688_v27, 9  ;;  %v13451_v50 = vrot.slane %v11694_v31, 9 }
 0x3d6   : > { %v18486_v43 = vadd.f32 %v8828_v63, %v18426_v13  ;;  %v8475_v32 = vadd.f32 %v8410_v23, %v19279_v58  ;;  %v11842_v48 = vsel %vm15658_vm5, %v11840_v40, %v11841_v49  ;;  %v13450_v23 = vrot.slane %v11691_v24, 9 }
 0x3d7   : > { %v14558_v20 = vpop.f32.mrf.mxu0  ;;  %v14518_v14 = vpop.f32.mrf.mxu1  ;;  %14801 = vmatmul.mubr.bf16.gmra.mxu1 %v13463_v36  ;;  %v11849_v36 = vsel %vm15658_vm5, %v11847_v44, %v11848_v33 }
 0x3d8   : > { %v18492_v35 = vadd.f32 %v14558_v20, %v18432_v21  ;;  %v8480_v13 = vadd.f32 %v14518_v14, %v19280_v3  ;;  %14804 = vmatprep.mubr.bf16.mxu1 %v13464_v22  ;;  %v11855_v20 = vrot.slane %v11696_v57, 5 }
 0x3d9   : > { %v8841_v39 = vpop.f32.mrf.mxu0  ;;  %v8423_v56 = vpop.f32.mrf.mxu1 }
 0x3da   : > { %v18496_v38 = vadd.f32 %v8841_v39, %v18440_v5  ;;  %v8478_v8 = vadd.f32 %v8423_v56, %v18284_v28  ;;  %v11839_v28 = vsel %vm15658_vm5, %v13449_v0, %v11838_v26  ;;  %v11856_v39 = vsel %vm15658_vm5, %v11854_v7, %v11855_v20 }
 0x3db   : > { %v14559_v21 = vpop.f32.mrf.mxu0  ;;  %v14519_v63 = vpop.f32.mrf.mxu1  ;;  %v13465_v14 = vcombine.low %v11839_v28, %v11842_v48 }
 0x3dc   : > { %v18502_v53 = vadd.f32 %v14559_v21, %v18450_v61  ;;  %v8481_v5 = vadd.f32 %v14519_v63, %v18287_v34  ;;  %v11846_v61 = vsel %vm15658_vm5, %v13450_v23, %v11845_v30 }
 0x3dd   : > { %v8844_v15 = vpop.f32.mrf.mxu0  ;;  %v8426_v58 = vpop.f32.mrf.mxu1  ;;  %v13466_v3 = vcombine.low %v11846_v61, %v11849_v36 }
 0x3de   : > { %v18510_v22 = vadd.f32 %v8844_v15, %v18459_v47  ;;  %v8479_v40 = vadd.f32 %v8426_v58, %v18295_v51  ;;  %v11853_v47 = vsel %vm15658_vm5, %v13451_v50, %v11852_v62 }
 0x3df   : > { %v14562_v54 = vpop.f32.mrf.mxu0  ;;  %v14522_v34 = vpop.f32.mrf.mxu1  ;;  %14805 = vmatmul.mubr.bf16.gmra.mxu1 %v13465_v14 }
 0x3e0   : > { %v18516_v27 = vadd.f32 %v14562_v54, %v18465_v10  ;;  %v8484_v26 = vadd.f32 %v14522_v34, %v18317_v19  ;;  %14808 = vmatprep.mubr.bf16.mxu1 %v13466_v3  ;;  %v13467_v19 = vcombine.low %v11853_v47, %v11856_v39 }
 0x3e1   : > { %v8857_v44 = vpop.f32.mrf.mxu0  ;;  %v8439_v30 = vpop.f32.mrf.mxu1 }
 0x3e2   : > { %v18524_v51 = vadd.f32 %v8857_v44, %v18471_v59  ;;  %v8482_v49 = vadd.f32 %v8439_v30, %v18329_v1 }
 0x3e3   : > { %v14563_v24 = vpop.f32.mrf.mxu0  ;;  %v14523_v56 = vpop.f32.mrf.mxu1 }
 0x3e4   : > { %v18528_v10 = vadd.f32 %v14563_v24, %v18481_v45  ;;  %v8485_v33 = vadd.f32 %v14523_v56, %v18334_v9 }
 0x3e5   : > { %v8860_v31 = vpop.f32.mrf.mxu0  ;;  %v8442_v57 = vpop.f32.mrf.mxu1 }
 0x3e6   : > { %v18531_v62 = vadd.f32 %v8860_v31, %v8475_v32  ;;  %v8483_v12 = vadd.f32 %v8442_v57, %v18347_v18 }
 0x3e7   : > { %v14566_v21 = vpop.f32.mrf.mxu0  ;;  %v14590_v0 = vpop.f32.mrf.mxu1  ;;  %14809 = vmatmul.mubr.bf16.gmra.mxu1 %v13467_v19 }
 0x3e8   : > { %v18534_v59 = vadd.f32 %v14566_v21, %v8480_v13  ;;  %v18537_v1 = vadd.f32 %v14590_v0, %v18353_v52 }
 0x3e9   : > { %v8873_v48 = vpop.f32.mrf.mxu0  ;;  %v9595_v45 = vpop.f32.mrf.mxu1 }
 0x3ea   : > { %v18539_v63 = vadd.f32 %v8873_v48, %v8478_v8  ;;  %v18542_v9 = vadd.f32 %v9595_v45, %v18365_v46 }
 0x3eb   : > { %v14567_v23 = vpop.f32.mrf.mxu0  ;;  %v14591_v32 = vpop.f32.mrf.mxu1 }
 0x3ec   : > { %v18544_v36 = vadd.f32 %v14567_v23, %v8481_v5  ;;  %v18547_v18 = vadd.f32 %v14591_v32, %v18376_v42 }
 0x3ed   : > { %v8876_v15 = vpop.f32.mrf.mxu0  ;;  %v9598_v13 = vpop.f32.mrf.mxu1 }
 0x3ee   : > { %v18549_v28 = vadd.f32 %v8876_v15, %v8479_v40  ;;  %v18552_v52 = vadd.f32 %v9598_v13, %v18388_v11 }
 0x3ef   : > { %v14570_v58 = vpop.f32.mrf.mxu0  ;;  %v14594_v8 = vpop.f32.mrf.mxu1 }
 0x3f0   : > { %v18554_v50 = vadd.f32 %v14570_v58, %v8484_v26  ;;  %v18557_v46 = vadd.f32 %v14594_v8, %v18393_v41 }
 0x3f1   : > { %v8889_v7 = vpop.f32.mrf.mxu0  ;;  %v9611_v5 = vpop.f32.mrf.mxu1 }
 0x3f2   : > { %v18559_v20 = vadd.f32 %v8889_v7, %v8482_v49  ;;  %v18562_v42 = vadd.f32 %v9611_v5, %v18403_v2 }
 0x3f3   : > { %v14571_v14 = vpop.f32.mrf.mxu0  ;;  %v14595_v61 = vpop.f32.mrf.mxu1 }
 0x3f4   : > { %v18564_v40 = vadd.f32 %v14571_v14, %v8485_v33  ;;  %v18567_v11 = vadd.f32 %v14595_v61, %v18412_v29 }
 0x3f5   : > { %v8892_v54 = vpop.f32.mrf.mxu0  ;;  %v9614_v3 = vpop.f32.mrf.mxu1 }
 0x3f6   : > { %v18569_v34 = vadd.f32 %v8892_v54, %v8483_v12  ;;  %v18572_v41 = vadd.f32 %v9614_v3, %v18422_v4 }
 0x3f7   : > { %v18574_v26 = vpop.f32.mrf.mxu0  ;;  %v14598_v44 = vpop.f32.mrf.mxu1 }
 0x3f8   : > { %v18577_v2 = vadd.f32 %v14598_v44, %v18429_v6 }
 0x3f9   : > { %v18579_v47 = vpop.f32.mrf.mxu0  ;;  %v9627_v39 = vpop.f32.mrf.mxu1 }
 0x3fa   : > { %v18582_v30 = vadd.f32 %v9627_v39, %v18437_v55 }
 0x3fb   : > { %v18584_v29 = vpop.f32.mrf.mxu0  ;;  %v14599_v49 = vpop.f32.mrf.mxu1 }
 0x3fc   : > { %v18587_v24 = vadd.f32 %v14599_v49, %v18445_v17 }
 0x3fd   : > { %v18589_v4 = vpop.f32.mrf.mxu0  ;;  %v9630_v56 = vpop.f32.mrf.mxu1 }
 0x3fe   : > { %v18592_v19 = vadd.f32 %v9630_v56, %v18455_v25 }
 0x3ff   : > { %v18594_v6 = vpop.f32.mrf.mxu0  ;;  %v14602_v33 = vpop.f32.mrf.mxu1 }
 0x400   : > { %v18597_v31 = vadd.f32 %v14602_v33, %v18462_v16 }
 0x401   : > { %v18599_v55 = vpop.f32.mrf.mxu0  ;;  %v9643_v57 = vpop.f32.mrf.mxu1 }
 0x402   : > { %v18602_v12 = vadd.f32 %v9643_v57, %v18468_v60 }
 0x403   : > { %v18604_v17 = vpop.f32.mrf.mxu0  ;;  %v14603_v21 = vpop.f32.mrf.mxu1 }
 0x404   : > { %v18607_v0 = vadd.f32 %v14603_v21, %v18476_v37 }
 0x405   : > { %v18609_v25 = vpop.f32.mrf.mxu0  ;;  %v9646_v48 = vpop.f32.mrf.mxu1 }
 0x406   : > { %v18612_v45 = vadd.f32 %v9646_v48, %v18486_v43 }
 0x407   : > { %v18614_v16 = vpop.f32.mrf.mxu0  ;;  %v14606_v23 = vpop.f32.mrf.mxu1 }
 0x408   : > { %19281 = vst [vmem:[#allocation28_spill] sm:$0xff] %v18612_v45  ;;  %v18617_v32 = vadd.f32 %v14606_v23, %v18492_v35 }
 0x409   : > { %v18619_v60 = vpop.f32.mrf.mxu0  ;;  %v9659_v15 = vpop.f32.mrf.mxu1 }
 0x40a   : > { %19282 = vst [vmem:[#allocation31_spill] sm:$0xff] %v18617_v32  ;;  %v18622_v13 = vadd.f32 %v9659_v15, %v18496_v38 }
 0x40b   : > { %v18624_v37 = vpop.f32.mrf.mxu0  ;;  %v14607_v58 = vpop.f32.mrf.mxu1 }
 0x40c   : > { %19283 = vst [vmem:[#allocation21_spill] sm:$0xff] %v18622_v13  ;;  %v18627_v8 = vadd.f32 %v14607_v58, %v18502_v53 }
 0x40d   : > { %v18629_v43 = vpop.f32.mrf.mxu0  ;;  %v9662_v7 = vpop.f32.mrf.mxu1 }
 0x40e   : > { %19284 = vst [vmem:[#allocation24_spill] sm:$0xff] %v18627_v8  ;;  %v18632_v5 = vadd.f32 %v9662_v7, %v18510_v22 }
 0x40f   : > { %v18634_v35 = vpop.f32.mrf.mxu0  ;;  %v14610_v14 = vpop.f32.mrf.mxu1 }
 0x410   : > { %19285 = vst [vmem:[#allocation38_spill] sm:$0xff] %v18632_v5  ;;  %v18637_v61 = vadd.f32 %v14610_v14, %v18516_v27 }
 0x411   : > { %v18639_v38 = vpop.f32.mrf.mxu0  ;;  %v9675_v54 = vpop.f32.mrf.mxu1 }
 0x412   : > { %19286 = vst [vmem:[#allocation35_spill] sm:$0xff] %v18637_v61  ;;  %v18642_v3 = vadd.f32 %v9675_v54, %v18524_v51 }
 0x413   : > { %v18644_v53 = vpop.f32.mrf.mxu0  ;;  %v14611_v44 = vpop.f32.mrf.mxu1 }
 0x414   : > { %19287 = vst [vmem:[#allocation40_spill] sm:$0xff] %v18642_v3  ;;  %19288 = vst [vmem:[#allocation37_spill] sm:$0xff] %v18644_v53  ;;  %v18647_v39 = vadd.f32 %v14611_v44, %v18528_v10 }
 0x415   : > { %v18649_v22 = vpop.f32.mrf.mxu0  ;;  %v9678_v49 = vpop.f32.mrf.mxu1 }
 0x416   : > { %19289 = vst [vmem:[#allocation42_spill] sm:$0xff] %v18647_v39  ;;  %19290 = vst [vmem:[#allocation39_spill] sm:$0xff] %v18649_v22  ;;  %v18652_v56 = vadd.f32 %v9678_v49, %v18531_v62 }
 0x417   : > { %v18654_v27 = vpop.f32.mrf.mxu0  ;;  %v14614_v33 = vpop.f32.mrf.mxu1 }
 0x418   : > { %19291 = vst [vmem:[#allocation41_spill] sm:$0xff] %v18652_v56  ;;  %19292 = vst [vmem:[#allocation19_spill] sm:$0xff] %v18654_v27  ;;  %v18657_v57 = vadd.f32 %v14614_v33, %v18534_v59 }
 0x419   : > { %v18659_v51 = vpop.f32.mrf.mxu0  ;;  %v9691_v21 = vpop.f32.mrf.mxu1 }
 0x41a   : > { %19293 = vst [vmem:[#allocation22_spill] sm:$0xff] %v18657_v57  ;;  %19294 = vst [vmem:[#allocation26_spill] sm:$0xff] %v18659_v51  ;;  %v18662_v48 = vadd.f32 %v9691_v21, %v18539_v63 }
 0x41b   : > { %v18664_v10 = vpop.f32.mrf.mxu0  ;;  %v14615_v23 = vpop.f32.mrf.mxu1 }
 0x41c   : > { %19295 = vst [vmem:[#allocation27_spill] sm:$0xff] %v18662_v48  ;;  %19296 = vst [vmem:[#allocation29_spill] sm:$0xff] %v18664_v10  ;;  %v18667_v15 = vadd.f32 %v14615_v23, %v18544_v36 }
 0x41d   : > { %v18669_v62 = vpop.f32.mrf.mxu0  ;;  %v9694_v58 = vpop.f32.mrf.mxu1 }
 0x41e   : > { %19297 = vst [vmem:[#allocation30_spill] sm:$0xff] %v18667_v15  ;;  %19298 = vst [vmem:[#allocation32_spill] sm:$0xff] %v18669_v62  ;;  %v18672_v7 = vadd.f32 %v9694_v58, %v18549_v28 }
 0x41f   : > { %v18674_v59 = vpop.f32.mrf.mxu0 }
 0x420   : > { %19299 = vst [vmem:[#allocation33_spill] sm:$0xff] %v18672_v7  ;;  %19300 = vst [vmem:[#allocation36_spill] sm:$0xff] %v18674_v59 }
 0x421   : > { %v18676_v14 = vpop.f32.mrf.mxu0 }
 0x422   : > { %19301 = vst [vmem:[#allocation44_spill] sm:$0xff] %v18676_v14  ;;  %v14618_v54 = vpop.f32.mrf.mxu1 }
 0x423   : > { %v18678_v44 = vpop.f32.mrf.mxu0  ;;  %v18681_v63 = vadd.f32 %v14618_v54, %v18554_v50 }
 0x424   : > { %19302 = vst [vmem:[#allocation45_spill] sm:$0xff] %v18678_v44  ;;  %v9707_v49 = vpop.f32.mrf.mxu1 }
 0x425   : > { %19303 = vst [vmem:[#allocation43_spill] sm:$0xff] %v18681_v63  ;;  %v18683_v33 = vpop.f32.mrf.mxu0  ;;  %v18686_v36 = vadd.f32 %v9707_v49, %v18559_v20 }
 0x426   : > { %19304 = vst [vmem:[#allocation46_spill] sm:$0xff] %v18683_v33  ;;  %v14619_v21 = vpop.f32.mrf.mxu1 }
 0x427   : > { %19305 = vst [vmem:[#allocation49_spill] sm:$0xff] %v18686_v36  ;;  %v18688_v23 = vpop.f32.mrf.mxu0  ;;  %v18691_v28 = vadd.f32 %v14619_v21, %v18564_v40 }
 0x428   : > { %19306 = vst [vmem:[#allocation47_spill] sm:$0xff] %v18688_v23  ;;  %v9710_v58 = vpop.f32.mrf.mxu1 }
 0x429   : > { %19307 = vst [vmem:[#allocation48_spill] sm:$0xff] %v18691_v28  ;;  %v18693_v7 = vpop.f32.mrf.mxu0  ;;  %v18696_v15 = vadd.f32 %v9710_v58, %v18569_v34 }
 0x42a   : > { %19308 = vst [vmem:[#allocation50_spill] sm:$0xff] %v18693_v7  ;;  %v14686_v50 = vpop.f32.mrf.mxu1 }
 0x42b   : > { %19309 = vst [vmem:[#allocation53_spill] sm:$0xff] %v18696_v15  ;;  %v18698_v54 = vpop.f32.mrf.mxu0 }
 0x42c   : > { %19310 = vst [vmem:[#allocation51_spill] sm:$0xff] %v18698_v54  ;;  %v10640_v63 = vpop.f32.mrf.mxu1 }
 0x42d   : > { %v18700_v48 = vpop.f32.mrf.mxu0 }
 0x42e   : > { %19311 = vst [vmem:[#allocation55_spill] sm:$0xff] %v18700_v48  ;;  %v14687_v20 = vpop.f32.mrf.mxu1 }
 0x42f   : > { %v18702_v49 = vpop.f32.mrf.mxu0 }
 0x430   : > { %19312 = vst [vmem:[#allocation52_spill] sm:$0xff] %v18702_v49  ;;  %v18704_v36 = vpop.f32.mrf.mxu1 }
 0x431   : > { %v18706_v23 = vpop.f32.mrf.mxu0 }
 0x432   : > { %19313 = vst [vmem:[#allocation57_spill] sm:$0xff] %v18706_v23  ;;  %v18708_v40 = vpop.f32.mrf.mxu1 }
 0x433   : > { %v18710_v21 = vpop.f32.mrf.mxu0 }
 0x434   : > { %19314 = vst [vmem:[#allocation59_spill] sm:$0xff] %v18710_v21  ;;  %v18712_v28 = vpop.f32.mrf.mxu1 }
 0x435   : > { %v18714_v34 = vpop.f32.mrf.mxu0 }
 0x436   : > { %19315 = vst [vmem:[#allocation65_spill] sm:$0xff] %v18714_v34  ;;  %v18716_v58 = vpop.f32.mrf.mxu1 }
 0x437   : > { %v14734_v15 = vpop.f32.mrf.mxu0 }
 0x438   : > { %v18718_v54 = vpop.f32.mrf.mxu1 }
 0x439   : > { %v11458_v48 = vpop.f32.mrf.mxu0 }
 0x43a   : > { %v18720_v7 = vpop.f32.mrf.mxu1 }
 0x43b   : > { %v14735_v49 = vpop.f32.mrf.mxu0 }
 0x43c   : > { %v18722_v57 = vpop.f32.mrf.mxu1 }
 0x43d   : > { %v11461_v23 = vpop.f32.mrf.mxu0 }
 0x43e   : > { %v18724_v33 = vpop.f32.mrf.mxu1 }
 0x43f   : > { %v18726_v56 = vpop.f32.mrf.mxu0 }
 0x440   : > { %v18728_v21 = vpop.f32.mrf.mxu1 }
 0x441   : > { %v18730_v44 = vpop.f32.mrf.mxu0 }
 0x442   : > { %v18732_v34 = vpop.f32.mrf.mxu1 }
 0x443   : > { %v18736_v14 = vpop.f32.mrf.mxu0 }
 0x444   : > { %v18734_v39 = vpop.f32.mrf.mxu1 }
 0x445   : > { %19316 = vst [vmem:[#allocation54_spill] sm:$0xff] %v18734_v39  ;;  %v18742_v61 = vpop.f32.mrf.mxu0 }
 0x446   : > { %v18738_v3 = vpop.f32.mrf.mxu1 }
 0x447   : > { %19317 = vst [vmem:[#allocation61_spill] sm:$0xff] %v18738_v3  ;;  %v18748_v10 = vpop.f32.mrf.mxu0 }
 0x448   : > { %v18740_v59 = vpop.f32.mrf.mxu1 }
 0x449   : > { %19318 = vst [vmem:[#allocation56_spill] sm:$0xff] %v18740_v59  ;;  %v18754_v13 = vpop.f32.mrf.mxu0 }
 0x44a   : > { %v18744_v62 = vpop.f32.mrf.mxu1 }
 0x44b   : > { %19319 = vst [vmem:[#allocation63_spill] sm:$0xff] %v18744_v62  ;;  %v18760_v3 = vpop.f32.mrf.mxu0 }
 0x44c   : > { %v18746_v5 = vpop.f32.mrf.mxu1 }
 0x44d   : > { %19320 = vst [vmem:[#allocation58_spill] sm:$0xff] %v18746_v5  ;;  %v18766_v62 = vpop.f32.mrf.mxu0 }
 0x44e   : > { %v18750_v8 = vpop.f32.mrf.mxu1 }
 0x44f   : > { %19321 = vst [vmem:[#allocation66_spill] sm:$0xff] %v18750_v8  ;;  %v18772_v8 = vpop.f32.mrf.mxu0 }
 0x450   : > { %v18752_v51 = vpop.f32.mrf.mxu1  ;;  %19329 = vst [vmem:[#allocation15_spill] sm:$0xff] %v18772_v8 }
 0x451   : > { %19322 = vst [vmem:[#allocation67_spill] sm:$0xff] %v18752_v51 }
 0x452   : > { %v18756_v27 = vpop.f32.mrf.mxu1 }
 0x453   : > { %19323 = vst [vmem:[#allocation60_spill] sm:$0xff] %v18756_v27  ;;  %v18778_v27 = vpop.f32.mrf.mxu0 }
 0x454   : > { %v18758_v32 = vpop.f32.mrf.mxu1  ;;  %19332 = vst [vmem:[#allocation69_spill] sm:$0xff] %v18778_v27 }
 0x455   : > { %19324 = vst [vmem:[#allocation70_spill] sm:$0xff] %v18758_v32 }
 0x456   : > { %v18762_v59 = vpop.f32.mrf.mxu1 }
 0x457   : > { %19325 = vst [vmem:[#allocation73_spill] sm:$0xff] %v18762_v59  ;;  %v18784_v59 = vpop.f32.mrf.mxu0 }
 0x458   : > { %v18764_v22 = vpop.f32.mrf.mxu1  ;;  %19335 = vst [vmem:[#allocation18_spill] sm:$0xff] %v18784_v59 }
 0x459   : > { %19326 = vst [vmem:[#allocation62_spill] sm:$0xff] %v18764_v22 }
 0x45a   : > { %v18768_v5 = vpop.f32.mrf.mxu1 }
 0x45b   : > { %19327 = vst [vmem:[#allocation72_spill] sm:$0xff] %v18768_v5  ;;  %v18790_v5 = vpop.f32.mrf.mxu0 }
 0x45c   : > { %v18770_v45 = vpop.f32.mrf.mxu1 }
 0x45d   : > { %19328 = vst [vmem:[#allocation64_spill] sm:$0xff] %v18770_v45  ;;  %v10318_v45 = vadd.f32 %v18574_v26, %v18537_v1  ;;  %v18798_v59 = vpop.f32.mrf.mxu0  ;;  %v18803_v1 = vld [vmem:[%s19087_s5] ss:$0 sm:$0xff]  ;;  %v10317_v26 = vadd.f32 %v18589_v4, %v18552_v52 }
 0x45e   : > { %v18774_v51 = vpop.f32.mrf.mxu1  ;;  %19338 = vst [vmem:[#allocation14_spill] sm:$0xff] %v18798_v59  ;;  %v12314_v59 = vld [vmem:[%s15410_s19] sm:$0xff] }
 0x45f   : > { %19330 = vst [vmem:[#allocation17_spill] sm:$0xff] %v18774_v51  ;;  %v10769_v51 = vadd.f32 %v14686_v50, %v10318_v45  ;;  %v12316_v45 = vld [vmem:[%s15410_s19 + $0x10] sm:$0xff]  ;;  %v18812_v50 = vpop.f32.mrf.mxu0 }
 0x460   : > { %v18776_v39 = vpop.f32.mrf.mxu1 }
 0x461   : > { %19331 = vst [vmem:[#allocation68_spill] sm:$0xff] %v18776_v39  ;;  %v10316_v39 = vadd.f32 %v18579_v47, %v18542_v9  ;;  %v11587_v27 = vadd.f32 %v14734_v15, %v10769_v51 }
 0x462   : > { %v18780_v32 = vpop.f32.mrf.mxu1 }
 0x463   : > { %19333 = vst [vmem:[#allocation71_spill] sm:$0xff] %v18780_v32  ;;  %v10319_v32 = vadd.f32 %v18584_v29, %v18547_v18  ;;  %v10768_v29 = vadd.f32 %v18704_v36, %v10317_v26 }
 0x464   : > { %v18782_v53 = vpop.f32.mrf.mxu1 }
 0x465   : > { %19334 = vst [vmem:[#allocation16_spill] sm:$0xff] %v18782_v53  ;;  %v10767_v53 = vadd.f32 %v10640_v63, %v10316_v39  ;;  %v10322_v63 = vadd.f32 %v18594_v6, %v18557_v46  ;;  %v11586_v4 = vadd.f32 %v11461_v23, %v10768_v29  ;;  %v12320_v29 = vld [vmem:[%s15410_s19 + $0x30] sm:$0xff] }
 0x466   : > { %v18786_v22 = vpop.f32.mrf.mxu1 }
 0x467   : > { %19336 = vst [vmem:[#allocation34_spill] sm:$0xff] %v18786_v22  ;;  %v11585_v9 = vadd.f32 %v11458_v48, %v10767_v53  ;;  %v10773_v36 = vadd.f32 %v18708_v40, %v10322_v63 }
 0x468   : > { %v18792_v8 = vpop.f32.mrf.mxu1 }
 0x469   : > { %19337 = vst [vmem:[#allocation13_spill] sm:$0xff] %v18792_v8  ;;  %v10770_v8 = vadd.f32 %v14687_v20, %v10319_v32  ;;  %v10323_v20 = vadd.f32 %v18604_v17, %v18567_v11  ;;  %v11591_v40 = vadd.f32 %v18726_v56, %v10773_v36  ;;  %v10326_v56 = vadd.f32 %v18614_v16, %v18577_v2  ;;  %v12318_v2 = vld [vmem:[%s15410_s19 + $0x20] sm:$0xff] }
 0x46b   : > { %v11588_v39 = vadd.f32 %v14735_v49, %v10770_v8  ;;  %v12317_v8 = vld [vmem:[%s15410_s19 + $0x18] sm:$0xff]  ;;  %v18828_v49 = vpop.f32.mrf.mxu0 }
 0x46e   : > { %v14782_v22 = vpop.f32.mrf.mxu1 }
 0x46f   : > { %v12181_v47 = vadd.f32 %v14782_v22, %v11587_v27  ;;  %v10320_v27 = vadd.f32 %v18599_v55, %v18562_v42  ;;  %v12315_v42 = vld [vmem:[%s15410_s19 + $0x8] sm:$0xff] }
 0x470   : > { %v12052_v18 = vpop.f32.mrf.mxu1 }
 0x471   : > { %v12284_v51 = vadd.f32 %v18803_v1, %v12181_v47  ;;  %v12179_v15 = vadd.f32 %v12052_v18, %v11585_v9  ;;  %v10771_v55 = vadd.f32 %v18712_v28, %v10320_v27  ;;  %v18842_v28 = vpop.f32.mrf.mxu0 }
 0x472   : > { %v14783_v52 = vpop.f32.mrf.mxu1 }
 0x473   : > { %v12348_v32 = vadd.f32 %v12316_v45, %v12284_v51  ;;  %v12282_v53 = vadd.f32 %v18803_v1, %v12179_v15  ;;  %v12182_v22 = vadd.f32 %v14783_v52, %v11588_v39  ;;  %v10774_v45 = vadd.f32 %v18716_v58, %v10323_v20 }
 0x474   : > { %v12055_v48 = vpop.f32.mrf.mxu1  ;;  %v11589_v11 = vadd.f32 %v18730_v44, %v10771_v55  ;;  %v10324_v58 = vadd.f32 %v18619_v60, %v18582_v30  ;;  %v10777_v15 = vadd.f32 %v18720_v7, %v10326_v56  ;;  %v12321_v30 = vld [vmem:[%s15410_s19 + $0x38] sm:$0xff] }
 0x475   : > { %12380 = vst [vmem:[%s18822_s14 + $0x10] sm:$0xff] %v12348_v32  ;;  %v12346_v46 = vadd.f32 %v12314_v59, %v12282_v53  ;;  %v12285_v6 = vadd.f32 %v18803_v1, %v12182_v22  ;;  %v12180_v23 = vadd.f32 %v12055_v48, %v11586_v4  ;;  %v10321_v59 = vadd.f32 %v18609_v25, %v18572_v41  ;;  %v18858_v53 = vpop.f32.mrf.mxu0 }
 0x476   : > { %v11592_v41 = vadd.f32 %v18736_v14, %v10774_v45  ;;  %v10327_v14 = vadd.f32 %v18624_v37, %v18587_v24  ;;  %v10775_v32 = vadd.f32 %v18722_v57, %v10324_v58  ;;  %v11595_v7 = vadd.f32 %v18748_v10, %v10777_v15  ;;  %v12319_v37 = vld [vmem:[%s15410_s19 + $0x28] sm:$0xff] }
 0x477   : > { %12378 = vst [vmem:[%s18822_s14] sm:$0xff] %v12346_v46  ;;  %v12349_v26 = vadd.f32 %v12317_v8, %v12285_v6  ;;  %v12283_v9 = vadd.f32 %v18803_v1, %v12180_v23  ;;  %v14786_v47 = vpop.f32.mrf.mxu1  ;;  %v10772_v51 = vadd.f32 %v18718_v54, %v10321_v59  ;;  %v10325_v8 = vadd.f32 %v18629_v43, %v18592_v19  ;;  %v18874_v20 = vpop.f32.mrf.mxu0  ;;  %v12324_v19 = vld [vmem:[%s15410_s19 + $0x50] sm:$0xff]  ;;  %v12323_v58 = vld [vmem:[%s15410_s19 + $0x48] sm:$0xff] }
 0x478   : > { %v12185_v18 = vadd.f32 %v14786_v47, %v11591_v40  ;;  %v10778_v24 = vadd.f32 %v18724_v33, %v10327_v14  ;;  %v11593_v48 = vadd.f32 %v18754_v13, %v10775_v32  ;;  %v10330_v6 = vadd.f32 %v18634_v35, %v18597_v31  ;;  %v12322_v35 = vld [vmem:[%s15410_s19 + $0x40] sm:$0xff]  ;;  %v19347_v14 = vld [vmem:[#allocation19_spill] sm:$0xff] }
 0x479   : > { %12381 = vst [vmem:[%s18822_s14 + $0x18] sm:$0xff] %v12349_v26  ;;  %v12347_v17 = vadd.f32 %v12315_v42, %v12283_v9  ;;  %v12068_v39 = vpop.f32.mrf.mxu1  ;;  %v11590_v63 = vadd.f32 %v18742_v61, %v10772_v51  ;;  %v10776_v23 = vadd.f32 %v18728_v21, %v10325_v8  ;;  %v10328_v40 = vadd.f32 %v18639_v38, %v18602_v12  ;;  %v19339_v47 = vld [vmem:[#allocation37_spill] sm:$0xff]  ;;  %v12325_v12 = vld [vmem:[%s15410_s19 + $0x58] sm:$0xff] }
 0x47a   : > { %v12288_v25 = vadd.f32 %v18803_v1, %v12185_v18  ;;  %v12183_v44 = vadd.f32 %v12068_v39, %v11589_v11  ;;  %v11596_v33 = vadd.f32 %v18760_v3, %v10778_v24  ;;  %v10781_v31 = vadd.f32 %v18732_v34, %v10330_v6  ;;  %v19340_v11 = vld [vmem:[#allocation54_spill] sm:$0xff]  ;;  %v18890_v18 = vpop.f32.mrf.mxu0  ;;  %v19341_v34 = vld [vmem:[#allocation15_spill] sm:$0xff]  ;;  %v19342_v51 = vld [vmem:[#allocation28_spill] sm:$0xff] }
 0x47b   : > { %12379 = vst [vmem:[%s18822_s14 + $0x8] sm:$0xff] %v12347_v17  ;;  %v14787_v16 = vpop.f32.mrf.mxu1  ;;  %v11594_v26 = vadd.f32 %v18766_v62, %v10776_v23  ;;  %v10331_v45 = vadd.f32 %v19339_v47, %v18607_v0  ;;  %v10779_v17 = vadd.f32 %v19340_v11, %v10328_v40  ;;  %v12326_v23 = vld [vmem:[%s15410_s19 + $0x60] sm:$0xff] }
 0x47c   : > { %v12352_v52 = vadd.f32 %v12320_v29, %v12288_v25  ;;  %v12286_v54 = vadd.f32 %v18803_v1, %v12183_v44  ;;  %v12186_v4 = vadd.f32 %v14787_v16, %v11592_v41  ;;  %v11599_v56 = vadd.f32 %v19341_v34, %v10781_v31  ;;  %v19343_v41 = vld [vmem:[#allocation39_spill] sm:$0xff]  ;;  %v19344_v44 = vld [vmem:[#allocation61_spill] sm:$0xff]  ;;  %v19359_v34 = vld [vmem:[#allocation66_spill] sm:$0xff] }
 0x47d   : > { %v12071_v60 = vpop.f32.mrf.mxu1  ;;  %v10329_v25 = vadd.f32 %v19343_v41, %v19342_v51  ;;  %v10782_v0 = vadd.f32 %v19344_v44, %v10331_v45  ;;  %v19354_v40 = vld [vmem:[#allocation29_spill] sm:$0xff]  ;;  %v19360_v44 = vld [vmem:[#allocation35_spill] sm:$0xff] }
 0x47e   : > { %12384 = vst [vmem:[%s18822_s14 + $0x30] sm:$0xff] %v12352_v52  ;;  %v12350_v61 = vadd.f32 %v12318_v2, %v12286_v54  ;;  %v12289_v22 = vadd.f32 %v18803_v1, %v12186_v4  ;;  %v12184_v27 = vadd.f32 %v12071_v60, %v11590_v63  ;;  %v19345_v2 = vld [vmem:[#allocation69_spill] sm:$0xff]  ;;  %v19346_v4 = vld [vmem:[#allocation31_spill] sm:$0xff] }
 0x47f   : > { %v14790_v57 = vpop.f32.mrf.mxu1  ;;  %v11597_v16 = vadd.f32 %v19345_v2, %v10779_v17  ;;  %v10334_v32 = vadd.f32 %v19347_v14, %v19346_v4  ;;  %v19357_v17 = vld [vmem:[#allocation38_spill] sm:$0xff] }
 0x480   : > { %12382 = vst [vmem:[%s18822_s14 + $0x20] sm:$0xff] %v12350_v61  ;;  %v12353_v36 = vadd.f32 %v12321_v30, %v12289_v22  ;;  %v12287_v10 = vadd.f32 %v18803_v1, %v12184_v27  ;;  %v12189_v46 = vadd.f32 %v14790_v57, %v11595_v7  ;;  %v19348_v30 = vld [vmem:[#allocation56_spill] sm:$0xff]  ;;  %v18906_v7 = vpop.f32.mrf.mxu0  ;;  %v12328_v61 = vld [vmem:[%s15410_s19 + $0x70] sm:$0xff]  ;;  %v19349_v27 = vld [vmem:[#allocation18_spill] sm:$0xff] }
 0x481   : > { %v12084_v43 = vpop.f32.mrf.mxu1  ;;  %v10780_v60 = vadd.f32 %v19348_v30, %v10329_v25  ;;  %v11600_v8 = vadd.f32 %v19349_v27, %v10782_v0  ;;  %v19361_v0 = vld [vmem:[#allocation36_spill] sm:$0xff]  ;;  %v12330_v27 = vld [vmem:[%s15410_s19 + $0x80] sm:$0xff] }
 0x482   : > { %12385 = vst [vmem:[%s18822_s14 + $0x38] sm:$0xff] %v12353_v36  ;;  %v12351_v13 = vadd.f32 %v12319_v37, %v12287_v10  ;;  %v12292_v42 = vadd.f32 %v18803_v1, %v12189_v46  ;;  %v12187_v55 = vadd.f32 %v12084_v43, %v11593_v48  ;;  %v19350_v48 = vld [vmem:[#allocation21_spill] sm:$0xff]  ;;  %v19351_v36 = vld [vmem:[#allocation26_spill] sm:$0xff]  ;;  %v19352_v46 = vld [vmem:[#allocation63_spill] sm:$0xff] }
 0x483   : > { %v14791_v21 = vpop.f32.mrf.mxu1  ;;  %v10332_v10 = vadd.f32 %v19351_v36, %v19350_v48  ;;  %v10785_v6 = vadd.f32 %v19352_v46, %v10334_v32  ;;  %v11598_v43 = vadd.f32 %v18790_v5, %v10780_v60  ;;  %v19363_v32 = vld [vmem:[#allocation40_spill] sm:$0xff]  ;;  %v19366_v48 = vld [vmem:[#allocation42_spill] sm:$0xff]  ;;  %v19367_v36 = vld [vmem:[#allocation45_spill] sm:$0xff] }
 0x484   : > { %12383 = vst [vmem:[%s18822_s14 + $0x28] sm:$0xff] %v12351_v13  ;;  %v12356_v9 = vadd.f32 %v12324_v19, %v12292_v42  ;;  %v12290_v3 = vadd.f32 %v18803_v1, %v12187_v55  ;;  %v12190_v59 = vadd.f32 %v14791_v21, %v11596_v33  ;;  %v19353_v55 = vld [vmem:[#allocation24_spill] sm:$0xff]  ;;  %v19368_v46 = vld [vmem:[#allocation70_spill] sm:$0xff] }
 0x485   : > { %v12087_v38 = vpop.f32.mrf.mxu1  ;;  %v10335_v31 = vadd.f32 %v19354_v40, %v19353_v55  ;;  %v19364_v30 = vld [vmem:[#allocation44_spill] sm:$0xff]  ;;  %v19369_v55 = vld [vmem:[#allocation41_spill] sm:$0xff]  ;;  %v19370_v40 = vld [vmem:[#allocation46_spill] sm:$0xff] }
 0x486   : > { %12388 = vst [vmem:[%s18822_s14 + $0x50] sm:$0xff] %v12356_v9  ;;  %v12354_v62 = vadd.f32 %v12322_v35, %v12290_v3  ;;  %v12293_v29 = vadd.f32 %v18803_v1, %v12190_v59  ;;  %v12188_v39 = vadd.f32 %v12087_v38, %v11594_v26  ;;  %v19355_v35 = vld [vmem:[#allocation58_spill] sm:$0xff]  ;;  %v18922_v26 = vpop.f32.mrf.mxu0  ;;  %v12329_v9 = vld [vmem:[%s15410_s19 + $0x78] sm:$0xff]  ;;  %v10336_v60 = vadd.f32 %v19364_v30, %v19363_v32 }
 0x487   : > { %v14794_v15 = vpop.f32.mrf.mxu1  ;;  %v10783_v21 = vadd.f32 %v19355_v35, %v10332_v10  ;;  %v19356_v59 = vld [vmem:[#allocation14_spill] sm:$0xff]  ;;  %v10339_v10 = vadd.f32 %v19367_v36, %v19366_v48  ;;  %v19371_v35 = vld [vmem:[#allocation73_spill] sm:$0xff]  ;;  %v19380_v32 = vld [vmem:[#allocation64_spill] sm:$0xff] }
 0x488   : > { %12386 = vst [vmem:[%s18822_s14 + $0x40] sm:$0xff] %v12354_v62  ;;  %v12357_v63 = vadd.f32 %v12325_v12, %v12293_v29  ;;  %v12291_v52 = vadd.f32 %v18803_v1, %v12188_v39  ;;  %v12193_v54 = vadd.f32 %v14794_v15, %v11599_v56  ;;  %v11603_v47 = vadd.f32 %v19356_v59, %v10785_v6  ;;  %v19358_v12 = vld [vmem:[#allocation32_spill] sm:$0xff]  ;;  %v12327_v62 = vld [vmem:[%s15410_s19 + $0x68] sm:$0xff]  ;;  %v19362_v15 = vld [vmem:[#allocation67_spill] sm:$0xff] }
 0x489   : > { %v12100_v22 = vpop.f32.mrf.mxu1  ;;  %v10333_v38 = vadd.f32 %v19358_v12, %v19357_v17  ;;  %v10786_v56 = vadd.f32 %v19359_v34, %v10335_v31  ;;  %v11601_v39 = vadd.f32 %v18812_v50, %v10783_v21  ;;  %v10787_v6 = vadd.f32 %v19368_v46, %v10336_v60  ;;  %v19374_v12 = vld [vmem:[#allocation62_spill] sm:$0xff]  ;;  %v19383_v48 = vld [vmem:[#allocation17_spill] sm:$0xff] }
 0x48a   : > { %12389 = vst [vmem:[%s18822_s14 + $0x58] sm:$0xff] %v12357_v63  ;;  %v12355_v24 = vadd.f32 %v12323_v58, %v12291_v52  ;;  %v12296_v37 = vadd.f32 %v18803_v1, %v12193_v54  ;;  %v12191_v57 = vadd.f32 %v12100_v22, %v11597_v16  ;;  %v10338_v58 = vadd.f32 %v19361_v0, %v19360_v44  ;;  %v18938_v16 = vpop.f32.mrf.mxu0  ;;  %v12332_v63 = vld [vmem:[%s15410_s19 + $0x90] sm:$0xff]  ;;  %v19377_v0 = vld [vmem:[#allocation72_spill] sm:$0xff] }
 0x48b   : > { %v14795_v19 = vpop.f32.mrf.mxu1  ;;  %v10784_v2 = vadd.f32 %v19362_v15, %v10333_v38  ;;  %v11604_v54 = vadd.f32 %v18828_v49, %v10786_v56  ;;  %v10337_v31 = vadd.f32 %v19370_v40, %v19369_v55  ;;  %v10790_v21 = vadd.f32 %v19371_v35, %v10339_v10  ;;  %v12336_v56 = vld [vmem:[%s15410_s19 + $0xb0] sm:$0xff]  ;;  %v12334_v15 = vld [vmem:[%s15410_s19 + $0xa0] sm:$0xff]  ;;  %v12335_v10 = vld [vmem:[%s15410_s19 + $0xa8] sm:$0xff] }
 0x48c   : > { %12387 = vst [vmem:[%s18822_s14 + $0x48] sm:$0xff] %v12355_v24  ;;  %v12360_v33 = vadd.f32 %v12328_v61, %v12296_v37  ;;  %v12294_v13 = vadd.f32 %v18803_v1, %v12191_v57  ;;  %v12194_v42 = vadd.f32 %v14795_v19, %v11600_v8  ;;  %v19365_v61 = vld [vmem:[#allocation60_spill] sm:$0xff]  ;;  %v11605_v59 = vadd.f32 %v18874_v20, %v10787_v6 }
 0x48d   : > { %v12103_v3 = vpop.f32.mrf.mxu1  ;;  %v10789_v22 = vadd.f32 %v19365_v61, %v10338_v58  ;;  %v11602_v24 = vadd.f32 %v18842_v28, %v10784_v2  ;;  %v12333_v19 = vld [vmem:[%s15410_s19 + $0x98] sm:$0xff]  ;;  %v10788_v38 = vadd.f32 %v19374_v12, %v10337_v31  ;;  %v12340_v31 = vld [vmem:[%s15410_s19 + $0xd0] sm:$0xff] }
 0x48e   : > { %12392 = vst [vmem:[%s18822_s14 + $0x70] sm:$0xff] %v12360_v33  ;;  %v12358_v5 = vadd.f32 %v12326_v23, %v12294_v13  ;;  %v12297_v45 = vadd.f32 %v18803_v1, %v12194_v42  ;;  %v12192_v11 = vadd.f32 %v12103_v3, %v11598_v43  ;;  %v14759_v23 = vpop.f32.mrf.mxu0  ;;  %v12337_v61 = vld [vmem:[%s15410_s19 + $0xb8] sm:$0xff] }
 0x48f   : > { %v14798_v29 = vpop.f32.mrf.mxu1  ;;  %v11607_v33 = vadd.f32 %v18858_v53, %v10789_v22 }
 0x490   : > { %12390 = vst [vmem:[%s18822_s14 + $0x60] sm:$0xff] %v12358_v5  ;;  %v12361_v51 = vadd.f32 %v12329_v9, %v12297_v45  ;;  %v12295_v41 = vadd.f32 %v18803_v1, %v12192_v11  ;;  %v12197_v25 = vadd.f32 %v14798_v29, %v11603_v47  ;;  %v12331_v9 = vld [vmem:[%s15410_s19 + $0x88] sm:$0xff]  ;;  %v19373_v11 = vld [vmem:[#allocation47_spill] sm:$0xff]  ;;  %v11557_v34 = vpop.f32.mrf.mxu0  ;;  %v11608_v29 = vadd.f32 %v18890_v18, %v10790_v21 }
 0x491   : > { %v12116_v52 = vpop.f32.mrf.mxu1  ;;  %v19372_v45 = vld [vmem:[#allocation22_spill] sm:$0xff] }
 0x492   : > { %12393 = vst [vmem:[%s18822_s14 + $0x78] sm:$0xff] %v12361_v51  ;;  %v12359_v50 = vadd.f32 %v12327_v62, %v12295_v41  ;;  %v12300_v4 = vadd.f32 %v18803_v1, %v12197_v25  ;;  %v12195_v14 = vadd.f32 %v12116_v52, %v11601_v39  ;;  %v10342_v17 = vadd.f32 %v19373_v11, %v19372_v45  ;;  %v19375_v41 = vld [vmem:[#allocation27_spill] sm:$0xff]  ;;  %v19376_v25 = vld [vmem:[#allocation50_spill] sm:$0xff]  ;;  %v14762_v60 = vpop.f32.mrf.mxu0  ;;  %v12338_v11 = vld [vmem:[%s15410_s19 + $0xc0] sm:$0xff] }
 0x493   : > { %v14799_v8 = vpop.f32.mrf.mxu1  ;;  %v10340_v44 = vadd.f32 %v19376_v25, %v19375_v41  ;;  %v12341_v25 = vld [vmem:[%s15410_s19 + $0xd8] sm:$0xff] }
 0x494   : > { %12391 = vst [vmem:[%s18822_s14 + $0x68] sm:$0xff] %v12359_v50  ;;  %v12364_v37 = vadd.f32 %v12332_v63, %v12300_v4  ;;  %v12298_v49 = vadd.f32 %v18803_v1, %v12195_v14  ;;  %v12198_v57 = vadd.f32 %v14799_v8, %v11604_v54  ;;  %v10793_v58 = vadd.f32 %v19377_v0, %v10342_v17  ;;  %v19378_v50 = vld [vmem:[#allocation30_spill] sm:$0xff]  ;;  %v19379_v4 = vld [vmem:[#allocation51_spill] sm:$0xff]  ;;  %v11570_v40 = vpop.f32.mrf.mxu0 }
 0x495   : > { %v12119_v43 = vpop.f32.mrf.mxu1  ;;  %v11606_v63 = vadd.f32 %v18906_v7, %v10788_v38  ;;  %v10343_v14 = vadd.f32 %v19379_v4, %v19378_v50  ;;  %v10791_v30 = vadd.f32 %v19380_v32, %v10340_v44  ;;  %v12339_v50 = vld [vmem:[%s15410_s19 + $0xc8] sm:$0xff] }
 0x496   : > { %12396 = vst [vmem:[%s18822_s14 + $0x90] sm:$0xff] %v12364_v37  ;;  %v12362_v28 = vadd.f32 %v12330_v27, %v12298_v49  ;;  %v12301_v13 = vadd.f32 %v18803_v1, %v12198_v57  ;;  %v12196_v42 = vadd.f32 %v12119_v43, %v11602_v24  ;;  %v11611_v27 = vadd.f32 %v18922_v26, %v10793_v58  ;;  %v19381_v37 = vld [vmem:[#allocation33_spill] sm:$0xff]  ;;  %v19382_v49 = vld [vmem:[#allocation55_spill] sm:$0xff]  ;;  %v14763_v41 = vpop.f32.mrf.mxu0 }
 0x497   : > { %v14802_v3 = vpop.f32.mrf.mxu1  ;;  %v10341_v57 = vadd.f32 %v19382_v49, %v19381_v37  ;;  %v10794_v36 = vadd.f32 %v19383_v48, %v10343_v14  ;;  %v11609_v6 = vadd.f32 %v18938_v16, %v10791_v30  ;;  %v12342_v48 = vld [vmem:[%s15410_s19 + $0xe0] sm:$0xff] }
 0x498   : > { %12394 = vst [vmem:[%s18822_s14 + $0x80] sm:$0xff] %v12362_v28  ;;  %v12365_v47 = vadd.f32 %v12333_v19, %v12301_v13  ;;  %v12299_v53 = vadd.f32 %v18803_v1, %v12196_v42  ;;  %v12201_v5 = vadd.f32 %v14802_v3, %v11607_v33  ;;  %v19384_v33 = vld [vmem:[#allocation43_spill] sm:$0xff]  ;;  %v19385_v28 = vld [vmem:[#allocation52_spill] sm:$0xff] }
 0x499   : > { %v12132_v62 = vpop.f32.mrf.mxu1  ;;  %v10346_v13 = vadd.f32 %v19385_v28, %v19384_v33  ;;  %v19386_v42 = vld [vmem:[#allocation68_spill] sm:$0xff]  ;;  %v11612_v21 = vadd.f32 %v14759_v23, %v10794_v36 }
 0x49a   : > { %12397 = vst [vmem:[%s18822_s14 + $0x98] sm:$0xff] %v12365_v47  ;;  %v12363_v20 = vadd.f32 %v12331_v9, %v12299_v53  ;;  %v12304_v39 = vadd.f32 %v18803_v1, %v12201_v5  ;;  %v12199_v51 = vadd.f32 %v12132_v62, %v11605_v59  ;;  %v10792_v55 = vadd.f32 %v19386_v42, %v10341_v57  ;;  %v19387_v59 = vld [vmem:[#allocation49_spill] sm:$0xff]  ;;  %v19389_v5 = vld [vmem:[#allocation71_spill] sm:$0xff]  ;;  %v19390_v62 = vld [vmem:[#allocation48_spill] sm:$0xff] }
 0x49b   : > { %v14803_v2 = vpop.f32.mrf.mxu1  ;;  %v19388_v47 = vld [vmem:[#allocation57_spill] sm:$0xff]  ;;  %v10797_v45 = vadd.f32 %v19389_v5, %v10346_v13  ;;  %v12343_v42 = vld [vmem:[%s15410_s19 + $0xe8] sm:$0xff] }
 0x49c   : > { %12395 = vst [vmem:[%s18822_s14 + $0x88] sm:$0xff] %v12363_v20  ;;  %v12368_v52 = vadd.f32 %v12336_v56, %v12304_v39  ;;  %v12302_v18 = vadd.f32 %v18803_v1, %v12199_v51  ;;  %v12202_v54 = vadd.f32 %v14803_v2, %v11608_v29  ;;  %v10344_v53 = vadd.f32 %v19388_v47, %v19387_v59  ;;  %v19391_v29 = vld [vmem:[#allocation59_spill] sm:$0xff]  ;;  %v19392_v39 = vld [vmem:[#allocation16_spill] sm:$0xff]  ;;  %v19393_v2 = vld [vmem:[#allocation53_spill] sm:$0xff] }
 0x49d   : > { %v12135_v22 = vpop.f32.mrf.mxu1  ;;  %v11610_v12 = vadd.f32 %v11557_v34, %v10792_v55  ;;  %v10347_v20 = vadd.f32 %v19391_v29, %v19390_v62  ;;  %v11615_v0 = vadd.f32 %v14762_v60, %v10797_v45 }
 0x49e   : > { %12400 = vst [vmem:[%s18822_s14 + $0xb0] sm:$0xff] %v12368_v52  ;;  %v12366_v7 = vadd.f32 %v12334_v15, %v12302_v18  ;;  %v12305_v8 = vadd.f32 %v18803_v1, %v12202_v54  ;;  %v12200_v24 = vadd.f32 %v12135_v22, %v11606_v63  ;;  %v10795_v51 = vadd.f32 %v19392_v39, %v10344_v53  ;;  %v19394_v63 = vld [vmem:[#allocation65_spill] sm:$0xff]  ;;  %v19395_v18 = vld [vmem:[#allocation34_spill] sm:$0xff] }
 0x49f   : > { %v14806_v46 = vpop.f32.mrf.mxu1  ;;  %v10345_v52 = vadd.f32 %v19394_v63, %v19393_v2  ;;  %v10798_v54 = vadd.f32 %v19395_v18, %v10347_v20 }
 0x4a0   : > { %12398 = vst [vmem:[%s18822_s14 + $0xa0] sm:$0xff] %v12366_v7  ;;  %v12369_v19 = vadd.f32 %v12337_v61, %v12305_v8  ;;  %v12303_v26 = vadd.f32 %v18803_v1, %v12200_v24  ;;  %v12205_v43 = vadd.f32 %v14806_v46, %v11611_v27  ;;  %v11613_v14 = vadd.f32 %v11570_v40, %v10795_v51  ;;  %v19396_v61 = vld [vmem:[#allocation13_spill] sm:$0xff]  ;;  %v11573_v27 = vpop.f32.mrf.mxu0  ;;  %v12344_v7 = vld [vmem:[%s15410_s19 + $0xf0] sm:$0xff] }
 0x4a1   : > { %v12148_v35 = vpop.f32.mrf.mxu1  ;;  %v10796_v22 = vadd.f32 %v19396_v61, %v10345_v52  ;;  %v11616_v24 = vadd.f32 %v14763_v41, %v10798_v54 }
 0x4a2   : > { %12401 = vst [vmem:[%s18822_s14 + $0xb8] sm:$0xff] %v12369_v19  ;;  %v12367_v9 = vadd.f32 %v12335_v10, %v12303_v26  ;;  %v12308_v16 = vadd.f32 %v18803_v1, %v12205_v43  ;;  %v12203_v3 = vadd.f32 %v12148_v35, %v11609_v6  ;;  %v12345_v26 = vld [vmem:[%s15410_s19 + $0xf8] sm:$0xff]  ;;  %s15250_s19 = smov [#allocation9]  }
 0x4a3   : > { %v14807_v17 = vpop.f32.mrf.mxu1  ;;  %v11614_v10 = vadd.f32 %v11573_v27, %v10796_v22  ;;  %s15177_s10 = sshll.u32 %s15250_s19, 4  ;;  %s15178_s10 = int_to_ptr.vmem [resolvable:$false] %s15177_s10 }
 0x4a4   : > { %12399 = vst [vmem:[%s18822_s14 + $0xa8] sm:$0xff] %v12367_v9  ;;  %v12372_v38 = vadd.f32 %v12340_v31, %v12308_v16  ;;  %v12306_v23 = vadd.f32 %v18803_v1, %v12203_v3  ;;  %v12206_v56 = vadd.f32 %v14807_v17, %v11612_v21  ;;  %s15179_s13 = scalar_lea.vmem %s15178_s10, 8192  ;;  %p15180_p2 = scmp.lt.s32.totalorder %s19037_s16, %s15178_s10 }
 0x4a5   : > { %v12151_v44 = vpop.f32.mrf.mxu1  ;;  %p15181_p13 = scmp.lt.s32.totalorder %s15179_s13, %s15173_s11 }
 0x4a6   : > { %12404 = vst [vmem:[%s18822_s14 + $0xd0] sm:$0xff] %v12372_v38  ;;  %v12370_v58 = vadd.f32 %v12338_v11, %v12306_v23  ;;  %v12309_v34 = vadd.f32 %v18803_v1, %v12206_v56  ;;  %v12204_v15 = vadd.f32 %v12151_v44, %v11610_v12 }
 0x4a7   : > { %v14810_v4 = vpop.f32.mrf.mxu1  ;;  %p15182_p0 = por %p15181_p13, %p15180_p2 }
 0x4a8   : > { %12402 = vst [vmem:[%s18822_s14 + $0xc0] sm:$0xff] %v12370_v58  ;;  %v12373_v32 = vadd.f32 %v12341_v25, %v12309_v34  ;;  %v12307_v30 = vadd.f32 %v18803_v1, %v12204_v15  ;;  %v12209_v60 = vadd.f32 %v14810_v4, %v11615_v0 }
 0x4a9   : > { %v12164_v8 = vpop.f32.mrf.mxu1  ;;  %p15183_p5 = pnand %p15182_p0, %p15176_p10 }
 0x4aa   : > { %12405 = vst [vmem:[%s18822_s14 + $0xd8] sm:$0xff] %v12373_v32  ;;  %v12371_v37 = vadd.f32 %v12339_v50, %v12307_v30  ;;  %v12312_v49 = vadd.f32 %v18803_v1, %v12209_v60  ;;  %v12207_v57 = vadd.f32 %v12164_v8, %v11613_v14 }
 0x4ab   : > { %v14811_v36 = vpop.f32.mrf.mxu1 }
 0x4ac   : > { %12403 = vst [vmem:[%s18822_s14 + $0xc8] sm:$0xff] %v12371_v37  ;;  %v12376_v46 = vadd.f32 %v12344_v7, %v12312_v49  ;;  %v12310_v6 = vadd.f32 %v18803_v1, %v12207_v57  ;;  %v12210_v19 = vadd.f32 %v14811_v36, %v11616_v24 }
 0x4ad   : > { %v12167_v43 = vpop.f32.mrf.mxu1 }
 0x4ae   : > { %12408 = vst [vmem:[%s18822_s14 + $0xf0] sm:$0xff] %v12376_v46  ;;  %v12374_v33 = vadd.f32 %v12342_v48, %v12310_v6  ;;  %v12313_v28 = vadd.f32 %v18803_v1, %v12210_v19  ;;  %v12208_v13 = vadd.f32 %v12167_v43, %v11614_v10 }
 0x4b0   : > { %12406 = vst [vmem:[%s18822_s14 + $0xe0] sm:$0xff] %v12374_v33  ;;  %v12377_v55 = vadd.f32 %v12345_v26, %v12313_v28  ;;  %v12311_v40 = vadd.f32 %v18803_v1, %v12208_v13 }
 0x4b2   : > { %12409 = vst [vmem:[%s18822_s14 + $0xf8] sm:$0xff] %v12377_v55  ;;  %v12375_v31 = vadd.f32 %v12343_v42, %v12311_v40 }
 0x4b4   : > { %12407 = vst [vmem:[%s18822_s14 + $0xe8] sm:$0xff] %v12375_v31 }
 0x4b5   : > { %15186 = shalt.err (!%p15183_p5)
}
 0x4b6   : > { %s15187_s8 = scalar_lea.hbm %s19035_s29, 4096  ;;  %s15191_s15 = scalar_lea.hbm %s19088_s6, 8192 }
 0x4b7   : > { %p15188_p9 = scmp.ne.s32.totalorder %s19035_s29, %s15187_s8  ;;  %p15192_p6 = scmp.lt.s32.totalorder %s19035_s29, %s19088_s6 }
 0x4b8   : > { %p15193_p8 = scmp.lt.s32.totalorder %s15191_s15, %s15187_s8 }
 0x4b9   : > { %p15189_p1 = pnand %p15188_p9, %p19397_p7 }
 0x4ba   : > { %p15194_p3 = por %p15193_p8, %p15192_p6 }
 0x4bb   : > { %p15190_p4 = pneg %p15189_p1 }
 0x4bd   : > { %p15195_p11 = pnand %p15194_p3, %p15190_p4 }
 0x4bf   : > { %15198 = shalt.err (!%p15195_p11)
}
 0x4c0   : > { %s15251_s30 = smov 128   ;;  %s15252_s12 = smov 8  }
 0x4c1   : > { %14819 = dma.vmem_to_hbm [thread:$0]  (%p19397_p7), %s19037_s16, 4096, %s19035_s29, %s12411_s25, %s15251_s30, %s15251_s30, %s15252_s12  }
 0x4c2 PF: > { %s12439_s11 = sand.u32 1, %s15229_s21   ;;  %p19398_p12 = scmp.ne.s32.totalorder %s19099_s28, 0 }
 0x4c3   : > { %p19399_p10 = scmp.ge.s32.totalorder %s15241_s24, 2  ;;  %s12440_s19 = scalar_lea.sflag [#allocation6], %s12439_s11 }
 0x4c5   : > { %p14830_p2 = pnand %p19399_p10, %p19398_p12 }
 0x4c7   : > { %p14831_p13 = pneg %p14830_p2 }
 0x4c9   : > { %15224 = dma.done.wait (%p14831_p13), %s12440_s19, 4096  }
 0x4ca   : > { %15226 = vsyncadd (%p14831_p13), %s12440_s19, 4294963200  ;;  %p20_p0 = scmp.ge.s32.totalorder %s15342_s9, 4   ;;  %s19400_s21 = smov %s15233_s22 }
 0x4cb   : > { %s19401_s22 = smov %s15237_s23  ;;  %s19402_s23 = smov %s15359_s17 }
 0x4cc   : > { %s19403_s24 = smov %s15342_s9  ;;  %22 = sbr.rel (!%p20_p0) target bundleno = 6 (0x6), region = 116 }
 0x4d1   :  { %12445 = vsyncpa [#allocation5], 1 }
 0x4d2   :  { %12447 = vsyncpa [#allocation5 + $0x1], 1 }
 0x4d3   :  { %12448 = vsyncpa [#allocation8], 1 }
 0x4d4   :  { %12449 = vsyncpa [#allocation6], 1 }
 0x4d5   :  { %12451 = vsyncpa [#allocation6 + $0x1], 1 }

</bundles_post_ra>
